<compile_context>
chip_gen: v6e
topology: v6e:2x2x1
jax: 0.10.0
libtpu: 0.0.40
codegen_flags: <defaults>
</compile_context>

<pallas_src>
import functools

import jax
import jax.numpy as jnp
from jax.experimental import pallas as pl
from jax.experimental.pallas import tpu as pltpu

_LANE = 128


def _round_up(v, m):
    return ((v + m - 1) // m) * m


def _pad_axis(a, axis, target):
    if a.shape[axis] == target:
        return a
    pads = [(0, 0)] * a.ndim
    pads[axis] = (0, target - a.shape[axis])
    return jnp.pad(a, pads)


# ----------------------------- fused Pallas kernel ---------------------------

def _make_fused_block_kernel(B, H, W, Ho, Wo, Cin_p, Cp, stride, has_shortcut):
    """One grid step = `B` batch elements: full basic block, intermediates in VMEM."""
    M = B * Ho * Wo
    K2_main = 9 * Cp

    def kernel(x_ref, w1_ref, b1_ref, w2_ref, b2_ref, o_ref,
               xpad_ref, mid_ref, p1_ref, p2_ref):
        cdt = xpad_ref.dtype

        def zero_border(ref, hh, ww, c):
            # Only the 1-pixel halo must be zero; interiors are fully rewritten below.
            zr = jnp.zeros((B, 1, ww + 2, c), cdt)
            ref[:, pl.ds(0, 1), :, :] = zr
            ref[:, pl.ds(hh + 1, 1), :, :] = zr
            zc = jnp.zeros((B, hh + 2, 1, c), cdt)
            ref[:, :, pl.ds(0, 1), :] = zc
            ref[:, :, pl.ds(ww + 1, 1), :] = zc

        zero_border(xpad_ref, H, W, Cin_p)
        zero_border(mid_ref, Ho, Wo, Cp)

        # ---- stage the input tile into the zero-haloed buffer (no HBM pad round-trip) ----
        xpad_ref[:, pl.ds(1, H), pl.ds(1, W), :] = x_ref[...]

        # ---- conv1 im2col: one (M, 9*Cin_p) patch with lane-aligned column blocks ----
        for ky in range(3):
            for kx in range(3):
                t = ky * 3 + kx
                if stride == 1:
                    v = xpad_ref[:, pl.ds(ky, Ho), pl.ds(kx, Wo), :]
                else:
                    v = xpad_ref[:, pl.ds(ky, Ho, stride), pl.ds(kx, Wo, stride), :]
                v = v.reshape(M, Cin_p)
                p1_ref[:, t * Cin_p:(t + 1) * Cin_p] = v
                if has_shortcut and ky == 1 and kx == 1:
                    # The center tap == the strided input: reuse it as the shortcut's
                    # K-block of the conv2 matmul (shortcut accumulates inside the MXU).
                    p2_ref[:, K2_main:K2_main + Cin_p] = v

        # ---- conv1 (BN1 folded into w1): single deep-K MXU matmul + bias + ReLU ----
        acc1 = jnp.dot(p1_ref[...], w1_ref[...], preferred_element_type=jnp.float32)
        hid = jnp.maximum(acc1 + b1_ref[...], 0.0)
        # TODO(synk): keep `mid` in f32 when compute_dtype=bf16 if the extra drift matters.
        mid_ref[:, pl.ds(1, Ho), pl.ds(1, Wo), :] = (
            hid.reshape(B, Ho, Wo, Cp).astype(cdt))

        # ---- conv2 im2col (stride 1) ----
        for ky in range(3):
            for kx in range(3):
                t = ky * 3 + kx
                v = mid_ref[:, pl.ds(ky, Ho), pl.ds(kx, Wo), :]
                p2_ref[:, t * Cp:(t + 1) * Cp] = v.reshape(M, Cp)

        # ---- conv2 (+ projection shortcut) single matmul, bias, residual, ReLU ----
        out = jnp.dot(p2_ref[...], w2_ref[...], preferred_element_type=jnp.float32)
        out = out + b2_ref[...]
        if not has_shortcut:
            # Identity shortcut: the input block is already resident in VMEM.
            out = out + x_ref[...].reshape(M, Cp).astype(jnp.float32)
        o_ref[...] = jnp.maximum(out, 0.0).reshape(B, Ho, Wo, Cp).astype(o_ref.dtype)

    return kernel


# ----------------------------- pallas_call wrapper ---------------------------

def fused_basic_block(x_nhwc, params, *, stride=1, compute_dtype=jnp.float32,
                      batch_tile=None, keep_padded_channels=False):
    N, H, W, Cin = x_nhwc.shape
    planes = params["conv1_w"].shape[-1]
    has_shortcut = (stride != 1) or (Cin != planes)
    Ho = (H + 2 - 3) // stride + 1
    Wo = (W + 2 - 3) // stride + 1

    Cin_p = _round_up(Cin, _LANE)      # lane-aligned K-block of conv1 / shortcut
    Cp = _round_up(planes, _LANE)      # lane-dense N of all matmuls and of the output
    cdt = compute_dtype

    if batch_tile is None:
        # Aim for a matmul M dimension of ~1024 rows; tile must divide the batch.
        target = max(1, 1024 // (Ho * Wo))
        batch_tile = max(d for d in range(1, N + 1) if N % d == 0 and d <= target)
    assert N % batch_tile == 0, (N, batch_tile)
    B = batch_tile
    M = B * Ho * Wo

    # ---- fold BN scales into conv / shortcut weights; biases stay in the f32 epilogue ----
    x_p = _pad_axis(x_nhwc, 3, Cin_p).astype(cdt)

    w1 = params["conv1_w"] * params["bn1_scale"].reshape(1, 1, 1, -1)
    w1 = _pad_axis(_pad_axis(w1, 2, Cin_p), 3, Cp).astype(cdt).reshape(9 * Cin_p, Cp)
    b1 = _pad_axis(params["bn1_bias"], 1, Cp).astype(jnp.float32)

    w2 = params["conv2_w"] * params["bn2_scale"].reshape(1, 1, 1, -1)
    w2 = _pad_axis(_pad_axis(w2, 2, Cp), 3, Cp).astype(cdt).reshape(9 * Cp, Cp)
    b2 = _pad_axis(params["bn2_bias"], 1, Cp).astype(jnp.float32)
    K2 = 9 * Cp
    if has_shortcut:
        wsc = params["sc_w"] * params["sc_scale"].reshape(1, -1)
        wsc = _pad_axis(_pad_axis(wsc, 0, Cin_p), 1, Cp).astype(cdt)
        w2 = jnp.concatenate([w2, wsc], axis=0)   # shortcut rides the conv2 matmul
        b2 = b2 + _pad_axis(params["sc_bias"], 1, Cp).astype(jnp.float32)
        K2 += Cin_p

    kernel = _make_fused_block_kernel(B, H, W, Ho, Wo, Cin_p, Cp, stride, has_shortcut)

    # Cost estimate with real (unpadded) channel counts.
    flops = 2 * N * Ho * Wo * 9 * (Cin * planes + planes * planes)
    if has_shortcut:
        flops += 2 * N * Ho * Wo * Cin * planes
    itemsize = jnp.dtype(cdt).itemsize
    bytes_acc = (N * H * W * Cin + 9 * Cin * planes + 9 * planes * planes
                 + (Cin * planes if has_shortcut else 0)
                 + N * Ho * Wo * planes) * itemsize

    out = pl.pallas_call(
        kernel,
        out_shape=jax.ShapeDtypeStruct((N, Ho, Wo, Cp), cdt),
        grid=(N // B,),
        in_specs=[
            pl.BlockSpec((B, H, W, Cin_p), lambda n: (n, 0, 0, 0)),
            pl.BlockSpec((9 * Cin_p, Cp), lambda n: (0, 0)),
            pl.BlockSpec((1, Cp), lambda n: (0, 0)),
            pl.BlockSpec((K2, Cp), lambda n: (0, 0)),
            pl.BlockSpec((1, Cp), lambda n: (0, 0)),
        ],
        out_specs=pl.BlockSpec((B, Ho, Wo, Cp), lambda n: (n, 0, 0, 0)),
        scratch_shapes=[
            pltpu.VMEM((B, H + 2, W + 2, Cin_p), cdt),    # zero-haloed input
            pltpu.VMEM((B, Ho + 2, Wo + 2, Cp), cdt),     # zero-haloed conv1 output
            pltpu.VMEM((M, 9 * Cin_p), cdt),              # conv1 im2col patch
            pltpu.VMEM((M, K2), cdt),                     # conv2 (+shortcut) im2col patch
        ],
        compiler_params=pltpu.CompilerParams(dimension_semantics=("parallel",)),
        cost_estimate=pl.CostEstimate(flops=flops, transcendentals=0,
                                      bytes_accessed=bytes_acc),
    )(x_p, w1, b1, w2, b2)

    return out if keep_padded_channels else out[..., :planes]


# ----------------------------- HCBasicBlock forward --------------------------

def hc_basic_block_forward(x_nchw, params, *, stride=1, compute_dtype=jnp.float32,
                           batch_tile=None):
    """Pallas implementation of HCBasicBlock.forward (inference-mode BatchNorm).

    When chaining blocks, prefer calling `fused_basic_block` directly with NHWC inputs and
    keep_padded_channels=True to avoid per-block transposes and channel-slice round trips.
    """
    x = jnp.transpose(x_nchw, (0, 2, 3, 1))                        # NCHW -> NHWC
    out = fused_basic_block(x, params, stride=stride, compute_dtype=compute_dtype,
                            batch_tile=batch_tile)
    return jnp.transpose(out, (0, 3, 1, 2)).astype(x_nchw.dtype)   # NHWC -> NCHW


# ----------------------------- parameter init --------------------------------

def _fold_bn(gamma, beta, mean, var, eps=1e-5):
    scale = gamma / jnp.sqrt(var + eps)
    bias = beta - mean * scale
    return scale.reshape(1, -1), bias.reshape(1, -1)


def init_params(key, in_planes, planes, stride):
    k1, k2, k3 = jax.random.split(key, 3)
    p = {}
    # conv weights in HWIO layout
    p["conv1_w"] = 0.1 * jax.random.normal(k1, (3, 3, in_planes, planes), jnp.float32)
    p["conv2_w"] = 0.1 * jax.random.normal(k2, (3, 3, planes, planes), jnp.float32)

    def bn(c, off):
        gamma = 1.0 + 0.01 * jnp.arange(c, dtype=jnp.float32)
        beta = 0.02 * jnp.arange(c, dtype=jnp.float32) + off
        mean = 0.05 * jnp.arange(c, dtype=jnp.float32)
        var = 1.0 + 0.1 * jnp.arange(c, dtype=jnp.float32)
        return _fold_bn(gamma, beta, mean, var)

    p["bn1_scale"], p["bn1_bias"] = bn(planes, 0.00)
    p["bn2_scale"], p["bn2_bias"] = bn(planes, 0.01)

    if stride != 1 or in_planes != planes:
        p["sc_w"] = 0.1 * jax.random.normal(k3, (in_planes, planes), jnp.float32)
        p["sc_scale"], p["sc_bias"] = bn(planes, 0.02)
    return p


# ----------------------------- pure-JAX reference ----------------------------

def reference_forward(x_nchw, params, *, stride=1):
    x = jnp.transpose(x_nchw, (0, 2, 3, 1))
    in_planes = x.shape[-1]
    planes = params["conv1_w"].shape[-1]
    has_shortcut = (stride != 1) or (in_planes != planes)

    def conv(v, w, s, pad):
        return jax.lax.conv_general_dilated(
            v, w, (s, s), pad, dimension_numbers=("NHWC", "HWIO", "NHWC"))

    out = conv(x, params["conv1_w"], stride, ((1, 1), (1, 1)))
    out = out * params["bn1_scale"] + params["bn1_bias"]
    out = jax.nn.relu(out)
    out = conv(out, params["conv2_w"], 1, ((1, 1), (1, 1)))
    out = out * params["bn2_scale"] + params["bn2_bias"]

    if has_shortcut:
        sc = conv(x, params["sc_w"][None, None], stride, "VALID")
        sc = sc * params["sc_scale"] + params["sc_bias"]
    else:
        sc = x
    out = jax.nn.relu(out + sc)
    return jnp.transpose(out, (0, 3, 1, 2))


# ----------------------------- main -------------------------------------------

if __name__ == "__main__":
    key = jax.random.PRNGKey(0)
    kx, kp = jax.random.split(key)

    N, H, W = 2, 16, 16
    # (in_planes, planes, stride, compute_dtype, batch_tile, tol)
    # Tolerances: TPU MXU f32 matmuls (Pallas and the XLA conv reference) may use
    # decomposed/bf16-pass precision by default, so bitwise-tight bounds aren't guaranteed.
    cases = [
        (4, 8, 1, jnp.float32, 2, 2e-2),      # projection shortcut, grid=(1,), M=512
        (8, 8, 1, jnp.float32, 1, 2e-2),      # identity shortcut,  grid=(2,), M=256
        (4, 8, 1, jnp.bfloat16, None, 1e-1),  # bf16 acts/weights, f32 accumulation
    ]

    for i, (cin, planes, stride, cdt, bt, tol) in enumerate(cases):
        kxi = jax.random.fold_in(kx, i)
        kpi = jax.random.fold_in(kp, i)
        x = jax.random.normal(kxi, (N, cin, H, W), jnp.float32)   # NCHW like PyTorch
        params = init_params(kpi, cin, planes, stride)

        fwd = jax.jit(functools.partial(hc_basic_block_forward, stride=stride,
                                        compute_dtype=cdt, batch_tile=bt))
        out = jax.block_until_ready(fwd(x, params))
        ref = jax.block_until_ready(reference_forward(x, params, stride=stride))

        assert out.shape == (N, planes, H // stride, W // stride), (i, out.shape)
        err = jnp.max(jnp.abs(out.astype(jnp.float32) - ref))
        assert jnp.allclose(out.astype(jnp.float32), ref, atol=tol, rtol=tol), (
            f"case {i}: max abs err {err}")

    print("KERNEL_OK")
</pallas_src>

<mosaic_0001>
module attributes {stable_mosaic.version = 11 : i64} {
  func.func @kernel(%arg0: i32, %arg1: memref<2x16x16x128xf32, #tpu.memory_space<vmem>>, %arg2: memref<1152x128xf32, #tpu.memory_space<vmem>>, %arg3: memref<1x128xf32, #tpu.memory_space<vmem>>, %arg4: memref<1280x128xf32, #tpu.memory_space<vmem>>, %arg5: memref<1x128xf32, #tpu.memory_space<vmem>>, %arg6: memref<2x16x16x128xf32, #tpu.memory_space<vmem>>, %arg7: memref<2x18x18x128xf32, #tpu.memory_space<vmem>>, %arg8: memref<2x18x18x128xf32, #tpu.memory_space<vmem>>, %arg9: memref<512x1152xf32, #tpu.memory_space<vmem>>, %arg10: memref<512x1280xf32, #tpu.memory_space<vmem>>) attributes {dimension_semantics = [#tpu.dimension_semantics<parallel>], iteration_bounds = array<i64: 1>, scalar_prefetch = 0 : i64, scratch_operands = 4 : i64, tpu.core_type = #tpu.core_type<tc>, window_params = [{transform_indices = @transform_0, window_bounds = array<i64: 2, 16, 16, 128>}, {pipeline_mode = #tpu.pipeline_mode<synchronous>, transform_indices = @transform_1, window_bounds = array<i64: 1152, 128>}, {pipeline_mode = #tpu.pipeline_mode<synchronous>, transform_indices = @transform_2, window_bounds = array<i64: 1, 128>}, {pipeline_mode = #tpu.pipeline_mode<synchronous>, transform_indices = @transform_3, window_bounds = array<i64: 1280, 128>}, {pipeline_mode = #tpu.pipeline_mode<synchronous>, transform_indices = @transform_4, window_bounds = array<i64: 1, 128>}, {transform_indices = @transform_5, window_bounds = array<i64: 2, 16, 16, 128>}]} {
    %cst = arith.constant 0.000000e+00 : f32
    %0 = vector.broadcast %cst : f32 to vector<2x1x18x128xf32>
    %c0 = arith.constant 0 : index
    %c0_0 = arith.constant 0 : index
    %c0_1 = arith.constant 0 : index
    %c0_2 = arith.constant 0 : index
    %1 = vector.load %arg7[%c0, %c0_0, %c0_1, %c0_2] : memref<2x18x18x128xf32, #tpu.memory_space<vmem>>, vector<2x1x18x128xf32>
    tpu.vector_store %arg7[%c0, %c0_0, %c0_1, %c0_2], %0 {strides = array<i32>} : memref<2x18x18x128xf32, #tpu.memory_space<vmem>>, vector<2x1x18x128xf32>,
    %c0_3 = arith.constant 0 : index
    %c17 = arith.constant 17 : index
    %c0_4 = arith.constant 0 : index
    %c0_5 = arith.constant 0 : index
    %2 = vector.load %arg7[%c0_3, %c17, %c0_4, %c0_5] : memref<2x18x18x128xf32, #tpu.memory_space<vmem>>, vector<2x1x18x128xf32>
    tpu.vector_store %arg7[%c0_3, %c17, %c0_4, %c0_5], %0 {strides = array<i32>} : memref<2x18x18x128xf32, #tpu.memory_space<vmem>>, vector<2x1x18x128xf32>,
    %cst_6 = arith.constant 0.000000e+00 : f32
    %3 = vector.broadcast %cst_6 : f32 to vector<2x18x1x128xf32>
    %c0_7 = arith.constant 0 : index
    %c0_8 = arith.constant 0 : index
    %c0_9 = arith.constant 0 : index
    %c0_10 = arith.constant 0 : index
    %4 = vector.load %arg7[%c0_7, %c0_8, %c0_9, %c0_10] : memref<2x18x18x128xf32, #tpu.memory_space<vmem>>, vector<2x18x1x128xf32>
    tpu.vector_store %arg7[%c0_7, %c0_8, %c0_9, %c0_10], %3 {strides = array<i32>} : memref<2x18x18x128xf32, #tpu.memory_space<vmem>>, vector<2x18x1x128xf32>,
    %c0_11 = arith.constant 0 : index
    %c0_12 = arith.constant 0 : index
    %c17_13 = arith.constant 17 : index
    %c0_14 = arith.constant 0 : index
    %5 = vector.load %arg7[%c0_11, %c0_12, %c17_13, %c0_14] : memref<2x18x18x128xf32, #tpu.memory_space<vmem>>, vector<2x18x1x128xf32>
    tpu.vector_store %arg7[%c0_11, %c0_12, %c17_13, %c0_14], %3 {strides = array<i32>} : memref<2x18x18x128xf32, #tpu.memory_space<vmem>>, vector<2x18x1x128xf32>,
    %cst_15 = arith.constant 0.000000e+00 : f32
    %6 = vector.broadcast %cst_15 : f32 to vector<2x1x18x128xf32>
    %c0_16 = arith.constant 0 : index
    %c0_17 = arith.constant 0 : index
    %c0_18 = arith.constant 0 : index
    %c0_19 = arith.constant 0 : index
    %7 = vector.load %arg8[%c0_16, %c0_17, %c0_18, %c0_19] : memref<2x18x18x128xf32, #tpu.memory_space<vmem>>, vector<2x1x18x128xf32>
    tpu.vector_store %arg8[%c0_16, %c0_17, %c0_18, %c0_19], %6 {strides = array<i32>} : memref<2x18x18x128xf32, #tpu.memory_space<vmem>>, vector<2x1x18x128xf32>,
    %c0_20 = arith.constant 0 : index
    %c17_21 = arith.constant 17 : index
    %c0_22 = arith.constant 0 : index
    %c0_23 = arith.constant 0 : index
    %8 = vector.load %arg8[%c0_20, %c17_21, %c0_22, %c0_23] : memref<2x18x18x128xf32, #tpu.memory_space<vmem>>, vector<2x1x18x128xf32>
    tpu.vector_store %arg8[%c0_20, %c17_21, %c0_22, %c0_23], %6 {strides = array<i32>} : memref<2x18x18x128xf32, #tpu.memory_space<vmem>>, vector<2x1x18x128xf32>,
    %cst_24 = arith.constant 0.000000e+00 : f32
    %9 = vector.broadcast %cst_24 : f32 to vector<2x18x1x128xf32>
    %c0_25 = arith.constant 0 : index
    %c0_26 = arith.constant 0 : index
    %c0_27 = arith.constant 0 : index
    %c0_28 = arith.constant 0 : index
    %10 = vector.load %arg8[%c0_25, %c0_26, %c0_27, %c0_28] : memref<2x18x18x128xf32, #tpu.memory_space<vmem>>, vector<2x18x1x128xf32>
    tpu.vector_store %arg8[%c0_25, %c0_26, %c0_27, %c0_28], %9 {strides = array<i32>} : memref<2x18x18x128xf32, #tpu.memory_space<vmem>>, vector<2x18x1x128xf32>,
    %c0_29 = arith.constant 0 : index
    %c0_30 = arith.constant 0 : index
    %c17_31 = arith.constant 17 : index
    %c0_32 = arith.constant 0 : index
    %11 = vector.load %arg8[%c0_29, %c0_30, %c17_31, %c0_32] : memref<2x18x18x128xf32, #tpu.memory_space<vmem>>, vector<2x18x1x128xf32>
    tpu.vector_store %arg8[%c0_29, %c0_30, %c17_31, %c0_32], %9 {strides = array<i32>} : memref<2x18x18x128xf32, #tpu.memory_space<vmem>>, vector<2x18x1x128xf32>,
    %c0_33 = arith.constant 0 : index
    %c0_34 = arith.constant 0 : index
    %c0_35 = arith.constant 0 : index
    %c0_36 = arith.constant 0 : index
    %12 = vector.load %arg1[%c0_33, %c0_34, %c0_35, %c0_36] : memref<2x16x16x128xf32, #tpu.memory_space<vmem>>, vector<2x16x16x128xf32>
    %c0_37 = arith.constant 0 : index
    %c1 = arith.constant 1 : index
    %c1_38 = arith.constant 1 : index
    %c0_39 = arith.constant 0 : index
    %13 = vector.load %arg7[%c0_37, %c1, %c1_38, %c0_39] : memref<2x18x18x128xf32, #tpu.memory_space<vmem>>, vector<2x16x16x128xf32>
    tpu.vector_store %arg7[%c0_37, %c1, %c1_38, %c0_39], %12 {strides = array<i32>} : memref<2x18x18x128xf32, #tpu.memory_space<vmem>>, vector<2x16x16x128xf32>,
    %c0_40 = arith.constant 0 : index
    %c0_41 = arith.constant 0 : index
    %c0_42 = arith.constant 0 : index
    %c0_43 = arith.constant 0 : index
    %14 = vector.load %arg7[%c0_40, %c0_41, %c0_42, %c0_43] : memref<2x18x18x128xf32, #tpu.memory_space<vmem>>, vector<2x16x16x128xf32>
    %15 = vector.shape_cast %14 : vector<2x16x16x128xf32> to vector<512x128xf32>
    %c0_44 = arith.constant 0 : index
    %c0_45 = arith.constant 0 : index
    %16 = vector.load %arg9[%c0_44, %c0_45] : memref<512x1152xf32, #tpu.memory_space<vmem>>, vector<512x128xf32>
    tpu.vector_store %arg9[%c0_44, %c0_45], %15 {strides = array<i32>} : memref<512x1152xf32, #tpu.memory_space<vmem>>, vector<512x128xf32>,
    %c0_46 = arith.constant 0 : index
    %c0_47 = arith.constant 0 : index
    %c1_48 = arith.constant 1 : index
    %c0_49 = arith.constant 0 : index
    %17 = vector.load %arg7[%c0_46, %c0_47, %c1_48, %c0_49] : memref<2x18x18x128xf32, #tpu.memory_space<vmem>>, vector<2x16x16x128xf32>
    %18 = vector.shape_cast %17 : vector<2x16x16x128xf32> to vector<512x128xf32>
    %c0_50 = arith.constant 0 : index
    %c128 = arith.constant 128 : index
    %19 = vector.load %arg9[%c0_50, %c128] : memref<512x1152xf32, #tpu.memory_space<vmem>>, vector<512x128xf32>
    tpu.vector_store %arg9[%c0_50, %c128], %18 {strides = array<i32>} : memref<512x1152xf32, #tpu.memory_space<vmem>>, vector<512x128xf32>,
    %c0_51 = arith.constant 0 : index
    %c0_52 = arith.constant 0 : index
    %c2 = arith.constant 2 : index
    %c0_53 = arith.constant 0 : index
    %20 = vector.load %arg7[%c0_51, %c0_52, %c2, %c0_53] : memref<2x18x18x128xf32, #tpu.memory_space<vmem>>, vector<2x16x16x128xf32>
    %21 = vector.shape_cast %20 : vector<2x16x16x128xf32> to vector<512x128xf32>
    %c0_54 = arith.constant 0 : index
    %c256 = arith.constant 256 : index
    %22 = vector.load %arg9[%c0_54, %c256] : memref<512x1152xf32, #tpu.memory_space<vmem>>, vector<512x128xf32>
    tpu.vector_store %arg9[%c0_54, %c256], %21 {strides = array<i32>} : memref<512x1152xf32, #tpu.memory_space<vmem>>, vector<512x128xf32>,
    %c0_55 = arith.constant 0 : index
    %c1_56 = arith.constant 1 : index
    %c0_57 = arith.constant 0 : index
    %c0_58 = arith.constant 0 : index
    %23 = vector.load %arg7[%c0_55, %c1_56, %c0_57, %c0_58] : memref<2x18x18x128xf32, #tpu.memory_space<vmem>>, vector<2x16x16x128xf32>
    %24 = vector.shape_cast %23 : vector<2x16x16x128xf32> to vector<512x128xf32>
    %c0_59 = arith.constant 0 : index
    %c384 = arith.constant 384 : index
    %25 = vector.load %arg9[%c0_59, %c384] : memref<512x1152xf32, #tpu.memory_space<vmem>>, vector<512x128xf32>
    tpu.vector_store %arg9[%c0_59, %c384], %24 {strides = array<i32>} : memref<512x1152xf32, #tpu.memory_space<vmem>>, vector<512x128xf32>,
    %c0_60 = arith.constant 0 : index
    %c1_61 = arith.constant 1 : index
    %c1_62 = arith.constant 1 : index
    %c0_63 = arith.constant 0 : index
    %26 = vector.load %arg7[%c0_60, %c1_61, %c1_62, %c0_63] : memref<2x18x18x128xf32, #tpu.memory_space<vmem>>, vector<2x16x16x128xf32>
    %27 = vector.shape_cast %26 : vector<2x16x16x128xf32> to vector<512x128xf32>
    %c0_64 = arith.constant 0 : index
    %c512 = arith.constant 512 : index
    %28 = vector.load %arg9[%c0_64, %c512] : memref<512x1152xf32, #tpu.memory_space<vmem>>, vector<512x128xf32>
    tpu.vector_store %arg9[%c0_64, %c512], %27 {strides = array<i32>} : memref<512x1152xf32, #tpu.memory_space<vmem>>, vector<512x128xf32>,
    %c0_65 = arith.constant 0 : index
    %c1152 = arith.constant 1152 : index
    %29 = vector.load %arg10[%c0_65, %c1152] : memref<512x1280xf32, #tpu.memory_space<vmem>>, vector<512x128xf32>
    tpu.vector_store %arg10[%c0_65, %c1152], %27 {strides = array<i32>} : memref<512x1280xf32, #tpu.memory_space<vmem>>, vector<512x128xf32>,
    %c0_66 = arith.constant 0 : index
    %c1_67 = arith.constant 1 : index
    %c2_68 = arith.constant 2 : index
    %c0_69 = arith.constant 0 : index
    %30 = vector.load %arg7[%c0_66, %c1_67, %c2_68, %c0_69] : memref<2x18x18x128xf32, #tpu.memory_space<vmem>>, vector<2x16x16x128xf32>
    %31 = vector.shape_cast %30 : vector<2x16x16x128xf32> to vector<512x128xf32>
    %c0_70 = arith.constant 0 : index
    %c640 = arith.constant 640 : index
    %32 = vector.load %arg9[%c0_70, %c640] : memref<512x1152xf32, #tpu.memory_space<vmem>>, vector<512x128xf32>
    tpu.vector_store %arg9[%c0_70, %c640], %31 {strides = array<i32>} : memref<512x1152xf32, #tpu.memory_space<vmem>>, vector<512x128xf32>,
    %c0_71 = arith.constant 0 : index
    %c2_72 = arith.constant 2 : index
    %c0_73 = arith.constant 0 : index
    %c0_74 = arith.constant 0 : index
    %33 = vector.load %arg7[%c0_71, %c2_72, %c0_73, %c0_74] : memref<2x18x18x128xf32, #tpu.memory_space<vmem>>, vector<2x16x16x128xf32>
    %34 = vector.shape_cast %33 : vector<2x16x16x128xf32> to vector<512x128xf32>
    %c0_75 = arith.constant 0 : index
    %c768 = arith.constant 768 : index
    %35 = vector.load %arg9[%c0_75, %c768] : memref<512x1152xf32, #tpu.memory_space<vmem>>, vector<512x128xf32>
    tpu.vector_store %arg9[%c0_75, %c768], %34 {strides = array<i32>} : memref<512x1152xf32, #tpu.memory_space<vmem>>, vector<512x128xf32>,
    %c0_76 = arith.constant 0 : index
    %c2_77 = arith.constant 2 : index
    %c1_78 = arith.constant 1 : index
    %c0_79 = arith.constant 0 : index
    %36 = vector.load %arg7[%c0_76, %c2_77, %c1_78, %c0_79] : memref<2x18x18x128xf32, #tpu.memory_space<vmem>>, vector<2x16x16x128xf32>
    %37 = vector.shape_cast %36 : vector<2x16x16x128xf32> to vector<512x128xf32>
    %c0_80 = arith.constant 0 : index
    %c896 = arith.constant 896 : index
    %38 = vector.load %arg9[%c0_80, %c896] : memref<512x1152xf32, #tpu.memory_space<vmem>>, vector<512x128xf32>
    tpu.vector_store %arg9[%c0_80, %c896], %37 {strides = array<i32>} : memref<512x1152xf32, #tpu.memory_space<vmem>>, vector<512x128xf32>,
    %c0_81 = arith.constant 0 : index
    %c2_82 = arith.constant 2 : index
    %c2_83 = arith.constant 2 : index
    %c0_84 = arith.constant 0 : index
    %39 = vector.load %arg7[%c0_81, %c2_82, %c2_83, %c0_84] : memref<2x18x18x128xf32, #tpu.memory_space<vmem>>, vector<2x16x16x128xf32>
    %40 = vector.shape_cast %39 : vector<2x16x16x128xf32> to vector<512x128xf32>
    %c0_85 = arith.constant 0 : index
    %c1024 = arith.constant 1024 : index
    %41 = vector.load %arg9[%c0_85, %c1024] : memref<512x1152xf32, #tpu.memory_space<vmem>>, vector<512x128xf32>
    tpu.vector_store %arg9[%c0_85, %c1024], %40 {strides = array<i32>} : memref<512x1152xf32, #tpu.memory_space<vmem>>, vector<512x128xf32>,
    %c0_86 = arith.constant 0 : index
    %c0_87 = arith.constant 0 : index
    %42 = vector.load %arg9[%c0_86, %c0_87] : memref<512x1152xf32, #tpu.memory_space<vmem>>, vector<512x1152xf32>
    %c0_88 = arith.constant 0 : index
    %c0_89 = arith.constant 0 : index
    %43 = vector.load %arg2[%c0_88, %c0_89] : memref<1152x128xf32, #tpu.memory_space<vmem>>, vector<1152x128xf32>
    %cst_90 = arith.constant dense<0.000000e+00> : vector<512x128xf32>
    %44 = tpu.matmul %42, %43, %cst_90 {dimension_numbers = #tpu.dot_dimension_numbers<[1], [0], [0], [1], [0, 0, 1, 1], [], []>} : vector<512x1152xf32>, vector<1152x128xf32>, vector<512x128xf32> -> vector<512x128xf32>
    %c0_91 = arith.constant 0 : index
    %c0_92 = arith.constant 0 : index
    %45 = vector.load %arg3[%c0_91, %c0_92] : memref<1x128xf32, #tpu.memory_space<vmem>>, vector<1x128xf32>
    %46 = vector.broadcast %45 : vector<1x128xf32> to vector<512x128xf32>
    %47 = arith.addf %44, %46 : vector<512x128xf32>
    %cst_93 = arith.constant 0.000000e+00 : f32
    %48 = vector.broadcast %cst_93 : f32 to vector<512x128xf32>
    %49 = arith.maximumf %47, %48 : vector<512x128xf32>
    %50 = vector.shape_cast %49 : vector<512x128xf32> to vector<2x16x16x128xf32>
    %c0_94 = arith.constant 0 : index
    %c1_95 = arith.constant 1 : index
    %c1_96 = arith.constant 1 : index
    %c0_97 = arith.constant 0 : index
    %51 = vector.load %arg8[%c0_94, %c1_95, %c1_96, %c0_97] : memref<2x18x18x128xf32, #tpu.memory_space<vmem>>, vector<2x16x16x128xf32>
    tpu.vector_store %arg8[%c0_94, %c1_95, %c1_96, %c0_97], %50 {strides = array<i32>} : memref<2x18x18x128xf32, #tpu.memory_space<vmem>>, vector<2x16x16x128xf32>,
    %c0_98 = arith.constant 0 : index
    %c0_99 = arith.constant 0 : index
    %c0_100 = arith.constant 0 : index
    %c0_101 = arith.constant 0 : index
    %52 = vector.load %arg8[%c0_98, %c0_99, %c0_100, %c0_101] : memref<2x18x18x128xf32, #tpu.memory_space<vmem>>, vector<2x16x16x128xf32>
    %53 = vector.shape_cast %52 : vector<2x16x16x128xf32> to vector<512x128xf32>
    %c0_102 = arith.constant 0 : index
    %c0_103 = arith.constant 0 : index
    %54 = vector.load %arg10[%c0_102, %c0_103] : memref<512x1280xf32, #tpu.memory_space<vmem>>, vector<512x128xf32>
    tpu.vector_store %arg10[%c0_102, %c0_103], %53 {strides = array<i32>} : memref<512x1280xf32, #tpu.memory_space<vmem>>, vector<512x128xf32>,
    %c0_104 = arith.constant 0 : index
    %c0_105 = arith.constant 0 : index
    %c1_106 = arith.constant 1 : index
    %c0_107 = arith.constant 0 : index
    %55 = vector.load %arg8[%c0_104, %c0_105, %c1_106, %c0_107] : memref<2x18x18x128xf32, #tpu.memory_space<vmem>>, vector<2x16x16x128xf32>
    %56 = vector.shape_cast %55 : vector<2x16x16x128xf32> to vector<512x128xf32>
    %c0_108 = arith.constant 0 : index
    %c128_109 = arith.constant 128 : index
    %57 = vector.load %arg10[%c0_108, %c128_109] : memref<512x1280xf32, #tpu.memory_space<vmem>>, vector<512x128xf32>
    tpu.vector_store %arg10[%c0_108, %c128_109], %56 {strides = array<i32>} : memref<512x1280xf32, #tpu.memory_space<vmem>>, vector<512x128xf32>,
    %c0_110 = arith.constant 0 : index
    %c0_111 = arith.constant 0 : index
    %c2_112 = arith.constant 2 : index
    %c0_113 = arith.constant 0 : index
    %58 = vector.load %arg8[%c0_110, %c0_111, %c2_112, %c0_113] : memref<2x18x18x128xf32, #tpu.memory_space<vmem>>, vector<2x16x16x128xf32>
    %59 = vector.shape_cast %58 : vector<2x16x16x128xf32> to vector<512x128xf32>
    %c0_114 = arith.constant 0 : index
    %c256_115 = arith.constant 256 : index
    %60 = vector.load %arg10[%c0_114, %c256_115] : memref<512x1280xf32, #tpu.memory_space<vmem>>, vector<512x128xf32>
    tpu.vector_store %arg10[%c0_114, %c256_115], %59 {strides = array<i32>} : memref<512x1280xf32, #tpu.memory_space<vmem>>, vector<512x128xf32>,
    %c0_116 = arith.constant 0 : index
    %c1_117 = arith.constant 1 : index
    %c0_118 = arith.constant 0 : index
    %c0_119 = arith.constant 0 : index
    %61 = vector.load %arg8[%c0_116, %c1_117, %c0_118, %c0_119] : memref<2x18x18x128xf32, #tpu.memory_space<vmem>>, vector<2x16x16x128xf32>
    %62 = vector.shape_cast %61 : vector<2x16x16x128xf32> to vector<512x128xf32>
    %c0_120 = arith.constant 0 : index
    %c384_121 = arith.constant 384 : index
    %63 = vector.load %arg10[%c0_120, %c384_121] : memref<512x1280xf32, #tpu.memory_space<vmem>>, vector<512x128xf32>
    tpu.vector_store %arg10[%c0_120, %c384_121], %62 {strides = array<i32>} : memref<512x1280xf32, #tpu.memory_space<vmem>>, vector<512x128xf32>,
    %c0_122 = arith.constant 0 : index
    %c1_123 = arith.constant 1 : index
    %c1_124 = arith.constant 1 : index
    %c0_125 = arith.constant 0 : index
    %64 = vector.load %arg8[%c0_122, %c1_123, %c1_124, %c0_125] : memref<2x18x18x128xf32, #tpu.memory_space<vmem>>, vector<2x16x16x128xf32>
    %65 = vector.shape_cast %64 : vector<2x16x16x128xf32> to vector<512x128xf32>
    %c0_126 = arith.constant 0 : index
    %c512_127 = arith.constant 512 : index
    %66 = vector.load %arg10[%c0_126, %c512_127] : memref<512x1280xf32, #tpu.memory_space<vmem>>, vector<512x128xf32>
    tpu.vector_store %arg10[%c0_126, %c512_127], %65 {strides = array<i32>} : memref<512x1280xf32, #tpu.memory_space<vmem>>, vector<512x128xf32>,
    %c0_128 = arith.constant 0 : index
    %c1_129 = arith.constant 1 : index
    %c2_130 = arith.constant 2 : index
    %c0_131 = arith.constant 0 : index
    %67 = vector.load %arg8[%c0_128, %c1_129, %c2_130, %c0_131] : memref<2x18x18x128xf32, #tpu.memory_space<vmem>>, vector<2x16x16x128xf32>
    %68 = vector.shape_cast %67 : vector<2x16x16x128xf32> to vector<512x128xf32>
    %c0_132 = arith.constant 0 : index
    %c640_133 = arith.constant 640 : index
    %69 = vector.load %arg10[%c0_132, %c640_133] : memref<512x1280xf32, #tpu.memory_space<vmem>>, vector<512x128xf32>
    tpu.vector_store %arg10[%c0_132, %c640_133], %68 {strides = array<i32>} : memref<512x1280xf32, #tpu.memory_space<vmem>>, vector<512x128xf32>,
    %c0_134 = arith.constant 0 : index
    %c2_135 = arith.constant 2 : index
    %c0_136 = arith.constant 0 : index
    %c0_137 = arith.constant 0 : index
    %70 = vector.load %arg8[%c0_134, %c2_135, %c0_136, %c0_137] : memref<2x18x18x128xf32, #tpu.memory_space<vmem>>, vector<2x16x16x128xf32>
    %71 = vector.shape_cast %70 : vector<2x16x16x128xf32> to vector<512x128xf32>
    %c0_138 = arith.constant 0 : index
    %c768_139 = arith.constant 768 : index
    %72 = vector.load %arg10[%c0_138, %c768_139] : memref<512x1280xf32, #tpu.memory_space<vmem>>, vector<512x128xf32>
    tpu.vector_store %arg10[%c0_138, %c768_139], %71 {strides = array<i32>} : memref<512x1280xf32, #tpu.memory_space<vmem>>, vector<512x128xf32>,
    %c0_140 = arith.constant 0 : index
    %c2_141 = arith.constant 2 : index
    %c1_142 = arith.constant 1 : index
    %c0_143 = arith.constant 0 : index
    %73 = vector.load %arg8[%c0_140, %c2_141, %c1_142, %c0_143] : memref<2x18x18x128xf32, #tpu.memory_space<vmem>>, vector<2x16x16x128xf32>
    %74 = vector.shape_cast %73 : vector<2x16x16x128xf32> to vector<512x128xf32>
    %c0_144 = arith.constant 0 : index
    %c896_145 = arith.constant 896 : index
    %75 = vector.load %arg10[%c0_144, %c896_145] : memref<512x1280xf32, #tpu.memory_space<vmem>>, vector<512x128xf32>
    tpu.vector_store %arg10[%c0_144, %c896_145], %74 {strides = array<i32>} : memref<512x1280xf32, #tpu.memory_space<vmem>>, vector<512x128xf32>,
    %c0_146 = arith.constant 0 : index
    %c2_147 = arith.constant 2 : index
    %c2_148 = arith.constant 2 : index
    %c0_149 = arith.constant 0 : index
    %76 = vector.load %arg8[%c0_146, %c2_147, %c2_148, %c0_149] : memref<2x18x18x128xf32, #tpu.memory_space<vmem>>, vector<2x16x16x128xf32>
    %77 = vector.shape_cast %76 : vector<2x16x16x128xf32> to vector<512x128xf32>
    %c0_150 = arith.constant 0 : index
    %c1024_151 = arith.constant 1024 : index
    %78 = vector.load %arg10[%c0_150, %c1024_151] : memref<512x1280xf32, #tpu.memory_space<vmem>>, vector<512x128xf32>
    tpu.vector_store %arg10[%c0_150, %c1024_151], %77 {strides = array<i32>} : memref<512x1280xf32, #tpu.memory_space<vmem>>, vector<512x128xf32>,
    %c0_152 = arith.constant 0 : index
    %c0_153 = arith.constant 0 : index
    %79 = vector.load %arg10[%c0_152, %c0_153] : memref<512x1280xf32, #tpu.memory_space<vmem>>, vector<512x1280xf32>
    %c0_154 = arith.constant 0 : index
    %c0_155 = arith.constant 0 : index
    %80 = vector.load %arg4[%c0_154, %c0_155] : memref<1280x128xf32, #tpu.memory_space<vmem>>, vector<1280x128xf32>
    %cst_156 = arith.constant dense<0.000000e+00> : vector<512x128xf32>
    %81 = tpu.matmul %79, %80, %cst_156 {dimension_numbers = #tpu.dot_dimension_numbers<[1], [0], [0], [1], [0, 0, 1, 1], [], []>} : vector<512x1280xf32>, vector<1280x128xf32>, vector<512x128xf32> -> vector<512x128xf32>
    %c0_157 = arith.constant 0 : index
    %c0_158 = arith.constant 0 : index
    %82 = vector.load %arg5[%c0_157, %c0_158] : memref<1x128xf32, #tpu.memory_space<vmem>>, vector<1x128xf32>
    %83 = vector.broadcast %82 : vector<1x128xf32> to vector<512x128xf32>
    %84 = arith.addf %81, %83 : vector<512x128xf32>
    %cst_159 = arith.constant 0.000000e+00 : f32
    %85 = vector.broadcast %cst_159 : f32 to vector<512x128xf32>
    %86 = arith.maximumf %84, %85 : vector<512x128xf32>
    %87 = vector.shape_cast %86 : vector<512x128xf32> to vector<2x16x16x128xf32>
    %c0_160 = arith.constant 0 : index
    %c0_161 = arith.constant 0 : index
    %c0_162 = arith.constant 0 : index
    %c0_163 = arith.constant 0 : index
    %88 = vector.load %arg6[%c0_160, %c0_161, %c0_162, %c0_163] : memref<2x16x16x128xf32, #tpu.memory_space<vmem>>, vector<2x16x16x128xf32>
    tpu.vector_store %arg6[%c0_160, %c0_161, %c0_162, %c0_163], %87 {strides = array<i32>} : memref<2x16x16x128xf32, #tpu.memory_space<vmem>>, vector<2x16x16x128xf32>,
    return
  }
  func.func @transform_0(%arg0: i32) -> (i32, i32, i32, i32) {
    %c0_i32 = arith.constant 0 : i32
    %c0_i32_0 = arith.constant 0 : i32
    %c0_i32_1 = arith.constant 0 : i32
    %c0_i32_2 = arith.constant 0 : i32
    return %arg0, %c0_i32, %c0_i32_0, %c0_i32_1 : i32, i32, i32, i32
  }
  func.func @transform_1(%arg0: i32) -> (i32, i32) {
    %c0_i32 = arith.constant 0 : i32
    %c0_i32_0 = arith.constant 0 : i32
    %c0_i32_1 = arith.constant 0 : i32
    return %c0_i32, %c0_i32_0 : i32, i32
  }
  func.func @transform_2(%arg0: i32) -> (i32, i32) {
    %c0_i32 = arith.constant 0 : i32
    %c0_i32_0 = arith.constant 0 : i32
    %c0_i32_1 = arith.constant 0 : i32
    return %c0_i32, %c0_i32_0 : i32, i32
  }
  func.func @transform_3(%arg0: i32) -> (i32, i32) {
    %c0_i32 = arith.constant 0 : i32
    %c0_i32_0 = arith.constant 0 : i32
    %c0_i32_1 = arith.constant 0 : i32
    return %c0_i32, %c0_i32_0 : i32, i32
  }
  func.func @transform_4(%arg0: i32) -> (i32, i32) {
    %c0_i32 = arith.constant 0 : i32
    %c0_i32_0 = arith.constant 0 : i32
    %c0_i32_1 = arith.constant 0 : i32
    return %c0_i32, %c0_i32_0 : i32, i32
  }
  func.func @transform_5(%arg0: i32) -> (i32, i32, i32, i32) {
    %c0_i32 = arith.constant 0 : i32
    %c0_i32_0 = arith.constant 0 : i32
    %c0_i32_1 = arith.constant 0 : i32
    %c0_i32_2 = arith.constant 0 : i32
    return %arg0, %c0_i32, %c0_i32_0, %c0_i32_1 : i32, i32, i32, i32
  }
}

</mosaic_0001>

<bundles_post_ra>
// kernel: hc_basic_block_forward.1
= control target key start
LH: loop header
LB: loop body
LE: loop exit
PB: predicated region body
PF: predicated region fallthrough
CT: control target
= control target key end

     0   :  { %v8683_v0 = vmov 0.0   ;;  %s13180_s1 = inlined_call_operand.vmem [shape: f32[1152,128], index: 1, kind: input, shape index: {}]   ;;  %s13181_s0 = inlined_call_operand.vmem [shape: f32[2,16,16,128], index: 0, kind: input, shape index: {}]   ;;  %s13182_s2 = inlined_call_operand.vmem [shape: f32[1,128], index: 2, kind: input, shape index: {}]   ;;  %s13183_s3 = inlined_call_operand.vmem [shape: f32[1280,128], index: 3, kind: input, shape index: {}]   ;;  %s13184_s4 = inlined_call_operand.vmem [shape: f32[1,128], index: 4, kind: input, shape index: {}]   ;;  %s13185_s5 = inlined_call_operand.vmem [shape: f32[2,16,16,128], index: 5, kind: output, shape index: {}]  }
   0x1   :  { %2263 = vmatprep.subr.mxu0 %v8683_v0  ;;  %20 = vst [vmem:[#allocation2] sm:$0xff] %v8683_v0  ;;  %21 = vst [vmem:[#allocation2 + $0x8] sm:$0xff] %v8683_v0  ;;  %v2127_v1 = vld [vmem:[%s13180_s1 + $0x78] sm:$0xff]  ;;  %v2126_v2 = vld [vmem:[%s13180_s1 + $0x70] sm:$0xff]  ;;  %8544 = vmatprep.subr.mxu1 %v8683_v0 }
   0x2   :  { %22 = vst [vmem:[#allocation2 + $0x10] sm:$0x3] %v8683_v0  ;;  %23 = vst [vmem:[#allocation2 + $0x1b0] sm:$0xff] %v8683_v0  ;;  %2264 = vmatpush1.msra.mxu0 %v2127_v1  ;;  %v2125_v3 = vld [vmem:[%s13180_s1 + $0x68] sm:$0xff]  ;;  %v2124_v4 = vld [vmem:[%s13180_s1 + $0x60] sm:$0xff] }
   0x3   :  { %24 = vst [vmem:[#allocation2 + $0x1b8] sm:$0xff] %v8683_v0  ;;  %25 = vst [vmem:[#allocation2 + $0x1c0] sm:$0x3] %v8683_v0  ;;  %2265 = vmatprep.subr.mxu0 %v8683_v0  ;;  %v2123_v5 = vld [vmem:[%s13180_s1 + $0x58] sm:$0xff]  ;;  %v2122_v6 = vld [vmem:[%s13180_s1 + $0x50] sm:$0xff] }
   0x4   :  { %27 = vst [vmem:[#allocation2 + $0x198] sm:$0xff] %v8683_v0  ;;  %28 = vst [vmem:[#allocation2 + $0x1a0] sm:$0xff] %v8683_v0  ;;  %2266 = vmatpush1.msra.mxu0 %v2126_v2  ;;  %v2121_v7 = vld [vmem:[%s13180_s1 + $0x48] sm:$0xff]  ;;  %v8913_v9 = vld [vmem:[%s13180_s1 + $0x178] sm:$0xff] }
   0x5   :  { %29 = vst [vmem:[#allocation2 + $0x1a8] sm:$0x3] %v8683_v0  ;;  %30 = vst [vmem:[#allocation2 + $0x348] sm:$0xff] %v8683_v0  ;;  %2267 = vmatprep.subr.mxu0 %v8683_v0  ;;  %v2120_v10 = vld [vmem:[%s13180_s1 + $0x40] sm:$0xff]  ;;  %8576 = vmatpush1.msra.mxu1 %v8913_v9  ;;  %v8923_v11 = vld [vmem:[%s13180_s1 + $0x170] sm:$0xff] }
   0x6   :  { %31 = vst [vmem:[#allocation2 + $0x350] sm:$0xff] %v8683_v0  ;;  %32 = vst [vmem:[#allocation2 + $0x358] sm:$0x3] %v8683_v0  ;;  %2268 = vmatpush1.msra.mxu0 %v2125_v3  ;;  %v8928_v12 = vld [vmem:[%s13181_s0] sm:$0xff]  ;;  %8545 = vmatprep.subr.mxu1 %v8683_v0  ;;  %v8935_v13 = vld [vmem:[%s13180_s1 + $0x168] sm:$0xff] }
   0x7   :  { %34 = vst [vmem:[#allocation2 + $0x18] sm:$0x1] %v8683_v0  ;;  %35 = vst [vmem:[#allocation2 + $0x30] sm:$0x1] %v8683_v0  ;;  %2269 = vmatprep.subr.mxu0 %v8683_v0  ;;  %v8940_v14 = vld [vmem:[%s13181_s0 + $0x8] sm:$0xff]  ;;  %v2119_v15 = vld [vmem:[%s13180_s1 + $0x38] sm:$0xff]  ;;  %8577 = vmatpush1.msra.mxu1 %v8923_v11 }
   0x8   :  { %36 = vst [vmem:[#allocation2 + $0x48] sm:$0x1] %v8683_v0  ;;  %37 = vst [vmem:[#allocation2 + $0x60] sm:$0x1] %v8683_v0  ;;  %2270 = vmatpush1.msra.mxu0 %v2124_v4  ;;  %v447_v8 = vld [vmem:[#allocation2 + $0x1] sm:$0xff]  ;;  %v8951_v16 = vld [vmem:[%s13181_s0 + $0x10] sm:$0xff]  ;;  %8546 = vmatprep.subr.mxu1 %v8683_v0 }
   0x9   :  { %38 = vst [vmem:[#allocation2 + $0x78] sm:$0x1] %v8683_v0  ;;  %39 = vst [vmem:[#allocation2 + $0x90] sm:$0x1] %v8683_v0  ;;  %2271 = vmatprep.subr.mxu0 %v8683_v0  ;;  %2327 = vmatprep.mubr.f32.mxu0 %v447_v8  ;;  %v8957_v17 = vld [vmem:[%s13180_s1 + $0x160] sm:$0xff]  ;;  %v8963_v18 = vld [vmem:[%s13181_s0 + $0x18] sm:$0xff] }
   0xa   :  { %40 = vst [vmem:[#allocation2 + $0xa8] sm:$0x1] %v8683_v0  ;;  %41 = vst [vmem:[#allocation2 + $0xc0] sm:$0x1] %v8683_v0  ;;  %2272 = vmatpush1.msra.mxu0 %v2123_v5  ;;  %v2118_v19 = vld [vmem:[%s13180_s1 + $0x30] sm:$0xff]  ;;  %8578 = vmatpush1.msra.mxu1 %v8935_v13  ;;  %v8974_v20 = vld [vmem:[%s13181_s0 + $0x20] sm:$0xff] }
   0xb   :  { %42 = vst [vmem:[#allocation2 + $0xd8] sm:$0x1] %v8683_v0  ;;  %43 = vst [vmem:[#allocation2 + $0xf0] sm:$0x1] %v8683_v0  ;;  %2273 = vmatprep.subr.mxu0 %v8683_v0  ;;  %8547 = vmatprep.subr.mxu1 %v8683_v0  ;;  %v8980_v21 = vld [vmem:[%s13180_s1 + $0x158] sm:$0xff]  ;;  %v8986_v22 = vld [vmem:[%s13181_s0 + $0x28] sm:$0xff] }
   0xc   :  { %44 = vst [vmem:[#allocation2 + $0x108] sm:$0x1] %v8683_v0  ;;  %45 = vst [vmem:[#allocation2 + $0x120] sm:$0x1] %v8683_v0  ;;  %2274 = vmatpush1.msra.mxu0 %v2122_v6  ;;  %v2117_v23 = vld [vmem:[%s13180_s1 + $0x28] sm:$0xff]  ;;  %8579 = vmatpush1.msra.mxu1 %v8957_v17  ;;  %v8997_v24 = vld [vmem:[%s13181_s0 + $0x30] sm:$0xff] }
   0xd   :  { %46 = vst [vmem:[#allocation2 + $0x138] sm:$0x1] %v8683_v0  ;;  %47 = vst [vmem:[#allocation2 + $0x150] sm:$0x1] %v8683_v0  ;;  %2275 = vmatprep.subr.mxu0 %v8683_v0  ;;  %8548 = vmatprep.subr.mxu1 %v8683_v0  ;;  %v9003_v25 = vld [vmem:[%s13180_s1 + $0x150] sm:$0xff]  ;;  %v9009_v26 = vld [vmem:[%s13181_s0 + $0x38] sm:$0xff] }
   0xe   :  { %48 = vst [vmem:[#allocation2 + $0x168] sm:$0x1] %v8683_v0  ;;  %49 = vst [vmem:[#allocation2 + $0x180] sm:$0x1] %v8683_v0  ;;  %2276 = vmatpush1.msra.mxu0 %v2121_v7  ;;  %v2116_v27 = vld [vmem:[%s13180_s1 + $0x20] sm:$0xff]  ;;  %8580 = vmatpush1.msra.mxu1 %v8980_v21  ;;  %v9026_v29 = vld [vmem:[%s13180_s1 + $0x148] sm:$0xff] }
   0xf   :  { %52 = vst [vmem:[#allocation2 + $0x1c8] sm:$0x1] %v8683_v0  ;;  %53 = vst [vmem:[#allocation2 + $0x1e0] sm:$0x1] %v8683_v0  ;;  %2277 = vmatprep.subr.mxu0 %v8683_v0  ;;  %v9020_v28 = vld [vmem:[%s13181_s0 + $0x40] sm:$0xff]  ;;  %8549 = vmatprep.subr.mxu1 %v8683_v0  ;;  %v2115_v30 = vld [vmem:[%s13180_s1 + $0x18] sm:$0xff] }
  0x10   :  { %54 = vst [vmem:[#allocation2 + $0x1f8] sm:$0x1] %v8683_v0  ;;  %55 = vst [vmem:[#allocation2 + $0x210] sm:$0x1] %v8683_v0  ;;  %2278 = vmatpush1.msra.mxu0 %v2120_v10  ;;  %8581 = vmatpush1.msra.mxu1 %v9003_v25  ;;  %v9037_v31 = vld [vmem:[%s13181_s0 + $0x48] sm:$0xff]  ;;  %v9043_v32 = vld [vmem:[%s13180_s1 + $0x140] sm:$0xff] }
  0x11   :  { %56 = vst [vmem:[#allocation2 + $0x228] sm:$0x1] %v8683_v0  ;;  %57 = vst [vmem:[#allocation2 + $0x240] sm:$0x1] %v8683_v0  ;;  %2279 = vmatprep.subr.mxu0 %v8683_v0  ;;  %8550 = vmatprep.subr.mxu1 %v8683_v0  ;;  %v9049_v33 = vld [vmem:[%s13181_s0 + $0x50] sm:$0xff]  ;;  %v9061_v35 = vld [vmem:[%s13180_s1 + $0x138] sm:$0xff] }
  0x12   :  { %58 = vst [vmem:[#allocation2 + $0x258] sm:$0x1] %v8683_v0  ;;  %59 = vst [vmem:[#allocation2 + $0x270] sm:$0x1] %v8683_v0  ;;  %2280 = vmatpush1.msra.mxu0 %v2119_v15  ;;  %v2114_v34 = vld [vmem:[%s13180_s1 + $0x10] sm:$0xff]  ;;  %8582 = vmatpush1.msra.mxu1 %v9026_v29  ;;  %v9066_v36 = vld [vmem:[%s13181_s0 + $0x58] sm:$0xff] }
  0x13   :  { %60 = vst [vmem:[#allocation2 + $0x288] sm:$0x1] %v8683_v0  ;;  %61 = vst [vmem:[#allocation2 + $0x2a0] sm:$0x1] %v8683_v0  ;;  %2281 = vmatprep.subr.mxu0 %v8683_v0  ;;  %8551 = vmatprep.subr.mxu1 %v8683_v0  ;;  %v2113_v37 = vld [vmem:[%s13180_s1 + $0x8] sm:$0xff]  ;;  %v9077_v38 = vld [vmem:[%s13181_s0 + $0x60] sm:$0xff] }
  0x14   :  { %62 = vst [vmem:[#allocation2 + $0x2b8] sm:$0x1] %v8683_v0  ;;  %63 = vst [vmem:[#allocation2 + $0x2d0] sm:$0x1] %v8683_v0  ;;  %2282 = vmatpush1.msra.mxu0 %v2118_v19  ;;  %8583 = vmatpush1.msra.mxu1 %v9043_v32  ;;  %v9083_v39 = vld [vmem:[%s13180_s1 + $0x130] sm:$0xff]  ;;  %v2112_v40 = vld [vmem:[%s13180_s1] sm:$0xff] }
  0x15   :  { %64 = vst [vmem:[#allocation2 + $0x2e8] sm:$0x1] %v8683_v0  ;;  %65 = vst [vmem:[#allocation2 + $0x300] sm:$0x1] %v8683_v0  ;;  %2283 = vmatprep.subr.mxu0 %v8683_v0  ;;  %8552 = vmatprep.subr.mxu1 %v8683_v0  ;;  %v9094_v41 = vld [vmem:[%s13181_s0 + $0x68] sm:$0xff]  ;;  %v9106_v43 = vld [vmem:[%s13181_s0 + $0x70] sm:$0xff] }
  0x16   :  { %66 = vst [vmem:[#allocation2 + $0x318] sm:$0x1] %v8683_v0  ;;  %67 = vst [vmem:[#allocation2 + $0x330] sm:$0x1] %v8683_v0  ;;  %2284 = vmatpush1.msra.mxu0 %v2117_v23  ;;  %8584 = vmatpush1.msra.mxu1 %v9061_v35  ;;  %v9100_v42 = vld [vmem:[%s13180_s1 + $0x128] sm:$0xff]  ;;  %v2143_v44 = vld [vmem:[%s13180_s1 + $0xf8] sm:$0xff] }
  0x17   :  { %70 = vst [vmem:[#allocation2 + $0x29] sm:$0x1] %v8683_v0  ;;  %71 = vst [vmem:[#allocation2 + $0x41] sm:$0x1] %v8683_v0  ;;  %2285 = vmatprep.subr.mxu0 %v8683_v0  ;;  %8553 = vmatprep.subr.mxu1 %v8683_v0  ;;  %v2142_v45 = vld [vmem:[%s13180_s1 + $0xf0] sm:$0xff]  ;;  %v9120_v46 = vld [vmem:[%s13181_s0 + $0x80] sm:$0xff] }
  0x18   :  { %72 = vst [vmem:[#allocation2 + $0x59] sm:$0x1] %v8683_v0  ;;  %73 = vst [vmem:[#allocation2 + $0x71] sm:$0x1] %v8683_v0  ;;  %2286 = vmatpush1.msra.mxu0 %v2116_v27  ;;  %8585 = vmatpush1.msra.mxu1 %v9083_v39  ;;  %v9126_v47 = vld [vmem:[%s13180_s1 + $0x120] sm:$0xff]  ;;  %v9132_v48 = vld [vmem:[%s13181_s0 + $0x78] sm:$0xff] }
  0x19   :  { %74 = vst [vmem:[#allocation2 + $0x89] sm:$0x1] %v8683_v0  ;;  %75 = vst [vmem:[#allocation2 + $0xa1] sm:$0x1] %v8683_v0  ;;  %2287 = vmatprep.subr.mxu0 %v8683_v0  ;;  %8554 = vmatprep.subr.mxu1 %v8683_v0  ;;  %v9137_v49 = vld [vmem:[%s13181_s0 + $0x88] sm:$0xff]  ;;  %v9146_v50 = vld [vmem:[%s13181_s0 + $0x90] sm:$0xff] }
  0x1a   :  { %76 = vst [vmem:[#allocation2 + $0xb9] sm:$0x1] %v8683_v0  ;;  %77 = vst [vmem:[#allocation2 + $0xd1] sm:$0x1] %v8683_v0  ;;  %2288 = vmatpush1.msra.mxu0 %v2115_v30  ;;  %8586 = vmatpush1.msra.mxu1 %v9100_v42  ;;  %v9151_v51 = vld [vmem:[%s13181_s0 + $0x98] sm:$0xff]  ;;  %v9156_v52 = vld [vmem:[%s13181_s0 + $0xa0] sm:$0xff] }
  0x1b   :  { %78 = vst [vmem:[#allocation2 + $0xe9] sm:$0x1] %v8683_v0  ;;  %79 = vst [vmem:[#allocation2 + $0x101] sm:$0x1] %v8683_v0  ;;  %2289 = vmatprep.subr.mxu0 %v8683_v0  ;;  %8555 = vmatprep.subr.mxu1 %v8683_v0  ;;  %v9162_v53 = vld [vmem:[%s13180_s1 + $0x118] sm:$0xff]  ;;  %v9170_v54 = vld [vmem:[%s13181_s0 + $0xa8] sm:$0xff] }
  0x1c   :  { %80 = vst [vmem:[#allocation2 + $0x119] sm:$0x1] %v8683_v0  ;;  %81 = vst [vmem:[#allocation2 + $0x131] sm:$0x1] %v8683_v0  ;;  %2290 = vmatpush1.msra.mxu0 %v2114_v34  ;;  %v9175_v55 = vld [vmem:[%s13181_s0 + $0xb0] sm:$0xff]  ;;  %v2141_v56 = vld [vmem:[%s13180_s1 + $0xe8] sm:$0xff]  ;;  %8587 = vmatpush1.msra.mxu1 %v9126_v47 }
  0x1d   :  { %82 = vst [vmem:[#allocation2 + $0x149] sm:$0x1] %v8683_v0  ;;  %83 = vst [vmem:[#allocation2 + $0x161] sm:$0x1] %v8683_v0  ;;  %2291 = vmatprep.subr.mxu0 %v8683_v0  ;;  %v9187_v57 = vld [vmem:[%s13181_s0 + $0xb8] sm:$0xff]  ;;  %v9192_v58 = vld [vmem:[%s13181_s0 + $0xc0] sm:$0xff]  ;;  %8556 = vmatprep.subr.mxu1 %v8683_v0 }
  0x1e   :  { %84 = vst [vmem:[#allocation2 + $0x179] sm:$0x1] %v8683_v0  ;;  %85 = vst [vmem:[#allocation2 + $0x191] sm:$0x1] %v8683_v0  ;;  %2292 = vmatpush1.msra.mxu0 %v2113_v37  ;;  %v9198_v59 = vld [vmem:[%s13180_s1 + $0x110] sm:$0xff]  ;;  %v9205_v60 = vld [vmem:[%s13181_s0 + $0xc8] sm:$0xff]  ;;  %8588 = vmatpush1.msra.mxu1 %v9162_v53 }
  0x1f   :  { %88 = vst [vmem:[#allocation2 + $0x1d9] sm:$0x1] %v8683_v0  ;;  %89 = vst [vmem:[#allocation2 + $0x1f1] sm:$0x1] %v8683_v0  ;;  %2293 = vmatprep.subr.mxu0 %v8683_v0  ;;  %v9210_v61 = vld [vmem:[%s13181_s0 + $0xd0] sm:$0xff]  ;;  %v2140_v62 = vld [vmem:[%s13180_s1 + $0xe0] sm:$0xff]  ;;  %8557 = vmatprep.subr.mxu1 %v8683_v0 }
  0x20   :  { %90 = vst [vmem:[#allocation2 + $0x209] sm:$0x1] %v8683_v0  ;;  %91 = vst [vmem:[#allocation2 + $0x221] sm:$0x1] %v8683_v0  ;;  %2294 = vmatpush1.msra.mxu0 %v2112_v40  ;;  %v9222_v63 = vld [vmem:[%s13181_s0 + $0xd8] sm:$0xff]  ;;  %v9228_v1 = vld [vmem:[%s13180_s1 + $0x108] sm:$0xff]  ;;  %8589 = vmatpush1.msra.mxu1 %v9198_v59 }
  0x21   :  { %92 = vst [vmem:[#allocation2 + $0x239] sm:$0x1] %v8683_v0  ;;  %93 = vst [vmem:[#allocation2 + $0x251] sm:$0x1] %v8683_v0  ;;  %2295 = vmatprep.subr.mxu0 %v8683_v0  ;;  %v2139_v2 = vld [vmem:[%s13180_s1 + $0xd8] sm:$0xff]  ;;  %8558 = vmatprep.subr.mxu1 %v8683_v0  ;;  %v9240_v3 = vld [vmem:[%s13180_s1 + $0x100] sm:$0xff] }
  0x22   :  { %94 = vst [vmem:[#allocation2 + $0x269] sm:$0x1] %v8683_v0  ;;  %95 = vst [vmem:[#allocation2 + $0x281] sm:$0x1] %v8683_v0  ;;  %2296 = vmatpush2.msra.mxu0 %v2143_v44  ;;  %v2138_v4 = vld [vmem:[%s13180_s1 + $0xd0] sm:$0xff]  ;;  %8590 = vmatpush1.msra.mxu1 %v9228_v1  ;;  %v9251_v5 = vld [vmem:[%s13180_s1 + $0x1f8] sm:$0xff] }
  0x23   :  { %96 = vst [vmem:[#allocation2 + $0x299] sm:$0x1] %v8683_v0  ;;  %97 = vst [vmem:[#allocation2 + $0x2b1] sm:$0x1] %v8683_v0  ;;  %2297 = vmatprep.subr.mxu0 %v8683_v0  ;;  %8559 = vmatprep.subr.mxu1 %v8683_v0  ;;  %v2137_v6 = vld [vmem:[%s13180_s1 + $0xc8] sm:$0xff]  ;;  %v9262_v7 = vld [vmem:[%s13180_s1 + $0x1f0] sm:$0xff] }
  0x24   :  { %98 = vst [vmem:[#allocation2 + $0x2c9] sm:$0x1] %v8683_v0  ;;  %99 = vst [vmem:[#allocation2 + $0x2e1] sm:$0x1] %v8683_v0  ;;  %2298 = vmatpush2.msra.mxu0 %v2142_v45  ;;  %8591 = vmatpush1.msra.mxu1 %v9240_v3  ;;  %v2136_v8 = vld [vmem:[%s13180_s1 + $0xc0] sm:$0xff]  ;;  %v9273_v10 = vld [vmem:[%s13180_s1 + $0x1e8] sm:$0xff] }
  0x25   :  { %100 = vst [vmem:[#allocation2 + $0x2f9] sm:$0x1] %v8683_v0  ;;  %101 = vst [vmem:[#allocation2 + $0x311] sm:$0x1] %v8683_v0  ;;  %2299 = vmatprep.subr.mxu0 %v8683_v0  ;;  %8560 = vmatprep.subr.mxu1 %v8683_v0  ;;  %v2135_v15 = vld [vmem:[%s13180_s1 + $0xb8] sm:$0xff]  ;;  %v9284_v19 = vld [vmem:[%s13180_s1 + $0x1e0] sm:$0xff] }
  0x26   :  { %102 = vst [vmem:[#allocation2 + $0x329] sm:$0x1] %v8683_v0  ;;  %103 = vst [vmem:[#allocation2 + $0x341] sm:$0x1] %v8683_v0  ;;  %2300 = vmatpush2.msra.mxu0 %v2141_v56  ;;  %8592 = vmatpush2.msra.mxu1 %v9251_v5  ;;  %v9289_v23 = vld [vmem:[%s13181_s0 + $0xe0] sm:$0xff]  ;;  %v9294_v27 = vld [vmem:[%s13181_s0 + $0xe8] sm:$0xff] }
  0x27   :  { %105 = vst [vmem:[#allocation3] sm:$0xff] %v8683_v0  ;;  %106 = vst [vmem:[#allocation3 + $0x8] sm:$0xff] %v8683_v0  ;;  %2301 = vmatprep.subr.mxu0 %v8683_v0  ;;  %8561 = vmatprep.subr.mxu1 %v8683_v0  ;;  %v2134_v30 = vld [vmem:[%s13180_s1 + $0xb0] sm:$0xff]  ;;  %v9310_v37 = vld [vmem:[%s13180_s1 + $0x1d8] sm:$0xff] }
  0x28   :  { %107 = vst [vmem:[#allocation3 + $0x10] sm:$0x3] %v8683_v0  ;;  %108 = vst [vmem:[#allocation3 + $0x1b0] sm:$0xff] %v8683_v0  ;;  %2302 = vmatpush2.msra.mxu0 %v2140_v62  ;;  %8593 = vmatpush2.msra.mxu1 %v9262_v7  ;;  %v220_v34 = vld [vmem:[%s13181_s0 + $0xf0] sm:$0xff]  ;;  %v2133_v40 = vld [vmem:[%s13180_s1 + $0xa8] sm:$0xff] }
  0x29   :  { %109 = vst [vmem:[#allocation3 + $0x1b8] sm:$0xff] %v8683_v0  ;;  %110 = vst [vmem:[#allocation3 + $0x1c0] sm:$0x3] %v8683_v0  ;;  %2303 = vmatprep.subr.mxu0 %v8683_v0  ;;  %8562 = vmatprep.subr.mxu1 %v8683_v0  ;;  %v9321_v44 = vld [vmem:[%s13180_s1 + $0x1d0] sm:$0xff]  ;;  %v2132_v45 = vld [vmem:[%s13180_s1 + $0xa0] sm:$0xff] }
  0x2a   :  { %112 = vst [vmem:[#allocation3 + $0x198] sm:$0xff] %v8683_v0  ;;  %113 = vst [vmem:[#allocation3 + $0x1a0] sm:$0xff] %v8683_v0  ;;  %2304 = vmatpush2.msra.mxu0 %v2139_v2  ;;  %8594 = vmatpush2.msra.mxu1 %v9273_v10  ;;  %v221_v56 = vld [vmem:[%s13181_s0 + $0xf8] sm:$0xff]  ;;  %v9335_v62 = vld [vmem:[%s13180_s1 + $0x1c8] sm:$0xff] }
  0x2b   :  { %114 = vst [vmem:[#allocation3 + $0x1a8] sm:$0x3] %v8683_v0  ;;  %115 = vst [vmem:[#allocation3 + $0x348] sm:$0xff] %v8683_v0  ;;  %2305 = vmatprep.subr.mxu0 %v8683_v0  ;;  %8563 = vmatprep.subr.mxu1 %v8683_v0  ;;  %v2131_v2 = vld [vmem:[%s13180_s1 + $0x98] sm:$0xff] }
  0x2c   :  { %116 = vst [vmem:[#allocation3 + $0x350] sm:$0xff] %v8683_v0  ;;  %117 = vst [vmem:[#allocation3 + $0x358] sm:$0x3] %v8683_v0  ;;  %2306 = vmatpush2.msra.mxu0 %v2138_v4  ;;  %8595 = vmatpush2.msra.mxu1 %v9284_v19  ;;  %v9346_v4 = vld [vmem:[%s13180_s1 + $0x1c0] sm:$0xff] }
  0x2d   :  { %119 = vst [vmem:[#allocation3 + $0x18] sm:$0x1] %v8683_v0  ;;  %120 = vst [vmem:[#allocation3 + $0x30] sm:$0x1] %v8683_v0  ;;  %2307 = vmatprep.subr.mxu0 %v8683_v0  ;;  %8564 = vmatprep.subr.mxu1 %v8683_v0 }
  0x2e   :  { %121 = vst [vmem:[#allocation3 + $0x48] sm:$0x1] %v8683_v0  ;;  %122 = vst [vmem:[#allocation3 + $0x60] sm:$0x1] %v8683_v0  ;;  %2308 = vmatpush2.msra.mxu0 %v2137_v6  ;;  %8596 = vmatpush2.msra.mxu1 %v9310_v37  ;;  %v2130_v6 = vld [vmem:[%s13180_s1 + $0x90] sm:$0xff] }
  0x2f   :  { %123 = vst [vmem:[#allocation3 + $0x78] sm:$0x1] %v8683_v0  ;;  %124 = vst [vmem:[#allocation3 + $0x90] sm:$0x1] %v8683_v0  ;;  %2309 = vmatprep.subr.mxu0 %v8683_v0  ;;  %8565 = vmatprep.subr.mxu1 %v8683_v0 }
  0x30   :  { %125 = vst [vmem:[#allocation3 + $0xa8] sm:$0x1] %v8683_v0  ;;  %126 = vst [vmem:[#allocation3 + $0xc0] sm:$0x1] %v8683_v0  ;;  %2310 = vmatpush2.msra.mxu0 %v2136_v8  ;;  %8597 = vmatpush2.msra.mxu1 %v9321_v44  ;;  %v9356_v8 = vld [vmem:[%s13181_s0 + $0x100] sm:$0xff] }
  0x31   :  { %127 = vst [vmem:[#allocation3 + $0xd8] sm:$0x1] %v8683_v0  ;;  %128 = vst [vmem:[#allocation3 + $0xf0] sm:$0x1] %v8683_v0  ;;  %2311 = vmatprep.subr.mxu0 %v8683_v0  ;;  %8566 = vmatprep.subr.mxu1 %v8683_v0 }
  0x32   :  { %129 = vst [vmem:[#allocation3 + $0x108] sm:$0x1] %v8683_v0  ;;  %130 = vst [vmem:[#allocation3 + $0x120] sm:$0x1] %v8683_v0  ;;  %2312 = vmatpush2.msra.mxu0 %v2135_v15  ;;  %8598 = vmatpush2.msra.mxu1 %v9335_v62  ;;  %v9362_v15 = vld [vmem:[%s13180_s1 + $0x1b8] sm:$0xff] }
  0x33   :  { %131 = vst [vmem:[#allocation3 + $0x138] sm:$0x1] %v8683_v0  ;;  %132 = vst [vmem:[#allocation3 + $0x150] sm:$0x1] %v8683_v0  ;;  %2313 = vmatprep.subr.mxu0 %v8683_v0  ;;  %8567 = vmatprep.subr.mxu1 %v8683_v0 }
  0x34   :  { %133 = vst [vmem:[#allocation3 + $0x168] sm:$0x1] %v8683_v0  ;;  %134 = vst [vmem:[#allocation3 + $0x180] sm:$0x1] %v8683_v0  ;;  %2314 = vmatpush2.msra.mxu0 %v2134_v30  ;;  %v2129_v30 = vld [vmem:[%s13180_s1 + $0x88] sm:$0xff]  ;;  %8599 = vmatpush2.msra.mxu1 %v9346_v4 }
  0x35   :  { %137 = vst [vmem:[#allocation3 + $0x1c8] sm:$0x1] %v8683_v0  ;;  %138 = vst [vmem:[#allocation3 + $0x1e0] sm:$0x1] %v8683_v0  ;;  %2315 = vmatprep.subr.mxu0 %v8683_v0  ;;  %8568 = vmatprep.subr.mxu1 %v8683_v0 }
  0x36   :  { %139 = vst [vmem:[#allocation3 + $0x1f8] sm:$0x1] %v8683_v0  ;;  %140 = vst [vmem:[#allocation3 + $0x210] sm:$0x1] %v8683_v0  ;;  %2316 = vmatpush2.msra.mxu0 %v2133_v40  ;;  %v2128_v40 = vld [vmem:[%s13180_s1 + $0x80] sm:$0xff]  ;;  %8600 = vmatpush2.msra.mxu1 %v9362_v15 }
  0x37   :  { %141 = vst [vmem:[#allocation3 + $0x228] sm:$0x1] %v8683_v0  ;;  %142 = vst [vmem:[#allocation3 + $0x240] sm:$0x1] %v8683_v0  ;;  %2317 = vmatprep.subr.mxu0 %v8683_v0  ;;  %8569 = vmatprep.subr.mxu1 %v8683_v0 }
  0x38   :  { %143 = vst [vmem:[#allocation3 + $0x258] sm:$0x1] %v8683_v0  ;;  %144 = vst [vmem:[#allocation3 + $0x270] sm:$0x1] %v8683_v0  ;;  %2318 = vmatpush2.msra.mxu0 %v2132_v45  ;;  %v9384_v45 = vld [vmem:[%s13181_s0 + $0x108] sm:$0xff] }
  0x39   :  { %145 = vst [vmem:[#allocation3 + $0x288] sm:$0x1] %v8683_v0  ;;  %146 = vst [vmem:[#allocation3 + $0x2a0] sm:$0x1] %v8683_v0  ;;  %2319 = vmatprep.subr.mxu0 %v8683_v0 }
  0x3a   :  { %147 = vst [vmem:[#allocation3 + $0x2b8] sm:$0x1] %v8683_v0  ;;  %148 = vst [vmem:[#allocation3 + $0x2d0] sm:$0x1] %v8683_v0  ;;  %2320 = vmatpush2.msra.mxu0 %v2131_v2  ;;  %v448_v2 = vld [vmem:[#allocation2 + $0x9] sm:$0xff] }
  0x3b   :  { %149 = vst [vmem:[#allocation3 + $0x2e8] sm:$0x1] %v8683_v0  ;;  %150 = vst [vmem:[#allocation3 + $0x300] sm:$0x1] %v8683_v0  ;;  %2321 = vmatprep.subr.mxu0 %v8683_v0 }
  0x3c   :  { %151 = vst [vmem:[#allocation3 + $0x318] sm:$0x1] %v8683_v0  ;;  %152 = vst [vmem:[#allocation3 + $0x330] sm:$0x1] %v8683_v0  ;;  %2322 = vmatpush2.msra.mxu0 %v2130_v6  ;;  %v9394_v6 = vld [vmem:[%s13180_s1 + $0x1a8] sm:$0xff] }
  0x3d   :  { %155 = vst [vmem:[#allocation3 + $0x29] sm:$0x1] %v8683_v0  ;;  %156 = vst [vmem:[#allocation3 + $0x41] sm:$0x1] %v8683_v0  ;;  %2323 = vmatprep.subr.mxu0 %v8683_v0 }
  0x3e   :  { %157 = vst [vmem:[#allocation3 + $0x59] sm:$0x1] %v8683_v0  ;;  %158 = vst [vmem:[#allocation3 + $0x71] sm:$0x1] %v8683_v0  ;;  %2324 = vmatpush2.msra.mxu0 %v2129_v30  ;;  %v9400_v30 = vld [vmem:[%s13181_s0 + $0x110] sm:$0xff] }
  0x3f   :  { %159 = vst [vmem:[#allocation3 + $0x89] sm:$0x1] %v8683_v0  ;;  %160 = vst [vmem:[#allocation3 + $0xa1] sm:$0x1] %v8683_v0  ;;  %2325 = vmatprep.subr.mxu0 %v8683_v0 }
  0x40   :  { %161 = vst [vmem:[#allocation3 + $0xb9] sm:$0x1] %v8683_v0  ;;  %162 = vst [vmem:[#allocation3 + $0xd1] sm:$0x1] %v8683_v0  ;;  %2326 = vmatpush2.msra.mxu0 %v2128_v40  ;;  %v9411_v40 = vld [vmem:[%s13180_s1 + $0x1a0] sm:$0xff] }
  0x41   :  { %163 = vst [vmem:[#allocation3 + $0xe9] sm:$0x1] %v8683_v0  ;;  %164 = vst [vmem:[#allocation3 + $0x101] sm:$0x1] %v8683_v0  ;;  %2648 = vmatprep.subr.mxu0 %v8683_v0 }
  0x42   :  { %165 = vst [vmem:[#allocation3 + $0x119] sm:$0x1] %v8683_v0  ;;  %166 = vst [vmem:[#allocation3 + $0x131] sm:$0x1] %v8683_v0 }
  0x43   :  { %167 = vst [vmem:[#allocation3 + $0x149] sm:$0x1] %v8683_v0  ;;  %168 = vst [vmem:[#allocation3 + $0x161] sm:$0x1] %v8683_v0 }
  0x44   :  { %169 = vst [vmem:[#allocation3 + $0x179] sm:$0x1] %v8683_v0  ;;  %170 = vst [vmem:[#allocation3 + $0x191] sm:$0x1] %v8683_v0 }
  0x45   :  { %173 = vst [vmem:[#allocation3 + $0x1d9] sm:$0x1] %v8683_v0  ;;  %174 = vst [vmem:[#allocation3 + $0x1f1] sm:$0x1] %v8683_v0 }
  0x46   :  { %175 = vst [vmem:[#allocation3 + $0x209] sm:$0x1] %v8683_v0  ;;  %176 = vst [vmem:[#allocation3 + $0x221] sm:$0x1] %v8683_v0 }
  0x47   :  { %177 = vst [vmem:[#allocation3 + $0x239] sm:$0x1] %v8683_v0  ;;  %178 = vst [vmem:[#allocation3 + $0x251] sm:$0x1] %v8683_v0 }
  0x48   :  { %179 = vst [vmem:[#allocation3 + $0x269] sm:$0x1] %v8683_v0  ;;  %180 = vst [vmem:[#allocation3 + $0x281] sm:$0x1] %v8683_v0 }
  0x49   :  { %181 = vst [vmem:[#allocation3 + $0x299] sm:$0x1] %v8683_v0  ;;  %182 = vst [vmem:[#allocation3 + $0x2b1] sm:$0x1] %v8683_v0 }
  0x4a   :  { %183 = vst [vmem:[#allocation3 + $0x2c9] sm:$0x1] %v8683_v0  ;;  %184 = vst [vmem:[#allocation3 + $0x2e1] sm:$0x1] %v8683_v0 }
  0x4b   :  { %185 = vst [vmem:[#allocation3 + $0x2f9] sm:$0x1] %v8683_v0  ;;  %186 = vst [vmem:[#allocation3 + $0x311] sm:$0x1] %v8683_v0 }
  0x4c   :  { %187 = vst [vmem:[#allocation3 + $0x329] sm:$0x1] %v8683_v0  ;;  %188 = vst [vmem:[#allocation3 + $0x341] sm:$0x1] %v8683_v0 }
  0x4d   :  { %33 = vst [vmem:[#allocation2] sm:$0x1] %v8683_v0  ;;  %50 = vst [vmem:[#allocation2 + $0x198] sm:$0x1] %v8683_v0 }
  0x4e   :  { %51 = vst [vmem:[#allocation2 + $0x1b0] sm:$0x1] %v8683_v0  ;;  %68 = vst [vmem:[#allocation2 + $0x348] sm:$0x1] %v8683_v0 }
  0x4f   :  { %69 = vst [vmem:[#allocation2 + $0x11] sm:$0x1] %v8683_v0  ;;  %86 = vst [vmem:[#allocation2 + $0x1a9] sm:$0x1] %v8683_v0 }
  0x50   :  { %87 = vst [vmem:[#allocation2 + $0x1c1] sm:$0x1] %v8683_v0  ;;  %104 = vst [vmem:[#allocation2 + $0x359] sm:$0x1] %v8683_v0 }
  0x51   :  { %118 = vst [vmem:[#allocation3] sm:$0x1] %v8683_v0  ;;  %135 = vst [vmem:[#allocation3 + $0x198] sm:$0x1] %v8683_v0 }
  0x52   :  { %136 = vst [vmem:[#allocation3 + $0x1b0] sm:$0x1] %v8683_v0  ;;  %153 = vst [vmem:[#allocation3 + $0x348] sm:$0x1] %v8683_v0 }
  0x53   :  { %154 = vst [vmem:[#allocation3 + $0x11] sm:$0x1] %v8683_v0  ;;  %171 = vst [vmem:[#allocation3 + $0x1a9] sm:$0x1] %v8683_v0 }
  0x54   :  { %172 = vst [vmem:[#allocation3 + $0x1c1] sm:$0x1] %v8683_v0  ;;  %189 = vst [vmem:[#allocation3 + $0x359] sm:$0x1] %v8683_v0 }
  0x55   :  { %255 = vst [vmem:[#allocation2 + $0x19] sm:$0xff] %v8928_v12  ;;  %256 = vst [vmem:[#allocation2 + $0x21] sm:$0xff] %v8940_v14 }
  0x56   :  { %257 = vst [vmem:[#allocation2 + $0x31] sm:$0xff] %v8951_v16  ;;  %258 = vst [vmem:[#allocation2 + $0x39] sm:$0xff] %v8963_v18 }
  0x57   :  { %259 = vst [vmem:[#allocation2 + $0x49] sm:$0xff] %v8974_v20  ;;  %260 = vst [vmem:[#allocation2 + $0x51] sm:$0xff] %v8986_v22 }
  0x58   :  { %261 = vst [vmem:[#allocation2 + $0x61] sm:$0xff] %v8997_v24  ;;  %262 = vst [vmem:[#allocation2 + $0x69] sm:$0xff] %v9009_v26 }
  0x59   :  { %263 = vst [vmem:[#allocation2 + $0x79] sm:$0xff] %v9020_v28  ;;  %264 = vst [vmem:[#allocation2 + $0x81] sm:$0xff] %v9037_v31 }
  0x5a   :  { %265 = vst [vmem:[#allocation2 + $0x91] sm:$0xff] %v9049_v33  ;;  %266 = vst [vmem:[#allocation2 + $0x99] sm:$0xff] %v9066_v36 }
  0x5b   :  { %267 = vst [vmem:[#allocation2 + $0xa9] sm:$0xff] %v9077_v38  ;;  %268 = vst [vmem:[#allocation2 + $0xb1] sm:$0xff] %v9094_v41 }
  0x5c   :  { %269 = vst [vmem:[#allocation2 + $0xc1] sm:$0xff] %v9106_v43  ;;  %271 = vst [vmem:[#allocation2 + $0xd9] sm:$0xff] %v9120_v46 }
  0x5d   :  { %270 = vst [vmem:[#allocation2 + $0xc9] sm:$0xff] %v9132_v48  ;;  %272 = vst [vmem:[#allocation2 + $0xe1] sm:$0xff] %v9137_v49 }
  0x5e   :  { %273 = vst [vmem:[#allocation2 + $0xf1] sm:$0xff] %v9146_v50  ;;  %274 = vst [vmem:[#allocation2 + $0xf9] sm:$0xff] %v9151_v51 }
  0x5f   :  { %275 = vst [vmem:[#allocation2 + $0x109] sm:$0xff] %v9156_v52  ;;  %276 = vst [vmem:[#allocation2 + $0x111] sm:$0xff] %v9170_v54 }
  0x60   :  { %277 = vst [vmem:[#allocation2 + $0x121] sm:$0xff] %v9175_v55  ;;  %278 = vst [vmem:[#allocation2 + $0x129] sm:$0xff] %v9187_v57 }
  0x61   :  { %279 = vst [vmem:[#allocation2 + $0x139] sm:$0xff] %v9192_v58  ;;  %280 = vst [vmem:[#allocation2 + $0x141] sm:$0xff] %v9205_v60 }
  0x62   :  { %281 = vst [vmem:[#allocation2 + $0x151] sm:$0xff] %v9210_v61  ;;  %282 = vst [vmem:[#allocation2 + $0x159] sm:$0xff] %v9222_v63 }
  0x63   :  { %283 = vst [vmem:[#allocation2 + $0x169] sm:$0xff] %v9289_v23  ;;  %284 = vst [vmem:[#allocation2 + $0x171] sm:$0xff] %v9294_v27 }
  0x64   :  { %285 = vst [vmem:[#allocation2 + $0x181] sm:$0xff] %v220_v34  ;;  %286 = vst [vmem:[#allocation2 + $0x189] sm:$0xff] %v221_v56  ;;  %v9374_v34 = vld [vmem:[%s13180_s1 + $0x1b0] sm:$0xff]  ;;  %v319_v56 = vld [vmem:[#allocation2] sm:$0xff] }
  0x65   :  { %287 = vst [vmem:[#allocation2 + $0x1c9] sm:$0xff] %v9356_v8  ;;  %288 = vst [vmem:[#allocation2 + $0x1d1] sm:$0xff] %v9384_v45  ;;  %8601 = vmatpush2.msra.mxu1 %v9374_v34  ;;  %2328 = vmatmul.mubr.f32.vlgmr.msra.gmra.mxu0 %v319_v56  ;;  %v321_v56 = vld [vmem:[#allocation2 + $0x18] sm:$0xff] }
  0x66   :  { %8570 = vmatprep.subr.mxu1 %v8683_v0  ;;  %2649 = vmatpush1.msra.mxu0 %v8913_v9  ;;  %289 = vst [vmem:[#allocation2 + $0x1e1] sm:$0xff] %v9400_v30  ;;  %v9418_v9 = vld [vmem:[%s13181_s0 + $0x118] sm:$0xff] }
  0x67   :  { %2332 = vmatprep.mubr.f32.mxu0 %v448_v2  ;;  %2650 = vmatprep.subr.mxu0 %v8683_v0  ;;  %290 = vst [vmem:[#allocation2 + $0x1e9] sm:$0xff] %v9418_v9  ;;  %v9479_v2 = vld [vmem:[%s13181_s0 + $0x130] sm:$0xff] }
  0x68   :  { %8602 = vmatpush2.msra.mxu1 %v9394_v6  ;;  %2651 = vmatpush1.msra.mxu0 %v8923_v11  ;;  %v9430_v11 = vld [vmem:[%s13180_s1 + $0x198] sm:$0xff]  ;;  %13217 = vst [vmem:[#allocation6_spill] sm:$0xff] %v9479_v2  ;;  %293 = vst [vmem:[#allocation2 + $0x211] sm:$0xff] %v9479_v2  ;;  %v9499_v2 = vld [vmem:[#allocation2 + $0xf0] sm:$0xff] }
  0x69   :  { %8571 = vmatprep.subr.mxu1 %v8683_v0  ;;  %2333 = vmatmul.mubr.f32.gmra.mxu0 %v8683_v0 }
  0x6a   :  { %2652 = vmatprep.subr.mxu0 %v8683_v0  ;;  %2337 = vmatprep.mubr.f32.mxu0 %v8928_v12  ;;  %v9436_v12 = vld [vmem:[%s13181_s0 + $0x120] sm:$0xff] }
  0x6b   :  { %2653 = vmatpush1.msra.mxu0 %v8935_v13  ;;  %8603 = vmatpush2.msra.mxu1 %v9411_v40  ;;  %v322_v13 = vld [vmem:[#allocation2 + $0x20] sm:$0xff]  ;;  %291 = vst [vmem:[#allocation2 + $0x1f9] sm:$0xff] %v9436_v12 }
  0x6c   :  { %2654 = vmatprep.subr.mxu0 %v8683_v0  ;;  %8572 = vmatprep.subr.mxu1 %v8683_v0 }
  0x6d   :  { %2655 = vmatpush1.msra.mxu0 %v8957_v17  ;;  %8604 = vmatpush2.msra.mxu1 %v9430_v11  ;;  %v9448_v17 = vld [vmem:[%s13180_s1 + $0x190] sm:$0xff] }
  0x6e   :  { %2338 = vmatmul.mubr.f32.gmra.mxu0 %v321_v56  ;;  %2656 = vmatprep.subr.mxu0 %v8683_v0  ;;  %v591_v56 = vld [vmem:[#allocation2 + $0xc2] sm:$0xff] }
  0x6f   :  { %2342 = vmatprep.mubr.f32.mxu0 %v8940_v14  ;;  %2657 = vmatpush1.msra.mxu0 %v8980_v21  ;;  %v9454_v14 = vld [vmem:[%s13181_s0 + $0x128] sm:$0xff]  ;;  %v323_v21 = vld [vmem:[#allocation2 + $0x30] sm:$0xff] }
  0x70   :  { %2658 = vmatprep.subr.mxu0 %v8683_v0  ;;  %8573 = vmatprep.subr.mxu1 %v8683_v0  ;;  %292 = vst [vmem:[#allocation2 + $0x201] sm:$0xff] %v9454_v14 }
  0x71   :  { %2659 = vmatpush1.msra.mxu0 %v9003_v25  ;;  %8605 = vmatpush2.msra.mxu1 %v9448_v17  ;;  %v9464_v25 = vld [vmem:[%s13180_s1 + $0x188] sm:$0xff] }
  0x72   :  { %2343 = vmatmul.mubr.f32.gmra.mxu0 %v322_v13  ;;  %2660 = vmatprep.subr.mxu0 %v8683_v0  ;;  %v9486_v13 = vld [vmem:[#allocation2 + $0xe0] sm:$0xff] }
  0x73   :  { %2347 = vmatprep.mubr.f32.mxu0 %v8951_v16  ;;  %2661 = vmatpush1.msra.mxu0 %v9026_v29  ;;  %v9472_v16 = vld [vmem:[%s13180_s1 + $0x180] sm:$0xff]  ;;  %v9474_v29 = vld [vmem:[#allocation2 + $0xd8] sm:$0xff] }
  0x74   :  { %2662 = vmatprep.subr.mxu0 %v8683_v0  ;;  %8574 = vmatprep.subr.mxu1 %v8683_v0 }
  0x75   :  { %2663 = vmatpush1.msra.mxu0 %v9043_v32  ;;  %v324_v32 = vld [vmem:[#allocation2 + $0x38] sm:$0xff]  ;;  %8606 = vmatpush2.msra.mxu1 %v9464_v25 }
  0x76   :  { %2348 = vmatmul.mubr.f32.gmra.mxu0 %v323_v21  ;;  %2664 = vmatprep.subr.mxu0 %v8683_v0  ;;  %v325_v21 = vld [vmem:[#allocation2 + $0x48] sm:$0xff] }
  0x77   :  { %2352 = vmatprep.mubr.f32.mxu0 %v8963_v18  ;;  %2665 = vmatpush1.msra.mxu0 %v9061_v35  ;;  %v9493_v18 = vld [vmem:[%s13181_s0 + $0x138] sm:$0xff]  ;;  %v592_v35 = vld [vmem:[#allocation2 + $0xca] sm:$0xff] }
  0x78   :  { %8575 = vmatprep.subr.mxu1 %v8683_v0  ;;  %2792 = vmatprep.mubr.f32.mxu1 %v9474_v29  ;;  %13218 = vst [vmem:[#allocation7_spill] sm:$0xff] %v9493_v18  ;;  %294 = vst [vmem:[#allocation2 + $0x219] sm:$0xff] %v9493_v18  ;;  %v9511_v18 = vld [vmem:[#allocation2 + $0xf8] sm:$0xff] }
  0x79   :  { %8607 = vmatpush2.msra.mxu1 %v9472_v16  ;;  %2666 = vmatprep.subr.mxu0 %v8683_v0 }
  0x7a   :  { %2353 = vmatmul.mubr.f32.gmra.mxu0 %v324_v32  ;;  %2793 = vmatmul.mubr.f32.vlgmr.msra.gmra.mxu1 %v591_v56  ;;  %v326_v32 = vld [vmem:[#allocation2 + $0x50] sm:$0xff]  ;;  %v593_v56 = vld [vmem:[#allocation2 + $0xda] sm:$0xff] }
  0x7b   :  { %2357 = vmatprep.mubr.f32.mxu0 %v8974_v20  ;;  %2797 = vmatprep.mubr.f32.mxu1 %v9486_v13  ;;  %v9506_v20 = vld [vmem:[%s13181_s0 + $0x140] sm:$0xff] }
  0x7c   :  { %3418 = vmatprep.subr.mxu1 %v8683_v0  ;;  %2667 = vmatpush1.msra.mxu0 %v9083_v39  ;;  %295 = vst [vmem:[#allocation2 + $0x229] sm:$0xff] %v9506_v20  ;;  %v9518_v39 = vld [vmem:[%s13181_s0 + $0x148] sm:$0xff] }
  0x7d   :  { %2668 = vmatprep.subr.mxu0 %v8683_v0  ;;  %296 = vst [vmem:[#allocation2 + $0x231] sm:$0xff] %v9518_v39 }
  0x7e   :  { %2358 = vmatmul.mubr.f32.gmra.mxu0 %v325_v21  ;;  %2798 = vmatmul.mubr.f32.gmra.mxu1 %v592_v35  ;;  %v594_v21 = vld [vmem:[#allocation2 + $0xe2] sm:$0xff] }
  0x7f   :  { %2362 = vmatprep.mubr.f32.mxu0 %v8986_v22  ;;  %2802 = vmatprep.mubr.f32.mxu1 %v9499_v2  ;;  %v327_v22 = vld [vmem:[#allocation2 + $0x60] sm:$0xff]  ;;  %v9523_v35 = vld [vmem:[#allocation2 + $0x108] sm:$0xff] }
  0x80   :  { %2669 = vmatpush1.msra.mxu0 %v9100_v42  ;;  %v9530_v42 = vld [vmem:[%s13181_s0 + $0x150] sm:$0xff] }
  0x81   :  { %2670 = vmatprep.subr.mxu0 %v8683_v0  ;;  %297 = vst [vmem:[#allocation2 + $0x241] sm:$0xff] %v9530_v42  ;;  %v9537_v0 = vld [vmem:[#allocation2 + $0x8] sm:$0xff] }
  0x82   :  { %2363 = vmatmul.mubr.f32.gmra.mxu0 %v326_v32  ;;  %2803 = vmatmul.mubr.f32.gmra.mxu1 %v593_v56  ;;  %v595_v32 = vld [vmem:[#allocation2 + $0xf2] sm:$0xff] }
  0x83   :  { %2367 = vmatprep.mubr.f32.mxu0 %v8997_v24  ;;  %2807 = vmatprep.mubr.f32.mxu1 %v9511_v18  ;;  %v328_v24 = vld [vmem:[#allocation2 + $0x68] sm:$0xff]  ;;  %v9535_v56 = vld [vmem:[#allocation2 + $0x110] sm:$0xff] }
  0x84   :  { %2671 = vmatpush1.msra.mxu0 %v9126_v47  ;;  %v329_v47 = vld [vmem:[#allocation2 + $0x78] sm:$0xff] }
  0x85   :  { %2672 = vmatprep.subr.mxu0 %v9537_v0 }
  0x86   :  { %2368 = vmatmul.mubr.f32.gmra.mxu0 %v327_v22  ;;  %2808 = vmatmul.mubr.f32.gmra.mxu1 %v594_v21  ;;  %v596_v22 = vld [vmem:[#allocation2 + $0xfa] sm:$0xff] }
  0x87   :  { %2372 = vmatprep.mubr.f32.mxu0 %v9009_v26  ;;  %2812 = vmatprep.mubr.f32.mxu1 %v9523_v35  ;;  %v9544_v26 = vld [vmem:[%s13181_s0 + $0x158] sm:$0xff]  ;;  %v9549_v21 = vld [vmem:[#allocation2 + $0x120] sm:$0xff] }
  0x88   :  { %2673 = vmatpush1.msra.mxu0 %v9162_v53  ;;  %298 = vst [vmem:[#allocation2 + $0x249] sm:$0xff] %v9544_v26  ;;  %v9556_v53 = vld [vmem:[%s13181_s0 + $0x160] sm:$0xff] }
  0x89   :  { %2674 = vmatprep.subr.mxu0 %v9537_v0  ;;  %299 = vst [vmem:[#allocation2 + $0x259] sm:$0xff] %v9556_v53 }
  0x8a   :  { %2373 = vmatmul.mubr.f32.gmra.mxu0 %v328_v24  ;;  %2813 = vmatmul.mubr.f32.gmra.mxu1 %v595_v32  ;;  %v597_v24 = vld [vmem:[#allocation2 + $0x10a] sm:$0xff] }
  0x8b   :  { %2377 = vmatprep.mubr.f32.mxu0 %v9020_v28  ;;  %2817 = vmatprep.mubr.f32.mxu1 %v9535_v56  ;;  %v330_v28 = vld [vmem:[#allocation2 + $0x80] sm:$0xff]  ;;  %v9561_v32 = vld [vmem:[#allocation2 + $0x128] sm:$0xff] }
  0x8c   :  { %2675 = vmatpush1.msra.mxu0 %v9198_v59  ;;  %v9568_v59 = vld [vmem:[%s13181_s0 + $0x168] sm:$0xff] }
  0x8d   :  { %2676 = vmatprep.subr.mxu0 %v9537_v0  ;;  %300 = vst [vmem:[#allocation2 + $0x261] sm:$0xff] %v9568_v59 }
  0x8e   :  { %2378 = vmatmul.mubr.f32.gmra.mxu0 %v329_v47  ;;  %2818 = vmatmul.mubr.f32.gmra.mxu1 %v596_v22  ;;  %v598_v47 = vld [vmem:[#allocation2 + $0x112] sm:$0xff] }
  0x8f   :  { %2382 = vmatprep.mubr.f32.mxu0 %v9037_v31  ;;  %2822 = vmatprep.mubr.f32.mxu1 %v9549_v21  ;;  %v331_v31 = vld [vmem:[#allocation2 + $0x90] sm:$0xff]  ;;  %v9573_v22 = vld [vmem:[#allocation2 + $0x138] sm:$0xff] }
  0x90   :  { %2677 = vmatpush1.msra.mxu0 %v9228_v1  ;;  %v9580_v1 = vld [vmem:[%s13181_s0 + $0x170] sm:$0xff] }
  0x91   :  { %2678 = vmatprep.subr.mxu0 %v9537_v0  ;;  %301 = vst [vmem:[#allocation2 + $0x271] sm:$0xff] %v9580_v1 }
  0x92   :  { %2383 = vmatmul.mubr.f32.gmra.mxu0 %v330_v28  ;;  %2823 = vmatmul.mubr.f32.gmra.mxu1 %v597_v24  ;;  %v599_v28 = vld [vmem:[#allocation2 + $0x122] sm:$0xff] }
  0x93   :  { %2387 = vmatprep.mubr.f32.mxu0 %v9049_v33  ;;  %2827 = vmatprep.mubr.f32.mxu1 %v9561_v32  ;;  %v332_v33 = vld [vmem:[#allocation2 + $0x98] sm:$0xff]  ;;  %v9585_v24 = vld [vmem:[#allocation2 + $0x140] sm:$0xff] }
  0x94   :  { %2679 = vmatpush1.msra.mxu0 %v9240_v3  ;;  %v9592_v3 = vld [vmem:[%s13181_s0 + $0x178] sm:$0xff] }
  0x95   :  { %2680 = vmatprep.subr.mxu0 %v9537_v0  ;;  %302 = vst [vmem:[#allocation2 + $0x279] sm:$0xff] %v9592_v3 }
  0x96   :  { %2388 = vmatmul.mubr.f32.gmra.mxu0 %v331_v31  ;;  %2828 = vmatmul.mubr.f32.gmra.mxu1 %v598_v47  ;;  %v600_v31 = vld [vmem:[#allocation2 + $0x12a] sm:$0xff] }
  0x97   :  { %2392 = vmatprep.mubr.f32.mxu0 %v9066_v36  ;;  %2832 = vmatprep.mubr.f32.mxu1 %v9573_v22  ;;  %v333_v36 = vld [vmem:[#allocation2 + $0xa8] sm:$0xff]  ;;  %v9597_v47 = vld [vmem:[#allocation2 + $0x150] sm:$0xff] }
  0x98   :  { %2681 = vmatpush2.msra.mxu0 %v9251_v5  ;;  %v9604_v5 = vld [vmem:[%s13181_s0 + $0x180] sm:$0xff] }
  0x99   :  { %2682 = vmatprep.subr.mxu0 %v9537_v0  ;;  %303 = vst [vmem:[#allocation2 + $0x289] sm:$0xff] %v9604_v5 }
  0x9a   :  { %2393 = vmatmul.mubr.f32.gmra.mxu0 %v332_v33  ;;  %2833 = vmatmul.mubr.f32.gmra.mxu1 %v599_v28  ;;  %v601_v33 = vld [vmem:[#allocation2 + $0x13a] sm:$0xff] }
  0x9b   :  { %2397 = vmatprep.mubr.f32.mxu0 %v9077_v38  ;;  %2837 = vmatprep.mubr.f32.mxu1 %v9585_v24  ;;  %v334_v38 = vld [vmem:[#allocation2 + $0xb0] sm:$0xff]  ;;  %v9609_v28 = vld [vmem:[#allocation2 + $0x158] sm:$0xff] }
  0x9c   :  { %2683 = vmatpush2.msra.mxu0 %v9262_v7  ;;  %v9616_v7 = vld [vmem:[%s13181_s0 + $0x188] sm:$0xff] }
  0x9d   :  { %2684 = vmatprep.subr.mxu0 %v9537_v0  ;;  %304 = vst [vmem:[#allocation2 + $0x291] sm:$0xff] %v9616_v7 }
  0x9e   :  { %2398 = vmatmul.mubr.f32.gmra.mxu0 %v333_v36  ;;  %2838 = vmatmul.mubr.f32.gmra.mxu1 %v600_v31  ;;  %v602_v36 = vld [vmem:[#allocation2 + $0x142] sm:$0xff] }
  0x9f   :  { %2402 = vmatprep.mubr.f32.mxu0 %v9094_v41  ;;  %2842 = vmatprep.mubr.f32.mxu1 %v9597_v47  ;;  %v335_v41 = vld [vmem:[#allocation2 + $0xc0] sm:$0xff]  ;;  %v9621_v31 = vld [vmem:[#allocation2 + $0x168] sm:$0xff] }
  0xa0   :  { %2685 = vmatpush2.msra.mxu0 %v9273_v10  ;;  %v9628_v10 = vld [vmem:[%s13181_s0 + $0x190] sm:$0xff] }
  0xa1   :  { %2686 = vmatprep.subr.mxu0 %v9537_v0  ;;  %305 = vst [vmem:[#allocation2 + $0x2a1] sm:$0xff] %v9628_v10 }
  0xa2   :  { %2403 = vmatmul.mubr.f32.gmra.mxu0 %v334_v38  ;;  %2843 = vmatmul.mubr.f32.gmra.mxu1 %v601_v33  ;;  %v603_v38 = vld [vmem:[#allocation2 + $0x152] sm:$0xff] }
  0xa3   :  { %2407 = vmatprep.mubr.f32.mxu0 %v9106_v43  ;;  %2847 = vmatprep.mubr.f32.mxu1 %v9609_v28  ;;  %v336_v43 = vld [vmem:[#allocation2 + $0xc8] sm:$0xff]  ;;  %v9633_v33 = vld [vmem:[#allocation2 + $0x170] sm:$0xff] }
  0xa4   :  { %2687 = vmatpush2.msra.mxu0 %v9284_v19  ;;  %v9640_v19 = vld [vmem:[%s13181_s0 + $0x198] sm:$0xff] }
  0xa5   :  { %2688 = vmatprep.subr.mxu0 %v9537_v0  ;;  %306 = vst [vmem:[#allocation2 + $0x2a9] sm:$0xff] %v9640_v19 }
  0xa6   :  { %2408 = vmatmul.mubr.f32.gmra.mxu0 %v335_v41  ;;  %2848 = vmatmul.mubr.f32.gmra.mxu1 %v602_v36  ;;  %v733_v41 = vld [vmem:[#allocation2 + $0x180] sm:$0xff]  ;;  %v734_v36 = vld [vmem:[#allocation2 + $0x188] sm:$0xff] }
  0xa7   :  { %2412 = vmatprep.mubr.f32.mxu0 %v9132_v48  ;;  %2852 = vmatprep.mubr.f32.mxu1 %v9621_v31  ;;  %v604_v48 = vld [vmem:[#allocation2 + $0x15a] sm:$0xff] }
  0xa8   :  { %2689 = vmatpush2.msra.mxu0 %v9310_v37  ;;  %v9651_v37 = vld [vmem:[%s13181_s0 + $0x1a0] sm:$0xff] }
  0xa9   :  { %2690 = vmatprep.subr.mxu0 %v9537_v0  ;;  %307 = vst [vmem:[#allocation2 + $0x2b9] sm:$0xff] %v9651_v37 }
  0xaa   :  { %2413 = vmatmul.mubr.f32.gmra.mxu0 %v336_v43  ;;  %2853 = vmatmul.mubr.f32.gmra.mxu1 %v603_v38  ;;  %v479_v43 = vld [vmem:[#allocation2 + $0x1b1] sm:$0xff]  ;;  %v9793_v38 = vld [vmem:[#allocation2 + $0x248] sm:$0xff] }
  0xab   :  { %2417 = vmatprep.mubr.f32.mxu0 %v9120_v46  ;;  %2857 = vmatprep.mubr.f32.mxu1 %v9633_v33  ;;  %v605_v46 = vld [vmem:[#allocation2 + $0x16a] sm:$0xff] }
  0xac   :  { %2691 = vmatpush2.msra.mxu0 %v9321_v44  ;;  %v9661_v44 = vld [vmem:[%s13181_s0 + $0x1a8] sm:$0xff] }
  0xad   :  { %2692 = vmatprep.subr.mxu0 %v9537_v0  ;;  %308 = vst [vmem:[#allocation2 + $0x2c1] sm:$0xff] %v9661_v44 }
  0xae   :  { %2418 = vmatmul.mubr.f32.gmra.mxu0 %v9474_v29  ;;  %2858 = vmatmul.mubr.f32.gmra.mxu1 %v604_v48  ;;  %v9665_v29 = vld [vmem:[#allocation2 + $0x1c8] sm:$0xff]  ;;  %v618_v48 = vld [vmem:[#allocation2 + $0x232] sm:$0xff] }
  0xaf   :  { %2422 = vmatprep.mubr.f32.mxu0 %v9137_v49  ;;  %2862 = vmatprep.mubr.f32.mxu1 %v733_v41  ;;  %v606_v49 = vld [vmem:[#allocation2 + $0x172] sm:$0xff] }
  0xb0   :  { %2693 = vmatpush2.msra.mxu0 %v9335_v62  ;;  %v9673_v62 = vld [vmem:[%s13181_s0 + $0x1b0] sm:$0xff]  ;;  %v480_v41 = vld [vmem:[#allocation2 + $0x1b9] sm:$0xff] }
  0xb1   :  { %2694 = vmatprep.subr.mxu0 %v9537_v0  ;;  %309 = vst [vmem:[#allocation2 + $0x2d1] sm:$0xff] %v9673_v62 }
  0xb2   :  { %2423 = vmatmul.mubr.f32.gmra.mxu0 %v9486_v13  ;;  %2863 = vmatmul.mubr.f32.gmra.mxu1 %v605_v46  ;;  %v9678_v13 = vld [vmem:[#allocation2 + $0x1d0] sm:$0xff]  ;;  %v9797_v46 = vld [vmem:[#allocation2 + $0x258] sm:$0xff] }
  0xb3   :  { %2427 = vmatprep.mubr.f32.mxu0 %v9146_v50  ;;  %2867 = vmatprep.mubr.f32.mxu1 %v734_v36  ;;  %v607_v50 = vld [vmem:[#allocation2 + $0x1b2] sm:$0xff] }
  0xb4   :  { %2695 = vmatpush2.msra.mxu0 %v9346_v4  ;;  %v9686_v4 = vld [vmem:[%s13181_s0 + $0x1b8] sm:$0xff]  ;;  %v2222_v36 = vld [vmem:[%s13180_s1 + $0x370] sm:$0xff] }
  0xb5   :  { %2696 = vmatprep.subr.mxu0 %v9537_v0  ;;  %310 = vst [vmem:[#allocation2 + $0x2d9] sm:$0xff] %v9686_v4 }
  0xb6   :  { %2428 = vmatmul.mubr.f32.gmra.mxu0 %v9499_v2  ;;  %2868 = vmatmul.mubr.f32.gmra.mxu1 %v606_v49  ;;  %v9691_v2 = vld [vmem:[#allocation2 + $0x1e0] sm:$0xff]  ;;  %v620_v49 = vld [vmem:[#allocation2 + $0x24a] sm:$0xff] }
  0xb7   :  { %2432 = vmatprep.mubr.f32.mxu0 %v9151_v51  ;;  %2872 = vmatprep.mubr.f32.mxu1 %v9665_v29  ;;  %v608_v51 = vld [vmem:[#allocation2 + $0x1ba] sm:$0xff] }
  0xb8   :  { %2697 = vmatpush2.msra.mxu0 %v9362_v15  ;;  %v9699_v15 = vld [vmem:[%s13181_s0 + $0x1c0] sm:$0xff] }
  0xb9   :  { %2698 = vmatprep.subr.mxu0 %v9537_v0  ;;  %311 = vst [vmem:[#allocation2 + $0x2e9] sm:$0xff] %v9699_v15 }
  0xba   :  { %2433 = vmatmul.mubr.f32.gmra.mxu0 %v9511_v18  ;;  %2873 = vmatmul.mubr.f32.gmra.mxu1 %v607_v50  ;;  %v9704_v18 = vld [vmem:[#allocation2 + $0x1e8] sm:$0xff]  ;;  %v9811_v50 = vld [vmem:[#allocation2 + $0x270] sm:$0xff] }
  0xbb   :  { %2437 = vmatprep.mubr.f32.mxu0 %v9156_v52  ;;  %2877 = vmatprep.mubr.f32.mxu1 %v9678_v13  ;;  %v609_v52 = vld [vmem:[#allocation2 + $0x1ca] sm:$0xff] }
  0xbc   :  { %2699 = vmatpush2.msra.mxu0 %v9374_v34  ;;  %v9712_v34 = vld [vmem:[%s13181_s0 + $0x1c8] sm:$0xff] }
  0xbd   :  { %2700 = vmatprep.subr.mxu0 %v9537_v0  ;;  %312 = vst [vmem:[#allocation2 + $0x2f1] sm:$0xff] %v9712_v34 }
  0xbe   :  { %2438 = vmatmul.mubr.f32.gmra.mxu0 %v9523_v35  ;;  %2878 = vmatmul.mubr.f32.gmra.mxu1 %v608_v51  ;;  %v9717_v35 = vld [vmem:[#allocation2 + $0x1f8] sm:$0xff]  ;;  %v2221_v51 = vld [vmem:[%s13180_s1 + $0x368] sm:$0xff] }
  0xbf   :  { %2442 = vmatprep.mubr.f32.mxu0 %v9170_v54  ;;  %2882 = vmatprep.mubr.f32.mxu1 %v9691_v2  ;;  %v610_v54 = vld [vmem:[#allocation2 + $0x1d2] sm:$0xff] }
  0xc0   :  { %2701 = vmatpush2.msra.mxu0 %v9394_v6  ;;  %v9725_v6 = vld [vmem:[%s13181_s0 + $0x1d0] sm:$0xff] }
  0xc1   :  { %2702 = vmatprep.subr.mxu0 %v9537_v0  ;;  %313 = vst [vmem:[#allocation2 + $0x301] sm:$0xff] %v9725_v6 }
  0xc2   :  { %2443 = vmatmul.mubr.f32.gmra.mxu0 %v9535_v56  ;;  %2883 = vmatmul.mubr.f32.gmra.mxu1 %v609_v52  ;;  %v9730_v56 = vld [vmem:[#allocation2 + $0x200] sm:$0xff]  ;;  %v9820_v52 = vld [vmem:[#allocation2 + $0x278] sm:$0xff] }
  0xc3   :  { %2447 = vmatprep.mubr.f32.mxu0 %v9175_v55  ;;  %2887 = vmatprep.mubr.f32.mxu1 %v9704_v18  ;;  %v611_v55 = vld [vmem:[#allocation2 + $0x1e2] sm:$0xff] }
  0xc4   :  { %2703 = vmatpush2.msra.mxu0 %v9411_v40  ;;  %v9738_v40 = vld [vmem:[%s13181_s0 + $0x1d8] sm:$0xff] }
  0xc5   :  { %2704 = vmatprep.subr.mxu0 %v9537_v0  ;;  %314 = vst [vmem:[#allocation2 + $0x309] sm:$0xff] %v9738_v40 }
  0xc6   :  { %2448 = vmatmul.mubr.f32.gmra.mxu0 %v9549_v21  ;;  %2888 = vmatmul.mubr.f32.gmra.mxu1 %v610_v54  ;;  %v9743_v21 = vld [vmem:[#allocation2 + $0x210] sm:$0xff]  ;;  %v9829_v54 = vld [vmem:[#allocation2 + $0x288] sm:$0xff] }
  0xc7   :  { %2452 = vmatprep.mubr.f32.mxu0 %v9187_v57  ;;  %2892 = vmatprep.mubr.f32.mxu1 %v9717_v35  ;;  %v612_v57 = vld [vmem:[#allocation2 + $0x1ea] sm:$0xff] }
  0xc8   :  { %2705 = vmatpush2.msra.mxu0 %v9430_v11  ;;  %v9751_v11 = vld [vmem:[%s13181_s0 + $0x1e0] sm:$0xff] }
  0xc9   :  { %2706 = vmatprep.subr.mxu0 %v9537_v0  ;;  %315 = vst [vmem:[#allocation2 + $0x319] sm:$0xff] %v9751_v11 }
  0xca   :  { %2453 = vmatmul.mubr.f32.gmra.mxu0 %v9561_v32  ;;  %2893 = vmatmul.mubr.f32.gmra.mxu1 %v611_v55  ;;  %v9756_v32 = vld [vmem:[#allocation2 + $0x218] sm:$0xff]  ;;  %v9838_v55 = vld [vmem:[#allocation2 + $0x290] sm:$0xff] }
  0xcb   :  { %2457 = vmatprep.mubr.f32.mxu0 %v9192_v58  ;;  %2897 = vmatprep.mubr.f32.mxu1 %v9730_v56  ;;  %v613_v58 = vld [vmem:[#allocation2 + $0x1fa] sm:$0xff] }
  0xcc   :  { %2707 = vmatpush2.msra.mxu0 %v9448_v17  ;;  %v9764_v17 = vld [vmem:[%s13181_s0 + $0x1e8] sm:$0xff] }
  0xcd   :  { %2708 = vmatprep.subr.mxu0 %v9537_v0  ;;  %316 = vst [vmem:[#allocation2 + $0x321] sm:$0xff] %v9764_v17 }
  0xce   :  { %2458 = vmatmul.mubr.f32.gmra.mxu0 %v9573_v22  ;;  %2898 = vmatmul.mubr.f32.gmra.mxu1 %v612_v57  ;;  %v9769_v22 = vld [vmem:[#allocation2 + $0x228] sm:$0xff]  ;;  %v9847_v57 = vld [vmem:[#allocation2 + $0x2a0] sm:$0xff] }
  0xcf   :  { %2462 = vmatprep.mubr.f32.mxu0 %v9205_v60  ;;  %2902 = vmatprep.mubr.f32.mxu1 %v9743_v21  ;;  %v614_v60 = vld [vmem:[#allocation2 + $0x202] sm:$0xff] }
  0xd0   :  { %2709 = vmatpush2.msra.mxu0 %v9464_v25  ;;  %v252_v25 = vld [vmem:[%s13181_s0 + $0x1f0] sm:$0xff] }
  0xd1   :  { %2710 = vmatprep.subr.mxu0 %v9537_v0  ;;  %317 = vst [vmem:[#allocation2 + $0x331] sm:$0xff] %v252_v25  ;;  %v9865_v25 = vld [vmem:[#allocation2 + $0x2b8] sm:$0xff] }
  0xd2   :  { %2463 = vmatmul.mubr.f32.gmra.mxu0 %v9585_v24  ;;  %2903 = vmatmul.mubr.f32.gmra.mxu1 %v613_v58  ;;  %v9779_v24 = vld [vmem:[#allocation2 + $0x230] sm:$0xff]  ;;  %v9856_v58 = vld [vmem:[#allocation2 + $0x2a8] sm:$0xff] }
  0xd3   :  { %2467 = vmatprep.mubr.f32.mxu0 %v9210_v61  ;;  %2907 = vmatprep.mubr.f32.mxu1 %v9756_v32  ;;  %v615_v61 = vld [vmem:[#allocation2 + $0x212] sm:$0xff] }
  0xd4   :  { %2711 = vmatpush2.msra.mxu0 %v9472_v16  ;;  %v253_v16 = vld [vmem:[%s13181_s0 + $0x1f8] sm:$0xff] }
  0xd5   :  { %3033 = vmatprep.subr.mxu0 %v9537_v0  ;;  %318 = vst [vmem:[#allocation2 + $0x339] sm:$0xff] %v253_v16  ;;  %v627_v16 = vld [vmem:[#allocation2 + $0x2a2] sm:$0xff] }
  0xd6   :  { %2468 = vmatmul.mubr.f32.gmra.mxu0 %v9597_v47  ;;  %2908 = vmatmul.mubr.f32.gmra.mxu1 %v614_v60  ;;  %v9788_v47 = vld [vmem:[#allocation2 + $0x240] sm:$0xff] }
  0xd7   :  { %2472 = vmatprep.mubr.f32.mxu0 %v9222_v63  ;;  %2912 = vmatprep.mubr.f32.mxu1 %v9769_v22  ;;  %v616_v63 = vld [vmem:[#allocation2 + $0x21a] sm:$0xff] }
  0xd8   :  { %v13219_v60 = vld [vmem:[#allocation6_spill] sm:$0xff] }
  0xda   :  { %2473 = vmatmul.mubr.f32.gmra.mxu0 %v9609_v28  ;;  %2913 = vmatmul.mubr.f32.gmra.mxu1 %v615_v61  ;;  %v617_v28 = vld [vmem:[#allocation2 + $0x22a] sm:$0xff] }
  0xdb   :  { %2477 = vmatprep.mubr.f32.mxu0 %v9289_v23  ;;  %2917 = vmatprep.mubr.f32.mxu1 %v9779_v24  ;;  %v351_v23 = vld [vmem:[#allocation2 + $0x1b0] sm:$0xff]  ;;  %v13220_v61 = vld [vmem:[#allocation7_spill] sm:$0xff] }
  0xde   :  { %2478 = vmatmul.mubr.f32.gmra.mxu0 %v9621_v31  ;;  %2918 = vmatmul.mubr.f32.gmra.mxu1 %v616_v63  ;;  %v9800_v31 = vld [vmem:[#allocation2 + $0x260] sm:$0xff] }
  0xdf   :  { %2482 = vmatprep.mubr.f32.mxu0 %v9294_v27  ;;  %2922 = vmatprep.mubr.f32.mxu1 %v9788_v47  ;;  %v619_v27 = vld [vmem:[#allocation2 + $0x242] sm:$0xff] }
  0xe0   :  { %v9874_v63 = vld [vmem:[#allocation2 + $0x2c0] sm:$0xff] }
  0xe2   :  { %2483 = vmatmul.mubr.f32.gmra.mxu0 %v9633_v33  ;;  %2923 = vmatmul.mubr.f32.gmra.mxu1 %v617_v28  ;;  %v2223_v33 = vld [vmem:[%s13180_s1 + $0x378] sm:$0xff]  ;;  %v628_v28 = vld [vmem:[#allocation2 + $0x2aa] sm:$0xff] }
  0xe3   :  { %2487 = vmatprep.mubr.f32.mxu0 %v479_v43  ;;  %2927 = vmatprep.mubr.f32.mxu1 %v9793_v38  ;;  %v9883_v43 = vld [vmem:[#allocation2 + $0x2d0] sm:$0xff] }
  0xe4   :  { %3419 = vmatpush1.msra.mxu1 %v2223_v33  ;;  %v9928_v33 = vld [vmem:[#allocation2 + $0x308] sm:$0xff] }
  0xe5   :  { %3420 = vmatprep.subr.mxu1 %v9537_v0 }
  0xe6   :  { %2488 = vmatmul.mubr.f32.gmra.mxu0 %v351_v23  ;;  %2928 = vmatmul.mubr.f32.gmra.mxu1 %v618_v48  ;;  %v9892_v23 = vld [vmem:[#allocation2 + $0x2d8] sm:$0xff]  ;;  %v9901_v48 = vld [vmem:[#allocation2 + $0x2e8] sm:$0xff] }
  0xe7   :  { %2492 = vmatprep.mubr.f32.mxu0 %v480_v41  ;;  %2932 = vmatprep.mubr.f32.mxu1 %v9797_v46  ;;  %v9910_v41 = vld [vmem:[#allocation2 + $0x2f0] sm:$0xff] }
  0xe8   :  { %3421 = vmatpush1.msra.mxu1 %v2222_v36  ;;  %v9937_v36 = vld [vmem:[#allocation2 + $0x318] sm:$0xff] }
  0xe9   :  { %3422 = vmatprep.subr.mxu1 %v9537_v0 }
  0xea   :  { %2493 = vmatmul.mubr.f32.gmra.mxu0 %v9537_v0  ;;  %2933 = vmatmul.mubr.f32.gmra.mxu1 %v619_v27  ;;  %v9919_v27 = vld [vmem:[#allocation2 + $0x300] sm:$0xff] }
  0xeb   :  { %2497 = vmatprep.mubr.f32.mxu0 %v9356_v8  ;;  %2937 = vmatprep.mubr.f32.mxu1 %v9800_v31  ;;  %v621_v8 = vld [vmem:[#allocation2 + $0x25a] sm:$0xff] }
  0xec   :  { %3423 = vmatpush1.msra.mxu1 %v2221_v51 }
  0xed   :  { %3424 = vmatprep.subr.mxu1 %v9537_v0 }
  0xee   :  { %2498 = vmatmul.mubr.f32.gmra.mxu0 %v9665_v29  ;;  %2938 = vmatmul.mubr.f32.gmra.mxu1 %v620_v49  ;;  %v2220_v29 = vld [vmem:[%s13180_s1 + $0x360] sm:$0xff] }
  0xef   :  { %2502 = vmatprep.mubr.f32.mxu0 %v9384_v45  ;;  %2942 = vmatprep.mubr.f32.mxu1 %v9811_v50  ;;  %v622_v45 = vld [vmem:[#allocation2 + $0x262] sm:$0xff] }
  0xf0   :  { %3425 = vmatpush1.msra.mxu1 %v2220_v29 }
  0xf1   :  { %3426 = vmatprep.subr.mxu1 %v9537_v0 }
  0xf2   :  { %2503 = vmatmul.mubr.f32.gmra.mxu0 %v9678_v13  ;;  %2943 = vmatmul.mubr.f32.gmra.mxu1 %v621_v8  ;;  %v2219_v13 = vld [vmem:[%s13180_s1 + $0x358] sm:$0xff]  ;;  %v9948_v8 = vld [vmem:[#allocation2 + $0x320] sm:$0xff] }
  0xf3   :  { %2507 = vmatprep.mubr.f32.mxu0 %v9400_v30  ;;  %2947 = vmatprep.mubr.f32.mxu1 %v9820_v52  ;;  %v623_v30 = vld [vmem:[#allocation2 + $0x272] sm:$0xff] }
  0xf4   :  { %3427 = vmatpush1.msra.mxu1 %v2219_v13  ;;  %v765_v13 = vld [vmem:[#allocation2 + $0x330] sm:$0xff] }
  0xf5   :  { %3428 = vmatprep.subr.mxu1 %v9537_v0 }
  0xf6   :  { %2508 = vmatmul.mubr.f32.gmra.mxu0 %v9691_v2  ;;  %2948 = vmatmul.mubr.f32.gmra.mxu1 %v622_v45  ;;  %v2218_v2 = vld [vmem:[%s13180_s1 + $0x350] sm:$0xff] }
  0xf7   :  { %2512 = vmatprep.mubr.f32.mxu0 %v9418_v9  ;;  %2952 = vmatprep.mubr.f32.mxu1 %v9829_v54  ;;  %v624_v9 = vld [vmem:[#allocation2 + $0x27a] sm:$0xff] }
  0xf8   :  { %3429 = vmatpush1.msra.mxu1 %v2218_v2 }
  0xf9   :  { %3430 = vmatprep.subr.mxu1 %v9537_v0 }
  0xfa   :  { %2513 = vmatmul.mubr.f32.gmra.mxu0 %v9704_v18  ;;  %2953 = vmatmul.mubr.f32.gmra.mxu1 %v623_v30  ;;  %v2217_v18 = vld [vmem:[%s13180_s1 + $0x348] sm:$0xff] }
  0xfb   :  { %2517 = vmatprep.mubr.f32.mxu0 %v9436_v12  ;;  %2957 = vmatprep.mubr.f32.mxu1 %v9838_v55  ;;  %v625_v12 = vld [vmem:[#allocation2 + $0x28a] sm:$0xff] }
  0xfc   :  { %3431 = vmatpush1.msra.mxu1 %v2217_v18 }
  0xfd   :  { %3432 = vmatprep.subr.mxu1 %v9537_v0 }
  0xfe   :  { %2518 = vmatmul.mubr.f32.gmra.mxu0 %v9717_v35  ;;  %2958 = vmatmul.mubr.f32.gmra.mxu1 %v624_v9  ;;  %v2216_v35 = vld [vmem:[%s13180_s1 + $0x340] sm:$0xff]  ;;  %v766_v9 = vld [vmem:[#allocation2 + $0x338] sm:$0xff] }
  0xff   :  { %2522 = vmatprep.mubr.f32.mxu0 %v9454_v14  ;;  %2962 = vmatprep.mubr.f32.mxu1 %v9847_v57  ;;  %v626_v14 = vld [vmem:[#allocation2 + $0x292] sm:$0xff] }
 0x100   :  { %3433 = vmatpush1.msra.mxu1 %v2216_v35  ;;  %v2235_v35 = vld [vmem:[%s13180_s1 + $0x3d8] sm:$0xff] }
 0x101   :  { %3434 = vmatprep.subr.mxu1 %v9537_v0 }
 0x102   :  { %2523 = vmatmul.mubr.f32.gmra.mxu0 %v9730_v56  ;;  %2963 = vmatmul.mubr.f32.gmra.mxu1 %v625_v12  ;;  %v2215_v56 = vld [vmem:[%s13180_s1 + $0x338] sm:$0xff] }
 0x103   :  { %2527 = vmatprep.mubr.f32.mxu0 %v13219_v60  ;;  %2967 = vmatprep.mubr.f32.mxu1 %v9856_v58  ;;  %v9979_v60 = vld [vmem:[#allocation2 + $0x31] sm:$0xff] }
 0x104   :  { %3435 = vmatpush1.msra.mxu1 %v2215_v56  ;;  %v2233_v56 = vld [vmem:[%s13180_s1 + $0x3c8] sm:$0xff] }
 0x105   :  { %3436 = vmatprep.subr.mxu1 %v9537_v0 }
 0x106   :  { %2528 = vmatmul.mubr.f32.gmra.mxu0 %v9743_v21  ;;  %2968 = vmatmul.mubr.f32.gmra.mxu1 %v626_v14  ;;  %v2214_v21 = vld [vmem:[%s13180_s1 + $0x330] sm:$0xff] }
 0x107   :  { %2532 = vmatprep.mubr.f32.mxu0 %v13220_v61  ;;  %2972 = vmatprep.mubr.f32.mxu1 %v9865_v25  ;;  %v2232_v61 = vld [vmem:[%s13180_s1 + $0x3c0] sm:$0xff] }
 0x108   :  { %3437 = vmatpush1.msra.mxu1 %v2214_v21 }
 0x109   :  { %3438 = vmatprep.subr.mxu1 %v9537_v0 }
 0x10a   :  { %2533 = vmatmul.mubr.f32.gmra.mxu0 %v9756_v32  ;;  %2973 = vmatmul.mubr.f32.gmra.mxu1 %v627_v16  ;;  %v2213_v32 = vld [vmem:[%s13180_s1 + $0x328] sm:$0xff] }
 0x10b   :  { %2537 = vmatprep.mubr.f32.mxu0 %v9506_v20  ;;  %2977 = vmatprep.mubr.f32.mxu1 %v9874_v63  ;;  %v629_v20 = vld [vmem:[#allocation2 + $0x2ba] sm:$0xff] }
 0x10c   :  { %3439 = vmatpush1.msra.mxu1 %v2213_v32  ;;  %v2230_v32 = vld [vmem:[%s13180_s1 + $0x3b0] sm:$0xff] }
 0x10d   :  { %3440 = vmatprep.subr.mxu1 %v9537_v0 }
 0x10e   :  { %2538 = vmatmul.mubr.f32.gmra.mxu0 %v9769_v22  ;;  %2978 = vmatmul.mubr.f32.gmra.mxu1 %v628_v28  ;;  %v2212_v22 = vld [vmem:[%s13180_s1 + $0x320] sm:$0xff] }
 0x10f   :  { %2542 = vmatprep.mubr.f32.mxu0 %v9518_v39  ;;  %2982 = vmatprep.mubr.f32.mxu1 %v9883_v43  ;;  %v630_v39 = vld [vmem:[#allocation2 + $0x2c2] sm:$0xff] }
 0x110   :  { %3441 = vmatpush1.msra.mxu1 %v2212_v22 }
 0x111   :  { %3442 = vmatprep.subr.mxu1 %v9537_v0 }
 0x112   :  { %2543 = vmatmul.mubr.f32.gmra.mxu0 %v9779_v24  ;;  %2983 = vmatmul.mubr.f32.gmra.mxu1 %v629_v20  ;;  %v2211_v24 = vld [vmem:[%s13180_s1 + $0x318] sm:$0xff] }
 0x113   :  { %2547 = vmatprep.mubr.f32.mxu0 %v9530_v42  ;;  %2987 = vmatprep.mubr.f32.mxu1 %v9892_v23  ;;  %v631_v42 = vld [vmem:[#allocation2 + $0x2d2] sm:$0xff] }
 0x114   :  { %3443 = vmatpush1.msra.mxu1 %v2211_v24  ;;  %v2228_v24 = vld [vmem:[%s13180_s1 + $0x3a0] sm:$0xff] }
 0x115   :  { %3444 = vmatprep.subr.mxu1 %v9537_v0 }
 0x116   :  { %2548 = vmatmul.mubr.f32.gmra.mxu0 %v9788_v47  ;;  %2988 = vmatmul.mubr.f32.gmra.mxu1 %v630_v39  ;;  %v2210_v47 = vld [vmem:[%s13180_s1 + $0x310] sm:$0xff] }
 0x117   :  { %2552 = vmatprep.mubr.f32.mxu0 %v9544_v26  ;;  %2992 = vmatprep.mubr.f32.mxu1 %v9901_v48  ;;  %v632_v26 = vld [vmem:[#allocation2 + $0x2da] sm:$0xff] }
 0x118   :  { %3445 = vmatpush1.msra.mxu1 %v2210_v47 }
 0x119   :  { %3446 = vmatprep.subr.mxu1 %v9537_v0 }
 0x11a   :  { %2553 = vmatmul.mubr.f32.gmra.mxu0 %v9793_v38  ;;  %2993 = vmatmul.mubr.f32.gmra.mxu1 %v631_v42  ;;  %v2209_v38 = vld [vmem:[%s13180_s1 + $0x308] sm:$0xff] }
 0x11b   :  { %2557 = vmatprep.mubr.f32.mxu0 %v9556_v53  ;;  %2997 = vmatprep.mubr.f32.mxu1 %v9910_v41  ;;  %v633_v53 = vld [vmem:[#allocation2 + $0x2ea] sm:$0xff] }
 0x11c   :  { %3447 = vmatpush1.msra.mxu1 %v2209_v38  ;;  %v2226_v38 = vld [vmem:[%s13180_s1 + $0x390] sm:$0xff] }
 0x11d   :  { %3448 = vmatprep.subr.mxu1 %v9537_v0 }
 0x11e   :  { %2558 = vmatmul.mubr.f32.gmra.mxu0 %v9797_v46  ;;  %2998 = vmatmul.mubr.f32.gmra.mxu1 %v632_v26  ;;  %v2208_v46 = vld [vmem:[%s13180_s1 + $0x300] sm:$0xff] }
 0x11f   :  { %2562 = vmatprep.mubr.f32.mxu0 %v9568_v59  ;;  %3002 = vmatprep.mubr.f32.mxu1 %v9919_v27  ;;  %v634_v59 = vld [vmem:[#allocation2 + $0x2f2] sm:$0xff] }
 0x120   :  { %3449 = vmatpush1.msra.mxu1 %v2208_v46 }
 0x121   :  { %3450 = vmatprep.subr.mxu1 %v9537_v0 }
 0x122   :  { %2563 = vmatmul.mubr.f32.gmra.mxu0 %v9800_v31  ;;  %3003 = vmatmul.mubr.f32.gmra.mxu1 %v633_v53  ;;  %v2239_v31 = vld [vmem:[%s13180_s1 + $0x3f8] sm:$0xff] }
 0x123   :  { %2567 = vmatprep.mubr.f32.mxu0 %v9580_v1  ;;  %3007 = vmatprep.mubr.f32.mxu1 %v9928_v33  ;;  %v635_v1 = vld [vmem:[#allocation2 + $0x302] sm:$0xff] }
 0x124   :  { %3451 = vmatpush2.msra.mxu1 %v2239_v31  ;;  %v2224_v31 = vld [vmem:[%s13180_s1 + $0x380] sm:$0xff] }
 0x125   :  { %v9940_v49 = vpop.f32.mrf.mxu0  ;;  %3452 = vmatprep.subr.mxu1 %v9537_v0 }
 0x126   :  { %2568 = vmatmul.mubr.f32.gmra.mxu0 %v9811_v50  ;;  %3008 = vmatmul.mubr.f32.gmra.mxu1 %v634_v59  ;;  %v2238_v50 = vld [vmem:[%s13180_s1 + $0x3f0] sm:$0xff] }
 0x127   :  { %2572 = vmatprep.mubr.f32.mxu0 %v9592_v3  ;;  %3012 = vmatprep.mubr.f32.mxu1 %v9937_v36  ;;  %v2331_v51 = vpop.f32.mrf.mxu0  ;;  %v636_v3 = vld [vmem:[#allocation2 + $0x30a] sm:$0xff] }
 0x128   :  { %3453 = vmatpush2.msra.mxu1 %v2238_v50  ;;  %v10061_v50 = vld [vmem:[#allocation2 + $0x39] sm:$0xff] }
 0x129   :  { %v9951_v29 = vpop.f32.mrf.mxu0  ;;  %3454 = vmatprep.subr.mxu1 %v9537_v0 }
 0x12a   :  { %2573 = vmatmul.mubr.f32.gmra.mxu0 %v9820_v52  ;;  %3013 = vmatmul.mubr.f32.gmra.mxu1 %v635_v1  ;;  %v2237_v52 = vld [vmem:[%s13180_s1 + $0x3e8] sm:$0xff] }
 0x12b   :  { %2577 = vmatprep.mubr.f32.mxu0 %v9604_v5  ;;  %3017 = vmatprep.mubr.f32.mxu1 %v9948_v8  ;;  %v2336_v45 = vpop.f32.mrf.mxu0  ;;  %v637_v5 = vld [vmem:[#allocation2 + $0x31a] sm:$0xff] }
 0x12c   :  { %3455 = vmatpush2.msra.mxu1 %v2237_v52  ;;  %v10074_v52 = vld [vmem:[#allocation2 + $0x49] sm:$0xff] }
 0x12d   :  { %3456 = vmatprep.subr.mxu1 %v9537_v0 }
 0x12e   :  { %v9960_v30 = vpop.f32.mrf.mxu0  ;;  %2578 = vmatmul.mubr.f32.gmra.mxu0 %v9829_v54  ;;  %3018 = vmatmul.mubr.f32.gmra.mxu1 %v636_v3  ;;  %v2236_v54 = vld [vmem:[%s13180_s1 + $0x3e0] sm:$0xff] }
 0x12f   :  { %13221 = vst [vmem:[#allocation6_spill] sm:$0xff] %v9960_v30  ;;  %2582 = vmatprep.mubr.f32.mxu0 %v9616_v7  ;;  %3022 = vmatprep.mubr.f32.mxu1 %v765_v13  ;;  %v638_v7 = vld [vmem:[#allocation2 + $0x322] sm:$0xff] }
 0x130   :  { %v2341_v2 = vpop.f32.mrf.mxu0  ;;  %3457 = vmatpush2.msra.mxu1 %v2236_v54  ;;  %v10086_v54 = vld [vmem:[#allocation2 + $0x51] sm:$0xff] }
 0x131   :  { %3458 = vmatprep.subr.mxu1 %v9537_v0 }
 0x132   :  { %v9968_v18 = vpop.f32.mrf.mxu0  ;;  %2583 = vmatmul.mubr.f32.gmra.mxu0 %v9838_v55  ;;  %3023 = vmatmul.mubr.f32.gmra.mxu1 %v637_v5 }
 0x133   :  { %13222 = vst [vmem:[#allocation7_spill] sm:$0xff] %v9968_v18  ;;  %2587 = vmatprep.mubr.f32.mxu0 %v9628_v10  ;;  %3027 = vmatprep.mubr.f32.mxu1 %v766_v9  ;;  %v2234_v10 = vld [vmem:[%s13180_s1 + $0x3d0] sm:$0xff] }
 0x134   :  { %v2346_v12 = vpop.f32.mrf.mxu0  ;;  %3459 = vmatpush2.msra.mxu1 %v2235_v35  ;;  %v10098_v35 = vld [vmem:[#allocation2 + $0x61] sm:$0xff] }
 0x135   :  { %3460 = vmatprep.subr.mxu1 %v9537_v0 }
 0x136   :  { %v9981_v55 = vpop.f32.mrf.mxu0  ;;  %2588 = vmatmul.mubr.f32.gmra.mxu0 %v9847_v57  ;;  %3028 = vmatmul.mubr.f32.gmra.mxu1 %v638_v7  ;;  %v10091_v7 = vld [vmem:[#allocation2 + $0x48] sm:$0xff] }
 0x137   :  { %13223 = vst [vmem:[#allocation8_spill] sm:$0xff] %v9981_v55  ;;  %2592 = vmatprep.mubr.f32.mxu0 %v9640_v19  ;;  %3482 = vmatprep.mubr.f32.mxu1 %v9979_v60 }
 0x138   :  { %v2351_v14 = vpop.f32.mrf.mxu0  ;;  %3461 = vmatpush2.msra.mxu1 %v2234_v10 }
 0x139   :  { %3462 = vmatprep.subr.mxu1 %v9537_v0  ;;  %v10103_v14 = vld [vmem:[#allocation2 + $0x50] sm:$0xff] }
 0x13a   :  { %v9994_v57 = vpop.f32.mrf.mxu0  ;;  %2593 = vmatmul.mubr.f32.gmra.mxu0 %v9856_v58  ;;  %v9997_v19 = vpop.f32.mrf.mxu1  ;;  %3463 = vmatpush2.msra.mxu1 %v2233_v56  ;;  %v2231_v58 = vld [vmem:[%s13180_s1 + $0x3b8] sm:$0xff] }
 0x13b   :  { %13224 = vst [vmem:[#allocation9_spill] sm:$0xff] %v9994_v57  ;;  %2597 = vmatprep.mubr.f32.mxu0 %v9651_v37  ;;  %3464 = vmatprep.subr.mxu1 %v9537_v0 }
 0x13c   :  { %v2356_v16 = vpop.f32.mrf.mxu0  ;;  %v2796_v21 = vpop.f32.mrf.mxu1  ;;  %3465 = vmatpush2.msra.mxu1 %v2232_v61  ;;  %v10110_v61 = vld [vmem:[#allocation2 + $0x69] sm:$0xff] }
 0x13d   :  { %3466 = vmatprep.subr.mxu1 %v9537_v0  ;;  %v10115_v21 = vld [vmem:[#allocation2 + $0x60] sm:$0xff] }
 0x13e   :  { %v10008_v28 = vpop.f32.mrf.mxu0  ;;  %2598 = vmatmul.mubr.f32.gmra.mxu0 %v9865_v25  ;;  %v10011_v37 = vpop.f32.mrf.mxu1  ;;  %3467 = vmatpush2.msra.mxu1 %v2231_v58  ;;  %v2229_v25 = vld [vmem:[%s13180_s1 + $0x3a8] sm:$0xff]  ;;  %v703_v58 = vld [vmem:[#allocation2 + $0x18] sm:$0xff] }
 0x13f   :  { %13225 = vst [vmem:[#allocation10_spill] sm:$0xff] %v10008_v28  ;;  %2602 = vmatprep.mubr.f32.mxu0 %v9661_v44  ;;  %3468 = vmatprep.subr.mxu1 %v9537_v0 }
 0x140   :  { %v2361_v20 = vpop.f32.mrf.mxu0  ;;  %v2801_v22 = vpop.f32.mrf.mxu1  ;;  %3469 = vmatpush2.msra.mxu1 %v2230_v32 }
 0x141   :  { %3470 = vmatprep.subr.mxu1 %v9537_v0  ;;  %v10122_v20 = vld [vmem:[#allocation2 + $0x79] sm:$0xff] }
 0x142   :  { %v10022_v39 = vpop.f32.mrf.mxu0  ;;  %2603 = vmatmul.mubr.f32.gmra.mxu0 %v9874_v63  ;;  %v10025_v44 = vpop.f32.mrf.mxu1  ;;  %3471 = vmatpush2.msra.mxu1 %v2229_v25  ;;  %v2227_v63 = vld [vmem:[%s13180_s1 + $0x398] sm:$0xff] }
 0x143   :  { %13226 = vst [vmem:[#allocation11_spill] sm:$0xff] %v10022_v39  ;;  %2607 = vmatprep.mubr.f32.mxu0 %v9673_v62  ;;  %3472 = vmatprep.subr.mxu1 %v9537_v0 }
 0x144   :  { %v2366_v42 = vpop.f32.mrf.mxu0  ;;  %v2806_v47 = vpop.f32.mrf.mxu1  ;;  %3473 = vmatpush2.msra.mxu1 %v2228_v24  ;;  %v575_v24 = vld [vmem:[#allocation2 + $0x2] sm:$0xff] }
 0x145   :  { %3474 = vmatprep.subr.mxu1 %v9537_v0  ;;  %v2191_v42 = vld [vmem:[%s13180_s1 + $0x278] sm:$0xff]  ;;  %v704_v47 = vld [vmem:[#allocation2 + $0x20] sm:$0xff] }
 0x146   :  { %v10036_v26 = vpop.f32.mrf.mxu0  ;;  %2608 = vmatmul.mubr.f32.gmra.mxu0 %v9883_v43  ;;  %v10039_v62 = vpop.f32.mrf.mxu1  ;;  %3475 = vmatpush2.msra.mxu1 %v2227_v63  ;;  %v2225_v43 = vld [vmem:[%s13180_s1 + $0x388] sm:$0xff] }
 0x147   :  { %13227 = vst [vmem:[#allocation12_spill] sm:$0xff] %v10036_v26  ;;  %2612 = vmatprep.mubr.f32.mxu0 %v9686_v4  ;;  %3476 = vmatprep.subr.mxu1 %v9537_v0 }
 0x148   :  { %v2371_v53 = vpop.f32.mrf.mxu0  ;;  %v2811_v46 = vpop.f32.mrf.mxu1  ;;  %3477 = vmatpush2.msra.mxu1 %v2226_v38 }
 0x149   :  { %3478 = vmatprep.subr.mxu1 %v9537_v0  ;;  %v2190_v53 = vld [vmem:[%s13180_s1 + $0x270] sm:$0xff] }
 0x14a   :  { %v10050_v59 = vpop.f32.mrf.mxu0  ;;  %2613 = vmatmul.mubr.f32.gmra.mxu0 %v9892_v23  ;;  %v10053_v4 = vpop.f32.mrf.mxu1  ;;  %3479 = vmatpush2.msra.mxu1 %v2225_v43  ;;  %v10066_v23 = vld [vmem:[#allocation2 + $0x30] sm:$0xff]  ;;  %v10146_v43 = vld [vmem:[#allocation2 + $0x81] sm:$0xff] }
 0x14b   :  { %13228 = vst [vmem:[#allocation13_spill] sm:$0xff] %v10050_v59  ;;  %2617 = vmatprep.mubr.f32.mxu0 %v9699_v15  ;;  %3480 = vmatprep.subr.mxu1 %v9537_v0 }
 0x14c   :  { %v2376_v1 = vpop.f32.mrf.mxu0  ;;  %v2816_v51 = vpop.f32.mrf.mxu1  ;;  %3481 = vmatpush2.msra.mxu1 %v2224_v31 }
 0x14d   :  { %3483 = vmatmul.mubr.f32.vlgmr.msra.gmra.mxu1 %v10066_v23  ;;  %6277 = vmatprep.subr.mxu1 %v9537_v0  ;;  %v576_v1 = vld [vmem:[#allocation2 + $0xa] sm:$0xff]  ;;  %v10149_v51 = vld [vmem:[#allocation2 + $0x78] sm:$0xff] }
 0x14e   :  { %v10063_v3 = vpop.f32.mrf.mxu0  ;;  %2618 = vmatmul.mubr.f32.gmra.mxu0 %v9901_v48  ;;  %v10068_v15 = vpop.f32.mrf.mxu1  ;;  %3487 = vmatprep.mubr.f32.mxu1 %v10061_v50  ;;  %v10079_v48 = vld [vmem:[#allocation2 + $0x38] sm:$0xff] }
 0x14f   :  { %13229 = vst [vmem:[#allocation14_spill] sm:$0xff] %v10063_v3  ;;  %2622 = vmatprep.mubr.f32.mxu0 %v9712_v34 }
 0x150   :  { %v2381_v45 = vpop.f32.mrf.mxu0  ;;  %v2821_v13 = vpop.f32.mrf.mxu1 }
 0x151   :  { %3488 = vmatmul.mubr.f32.gmra.mxu1 %v10079_v48  ;;  %v10151_v13 = vld [vmem:[#allocation2 + $0x8] sm:$0xff] }
 0x152   :  { %v10076_v5 = vpop.f32.mrf.mxu0  ;;  %2623 = vmatmul.mubr.f32.gmra.mxu0 %v9910_v41  ;;  %v10081_v2 = vpop.f32.mrf.mxu1  ;;  %3492 = vmatprep.mubr.f32.mxu1 %v10074_v52 }
 0x153   :  { %13230 = vst [vmem:[#allocation15_spill] sm:$0xff] %v10076_v5  ;;  %2627 = vmatprep.mubr.f32.mxu0 %v9725_v6 }
 0x154   :  { %v2386_v34 = vpop.f32.mrf.mxu0  ;;  %v2826_v9 = vpop.f32.mrf.mxu1 }
 0x155   :  { %3493 = vmatmul.mubr.f32.gmra.mxu1 %v10091_v7  ;;  %v2189_v34 = vld [vmem:[%s13180_s1 + $0x268] sm:$0xff] }
 0x156   :  { %v10088_v0 = vpop.f32.mrf.mxu0  ;;  %2628 = vmatmul.mubr.f32.gmra.mxu0 %v9919_v27  ;;  %v10093_v41 = vpop.f32.mrf.mxu1  ;;  %3497 = vmatprep.mubr.f32.mxu1 %v10086_v54 }
 0x157   :  { %13231 = vst [vmem:[#allocation16_spill] sm:$0xff] %v10088_v0  ;;  %2632 = vmatprep.mubr.f32.mxu0 %v9738_v40 }
 0x158   :  { %v2391_v6 = vpop.f32.mrf.mxu0  ;;  %v2831_v12 = vpop.f32.mrf.mxu1 }
 0x159   :  { %3498 = vmatmul.mubr.f32.gmra.mxu1 %v10103_v14 }
 0x15a   :  { %v10100_v10 = vpop.f32.mrf.mxu0  ;;  %2633 = vmatmul.mubr.f32.gmra.mxu0 %v9928_v33  ;;  %v10105_v27 = vpop.f32.mrf.mxu1  ;;  %3502 = vmatprep.mubr.f32.mxu1 %v10098_v35 }
 0x15b   :  { %13232 = vst [vmem:[#allocation17_spill] sm:$0xff] %v10100_v10  ;;  %2637 = vmatprep.mubr.f32.mxu0 %v9751_v11 }
 0x15c   :  { %v2396_v40 = vpop.f32.mrf.mxu0  ;;  %v2836_v56 = vpop.f32.mrf.mxu1 }
 0x15d   :  { %3503 = vmatmul.mubr.f32.gmra.mxu1 %v10115_v21  ;;  %v2188_v40 = vld [vmem:[%s13180_s1 + $0x260] sm:$0xff] }
 0x15e   :  { %v10112_v16 = vpop.f32.mrf.mxu0  ;;  %2638 = vmatmul.mubr.f32.gmra.mxu0 %v9937_v36  ;;  %v10117_v33 = vpop.f32.mrf.mxu1  ;;  %3507 = vmatprep.mubr.f32.mxu1 %v10110_v61  ;;  %v10127_v36 = vld [vmem:[#allocation2 + $0x68] sm:$0xff] }
 0x15f   :  { %13233 = vst [vmem:[#allocation18_spill] sm:$0xff] %v10112_v16  ;;  %2642 = vmatprep.mubr.f32.mxu0 %v9764_v17 }
 0x160   :  { %v2401_v11 = vpop.f32.mrf.mxu0  ;;  %v2841_v32 = vpop.f32.mrf.mxu1 }
 0x161   :  { %3508 = vmatmul.mubr.f32.gmra.mxu1 %v10127_v36  ;;  %v10168_v11 = vld [vmem:[#allocation2 + $0x91] sm:$0xff]  ;;  %v10174_v32 = vld [vmem:[#allocation2 + $0x80] sm:$0xff] }
 0x162   :  { %v10124_v22 = vpop.f32.mrf.mxu0  ;;  %2643 = vmatmul.mubr.f32.gmra.mxu0 %v9948_v8  ;;  %v10129_v25 = vpop.f32.mrf.mxu1  ;;  %3512 = vmatprep.mubr.f32.mxu1 %v10122_v20  ;;  %v10139_v8 = vld [vmem:[%s13182_s2] ss:$0 sm:$0xff] }
 0x163   :  { %13234 = vst [vmem:[#allocation19_spill] sm:$0xff] %v10124_v22  ;;  %2712 = vmatprep.mubr.f32.mxu0 %v703_v58 }
 0x164   :  { %v2406_v17 = vpop.f32.mrf.mxu0  ;;  %v2846_v63 = vpop.f32.mrf.mxu1 }
 0x165   :  { %3513 = vmatmul.mubr.f32.gmra.mxu1 %v10149_v51  ;;  %v2187_v17 = vld [vmem:[%s13180_s1 + $0x258] sm:$0xff]  ;;  %v2186_v63 = vld [vmem:[%s13180_s1 + $0x250] sm:$0xff] }
 0x166   :  { %v2409_v38 = vpop.f32.mrf.mxu0  ;;  %2713 = vmatmul.mubr.f32.vlgmr.msra.gmra.mxu0 %v575_v24  ;;  %v10144_v46 = vpop.f32.mrf.mxu1  ;;  %3517 = vmatprep.mubr.f32.mxu1 %v10146_v43 }
 0x167   :  { %v2410_v31 = vadd.f32 %v10139_v8, %v2409_v38  ;;  %3034 = vmatpush1.msra.mxu0 %v2191_v42  ;;  %2717 = vmatprep.mubr.f32.mxu0 %v704_v47 }
 0x168   :  { %v2411_v45 = vpop.f32.mrf.mxu0  ;;  %3035 = vmatprep.subr.mxu0 %v10151_v13  ;;  %v2851_v9 = vpop.f32.mrf.mxu1 }
 0x169   :  { %v10159_v6 = vadd.f32 %v9997_v19, %v2410_v31  ;;  %3036 = vmatpush1.msra.mxu0 %v2190_v53  ;;  %v10172_v19 = vld [vmem:[#allocation2 + $0x1a] sm:$0xff]  ;;  %3518 = vmatmul.mubr.f32.gmra.mxu1 %v10174_v32 }
 0x16a   :  { %v2414_v12 = vpop.f32.mrf.mxu0  ;;  %2718 = vmatmul.mubr.f32.gmra.mxu0 %v576_v1  ;;  %3037 = vmatprep.subr.mxu0 %v10151_v13  ;;  %v10166_v56 = vpop.f32.mrf.mxu1  ;;  %v10192_v53 = vld [vmem:[#allocation2 + $0x99] sm:$0xff]  ;;  %v10198_v1 = vld [vmem:[#allocation2 + $0x90] sm:$0xff] }
 0x16b   :  { %13235 = vst [vmem:[#allocation20_spill] sm:$0xff] %v10159_v6  ;;  %v2415_v58 = vadd.f32 %v10139_v8, %v2414_v12  ;;  %3038 = vmatpush1.msra.mxu0 %v2189_v34  ;;  %2722 = vmatprep.mubr.f32.mxu0 %v10066_v23  ;;  %v2185_v34 = vld [vmem:[%s13180_s1 + $0x248] sm:$0xff] }
 0x16c   :  { %v2416_v24 = vpop.f32.mrf.mxu0  ;;  %3039 = vmatprep.subr.mxu0 %v10151_v13  ;;  %v2856_v42 = vpop.f32.mrf.mxu1  ;;  %3522 = vmatprep.mubr.f32.mxu1 %v10168_v11 }
 0x16d   :  { %v10182_v47 = vadd.f32 %v10011_v37, %v2415_v58  ;;  %3040 = vmatpush1.msra.mxu0 %v2188_v40  ;;  %v10196_v37 = vld [vmem:[#allocation2 + $0x22] sm:$0xff]  ;;  %3523 = vmatmul.mubr.f32.gmra.mxu1 %v10198_v1  ;;  %v10222_v42 = vld [vmem:[#allocation2 + $0x98] sm:$0xff] }
 0x16e   :  { %v2419_v23 = vpop.f32.mrf.mxu0  ;;  %2723 = vmatmul.mubr.f32.gmra.mxu0 %v10172_v19  ;;  %3041 = vmatprep.subr.mxu0 %v10151_v13  ;;  %v10190_v38 = vpop.f32.mrf.mxu1  ;;  %v2184_v40 = vld [vmem:[%s13180_s1 + $0x240] sm:$0xff]  ;;  %v10216_v24 = vld [vmem:[#allocation2 + $0xa9] sm:$0xff] }
 0x16f   :  { %13236 = vst [vmem:[#allocation21_spill] sm:$0xff] %v10182_v47  ;;  %v2420_v31 = vadd.f32 %v10139_v8, %v2419_v23  ;;  %3042 = vmatpush1.msra.mxu0 %v2187_v17  ;;  %2727 = vmatprep.mubr.f32.mxu0 %v10079_v48 }
 0x170   :  { %v2421_v45 = vpop.f32.mrf.mxu0  ;;  %3043 = vmatprep.subr.mxu0 %v10151_v13  ;;  %v2861_v9 = vpop.f32.mrf.mxu1  ;;  %3527 = vmatprep.mubr.f32.mxu1 %v10192_v53 }
 0x171   :  { %v10206_v12 = vadd.f32 %v10025_v44, %v2420_v31  ;;  %3044 = vmatpush1.msra.mxu0 %v2186_v63  ;;  %v10220_v44 = vld [vmem:[#allocation2 + $0x32] sm:$0xff]  ;;  %3528 = vmatmul.mubr.f32.gmra.mxu1 %v10222_v42 }
 0x172   :  { %v2424_v48 = vpop.f32.mrf.mxu0  ;;  %2728 = vmatmul.mubr.f32.gmra.mxu0 %v10196_v37  ;;  %3045 = vmatprep.subr.mxu0 %v10151_v13  ;;  %v10214_v58 = vpop.f32.mrf.mxu1  ;;  %v2183_v63 = vld [vmem:[%s13180_s1 + $0x238] sm:$0xff] }
 0x173   :  { %13237 = vst [vmem:[#allocation22_spill] sm:$0xff] %v10206_v12  ;;  %v2425_v17 = vadd.f32 %v10139_v8, %v2424_v48  ;;  %3046 = vmatpush1.msra.mxu0 %v2185_v34  ;;  %2732 = vmatprep.mubr.f32.mxu0 %v10091_v7  ;;  %v2182_v34 = vld [vmem:[%s13180_s1 + $0x230] sm:$0xff] }
 0x174   :  { %v2426_v23 = vpop.f32.mrf.mxu0  ;;  %3047 = vmatprep.subr.mxu0 %v10151_v13  ;;  %v2866_v31 = vpop.f32.mrf.mxu1  ;;  %3532 = vmatprep.mubr.f32.mxu1 %v10216_v24  ;;  %v10240_v48 = vld [vmem:[#allocation2 + $0xb1] sm:$0xff] }
 0x175   :  { %v10230_v45 = vadd.f32 %v10039_v62, %v2425_v17  ;;  %3048 = vmatpush1.msra.mxu0 %v2184_v40  ;;  %v10244_v62 = vld [vmem:[#allocation2 + $0x3a] sm:$0xff]  ;;  %v10246_v40 = vld [vmem:[#allocation2 + $0xa8] sm:$0xff] }
 0x176   :  { %v2429_v7 = vpop.f32.mrf.mxu0  ;;  %2733 = vmatmul.mubr.f32.gmra.mxu0 %v10220_v44  ;;  %3049 = vmatprep.subr.mxu0 %v10151_v13  ;;  %v10238_v9 = vpop.f32.mrf.mxu1  ;;  %v2181_v31 = vld [vmem:[%s13180_s1 + $0x228] sm:$0xff] }
 0x177   :  { %13238 = vst [vmem:[#allocation23_spill] sm:$0xff] %v10230_v45  ;;  %v2430_v23 = vadd.f32 %v10139_v8, %v2429_v7  ;;  %3050 = vmatpush1.msra.mxu0 %v2183_v63  ;;  %2737 = vmatprep.mubr.f32.mxu0 %v10103_v14  ;;  %v2180_v63 = vld [vmem:[%s13180_s1 + $0x220] sm:$0xff] }
 0x178   :  { %v2431_v17 = vpop.f32.mrf.mxu0  ;;  %3051 = vmatprep.subr.mxu0 %v10151_v13  ;;  %v2871_v45 = vpop.f32.mrf.mxu1  ;;  %3533 = vmatmul.mubr.f32.gmra.mxu1 %v10246_v40 }
 0x179   :  { %v10254_v12 = vadd.f32 %v10053_v4, %v2430_v23  ;;  %3052 = vmatpush1.msra.mxu0 %v2182_v34  ;;  %3537 = vmatprep.mubr.f32.mxu1 %v10240_v48  ;;  %v10264_v45 = vld [vmem:[#allocation2 + $0xc1] sm:$0xff]  ;;  %v10268_v4 = vld [vmem:[#allocation2 + $0x4a] sm:$0xff] }
 0x17a   :  { %v2434_v14 = vpop.f32.mrf.mxu0  ;;  %2738 = vmatmul.mubr.f32.gmra.mxu0 %v10244_v62  ;;  %3053 = vmatprep.subr.mxu0 %v10151_v13  ;;  %v10262_v7 = vpop.f32.mrf.mxu1  ;;  %v10270_v34 = vld [vmem:[#allocation2 + $0xb0] sm:$0xff] }
 0x17b   :  { %13239 = vst [vmem:[#allocation24_spill] sm:$0xff] %v10254_v12  ;;  %v2435_v17 = vadd.f32 %v10139_v8, %v2434_v14  ;;  %3054 = vmatpush1.msra.mxu0 %v2181_v31  ;;  %2742 = vmatprep.mubr.f32.mxu0 %v10115_v21  ;;  %v2179_v12 = vld [vmem:[%s13180_s1 + $0x218] sm:$0xff]  ;;  %v2178_v31 = vld [vmem:[%s13180_s1 + $0x210] sm:$0xff] }
 0x17c   :  { %v2436_v23 = vpop.f32.mrf.mxu0  ;;  %3055 = vmatprep.subr.mxu0 %v10151_v13  ;;  %v2876_v47 = vpop.f32.mrf.mxu1  ;;  %3538 = vmatmul.mubr.f32.gmra.mxu1 %v10270_v34 }
 0x17d   :  { %v10278_v6 = vadd.f32 %v10068_v15, %v2435_v17  ;;  %3056 = vmatpush1.msra.mxu0 %v2180_v63  ;;  %3542 = vmatprep.mubr.f32.mxu1 %v10264_v45  ;;  %v10288_v47 = vld [vmem:[#allocation2 + $0xc9] sm:$0xff]  ;;  %v10292_v15 = vld [vmem:[#allocation2 + $0x52] sm:$0xff]  ;;  %v10294_v63 = vld [vmem:[#allocation2 + $0xc0] sm:$0xff] }
 0x17e   :  { %v2439_v21 = vpop.f32.mrf.mxu0  ;;  %2743 = vmatmul.mubr.f32.gmra.mxu0 %v10268_v4  ;;  %3057 = vmatprep.subr.mxu0 %v10151_v13  ;;  %v10286_v14 = vpop.f32.mrf.mxu1 }
 0x17f   :  { %13240 = vst [vmem:[#allocation25_spill] sm:$0xff] %v10278_v6  ;;  %v2440_v23 = vadd.f32 %v10139_v8, %v2439_v21  ;;  %3058 = vmatpush1.msra.mxu0 %v2179_v12  ;;  %2747 = vmatprep.mubr.f32.mxu0 %v10127_v36  ;;  %v2177_v6 = vld [vmem:[%s13180_s1 + $0x208] sm:$0xff]  ;;  %v2176_v12 = vld [vmem:[%s13180_s1 + $0x200] sm:$0xff] }
 0x180   :  { %v2441_v17 = vpop.f32.mrf.mxu0  ;;  %3059 = vmatprep.subr.mxu0 %v10151_v13  ;;  %v2881_v22 = vpop.f32.mrf.mxu1  ;;  %3543 = vmatmul.mubr.f32.gmra.mxu1 %v10294_v63 }
 0x181   :  { %v10302_v16 = vadd.f32 %v10081_v2, %v2440_v23  ;;  %3060 = vmatpush1.msra.mxu0 %v2178_v31  ;;  %3547 = vmatprep.mubr.f32.mxu1 %v10288_v47  ;;  %v10312_v22 = vld [vmem:[#allocation2 + $0xd9] sm:$0xff]  ;;  %v10316_v2 = vld [vmem:[#allocation2 + $0x62] sm:$0xff] }
 0x182   :  { %v2444_v36 = vpop.f32.mrf.mxu0  ;;  %2748 = vmatmul.mubr.f32.gmra.mxu0 %v10292_v15  ;;  %3061 = vmatprep.subr.mxu0 %v10151_v13  ;;  %v10310_v21 = vpop.f32.mrf.mxu1  ;;  %v10318_v31 = vld [vmem:[#allocation2 + $0xc8] sm:$0xff] }
 0x183   :  { %13241 = vst [vmem:[#allocation26_spill] sm:$0xff] %v10302_v16  ;;  %v2445_v17 = vadd.f32 %v10139_v8, %v2444_v36  ;;  %3062 = vmatpush1.msra.mxu0 %v2177_v6  ;;  %2752 = vmatprep.mubr.f32.mxu0 %v10149_v51  ;;  %v2207_v16 = vld [vmem:[%s13180_s1 + $0x2f8] sm:$0xff]  ;;  %v2206_v36 = vld [vmem:[%s13180_s1 + $0x2f0] sm:$0xff] }
 0x184   :  { %v2446_v23 = vpop.f32.mrf.mxu0  ;;  %3063 = vmatprep.subr.mxu0 %v10151_v13  ;;  %v2886_v10 = vpop.f32.mrf.mxu1  ;;  %3548 = vmatmul.mubr.f32.gmra.mxu1 %v10318_v31  ;;  %v1166_v51 = vld [vmem:[#allocation2 + $0xd8] sm:$0xff] }
 0x185   :  { %v10326_v0 = vadd.f32 %v10093_v41, %v2445_v17  ;;  %3064 = vmatpush1.msra.mxu0 %v2176_v12  ;;  %3552 = vmatprep.mubr.f32.mxu1 %v10312_v22  ;;  %v10336_v10 = vld [vmem:[#allocation2 + $0xe1] sm:$0xff]  ;;  %v10340_v12 = vld [vmem:[#allocation2 + $0x6a] sm:$0xff] }
 0x186   :  { %v2449_v6 = vpop.f32.mrf.mxu0  ;;  %2753 = vmatmul.mubr.f32.gmra.mxu0 %v10316_v2  ;;  %3065 = vmatprep.subr.mxu0 %v10151_v13  ;;  %v10334_v23 = vpop.f32.mrf.mxu1 }
 0x187   :  { %13242 = vst [vmem:[#allocation27_spill] sm:$0xff] %v10326_v0  ;;  %v2450_v41 = vadd.f32 %v10139_v8, %v2449_v6  ;;  %3066 = vmatpush2.msra.mxu0 %v2207_v16  ;;  %2757 = vmatprep.mubr.f32.mxu0 %v10174_v32  ;;  %v2205_v0 = vld [vmem:[%s13180_s1 + $0x2e8] sm:$0xff]  ;;  %v1167_v16 = vld [vmem:[#allocation2 + $0xe0] sm:$0xff] }
 0x188   :  { %v2451_v17 = vpop.f32.mrf.mxu0  ;;  %3067 = vmatprep.subr.mxu0 %v10151_v13  ;;  %v2891_v5 = vpop.f32.mrf.mxu1  ;;  %3553 = vmatmul.mubr.f32.gmra.mxu1 %v1166_v51  ;;  %v2204_v32 = vld [vmem:[%s13180_s1 + $0x2e0] sm:$0xff] }
 0x189   :  { %v10347_v3 = vadd.f32 %v10105_v27, %v2450_v41  ;;  %3068 = vmatpush2.msra.mxu0 %v2206_v36  ;;  %3557 = vmatprep.mubr.f32.mxu1 %v10336_v10  ;;  %v10357_v5 = vld [vmem:[#allocation2 + $0xf1] sm:$0xff]  ;;  %v10361_v51 = vld [vmem:[#allocation2 + $0x7a] sm:$0xff] }
 0x18a   :  { %v2454_v6 = vpop.f32.mrf.mxu0  ;;  %2758 = vmatmul.mubr.f32.gmra.mxu0 %v10340_v12  ;;  %3069 = vmatprep.subr.mxu0 %v10151_v13  ;;  %v10355_v17 = vpop.f32.mrf.mxu1  ;;  %v2203_v41 = vld [vmem:[%s13180_s1 + $0x2d8] sm:$0xff] }
 0x18b   :  { %13243 = vst [vmem:[#allocation28_spill] sm:$0xff] %v10347_v3  ;;  %v2455_v27 = vadd.f32 %v10139_v8, %v2454_v6  ;;  %3070 = vmatpush2.msra.mxu0 %v2205_v0  ;;  %2762 = vmatprep.mubr.f32.mxu0 %v10198_v1  ;;  %v1168_v0 = vld [vmem:[#allocation2 + $0xf0] sm:$0xff] }
 0x18c   :  { %v2456_v36 = vpop.f32.mrf.mxu0  ;;  %3071 = vmatprep.subr.mxu0 %v10151_v13  ;;  %v2896_v3 = vpop.f32.mrf.mxu1  ;;  %3558 = vmatmul.mubr.f32.gmra.mxu1 %v1167_v16  ;;  %v2202_v1 = vld [vmem:[%s13180_s1 + $0x2d0] sm:$0xff]  ;;  %v10382_v16 = vld [vmem:[#allocation2 + $0x82] sm:$0xff] }
 0x18d   :  { %v10368_v59 = vadd.f32 %v10117_v33, %v2455_v27  ;;  %3072 = vmatpush2.msra.mxu0 %v2204_v32  ;;  %3562 = vmatprep.mubr.f32.mxu1 %v10357_v5  ;;  %v10378_v3 = vld [vmem:[#allocation2 + $0xf9] sm:$0xff]  ;;  %v2201_v27 = vld [vmem:[%s13180_s1 + $0x2c8] sm:$0xff] }
 0x18e   :  { %v2459_v6 = vpop.f32.mrf.mxu0  ;;  %2763 = vmatmul.mubr.f32.gmra.mxu0 %v10361_v51  ;;  %3073 = vmatprep.subr.mxu0 %v10151_v13  ;;  %v10376_v36 = vpop.f32.mrf.mxu1 }
 0x18f   :  { %13244 = vst [vmem:[#allocation29_spill] sm:$0xff] %v10368_v59  ;;  %v2460_v33 = vadd.f32 %v10139_v8, %v2459_v6  ;;  %3074 = vmatpush2.msra.mxu0 %v2203_v41  ;;  %2767 = vmatprep.mubr.f32.mxu0 %v10222_v42  ;;  %v1169_v41 = vld [vmem:[#allocation2 + $0xf8] sm:$0xff]  ;;  %v2200_v42 = vld [vmem:[%s13180_s1 + $0x2c0] sm:$0xff] }
 0x190   :  { %v2461_v32 = vpop.f32.mrf.mxu0  ;;  %3075 = vmatprep.subr.mxu0 %v10151_v13  ;;  %v2901_v59 = vpop.f32.mrf.mxu1  ;;  %3563 = vmatmul.mubr.f32.gmra.mxu1 %v1168_v0  ;;  %v10403_v0 = vld [vmem:[#allocation2 + $0x92] sm:$0xff] }
 0x191   :  { %v10389_v26 = vadd.f32 %v10129_v25, %v2460_v33  ;;  %3076 = vmatpush2.msra.mxu0 %v2202_v1  ;;  %3567 = vmatprep.mubr.f32.mxu1 %v10378_v3  ;;  %v10399_v59 = vld [vmem:[#allocation2 + $0x109] sm:$0xff]  ;;  %v2199_v33 = vld [vmem:[%s13180_s1 + $0x2b8] sm:$0xff] }
 0x192   :  { %v2464_v6 = vpop.f32.mrf.mxu0  ;;  %2768 = vmatmul.mubr.f32.gmra.mxu0 %v10382_v16  ;;  %3077 = vmatprep.subr.mxu0 %v10151_v13  ;;  %v10397_v32 = vpop.f32.mrf.mxu1 }
 0x193   :  { %13245 = vst [vmem:[#allocation30_spill] sm:$0xff] %v10389_v26  ;;  %v2465_v25 = vadd.f32 %v10139_v8, %v2464_v6  ;;  %3078 = vmatpush2.msra.mxu0 %v2201_v27  ;;  %2772 = vmatprep.mubr.f32.mxu0 %v10246_v40  ;;  %v1170_v27 = vld [vmem:[#allocation2 + $0x108] sm:$0xff]  ;;  %v2198_v40 = vld [vmem:[%s13180_s1 + $0x2b0] sm:$0xff] }
 0x194   :  { %v2466_v1 = vpop.f32.mrf.mxu0  ;;  %3079 = vmatprep.subr.mxu0 %v10151_v13  ;;  %v2906_v26 = vpop.f32.mrf.mxu1  ;;  %3568 = vmatmul.mubr.f32.gmra.mxu1 %v1169_v41  ;;  %v10424_v41 = vld [vmem:[#allocation2 + $0x9a] sm:$0xff] }
 0x195   :  { %v10410_v39 = vadd.f32 %v10144_v46, %v2465_v25  ;;  %3080 = vmatpush2.msra.mxu0 %v2200_v42  ;;  %3572 = vmatprep.mubr.f32.mxu1 %v10399_v59  ;;  %v10420_v26 = vld [vmem:[#allocation2 + $0x111] sm:$0xff]  ;;  %v2197_v25 = vld [vmem:[%s13180_s1 + $0x2a8] sm:$0xff] }
 0x196   :  { %v2469_v6 = vpop.f32.mrf.mxu0  ;;  %2773 = vmatmul.mubr.f32.gmra.mxu0 %v10403_v0  ;;  %3081 = vmatprep.subr.mxu0 %v10151_v13  ;;  %v10418_v1 = vpop.f32.mrf.mxu1 }
 0x197   :  { %13246 = vst [vmem:[#allocation31_spill] sm:$0xff] %v10410_v39  ;;  %v2470_v46 = vadd.f32 %v10139_v8, %v2469_v6  ;;  %3082 = vmatpush2.msra.mxu0 %v2199_v33  ;;  %2777 = vmatprep.mubr.f32.mxu0 %v10270_v34  ;;  %v1171_v33 = vld [vmem:[#allocation2 + $0x110] sm:$0xff]  ;;  %v2196_v34 = vld [vmem:[%s13180_s1 + $0x2a0] sm:$0xff] }
 0x198   :  { %v2471_v42 = vpop.f32.mrf.mxu0  ;;  %3083 = vmatprep.subr.mxu0 %v10151_v13  ;;  %v2911_v39 = vpop.f32.mrf.mxu1  ;;  %3573 = vmatmul.mubr.f32.gmra.mxu1 %v1170_v27  ;;  %v10445_v27 = vld [vmem:[#allocation2 + $0xaa] sm:$0xff] }
 0x199   :  { %v10431_v28 = vadd.f32 %v10166_v56, %v2470_v46  ;;  %3084 = vmatpush2.msra.mxu0 %v2198_v40  ;;  %3577 = vmatprep.mubr.f32.mxu1 %v10420_v26  ;;  %v10441_v39 = vld [vmem:[#allocation2 + $0x121] sm:$0xff]  ;;  %v2195_v46 = vld [vmem:[%s13180_s1 + $0x298] sm:$0xff] }
 0x19a   :  { %v2474_v6 = vpop.f32.mrf.mxu0  ;;  %2778 = vmatmul.mubr.f32.gmra.mxu0 %v10424_v41  ;;  %3085 = vmatprep.subr.mxu0 %v10151_v13  ;;  %v10439_v42 = vpop.f32.mrf.mxu1 }
 0x19b   :  { %13247 = vst [vmem:[#allocation32_spill] sm:$0xff] %v10431_v28  ;;  %v2475_v56 = vadd.f32 %v10139_v8, %v2474_v6  ;;  %3086 = vmatpush2.msra.mxu0 %v2197_v25  ;;  %2782 = vmatprep.mubr.f32.mxu0 %v10294_v63  ;;  %v1172_v25 = vld [vmem:[#allocation2 + $0x120] sm:$0xff]  ;;  %v2194_v63 = vld [vmem:[%s13180_s1 + $0x290] sm:$0xff] }
 0x19c   :  { %v2476_v40 = vpop.f32.mrf.mxu0  ;;  %3087 = vmatprep.subr.mxu0 %v10151_v13  ;;  %v2916_v28 = vpop.f32.mrf.mxu1  ;;  %3578 = vmatmul.mubr.f32.gmra.mxu1 %v1171_v33  ;;  %v10466_v33 = vld [vmem:[#allocation2 + $0xb2] sm:$0xff] }
 0x19d   :  { %v10452_v57 = vadd.f32 %v10190_v38, %v2475_v56  ;;  %3088 = vmatpush2.msra.mxu0 %v2196_v34  ;;  %3582 = vmatprep.mubr.f32.mxu1 %v10441_v39  ;;  %v10462_v28 = vld [vmem:[#allocation2 + $0x129] sm:$0xff] }
 0x19e   :  { %v2479_v6 = vpop.f32.mrf.mxu0  ;;  %2783 = vmatmul.mubr.f32.gmra.mxu0 %v10445_v27  ;;  %3089 = vmatprep.subr.mxu0 %v10151_v13  ;;  %v10460_v40 = vpop.f32.mrf.mxu1  ;;  %v2193_v56 = vld [vmem:[%s13180_s1 + $0x288] sm:$0xff] }
 0x19f   :  { %13248 = vst [vmem:[#allocation33_spill] sm:$0xff] %v10452_v57  ;;  %v2480_v38 = vadd.f32 %v10139_v8, %v2479_v6  ;;  %3090 = vmatpush2.msra.mxu0 %v2195_v46  ;;  %2787 = vmatprep.mubr.f32.mxu0 %v10318_v31  ;;  %v1173_v46 = vld [vmem:[#allocation2 + $0x128] sm:$0xff]  ;;  %v2192_v31 = vld [vmem:[%s13180_s1 + $0x280] sm:$0xff] }
 0x1a0   :  { %v2481_v34 = vpop.f32.mrf.mxu0  ;;  %3091 = vmatprep.subr.mxu0 %v10151_v13  ;;  %v2921_v57 = vpop.f32.mrf.mxu1  ;;  %3583 = vmatmul.mubr.f32.gmra.mxu1 %v1172_v25  ;;  %v831_v25 = vld [vmem:[#allocation2 + $0x19] sm:$0xff] }
 0x1a1   :  { %v10473_v55 = vadd.f32 %v10214_v58, %v2480_v38  ;;  %3092 = vmatpush2.msra.mxu0 %v2194_v63  ;;  %3587 = vmatprep.mubr.f32.mxu1 %v10462_v28  ;;  %v10483_v57 = vld [vmem:[#allocation2 + $0x139] sm:$0xff] }
 0x1a2   :  { %v2484_v6 = vpop.f32.mrf.mxu0  ;;  %2788 = vmatmul.mubr.f32.gmra.mxu0 %v10466_v33  ;;  %3093 = vmatprep.subr.mxu0 %v10151_v13  ;;  %v10481_v34 = vpop.f32.mrf.mxu1  ;;  %v2255_v63 = vld [vmem:[%s13180_s1 + $0x478] sm:$0xff] }
 0x1a3   :  { %13249 = vst [vmem:[#allocation34_spill] sm:$0xff] %v10473_v55  ;;  %v2485_v58 = vadd.f32 %v10139_v8, %v2484_v6  ;;  %3094 = vmatpush2.msra.mxu0 %v2193_v56  ;;  %3097 = vmatprep.mubr.f32.mxu0 %v10172_v19  ;;  %v2254_v56 = vld [vmem:[%s13180_s1 + $0x470] sm:$0xff]  ;;  %v1174_v19 = vld [vmem:[#allocation2 + $0x138] sm:$0xff] }
 0x1a4   :  { %v2486_v38 = vpop.f32.mrf.mxu0  ;;  %3095 = vmatprep.subr.mxu0 %v10151_v13  ;;  %v2926_v55 = vpop.f32.mrf.mxu1  ;;  %3588 = vmatmul.mubr.f32.gmra.mxu1 %v1173_v46  ;;  %v2253_v46 = vld [vmem:[%s13180_s1 + $0x468] sm:$0xff] }
 0x1a5   :  { %v10492_v18 = vadd.f32 %v10238_v9, %v2485_v58  ;;  %3096 = vmatpush2.msra.mxu0 %v2192_v31  ;;  %3592 = vmatprep.mubr.f32.mxu1 %v10483_v57  ;;  %v10500_v38 = vld [vmem:[#allocation2 + $0x141] sm:$0xff] }
 0x1a6   :  { %v2489_v6 = vpop.f32.mrf.mxu0  ;;  %3098 = vmatmul.mubr.f32.vlgmr.msra.gmra.mxu0 %v831_v25  ;;  %8416 = vmatprep.subr.mxu0 %v2255_v63  ;;  %v10498_v30 = vpop.f32.mrf.mxu1  ;;  %v832_v9 = vld [vmem:[#allocation2 + $0x21] sm:$0xff] }
 0x1a7   :  { %13250 = vst [vmem:[#allocation35_spill] sm:$0xff] %v10492_v18  ;;  %v2490_v55 = vadd.f32 %v10139_v8, %v2489_v6  ;;  %8417 = vmatpush3.msra.mxu0 %v2255_v63  ;;  %3102 = vmatprep.mubr.f32.mxu0 %v10196_v37  ;;  %v2252_v6 = vld [vmem:[%s13180_s1 + $0x460] sm:$0xff] }
 0x1a8   :  { %v2491_v31 = vpop.f32.mrf.mxu0  ;;  %8418 = vmatprep.subr.mxu0 %v2254_v56  ;;  %v2931_v58 = vpop.f32.mrf.mxu1  ;;  %3593 = vmatmul.mubr.f32.gmra.mxu1 %v1174_v19  ;;  %v1175_v37 = vld [vmem:[#allocation2 + $0x140] sm:$0xff] }
 0x1a9   :  { %v10508_v25 = vadd.f32 %v10262_v7, %v2490_v55  ;;  %8419 = vmatpush3.msra.mxu0 %v2254_v56  ;;  %3597 = vmatprep.mubr.f32.mxu1 %v10500_v38  ;;  %v10516_v31 = vld [vmem:[#allocation2 + $0x151] sm:$0xff] }
 0x1aa   :  { %v2494_v63 = vpop.f32.mrf.mxu0  ;;  %3103 = vmatmul.mubr.f32.gmra.mxu0 %v832_v9  ;;  %8420 = vmatprep.subr.mxu0 %v2253_v46  ;;  %v10514_v18 = vpop.f32.mrf.mxu1  ;;  %v2251_v7 = vld [vmem:[%s13180_s1 + $0x458] sm:$0xff]  ;;  %v2250_v58 = vld [vmem:[%s13180_s1 + $0x450] sm:$0xff] }
 0x1ab   :  { %v2495_v19 = vadd.f32 %v10139_v8, %v2494_v63  ;;  %3107 = vmatprep.mubr.f32.mxu0 %v10220_v44  ;;  %8421 = vmatpush3.msra.mxu0 %v2253_v46  ;;  %v1176_v44 = vld [vmem:[#allocation2 + $0x150] sm:$0xff] }
 0x1ac   :  { %v2496_v56 = vpop.f32.mrf.mxu0  ;;  %8422 = vmatprep.subr.mxu0 %v2252_v6  ;;  %v2936_v55 = vpop.f32.mrf.mxu1  ;;  %3598 = vmatmul.mubr.f32.gmra.mxu1 %v1175_v37 }
 0x1ad   :  { %v10524_v9 = vadd.f32 %v10286_v14, %v2495_v19  ;;  %8423 = vmatpush3.msra.mxu0 %v2252_v6  ;;  %3602 = vmatprep.mubr.f32.mxu1 %v10516_v31  ;;  %v10533_v56 = vld [vmem:[#allocation2 + $0x159] sm:$0xff]  ;;  %v2249_v14 = vld [vmem:[%s13180_s1 + $0x448] sm:$0xff] }
 0x1ae   :  { %v2499_v46 = vpop.f32.mrf.mxu0  ;;  %3108 = vmatmul.mubr.f32.gmra.mxu0 %v9979_v60  ;;  %v10531_v63 = vpop.f32.mrf.mxu1  ;;  %8424 = vmatprep.subr.mxu0 %v2251_v7  ;;  %v1177_v55 = vld [vmem:[#allocation2 + $0x158] sm:$0xff] }
 0x1af   :  { %v2500_v37 = vadd.f32 %v10139_v8, %v2499_v46  ;;  %3112 = vmatprep.mubr.f32.mxu0 %v10244_v62  ;;  %8425 = vmatpush3.msra.mxu0 %v2251_v7  ;;  %v2248_v62 = vld [vmem:[%s13180_s1 + $0x440] sm:$0xff] }
 0x1b0   :  { %v2501_v6 = vpop.f32.mrf.mxu0  ;;  %v2941_v19 = vpop.f32.mrf.mxu1  ;;  %8426 = vmatprep.subr.mxu0 %v2250_v58  ;;  %3603 = vmatmul.mubr.f32.gmra.mxu1 %v1176_v44 }
 0x1b1   :  { %v10541_v60 = vadd.f32 %v10310_v21, %v2500_v37  ;;  %8427 = vmatpush3.msra.mxu0 %v2250_v58  ;;  %3607 = vmatprep.mubr.f32.mxu1 %v10533_v56  ;;  %v10550_v6 = vld [vmem:[#allocation2 + $0x169] sm:$0xff]  ;;  %v2247_v21 = vld [vmem:[%s13180_s1 + $0x438] sm:$0xff] }
 0x1b2   :  { %v2504_v7 = vpop.f32.mrf.mxu0  ;;  %3113 = vmatmul.mubr.f32.gmra.mxu0 %v10061_v50  ;;  %v10548_v46 = vpop.f32.mrf.mxu1  ;;  %8428 = vmatprep.subr.mxu0 %v2249_v14  ;;  %v1178_v19 = vld [vmem:[#allocation2 + $0x168] sm:$0xff] }
 0x1b3   :  { %13251 = vst [vmem:[#allocation36_spill] sm:$0xff] %v10541_v60  ;;  %v2505_v44 = vadd.f32 %v10139_v8, %v2504_v7  ;;  %3117 = vmatprep.mubr.f32.mxu0 %v10268_v4  ;;  %8429 = vmatpush3.msra.mxu0 %v2249_v14  ;;  %v10564_v14 = vld [vmem:[#allocation2 + $0x171] sm:$0xff] }
 0x1b4   :  { %v2506_v58 = vpop.f32.mrf.mxu0  ;;  %v2946_v37 = vpop.f32.mrf.mxu1  ;;  %3608 = vmatmul.mubr.f32.gmra.mxu1 %v1177_v55  ;;  %8430 = vmatprep.subr.mxu0 %v2248_v62 }
 0x1b5   :  { %v10558_v50 = vadd.f32 %v10334_v23, %v2505_v44  ;;  %3612 = vmatprep.mubr.f32.mxu1 %v10550_v6  ;;  %8431 = vmatpush3.msra.mxu0 %v2248_v62  ;;  %v2246_v23 = vld [vmem:[%s13180_s1 + $0x430] sm:$0xff] }
 0x1b6   :  { %v2509_v60 = vpop.f32.mrf.mxu0  ;;  %3118 = vmatmul.mubr.f32.gmra.mxu0 %v10074_v52  ;;  %v10562_v4 = vpop.f32.mrf.mxu1  ;;  %8432 = vmatprep.subr.mxu0 %v2247_v21  ;;  %v1179_v62 = vld [vmem:[#allocation2 + $0x170] sm:$0xff] }
 0x1b7   :  { %v2510_v7 = vadd.f32 %v10139_v8, %v2509_v60  ;;  %3122 = vmatprep.mubr.f32.mxu0 %v10292_v15  ;;  %8433 = vmatpush3.msra.mxu0 %v2247_v21  ;;  %v10578_v60 = vld [vmem:[#allocation2 + $0x181] sm:$0xff] }
 0x1b8   :  { %v2511_v55 = vpop.f32.mrf.mxu0  ;;  %v2951_v44 = vpop.f32.mrf.mxu1  ;;  %3613 = vmatmul.mubr.f32.gmra.mxu1 %v1178_v19  ;;  %8434 = vmatprep.subr.mxu0 %v2246_v23 }
 0x1b9   :  { %v10572_v52 = vadd.f32 %v10355_v17, %v2510_v7  ;;  %3617 = vmatprep.mubr.f32.mxu1 %v10564_v14  ;;  %8435 = vmatpush3.msra.mxu0 %v2246_v23  ;;  %v1180_v7 = vld [vmem:[#allocation2 + $0x180] sm:$0xff]  ;;  %v10589_v55 = vld [vmem:[#allocation2 + $0x189] sm:$0xff] }
 0x1ba   :  { %v2514_v58 = vpop.f32.mrf.mxu0  ;;  %3123 = vmatmul.mubr.f32.gmra.mxu0 %v10086_v54  ;;  %v10576_v15 = vpop.f32.mrf.mxu1 }
 0x1bb   :  { %v2515_v21 = vadd.f32 %v10139_v8, %v2514_v58  ;;  %3127 = vmatprep.mubr.f32.mxu0 %v10316_v2 }
 0x1bc   :  { %v2516_v37 = vpop.f32.mrf.mxu0  ;;  %v2956_v19 = vpop.f32.mrf.mxu1  ;;  %3618 = vmatmul.mubr.f32.gmra.mxu1 %v1179_v62  ;;  %v1181_v62 = vld [vmem:[#allocation2 + $0x188] sm:$0xff] }
 0x1bd   :  { %v10583_v17 = vadd.f32 %v10376_v36, %v2515_v21  ;;  %3622 = vmatprep.mubr.f32.mxu1 %v10578_v60  ;;  %v1310_v37 = vld [vmem:[#allocation2 + $0x199] sm:$0xff] }
 0x1be   :  { %v2519_v23 = vpop.f32.mrf.mxu0  ;;  %3128 = vmatmul.mubr.f32.gmra.mxu0 %v10098_v35  ;;  %v10587_v54 = vpop.f32.mrf.mxu1 }
 0x1bf   :  { %v2520_v44 = vadd.f32 %v10139_v8, %v2519_v23  ;;  %3132 = vmatprep.mubr.f32.mxu0 %v10340_v12 }
 0x1c0   :  { %v2521_v2 = vpop.f32.mrf.mxu0  ;;  %v2961_v58 = vpop.f32.mrf.mxu1  ;;  %3623 = vmatmul.mubr.f32.gmra.mxu1 %v1180_v7 }
 0x1c1   :  { %v10594_v36 = vadd.f32 %v10397_v32, %v2520_v44  ;;  %3627 = vmatprep.mubr.f32.mxu1 %v10589_v55  ;;  %v1182_v32 = vld [vmem:[#allocation2 + $0x198] sm:$0xff] }
 0x1c2   :  { %v2524_v21 = vpop.f32.mrf.mxu0  ;;  %3133 = vmatmul.mubr.f32.gmra.mxu0 %v10110_v61  ;;  %v10598_v35 = vpop.f32.mrf.mxu1  ;;  %v1311_v61 = vld [vmem:[#allocation2 + $0x1a1] sm:$0xff] }
 0x1c3   :  { %v2525_v19 = vadd.f32 %v10139_v8, %v2524_v21  ;;  %3137 = vmatprep.mubr.f32.mxu0 %v10361_v51  ;;  %v2245_v51 = vld [vmem:[%s13180_s1 + $0x428] sm:$0xff] }
 0x1c4   :  { %v2526_v12 = vpop.f32.mrf.mxu0  ;;  %v2966_v23 = vpop.f32.mrf.mxu1  ;;  %3628 = vmatmul.mubr.f32.gmra.mxu1 %v1181_v62  ;;  %8436 = vmatprep.subr.mxu0 %v2245_v51 }
 0x1c5   :  { %v10603_v7 = vadd.f32 %v10418_v1, %v2525_v19  ;;  %3632 = vmatprep.mubr.f32.mxu1 %v1310_v37  ;;  %8437 = vmatpush3.msra.mxu0 %v2245_v51  ;;  %v10619_v19 = vld [vmem:[#allocation2 + $0x1e1] sm:$0xff] }
 0x1c6   :  { %v2529_v44 = vpop.f32.mrf.mxu0  ;;  %3138 = vmatmul.mubr.f32.gmra.mxu0 %v10122_v20  ;;  %v10606_v2 = vpop.f32.mrf.mxu1 }
 0x1c7   :  { %v2530_v58 = vadd.f32 %v10139_v8, %v2529_v44  ;;  %3142 = vmatprep.mubr.f32.mxu0 %v10382_v16 }
 0x1c8   :  { %v2531_v62 = vpop.f32.mrf.mxu0  ;;  %v2971_v21 = vpop.f32.mrf.mxu1  ;;  %3633 = vmatmul.mubr.f32.gmra.mxu1 %v1182_v32  ;;  %v1184_v32 = vld [vmem:[#allocation2 + $0x1e0] sm:$0xff] }
 0x1c9   :  { %v10614_v1 = vadd.f32 %v10439_v42, %v2530_v58  ;;  %3637 = vmatprep.mubr.f32.mxu1 %v1311_v61  ;;  %v10631_v61 = vld [vmem:[#allocation2 + $0x1e9] sm:$0xff]  ;;  %v10642_v21 = vld [vmem:[#allocation2 + $0x1f9] sm:$0xff] }
 0x1ca   :  { %v2534_v20 = vpop.f32.mrf.mxu0  ;;  %3143 = vmatmul.mubr.f32.gmra.mxu0 %v10146_v43  ;;  %v10617_v37 = vpop.f32.mrf.mxu1 }
 0x1cb   :  { %v2535_v16 = vadd.f32 %v10139_v8, %v2534_v20  ;;  %3147 = vmatprep.mubr.f32.mxu0 %v10403_v0 }
 0x1cc   :  { %v2536_v12 = vpop.f32.mrf.mxu0  ;;  %v2976_v23 = vpop.f32.mrf.mxu1  ;;  %3638 = vmatmul.mubr.f32.gmra.mxu1 %v10151_v13 }
 0x1cd   :  { %v10625_v42 = vadd.f32 %v10460_v40, %v2535_v16  ;;  %3642 = vmatprep.mubr.f32.mxu1 %v10619_v19  ;;  %v1185_v40 = vld [vmem:[#allocation2 + $0x1e8] sm:$0xff]  ;;  %v1186_v12 = vld [vmem:[#allocation2 + $0x1f8] sm:$0xff] }
 0x1ce   :  { %v2539_v44 = vpop.f32.mrf.mxu0  ;;  %3148 = vmatmul.mubr.f32.gmra.mxu0 %v10168_v11  ;;  %v10629_v43 = vpop.f32.mrf.mxu1 }
 0x1cf   :  { %v2540_v58 = vadd.f32 %v10139_v8, %v2539_v44  ;;  %3152 = vmatprep.mubr.f32.mxu0 %v10424_v41 }
 0x1d0   :  { %v2541_v0 = vpop.f32.mrf.mxu0  ;;  %v2981_v51 = vpop.f32.mrf.mxu1  ;;  %3643 = vmatmul.mubr.f32.gmra.mxu1 %v1184_v32  ;;  %v10653_v32 = vld [vmem:[#allocation2 + $0x201] sm:$0xff] }
 0x1d1   :  { %v10636_v13 = vadd.f32 %v10481_v34, %v2540_v58  ;;  %3647 = vmatprep.mubr.f32.mxu1 %v10631_v61  ;;  %v1037_v58 = vld [vmem:[#allocation2 + $0xc2] sm:$0xff] }
 0x1d2   :  { %v2544_v62 = vpop.f32.mrf.mxu0  ;;  %3153 = vmatmul.mubr.f32.gmra.mxu0 %v10192_v53  ;;  %v10640_v11 = vpop.f32.mrf.mxu1 }
 0x1d3   :  { %v2545_v20 = vadd.f32 %v10139_v8, %v2544_v62  ;;  %3157 = vmatprep.mubr.f32.mxu0 %v10445_v27  ;;  %v2244_v27 = vld [vmem:[%s13180_s1 + $0x420] sm:$0xff]  ;;  %v10667_v62 = vld [vmem:[#allocation2 + $0x211] sm:$0xff] }
 0x1d4   :  { %v2546_v41 = vpop.f32.mrf.mxu0  ;;  %v2986_v16 = vpop.f32.mrf.mxu1  ;;  %3648 = vmatmul.mubr.f32.gmra.mxu1 %v1185_v40  ;;  %8438 = vmatprep.subr.mxu0 %v2244_v27 }
 0x1d5   :  { %v10647_v34 = vadd.f32 %v10498_v30, %v2545_v20  ;;  %3652 = vmatprep.mubr.f32.mxu1 %v10642_v21  ;;  %8439 = vmatpush3.msra.mxu0 %v2244_v27  ;;  %v1038_v16 = vld [vmem:[#allocation2 + $0xca] sm:$0xff]  ;;  %v10677_v27 = vld [vmem:[#allocation2 + $0x219] sm:$0xff] }
 0x1d6   :  { %v2549_v23 = vpop.f32.mrf.mxu0  ;;  %3158 = vmatmul.mubr.f32.gmra.mxu0 %v10216_v24  ;;  %v10651_v53 = vpop.f32.mrf.mxu1  ;;  %v1187_v24 = vld [vmem:[#allocation2 + $0x200] sm:$0xff] }
 0x1d7   :  { %v2550_v44 = vadd.f32 %v10139_v8, %v2549_v23  ;;  %3162 = vmatprep.mubr.f32.mxu0 %v10466_v33  ;;  %v1188_v23 = vld [vmem:[#allocation2 + $0x210] sm:$0xff] }
 0x1d8   :  { %v2551_v30 = vpop.f32.mrf.mxu0  ;;  %v2991_v0 = vpop.f32.mrf.mxu1  ;;  %3653 = vmatmul.mubr.f32.gmra.mxu1 %v1186_v12 }
 0x1d9   :  { %v10661_v51 = vadd.f32 %v10514_v18, %v2550_v44  ;;  %3657 = vmatprep.mubr.f32.mxu1 %v10653_v32 }
 0x1da   :  { %v2554_v40 = vpop.f32.mrf.mxu0  ;;  %3163 = vmatmul.mubr.f32.gmra.mxu0 %v10240_v48  ;;  %v10665_v33 = vpop.f32.mrf.mxu1 }
 0x1db   :  { %v2555_v20 = vadd.f32 %v10139_v8, %v2554_v40  ;;  %3167 = vmatprep.mubr.f32.mxu0 %v1037_v58  ;;  %v10682_v8 = vld [vmem:[%s13182_s2] ss:$0 sm:$0xff] }
 0x1dc   :  { %v2556_v41 = vpop.f32.mrf.mxu0  ;;  %v2996_v12 = vpop.f32.mrf.mxu1  ;;  %3658 = vmatmul.mubr.f32.gmra.mxu1 %v1187_v24  ;;  %v1039_v58 = vld [vmem:[#allocation2 + $0xda] sm:$0xff] }
 0x1dd   :  { %v10671_v18 = vadd.f32 %v10531_v63, %v2555_v20  ;;  %3662 = vmatprep.mubr.f32.mxu1 %v10667_v62  ;;  %v10692_v41 = vld [vmem:[#allocation2 + $0x229] sm:$0xff] }
 0x1de   :  { %v2559_v44 = vpop.f32.mrf.mxu0  ;;  %3168 = vmatmul.mubr.f32.gmra.mxu0 %v10264_v45  ;;  %v10675_v48 = vpop.f32.mrf.mxu1  ;;  %v1189_v45 = vld [vmem:[#allocation2 + $0x218] sm:$0xff] }
 0x1df   :  { %v2560_v30 = vadd.f32 %v10682_v8, %v2559_v44  ;;  %3172 = vmatprep.mubr.f32.mxu0 %v1038_v16  ;;  %v1040_v44 = vld [vmem:[#allocation2 + $0xe2] sm:$0xff] }
 0x1e0   :  { %v2561_v63 = vpop.f32.mrf.mxu0  ;;  %v3001_v0 = vpop.f32.mrf.mxu1  ;;  %3663 = vmatmul.mubr.f32.gmra.mxu1 %v1188_v23  ;;  %v1190_v23 = vld [vmem:[#allocation2 + $0x228] sm:$0xff] }
 0x1e1   :  { %v10686_v24 = vadd.f32 %v10548_v46, %v2560_v30  ;;  %3667 = vmatprep.mubr.f32.mxu1 %v10677_v27  ;;  %v10702_v0 = vld [vmem:[#allocation2 + $0x231] sm:$0xff] }
 0x1e2   :  { %v2564_v40 = vpop.f32.mrf.mxu0  ;;  %3173 = vmatmul.mubr.f32.gmra.mxu0 %v10288_v47  ;;  %v10690_v20 = vpop.f32.mrf.mxu1 }
 0x1e3   :  { %13252 = vst [vmem:[#allocation37_spill] sm:$0xff] %v10686_v24  ;;  %v2565_v12 = vadd.f32 %v10682_v8, %v2564_v40  ;;  %3177 = vmatprep.mubr.f32.mxu0 %v1039_v58  ;;  %v2243_v58 = vld [vmem:[%s13180_s1 + $0x418] sm:$0xff]  ;;  %v10751_v24 = vld [vmem:[#allocation2 + $0x261] sm:$0xff] }
 0x1e4   :  { %v2566_v16 = vpop.f32.mrf.mxu0  ;;  %v3006_v63 = vpop.f32.mrf.mxu1  ;;  %3668 = vmatmul.mubr.f32.gmra.mxu1 %v1189_v45  ;;  %8440 = vmatprep.subr.mxu0 %v2243_v58 }
 0x1e5   :  { %v10696_v46 = vadd.f32 %v10562_v4, %v2565_v12  ;;  %3672 = vmatprep.mubr.f32.mxu1 %v10692_v41  ;;  %v1041_v4 = vld [vmem:[#allocation2 + $0xf2] sm:$0xff]  ;;  %8441 = vmatpush3.msra.mxu0 %v2243_v58 }
 0x1e6   :  { %v2569_v30 = vpop.f32.mrf.mxu0  ;;  %3178 = vmatmul.mubr.f32.gmra.mxu0 %v10312_v22  ;;  %v10700_v47 = vpop.f32.mrf.mxu1  ;;  %v1191_v22 = vld [vmem:[#allocation2 + $0x230] sm:$0xff] }
 0x1e7   :  { %13253 = vst [vmem:[#allocation38_spill] sm:$0xff] %v10696_v46  ;;  %v2570_v40 = vadd.f32 %v10682_v8, %v2569_v30  ;;  %3182 = vmatprep.mubr.f32.mxu0 %v1040_v44  ;;  %v10715_v30 = vld [vmem:[#allocation2 + $0x241] sm:$0xff] }
 0x1e8   :  { %v2571_v45 = vpop.f32.mrf.mxu0  ;;  %v3011_v12 = vpop.f32.mrf.mxu1  ;;  %3673 = vmatmul.mubr.f32.gmra.mxu1 %v1190_v23  ;;  %v1042_v23 = vld [vmem:[#allocation2 + $0xfa] sm:$0xff] }
 0x1e9   :  { %v10709_v16 = vadd.f32 %v10576_v15, %v2570_v40  ;;  %3677 = vmatprep.mubr.f32.mxu1 %v10702_v0  ;;  %v1192_v40 = vld [vmem:[#allocation2 + $0x240] sm:$0xff] }
 0x1ea   :  { %v2574_v63 = vpop.f32.mrf.mxu0  ;;  %3183 = vmatmul.mubr.f32.gmra.mxu0 %v10336_v10  ;;  %v10713_v44 = vpop.f32.mrf.mxu1 }
 0x1eb   :  { %13254 = vst [vmem:[#allocation39_spill] sm:$0xff] %v10709_v16  ;;  %v2575_v45 = vadd.f32 %v10682_v8, %v2574_v63  ;;  %3187 = vmatprep.mubr.f32.mxu0 %v1041_v4  ;;  %v10725_v16 = vld [vmem:[#allocation2 + $0x249] sm:$0xff] }
 0x1ec   :  { %v2576_v12 = vpop.f32.mrf.mxu0  ;;  %v3016_v46 = vpop.f32.mrf.mxu1  ;;  %3678 = vmatmul.mubr.f32.gmra.mxu1 %v1191_v22 }
 0x1ed   :  { %v10719_v15 = vadd.f32 %v10587_v54, %v2575_v45  ;;  %3682 = vmatprep.mubr.f32.mxu1 %v10715_v30  ;;  %v1043_v12 = vld [vmem:[#allocation2 + $0x10a] sm:$0xff]  ;;  %v6125_v54 = vld [vmem:[%s13183_s3 + $0x78] sm:$0xff] }
 0x1ee   :  { %v2579_v58 = vpop.f32.mrf.mxu0  ;;  %3188 = vmatmul.mubr.f32.gmra.mxu0 %v10357_v5  ;;  %v10723_v10 = vpop.f32.mrf.mxu1  ;;  %v1193_v5 = vld [vmem:[#allocation2 + $0x248] sm:$0xff]  ;;  %6278 = vmatpush1.msra.mxu1 %v6125_v54 }
 0x1ef   :  { %13255 = vst [vmem:[#allocation40_spill] sm:$0xff] %v10719_v15  ;;  %v2580_v63 = vadd.f32 %v10682_v8, %v2579_v58  ;;  %3192 = vmatprep.mubr.f32.mxu0 %v1042_v23  ;;  %v10738_v23 = vld [vmem:[#allocation2 + $0x259] sm:$0xff] }
 0x1f0   :  { %v2581_v4 = vpop.f32.mrf.mxu0  ;;  %v3021_v46 = vpop.f32.mrf.mxu1  ;;  %3683 = vmatmul.mubr.f32.gmra.mxu1 %v1192_v40 }
 0x1f1   :  { %v10732_v22 = vadd.f32 %v10598_v35, %v2580_v63  ;;  %3687 = vmatprep.mubr.f32.mxu1 %v10725_v16  ;;  %v10740_v4 = vld [vmem:[#allocation2 + $0x8] sm:$0xff]  ;;  %v1044_v63 = vld [vmem:[#allocation2 + $0x112] sm:$0xff] }
 0x1f2   :  { %v2584_v45 = vpop.f32.mrf.mxu0  ;;  %3193 = vmatmul.mubr.f32.gmra.mxu0 %v10378_v3  ;;  %v10736_v58 = vpop.f32.mrf.mxu1  ;;  %6279 = vmatprep.subr.mxu1 %v10740_v4  ;;  %v1194_v3 = vld [vmem:[#allocation2 + $0x258] sm:$0xff] }
 0x1f3   :  { %13256 = vst [vmem:[#allocation41_spill] sm:$0xff] %v10732_v22  ;;  %v2585_v40 = vadd.f32 %v10682_v8, %v2584_v45  ;;  %3197 = vmatprep.mubr.f32.mxu0 %v1043_v12  ;;  %v2242_v12 = vld [vmem:[%s13180_s1 + $0x410] sm:$0xff] }
 0x1f4   :  { %v2586_v35 = vpop.f32.mrf.mxu0  ;;  %v3026_v46 = vpop.f32.mrf.mxu1  ;;  %3688 = vmatmul.mubr.f32.gmra.mxu1 %v1193_v5  ;;  %8442 = vmatprep.subr.mxu0 %v2242_v12 }
 0x1f5   :  { %v10745_v54 = vadd.f32 %v10606_v2, %v2585_v40  ;;  %3692 = vmatprep.mubr.f32.mxu1 %v10738_v23  ;;  %v6124_v2 = vld [vmem:[%s13183_s3 + $0x70] sm:$0xff]  ;;  %v1045_v40 = vld [vmem:[#allocation2 + $0x122] sm:$0xff]  ;;  %8443 = vmatpush3.msra.mxu0 %v2242_v12 }
 0x1f6   :  { %v2589_v22 = vpop.f32.mrf.mxu0  ;;  %3198 = vmatmul.mubr.f32.gmra.mxu0 %v10399_v59  ;;  %v10749_v15 = vpop.f32.mrf.mxu1  ;;  %v10765_v46 = vld [vmem:[#allocation2 + $0x271] sm:$0xff]  ;;  %6280 = vmatpush1.msra.mxu1 %v6124_v2 }
 0x1f7   :  { %13257 = vst [vmem:[#allocation42_spill] sm:$0xff] %v10745_v54  ;;  %v2590_v45 = vadd.f32 %v10682_v8, %v2589_v22  ;;  %3202 = vmatprep.mubr.f32.mxu0 %v1044_v63  ;;  %v1195_v22 = vld [vmem:[#allocation2 + $0x260] sm:$0xff]  ;;  %6281 = vmatprep.subr.mxu1 %v10740_v4 }
 0x1f8   :  { %v2591_v5 = vpop.f32.mrf.mxu0  ;;  %3693 = vmatmul.mubr.f32.gmra.mxu1 %v1194_v3  ;;  %v3031_v35 = vpop.f32.mrf.mxu1 }
 0x1f9   :  { %v10761_v59 = vadd.f32 %v10617_v37, %v2590_v45  ;;  %3697 = vmatprep.mubr.f32.mxu1 %v10751_v24  ;;  %v1046_v5 = vld [vmem:[#allocation2 + $0x12a] sm:$0xff] }
 0x1fa   :  { %v2594_v63 = vpop.f32.mrf.mxu0  ;;  %3203 = vmatmul.mubr.f32.gmra.mxu0 %v10420_v26  ;;  %v1196_v45 = vld [vmem:[#allocation2 + $0x270] sm:$0xff]  ;;  %v10774_v26 = vld [vmem:[#allocation2 + $0x279] sm:$0xff] }
 0x1fb   :  { %v2595_v54 = vadd.f32 %v10682_v8, %v2594_v63  ;;  %3207 = vmatprep.mubr.f32.mxu0 %v1045_v40  ;;  %v6123_v40 = vld [vmem:[%s13183_s3 + $0x68] sm:$0xff] }
 0x1fc   :  { %v2596_v3 = vpop.f32.mrf.mxu0  ;;  %3698 = vmatmul.mubr.f32.gmra.mxu1 %v1195_v22  ;;  %v1047_v22 = vld [vmem:[#allocation2 + $0x13a] sm:$0xff]  ;;  %v10785_v63 = vld [vmem:[#allocation2 + $0x289] sm:$0xff] }
 0x1fd   :  { %v10770_v37 = vadd.f32 %v10629_v43, %v2595_v54  ;;  %3702 = vmatprep.mubr.f32.mxu1 %v10765_v46  ;;  %v1197_v54 = vld [vmem:[#allocation2 + $0x278] sm:$0xff]  ;;  %6282 = vmatpush1.msra.mxu1 %v6123_v40 }
 0x1fe   :  { %v2599_v12 = vpop.f32.mrf.mxu0  ;;  %3208 = vmatmul.mubr.f32.gmra.mxu0 %v10441_v39  ;;  %6283 = vmatprep.subr.mxu1 %v10740_v4 }
 0x1ff   :  { %v2600_v2 = vadd.f32 %v10682_v8, %v2599_v12  ;;  %3212 = vmatprep.mubr.f32.mxu0 %v1046_v5  ;;  %v1048_v12 = vld [vmem:[#allocation2 + $0x142] sm:$0xff] }
 0x200   :  { %v2601_v35 = vpop.f32.mrf.mxu0  ;;  %3703 = vmatmul.mubr.f32.gmra.mxu1 %v1196_v45  ;;  %v1198_v45 = vld [vmem:[#allocation2 + $0x288] sm:$0xff] }
 0x201   :  { %v10781_v43 = vadd.f32 %v10640_v11, %v2600_v2  ;;  %3707 = vmatprep.mubr.f32.mxu1 %v10774_v26  ;;  %v2241_v35 = vld [vmem:[%s13180_s1 + $0x408] sm:$0xff] }
 0x202   :  { %v2604_v39 = vpop.f32.mrf.mxu0  ;;  %3213 = vmatmul.mubr.f32.gmra.mxu0 %v10462_v28  ;;  %v10794_v28 = vld [vmem:[#allocation2 + $0x291] sm:$0xff]  ;;  %8444 = vmatprep.subr.mxu0 %v2241_v35 }
 0x203   :  { %13258 = vst [vmem:[#allocation43_spill] sm:$0xff] %v10781_v43  ;;  %v2605_v3 = vadd.f32 %v10682_v8, %v2604_v39  ;;  %3217 = vmatprep.mubr.f32.mxu0 %v1047_v22  ;;  %8445 = vmatpush3.msra.mxu0 %v2241_v35 }
 0x204   :  { %v2606_v5 = vpop.f32.mrf.mxu0  ;;  %3708 = vmatmul.mubr.f32.gmra.mxu1 %v1197_v54  ;;  %v1049_v54 = vld [vmem:[#allocation2 + $0x152] sm:$0xff] }
 0x205   :  { %v10790_v11 = vadd.f32 %v10651_v53, %v2605_v3  ;;  %3712 = vmatprep.mubr.f32.mxu1 %v10785_v63  ;;  %v6122_v53 = vld [vmem:[%s13183_s3 + $0x60] sm:$0xff] }
 0x206   :  { %v2609_v2 = vpop.f32.mrf.mxu0  ;;  %3218 = vmatmul.mubr.f32.gmra.mxu0 %v10483_v57  ;;  %v1199_v57 = vld [vmem:[#allocation2 + $0x290] sm:$0xff]  ;;  %v10808_v5 = vld [vmem:[#allocation2 + $0x2a1] sm:$0xff]  ;;  %6284 = vmatpush1.msra.mxu1 %v6122_v53 }
 0x207   :  { %13259 = vst [vmem:[#allocation44_spill] sm:$0xff] %v10790_v11  ;;  %v2610_v40 = vadd.f32 %v10682_v8, %v2609_v2  ;;  %3222 = vmatprep.mubr.f32.mxu0 %v1048_v12  ;;  %6285 = vmatprep.subr.mxu1 %v10740_v4  ;;  %v1050_v2 = vld [vmem:[#allocation2 + $0x15a] sm:$0xff] }
 0x208   :  { %v2611_v22 = vpop.f32.mrf.mxu0  ;;  %3713 = vmatmul.mubr.f32.gmra.mxu1 %v1198_v45 }
 0x209   :  { %v10804_v39 = vadd.f32 %v10665_v33, %v2610_v40  ;;  %3717 = vmatprep.mubr.f32.mxu1 %v10794_v28  ;;  %v1200_v40 = vld [vmem:[#allocation2 + $0x2a0] sm:$0xff] }
 0x20a   :  { %v2614_v3 = vpop.f32.mrf.mxu0  ;;  %3223 = vmatmul.mubr.f32.gmra.mxu0 %v10500_v38  ;;  %v10817_v38 = vld [vmem:[#allocation2 + $0x2a9] sm:$0xff] }
 0x20b   :  { %13260 = vst [vmem:[#allocation45_spill] sm:$0xff] %v10804_v39  ;;  %v2615_v12 = vadd.f32 %v10682_v8, %v2614_v3  ;;  %3227 = vmatprep.mubr.f32.mxu0 %v1049_v54  ;;  %v6121_v54 = vld [vmem:[%s13183_s3 + $0x58] sm:$0xff] }
 0x20c   :  { %v2616_v45 = vpop.f32.mrf.mxu0  ;;  %3718 = vmatmul.mubr.f32.gmra.mxu1 %v1199_v57 }
 0x20d   :  { %v10813_v33 = vadd.f32 %v10675_v48, %v2615_v12  ;;  %3722 = vmatprep.mubr.f32.mxu1 %v10808_v5  ;;  %v10820_v22 = vpop.f32.mrf.mxu1  ;;  %v1051_v48 = vld [vmem:[#allocation2 + $0x16a] sm:$0xff]  ;;  %6286 = vmatpush1.msra.mxu1 %v6121_v54  ;;  %v1202_v54 = vld [vmem:[#allocation2 + $0x2b8] sm:$0xff] }
 0x20e   :  { %v2619_v35 = vpop.f32.mrf.mxu0  ;;  %3228 = vmatmul.mubr.f32.gmra.mxu0 %v10516_v31  ;;  %13262 = vst [vmem:[#allocation47_spill] sm:$0xff] %v10820_v22  ;;  %v1201_v31 = vld [vmem:[#allocation2 + $0x2a8] sm:$0xff]  ;;  %6287 = vmatprep.subr.mxu1 %v10740_v4 }
 0x20f   :  { %13261 = vst [vmem:[#allocation46_spill] sm:$0xff] %v10813_v33  ;;  %v2620_v53 = vadd.f32 %v10682_v8, %v2619_v35  ;;  %3232 = vmatprep.mubr.f32.mxu0 %v1050_v2  ;;  %v3486_v12 = vpop.f32.mrf.mxu1  ;;  %v10830_v2 = vld [vmem:[#allocation2 + $0x2b9] sm:$0xff]  ;;  %v10841_v22 = vld [vmem:[#allocation2 + $0x2c1] sm:$0xff] }
 0x210   :  { %v2621_v57 = vpop.f32.mrf.mxu0  ;;  %3723 = vmatmul.mubr.f32.gmra.mxu1 %v1200_v40  ;;  %v10965_v33 = vld [vmem:[#allocation2 + $0x339] sm:$0xff] }
 0x211   :  { %v10826_v3 = vadd.f32 %v10690_v20, %v2620_v53  ;;  %3727 = vmatprep.mubr.f32.mxu1 %v10817_v38  ;;  %v10834_v57 = vpop.f32.mrf.mxu1  ;;  %v1052_v20 = vld [vmem:[#allocation2 + $0x172] sm:$0xff] }
 0x212   :  { %v2624_v45 = vpop.f32.mrf.mxu0  ;;  %3233 = vmatmul.mubr.f32.gmra.mxu0 %v10533_v56  ;;  %13264 = vst [vmem:[#allocation49_spill] sm:$0xff] %v10834_v57 }
 0x213   :  { %13263 = vst [vmem:[#allocation48_spill] sm:$0xff] %v10826_v3  ;;  %v2625_v35 = vadd.f32 %v10682_v8, %v2624_v45  ;;  %3237 = vmatprep.mubr.f32.mxu0 %v1051_v48  ;;  %v3491_v12 = vpop.f32.mrf.mxu1 }
 0x214   :  { %v2626_v40 = vpop.f32.mrf.mxu0  ;;  %3728 = vmatmul.mubr.f32.gmra.mxu1 %v1201_v31  ;;  %v2240_v31 = vld [vmem:[%s13180_s1 + $0x400] sm:$0xff] }
 0x215   :  { %v10837_v53 = vadd.f32 %v10700_v47, %v2625_v35  ;;  %3732 = vmatprep.mubr.f32.mxu1 %v10830_v2  ;;  %v10844_v48 = vpop.f32.mrf.mxu1  ;;  %v6120_v47 = vld [vmem:[%s13183_s3 + $0x50] sm:$0xff]  ;;  %v1053_v40 = vld [vmem:[#allocation2 + $0x182] sm:$0xff]  ;;  %8446 = vmatprep.subr.mxu0 %v2240_v31 }
 0x216   :  { %v2629_v56 = vpop.f32.mrf.mxu0  ;;  %3238 = vmatmul.mubr.f32.gmra.mxu0 %v10550_v6  ;;  %13266 = vst [vmem:[#allocation51_spill] sm:$0xff] %v10844_v48  ;;  %v10857_v48 = vld [vmem:[#allocation2 + $0x2d1] sm:$0xff]  ;;  %6288 = vmatpush1.msra.mxu1 %v6120_v47 }
 0x217   :  { %13265 = vst [vmem:[#allocation50_spill] sm:$0xff] %v10837_v53  ;;  %v2630_v45 = vadd.f32 %v10682_v8, %v2629_v56  ;;  %3242 = vmatprep.mubr.f32.mxu0 %v1052_v20  ;;  %v3496_v12 = vpop.f32.mrf.mxu1  ;;  %v1203_v20 = vld [vmem:[#allocation2 + $0x2c0] sm:$0xff]  ;;  %8447 = vmatpush3.msra.mxu0 %v2240_v31 }
 0x218   :  { %v2631_v35 = vpop.f32.mrf.mxu0  ;;  %3733 = vmatmul.mubr.f32.gmra.mxu1 %v1202_v54  ;;  %6289 = vmatprep.subr.mxu1 %v10740_v4  ;;  %v1054_v54 = vld [vmem:[#allocation2 + $0x18a] sm:$0xff]  ;;  %v10941_v53 = vld [vmem:[#allocation2 + $0x321] sm:$0xff] }
 0x219   :  { %v10853_v6 = vadd.f32 %v10713_v44, %v2630_v45  ;;  %3737 = vmatprep.mubr.f32.mxu1 %v10841_v22  ;;  %v10860_v35 = vpop.f32.mrf.mxu1  ;;  %6662 = vmatprep.subr.mxu0 %v10740_v4 }
 0x21a   :  { %v2634_v56 = vpop.f32.mrf.mxu0  ;;  %3243 = vmatmul.mubr.f32.gmra.mxu0 %v10564_v14  ;;  %13268 = vst [vmem:[#allocation53_spill] sm:$0xff] %v10860_v35  ;;  %v1204_v14 = vld [vmem:[#allocation2 + $0x2d0] sm:$0xff] }
 0x21b   :  { %13267 = vst [vmem:[#allocation52_spill] sm:$0xff] %v10853_v6  ;;  %v2635_v57 = vadd.f32 %v10682_v8, %v2634_v56  ;;  %3247 = vmatprep.mubr.f32.mxu0 %v1053_v40  ;;  %v3501_v31 = vpop.f32.mrf.mxu1  ;;  %v10869_v40 = vld [vmem:[#allocation2 + $0x2d9] sm:$0xff] }
 0x21c   :  { %v2636_v44 = vpop.f32.mrf.mxu0  ;;  %3738 = vmatmul.mubr.f32.gmra.mxu1 %v1203_v20  ;;  %v6119_v20 = vld [vmem:[%s13183_s3 + $0x48] sm:$0xff] }
 0x21d   :  { %v10865_v45 = vadd.f32 %v10723_v10, %v2635_v57  ;;  %3742 = vmatprep.mubr.f32.mxu1 %v10857_v48  ;;  %v10872_v56 = vpop.f32.mrf.mxu1  ;;  %v1055_v57 = vld [vmem:[#allocation2 + $0x1ca] sm:$0xff]  ;;  %6290 = vmatpush1.msra.mxu1 %v6119_v20 }
 0x21e   :  { %v2639_v47 = vpop.f32.mrf.mxu0  ;;  %3248 = vmatmul.mubr.f32.gmra.mxu0 %v10578_v60  ;;  %13270 = vst [vmem:[#allocation55_spill] sm:$0xff] %v10872_v56  ;;  %v1205_v60 = vld [vmem:[#allocation2 + $0x2d8] sm:$0xff]  ;;  %6291 = vmatprep.subr.mxu1 %v10740_v4  ;;  %v1206_v56 = vld [vmem:[#allocation2 + $0x2e8] sm:$0xff] }
 0x21f   :  { %13269 = vst [vmem:[#allocation54_spill] sm:$0xff] %v10865_v45  ;;  %v2640_v12 = vadd.f32 %v10682_v8, %v2639_v47  ;;  %3252 = vmatprep.mubr.f32.mxu0 %v1054_v54  ;;  %v3506_v31 = vpop.f32.mrf.mxu1  ;;  %v10882_v54 = vld [vmem:[#allocation2 + $0x2e9] sm:$0xff] }
 0x220   :  { %v2641_v10 = vpop.f32.mrf.mxu0  ;;  %3743 = vmatmul.mubr.f32.gmra.mxu1 %v1204_v14  ;;  %v2330_v31 = vadd.f32 %v10682_v8, %v9940_v49  ;;  %v10917_v45 = vld [vmem:[#allocation2 + $0x309] sm:$0xff] }
 0x221   :  { %v10878_v44 = vadd.f32 %v10736_v58, %v2640_v12  ;;  %3747 = vmatprep.mubr.f32.mxu1 %v10869_v40  ;;  %v863_v10 = vld [vmem:[#allocation2 + $0x1c9] sm:$0xff]  ;;  %v10886_v14 = vpop.f32.mrf.mxu1  ;;  %v1056_v12 = vld [vmem:[#allocation2 + $0x1d2] sm:$0xff] }
 0x222   :  { %v2644_v35 = vpop.f32.mrf.mxu0  ;;  %3253 = vmatmul.mubr.f32.gmra.mxu0 %v10589_v55  ;;  %13272 = vst [vmem:[#allocation57_spill] sm:$0xff] %v10886_v14  ;;  %v1057_v14 = vld [vmem:[#allocation2 + $0x1e2] sm:$0xff] }
 0x223   :  { %13271 = vst [vmem:[#allocation56_spill] sm:$0xff] %v10878_v44  ;;  %v2645_v47 = vadd.f32 %v10682_v8, %v2644_v35  ;;  %3257 = vmatprep.mubr.f32.mxu0 %v1055_v57  ;;  %v3511_v55 = vpop.f32.mrf.mxu1  ;;  %v10894_v35 = vld [vmem:[#allocation2 + $0x2f1] sm:$0xff] }
 0x224   :  { %v2646_v58 = vpop.f32.mrf.mxu0  ;;  %3748 = vmatmul.mubr.f32.gmra.mxu1 %v1205_v60  ;;  %v6118_v60 = vld [vmem:[%s13183_s3 + $0x40] sm:$0xff] }
 0x225   :  { %v10891_v20 = vadd.f32 %v10749_v15, %v2645_v47  ;;  %3752 = vmatprep.mubr.f32.mxu1 %v10882_v54  ;;  %v864_v58 = vld [vmem:[#allocation2 + $0x1d1] sm:$0xff]  ;;  %v10901_v15 = vpop.f32.mrf.mxu1  ;;  %v2335_v47 = vadd.f32 %v10682_v8, %v9951_v29  ;;  %6292 = vmatpush1.msra.mxu1 %v6118_v60  ;;  %v13276_v29 = vld [vmem:[#allocation6_spill] sm:$0xff] }
 0x226   :  { %v2714_v44 = vpop.f32.mrf.mxu0  ;;  %3258 = vmatmul.mubr.f32.gmra.mxu0 %v863_v10  ;;  %13274 = vst [vmem:[#allocation59_spill] sm:$0xff] %v10901_v15  ;;  %v1207_v10 = vld [vmem:[#allocation2 + $0x2f0] sm:$0xff]  ;;  %6293 = vmatprep.subr.mxu1 %v10740_v4  ;;  %v1208_v60 = vld [vmem:[#allocation2 + $0x300] sm:$0xff] }
 0x227   :  { %13273 = vst [vmem:[#allocation58_spill] sm:$0xff] %v10891_v20  ;;  %v10896_v57 = vadd.f32 %v2714_v44, %v2330_v31  ;;  %3262 = vmatprep.mubr.f32.mxu0 %v1056_v12  ;;  %v3516_v12 = vpop.f32.mrf.mxu1  ;;  %v10906_v31 = vld [vmem:[#allocation2 + $0x301] sm:$0xff]  ;;  %v1058_v15 = vld [vmem:[#allocation2 + $0x1ea] sm:$0xff]  ;;  %v2340_v20 = vadd.f32 %v10682_v8, %v13276_v29 }
 0x228   :  { %v2716_v49 = vpop.f32.mrf.mxu0  ;;  %3753 = vmatmul.mubr.f32.gmra.mxu1 %v1206_v56  ;;  %v13278_v29 = vld [vmem:[#allocation7_spill] sm:$0xff] }
 0x229   :  { %3757 = vmatprep.mubr.f32.mxu1 %v10894_v35  ;;  %v10911_v56 = vpop.f32.mrf.mxu1 }
 0x22a   :  { %v2719_v44 = vpop.f32.mrf.mxu0  ;;  %3263 = vmatmul.mubr.f32.gmra.mxu0 %v864_v58  ;;  %13275 = vst [vmem:[#allocation60_spill] sm:$0xff] %v10911_v56  ;;  %v2345_v56 = vadd.f32 %v10682_v8, %v13278_v29  ;;  %v13280_v29 = vld [vmem:[#allocation8_spill] sm:$0xff] }
 0x22b   :  { %v10909_v55 = vadd.f32 %v2719_v44, %v2335_v47  ;;  %3267 = vmatprep.mubr.f32.mxu0 %v1057_v14  ;;  %v3521_v12 = vpop.f32.mrf.mxu1  ;;  %v6117_v14 = vld [vmem:[%s13183_s3 + $0x38] sm:$0xff]  ;;  %v2350_v6 = vadd.f32 %v10682_v8, %v13280_v29 }
 0x22c   :  { %v2721_v49 = vpop.f32.mrf.mxu0  ;;  %3758 = vmatmul.mubr.f32.gmra.mxu1 %v1207_v10  ;;  %v1059_v44 = vld [vmem:[#allocation2 + $0x1fa] sm:$0xff] }
 0x22d   :  { %3762 = vmatprep.mubr.f32.mxu1 %v10906_v31  ;;  %v10924_v49 = vpop.f32.mrf.mxu1  ;;  %6294 = vmatpush1.msra.mxu1 %v6117_v14  ;;  %v1210_v14 = vld [vmem:[#allocation2 + $0x318] sm:$0xff] }
 0x22e   :  { %v2724_v58 = vpop.f32.mrf.mxu0  ;;  %3268 = vmatmul.mubr.f32.gmra.mxu0 %v10619_v19  ;;  %13277 = vst [vmem:[#allocation6_spill] sm:$0xff] %v10924_v49  ;;  %v1209_v19 = vld [vmem:[#allocation2 + $0x308] sm:$0xff]  ;;  %6295 = vmatprep.subr.mxu1 %v10740_v4  ;;  %v13282_v29 = vld [vmem:[#allocation9_spill] sm:$0xff] }
 0x22f   :  { %v10919_v47 = vadd.f32 %v2724_v58, %v2340_v20  ;;  %3272 = vmatprep.mubr.f32.mxu0 %v1058_v15  ;;  %v3526_v20 = vpop.f32.mrf.mxu1  ;;  %v10930_v15 = vld [vmem:[#allocation2 + $0x319] sm:$0xff] }
 0x230   :  { %v2726_v10 = vpop.f32.mrf.mxu0  ;;  %3763 = vmatmul.mubr.f32.gmra.mxu1 %v1208_v60  ;;  %v1060_v60 = vld [vmem:[#allocation2 + $0x202] sm:$0xff] }
 0x231   :  { %3767 = vmatprep.mubr.f32.mxu1 %v10917_v45  ;;  %v10935_v49 = vpop.f32.mrf.mxu1 }
 0x232   :  { %v2729_v12 = vpop.f32.mrf.mxu0  ;;  %3273 = vmatmul.mubr.f32.gmra.mxu0 %v10631_v61  ;;  %13279 = vst [vmem:[#allocation7_spill] sm:$0xff] %v10935_v49  ;;  %v2355_v49 = vadd.f32 %v10682_v8, %v13282_v29  ;;  %v13284_v29 = vld [vmem:[#allocation10_spill] sm:$0xff] }
 0x233   :  { %v10933_v58 = vadd.f32 %v2729_v12, %v2345_v56  ;;  %3277 = vmatprep.mubr.f32.mxu0 %v1059_v44  ;;  %v3531_v20 = vpop.f32.mrf.mxu1  ;;  %v6116_v44 = vld [vmem:[%s13183_s3 + $0x30] sm:$0xff]  ;;  %v2360_v3 = vadd.f32 %v10682_v8, %v13284_v29  ;;  %v13286_v29 = vld [vmem:[#allocation11_spill] sm:$0xff] }
 0x234   :  { %v2731_v10 = vpop.f32.mrf.mxu0  ;;  %3768 = vmatmul.mubr.f32.gmra.mxu1 %v1209_v19  ;;  %v1061_v12 = vld [vmem:[#allocation2 + $0x212] sm:$0xff] }
 0x235   :  { %3772 = vmatprep.mubr.f32.mxu1 %v10930_v15  ;;  %6296 = vmatpush1.msra.mxu1 %v6116_v44  ;;  %v1212_v44 = vld [vmem:[#allocation2 + $0x330] sm:$0xff] }
 0x236   :  { %v2734_v61 = vpop.f32.mrf.mxu0  ;;  %3278 = vmatmul.mubr.f32.gmra.mxu0 %v10642_v21  ;;  %v1211_v21 = vld [vmem:[#allocation2 + $0x320] sm:$0xff]  ;;  %6297 = vmatprep.subr.mxu1 %v10740_v4 }
 0x237   :  { %v10943_v56 = vadd.f32 %v2734_v61, %v2350_v6  ;;  %3282 = vmatprep.mubr.f32.mxu0 %v1060_v60  ;;  %v10954_v60 = vld [vmem:[#allocation2 + $0x331] sm:$0xff] }
 0x238   :  { %v2736_v19 = vpop.f32.mrf.mxu0  ;;  %v10948_v10 = vpop.f32.mrf.mxu1  ;;  %3773 = vmatmul.mubr.f32.gmra.mxu1 %v1210_v14  ;;  %v1062_v14 = vld [vmem:[#allocation2 + $0x21a] sm:$0xff] }
 0x239   :  { %13281 = vst [vmem:[#allocation8_spill] sm:$0xff] %v10948_v10  ;;  %3777 = vmatprep.mubr.f32.mxu1 %v10941_v53 }
 0x23a   :  { %v2739_v20 = vpop.f32.mrf.mxu0  ;;  %3283 = vmatmul.mubr.f32.gmra.mxu0 %v10653_v32  ;;  %v3536_v6 = vpop.f32.mrf.mxu1 }
 0x23b   :  { %v10957_v61 = vadd.f32 %v2739_v20, %v2355_v49  ;;  %3287 = vmatprep.mubr.f32.mxu0 %v1061_v12  ;;  %v6115_v12 = vld [vmem:[%s13183_s3 + $0x28] sm:$0xff] }
 0x23c   :  { %v2741_v19 = vpop.f32.mrf.mxu0  ;;  %v10959_v10 = vpop.f32.mrf.mxu1  ;;  %3778 = vmatmul.mubr.f32.gmra.mxu1 %v1211_v21  ;;  %v1063_v20 = vld [vmem:[#allocation2 + $0x22a] sm:$0xff] }
 0x23d   :  { %13283 = vst [vmem:[#allocation9_spill] sm:$0xff] %v10959_v10  ;;  %3782 = vmatprep.mubr.f32.mxu1 %v10954_v60  ;;  %v2365_v10 = vadd.f32 %v10682_v8, %v13286_v29  ;;  %6298 = vmatpush1.msra.mxu1 %v6115_v12  ;;  %v13287_v29 = vld [vmem:[#allocation12_spill] sm:$0xff]  ;;  %v1214_v12 = vld [vmem:[#allocation2 + $0x348] sm:$0xff] }
 0x23e   :  { %v2744_v32 = vpop.f32.mrf.mxu0  ;;  %3288 = vmatmul.mubr.f32.gmra.mxu0 %v10667_v62  ;;  %v3541_v6 = vpop.f32.mrf.mxu1  ;;  %v1213_v62 = vld [vmem:[#allocation2 + $0x338] sm:$0xff]  ;;  %6299 = vmatprep.subr.mxu1 %v10740_v4  ;;  %v2370_v39 = vadd.f32 %v10682_v8, %v13287_v29  ;;  %v1066_v29 = vld [vmem:[#allocation2 + $0x24a] sm:$0xff] }
 0x23f   :  { %v10967_v49 = vadd.f32 %v2744_v32, %v2360_v3  ;;  %3292 = vmatprep.mubr.f32.mxu0 %v1062_v14  ;;  %v1342_v14 = vld [vmem:[#allocation2 + $0x349] sm:$0xff] }
 0x240   :  { %v2746_v21 = vpop.f32.mrf.mxu0  ;;  %v10972_v19 = vpop.f32.mrf.mxu1  ;;  %3783 = vmatmul.mubr.f32.gmra.mxu1 %v1212_v44 }
 0x241   :  { %13285 = vst [vmem:[#allocation10_spill] sm:$0xff] %v10972_v19  ;;  %3787 = vmatprep.mubr.f32.mxu1 %v10965_v33  ;;  %v1064_v19 = vld [vmem:[#allocation2 + $0x232] sm:$0xff] }
 0x242   :  { %v2749_v6 = vpop.f32.mrf.mxu0  ;;  %3293 = vmatmul.mubr.f32.gmra.mxu0 %v10677_v27  ;;  %v3546_v3 = vpop.f32.mrf.mxu1 }
 0x243   :  { %v10979_v32 = vadd.f32 %v2749_v6, %v2365_v10  ;;  %3297 = vmatprep.mubr.f32.mxu0 %v1063_v20  ;;  %v1343_v3 = vld [vmem:[#allocation2 + $0x351] sm:$0xff]  ;;  %v6114_v10 = vld [vmem:[%s13183_s3 + $0x20] sm:$0xff] }
 0x244   :  { %v2751_v21 = vpop.f32.mrf.mxu0  ;;  %v10981_v44 = vpop.f32.mrf.mxu1  ;;  %3788 = vmatmul.mubr.f32.gmra.mxu1 %v1213_v62  ;;  %v1065_v6 = vld [vmem:[#allocation2 + $0x242] sm:$0xff] }
 0x245   :  { %3792 = vmatprep.mubr.f32.mxu1 %v1342_v14  ;;  %v13289_v21 = vld [vmem:[#allocation13_spill] sm:$0xff]  ;;  %6300 = vmatpush1.msra.mxu1 %v6114_v10 }
 0x246   :  { %v2754_v11 = vpop.f32.mrf.mxu0  ;;  %3298 = vmatmul.mubr.f32.gmra.mxu0 %v10692_v41  ;;  %v3551_v27 = vpop.f32.mrf.mxu1  ;;  %v2375_v14 = vadd.f32 %v10682_v8, %v13289_v21  ;;  %6301 = vmatprep.subr.mxu1 %v10740_v4 }
 0x247   :  { %v10986_v43 = vadd.f32 %v2754_v11, %v2370_v39  ;;  %3302 = vmatprep.mubr.f32.mxu0 %v1064_v19 }
 0x248   :  { %v2756_v20 = vpop.f32.mrf.mxu0  ;;  %v10991_v62 = vpop.f32.mrf.mxu1  ;;  %3793 = vmatmul.mubr.f32.gmra.mxu1 %v1214_v12  ;;  %v13290_v12 = vld [vmem:[#allocation14_spill] sm:$0xff] }
 0x249   :  { %13288 = vst [vmem:[#allocation11_spill] sm:$0xff] %v10991_v62  ;;  %3797 = vmatprep.mubr.f32.mxu1 %v1343_v3  ;;  %v2380_v20 = vadd.f32 %v10682_v8, %v13290_v12 }
 0x24a   :  { %v2759_v41 = vpop.f32.mrf.mxu0  ;;  %3303 = vmatmul.mubr.f32.gmra.mxu0 %v10702_v0  ;;  %v3556_v11 = vpop.f32.mrf.mxu1 }
 0x24b   :  { %v10997_v39 = vadd.f32 %v2759_v41, %v2375_v14  ;;  %3307 = vmatprep.mubr.f32.mxu0 %v1065_v6  ;;  %v6113_v6 = vld [vmem:[%s13183_s3 + $0x18] sm:$0xff]  ;;  %v13292_v11 = vld [vmem:[#allocation15_spill] sm:$0xff] }
 0x24c   :  { %v2761_v19 = vpop.f32.mrf.mxu0  ;;  %v10999_v27 = vpop.f32.mrf.mxu1  ;;  %3798 = vmatmul.mubr.f32.gmra.mxu1 %v10740_v4  ;;  %v1067_v14 = vld [vmem:[#allocation2 + $0x25a] sm:$0xff] }
 0x24d   :  { %6302 = vmatpush1.msra.mxu1 %v6113_v6  ;;  %v2385_v19 = vadd.f32 %v10682_v8, %v13292_v11 }
 0x24e   :  { %v2764_v3 = vpop.f32.mrf.mxu0  ;;  %3308 = vmatmul.mubr.f32.gmra.mxu0 %v10715_v30  ;;  %v3561_v10 = vpop.f32.mrf.mxu1  ;;  %6303 = vmatprep.subr.mxu1 %v10740_v4 }
 0x24f   :  { %v11005_v0 = vadd.f32 %v2764_v3, %v2380_v20  ;;  %3312 = vmatprep.mubr.f32.mxu0 %v1066_v29  ;;  %v1068_v3 = vld [vmem:[#allocation2 + $0x262] sm:$0xff] }
 0x250   :  { %v2766_v21 = vpop.f32.mrf.mxu0  ;;  %v11010_v41 = vpop.f32.mrf.mxu1 }
 0x251   :  { %13291 = vst [vmem:[#allocation12_spill] sm:$0xff] %v11010_v41  ;;  %v13294_v21 = vld [vmem:[#allocation16_spill] sm:$0xff] }
 0x252   :  { %v2769_v12 = vpop.f32.mrf.mxu0  ;;  %3313 = vmatmul.mubr.f32.gmra.mxu0 %v10725_v16  ;;  %v3566_v30 = vpop.f32.mrf.mxu1  ;;  %v2390_v41 = vadd.f32 %v10682_v8, %v13294_v21  ;;  %v6112_v16 = vld [vmem:[%s13183_s3 + $0x10] sm:$0xff] }
 0x253   :  { %v11016_v20 = vadd.f32 %v2769_v12, %v2385_v19  ;;  %3317 = vmatprep.mubr.f32.mxu0 %v1067_v14  ;;  %v1069_v14 = vld [vmem:[#allocation2 + $0x272] sm:$0xff]  ;;  %6304 = vmatpush1.msra.mxu1 %v6112_v16 }
 0x254   :  { %v2771_v29 = vpop.f32.mrf.mxu0  ;;  %v11018_v10 = vpop.f32.mrf.mxu1  ;;  %v13296_v30 = vld [vmem:[#allocation17_spill] sm:$0xff]  ;;  %6305 = vmatprep.subr.mxu1 %v10740_v4 }
 0x255   :  { %13293 = vst [vmem:[#allocation13_spill] sm:$0xff] %v11018_v10  ;;  %v2395_v29 = vadd.f32 %v10682_v8, %v13296_v30 }
 0x256   :  { %v2774_v6 = vpop.f32.mrf.mxu0  ;;  %3318 = vmatmul.mubr.f32.gmra.mxu0 %v10738_v23  ;;  %v3571_v11 = vpop.f32.mrf.mxu1 }
 0x257   :  { %v11023_v62 = vadd.f32 %v2774_v6, %v2390_v41  ;;  %3322 = vmatprep.mubr.f32.mxu0 %v1068_v3  ;;  %v1070_v6 = vld [vmem:[#allocation2 + $0x27a] sm:$0xff] }
 0x258   :  { %v2776_v19 = vpop.f32.mrf.mxu0  ;;  %v11028_v12 = vpop.f32.mrf.mxu1 }
 0x259   :  { %13295 = vst [vmem:[#allocation14_spill] sm:$0xff] %v11028_v12  ;;  %v13298_v19 = vld [vmem:[#allocation18_spill] sm:$0xff] }
 0x25a   :  { %v2779_v21 = vpop.f32.mrf.mxu0  ;;  %3323 = vmatmul.mubr.f32.gmra.mxu0 %v10751_v24  ;;  %v3576_v23 = vpop.f32.mrf.mxu1  ;;  %v2400_v12 = vadd.f32 %v10682_v8, %v13298_v19  ;;  %v6111_v24 = vld [vmem:[%s13183_s3 + $0x8] sm:$0xff] }
 0x25b   :  { %v11034_v41 = vadd.f32 %v2779_v21, %v2395_v29  ;;  %3327 = vmatprep.mubr.f32.mxu0 %v1069_v14  ;;  %v1071_v14 = vld [vmem:[#allocation2 + $0x28a] sm:$0xff]  ;;  %6306 = vmatpush1.msra.mxu1 %v6111_v24 }
 0x25c   :  { %v2781_v3 = vpop.f32.mrf.mxu0  ;;  %v11036_v11 = vpop.f32.mrf.mxu1  ;;  %v13300_v23 = vld [vmem:[#allocation19_spill] sm:$0xff]  ;;  %6307 = vmatprep.subr.mxu1 %v10740_v4 }
 0x25d   :  { %13297 = vst [vmem:[#allocation15_spill] sm:$0xff] %v11036_v11  ;;  %v2405_v3 = vadd.f32 %v10682_v8, %v13300_v23 }
 0x25e   :  { %v2784_v16 = vpop.f32.mrf.mxu0  ;;  %3328 = vmatmul.mubr.f32.gmra.mxu0 %v10765_v46  ;;  %v3581_v30 = vpop.f32.mrf.mxu1 }
 0x25f   :  { %v11041_v10 = vadd.f32 %v2784_v16, %v2400_v12  ;;  %3332 = vmatprep.mubr.f32.mxu0 %v1070_v6  ;;  %v11054_v16 = vld [vmem:[#allocation2 + $0x292] sm:$0xff] }
 0x260   :  { %v2786_v29 = vpop.f32.mrf.mxu0  ;;  %v11046_v21 = vpop.f32.mrf.mxu1 }
 0x261   :  { %13299 = vst [vmem:[#allocation16_spill] sm:$0xff] %v11046_v21 }
 0x262   :  { %v2789_v19 = vpop.f32.mrf.mxu0  ;;  %3333 = vmatmul.mubr.f32.gmra.mxu0 %v10774_v26  ;;  %v3586_v46 = vpop.f32.mrf.mxu1  ;;  %v6110_v26 = vld [vmem:[%s13183_s3] sm:$0xff] }
 0x263   :  { %v11052_v12 = vadd.f32 %v2789_v19, %v2405_v3  ;;  %3337 = vmatprep.mubr.f32.mxu0 %v1071_v14  ;;  %v11066_v14 = vld [vmem:[#allocation2 + $0x2a2] sm:$0xff]  ;;  %6308 = vmatpush1.msra.mxu1 %v6110_v26 }
 0x264   :  { %v2791_v6 = vpop.f32.mrf.mxu0  ;;  %v11056_v30 = vpop.f32.mrf.mxu1  ;;  %6309 = vmatprep.subr.mxu1 %v10740_v4 }
 0x265   :  { %13301 = vst [vmem:[#allocation17_spill] sm:$0xff] %v11056_v30  ;;  %v11076_v6 = vld [vmem:[#allocation2 + $0x2aa] sm:$0xff]  ;;  %v1411_v30 = vld [vmem:[#allocation2 + $0x52] sm:$0xff] }
 0x266   :  { %v3099_v29 = vpop.f32.mrf.mxu0  ;;  %3338 = vmatmul.mubr.f32.gmra.mxu0 %v10785_v63  ;;  %v3591_v24 = vpop.f32.mrf.mxu1 }
 0x267   :  { %v11060_v8 = vadd.f32 %v3099_v29, %v10896_v57  ;;  %3342 = vmatprep.mubr.f32.mxu0 %v11054_v16 }
 0x268   :  { %v3101_v23 = vpop.f32.mrf.mxu0  ;;  %v11068_v3 = vpop.f32.mrf.mxu1 }
 0x269   :  { %13302 = vst [vmem:[#allocation18_spill] sm:$0xff] %v11068_v3 }
 0x26a   :  { %v3104_v19 = vpop.f32.mrf.mxu0  ;;  %3343 = vmatmul.mubr.f32.gmra.mxu0 %v10794_v28  ;;  %v3596_v63 = vpop.f32.mrf.mxu1  ;;  %v6141_v28 = vld [vmem:[%s13183_s3 + $0xf8] sm:$0xff] }
 0x26b   :  { %v11073_v57 = vadd.f32 %v3104_v19, %v10909_v55  ;;  %3347 = vmatprep.mubr.f32.mxu0 %v11066_v14  ;;  %v11088_v19 = vld [vmem:[#allocation2 + $0x2ba] sm:$0xff]  ;;  %6310 = vmatpush2.msra.mxu1 %v6141_v28 }
 0x26c   :  { %v3106_v46 = vpop.f32.mrf.mxu0  ;;  %v11078_v29 = vpop.f32.mrf.mxu1  ;;  %6311 = vmatprep.subr.mxu1 %v10740_v4 }
 0x26d   :  { %13303 = vst [vmem:[#allocation19_spill] sm:$0xff] %v11078_v29 }
 0x26e   :  { %v3109_v24 = vpop.f32.mrf.mxu0  ;;  %3348 = vmatmul.mubr.f32.gmra.mxu0 %v10808_v5  ;;  %v3601_v26 = vpop.f32.mrf.mxu1 }
 0x26f   :  { %v11082_v23 = vadd.f32 %v3109_v24, %v10919_v47  ;;  %3352 = vmatprep.mubr.f32.mxu0 %v11076_v6  ;;  %v11098_v26 = vld [vmem:[#allocation2 + $0x2c2] sm:$0xff] }
 0x270   :  { %v3111_v55 = vpop.f32.mrf.mxu0  ;;  %v11090_v63 = vpop.f32.mrf.mxu1 }
 0x271   :  { %13304 = vst [vmem:[#allocation61_spill] sm:$0xff] %v11090_v63 }
 0x272   :  { %v3114_v46 = vpop.f32.mrf.mxu0  ;;  %3353 = vmatmul.mubr.f32.gmra.mxu0 %v10817_v38  ;;  %v3606_v5 = vpop.f32.mrf.mxu1  ;;  %v6140_v38 = vld [vmem:[%s13183_s3 + $0xf0] sm:$0xff] }
 0x273   :  { %v11095_v47 = vadd.f32 %v3114_v46, %v10933_v58  ;;  %3357 = vmatprep.mubr.f32.mxu0 %v11088_v19  ;;  %v11110_v46 = vld [vmem:[#allocation2 + $0x2d2] sm:$0xff]  ;;  %6312 = vmatpush2.msra.mxu1 %v6140_v38 }
 0x274   :  { %v3116_v24 = vpop.f32.mrf.mxu0  ;;  %v11100_v55 = vpop.f32.mrf.mxu1  ;;  %6313 = vmatprep.subr.mxu1 %v10740_v4 }
 0x275   :  { %13305 = vst [vmem:[#allocation62_spill] sm:$0xff] %v11100_v55 }
 0x276   :  { %v3119_v3 = vpop.f32.mrf.mxu0  ;;  %3358 = vmatmul.mubr.f32.gmra.mxu0 %v10830_v2  ;;  %v3611_v28 = vpop.f32.mrf.mxu1 }
 0x277   :  { %v11104_v63 = vadd.f32 %v3119_v3, %v10943_v56  ;;  %3362 = vmatprep.mubr.f32.mxu0 %v11098_v26  ;;  %v11120_v28 = vld [vmem:[#allocation2 + $0x2da] sm:$0xff] }
 0x278   :  { %v3121_v58 = vpop.f32.mrf.mxu0  ;;  %v11112_v5 = vpop.f32.mrf.mxu1 }
 0x279   :  { %13306 = vst [vmem:[#allocation63_spill] sm:$0xff] %v11112_v5 }
 0x27a   :  { %v3124_v24 = vpop.f32.mrf.mxu0  ;;  %3363 = vmatmul.mubr.f32.gmra.mxu0 %v10841_v22  ;;  %v3616_v2 = vpop.f32.mrf.mxu1  ;;  %v6139_v22 = vld [vmem:[%s13183_s3 + $0xe8] sm:$0xff] }
 0x27b   :  { %v11117_v56 = vadd.f32 %v3124_v24, %v10957_v61  ;;  %3367 = vmatprep.mubr.f32.mxu0 %v11110_v46  ;;  %v11132_v24 = vld [vmem:[#allocation2 + $0x2ea] sm:$0xff]  ;;  %6314 = vmatpush2.msra.mxu1 %v6139_v22 }
 0x27c   :  { %v3126_v3 = vpop.f32.mrf.mxu0  ;;  %v11122_v58 = vpop.f32.mrf.mxu1  ;;  %6315 = vmatprep.subr.mxu1 %v10740_v4 }
 0x27d   :  { %13307 = vst [vmem:[#allocation64_spill] sm:$0xff] %v11122_v58 }
 0x27e   :  { %v3129_v55 = vpop.f32.mrf.mxu0  ;;  %3368 = vmatmul.mubr.f32.gmra.mxu0 %v10857_v48  ;;  %v3621_v38 = vpop.f32.mrf.mxu1 }
 0x27f   :  { %v11126_v5 = vadd.f32 %v3129_v55, %v10967_v49  ;;  %3372 = vmatprep.mubr.f32.mxu0 %v11120_v28  ;;  %v11142_v38 = vld [vmem:[#allocation2 + $0x2f2] sm:$0xff] }
 0x280   :  { %v3131_v61 = vpop.f32.mrf.mxu0  ;;  %v11134_v2 = vpop.f32.mrf.mxu1 }
 0x281   :  { %13308 = vst [vmem:[#allocation65_spill] sm:$0xff] %v11134_v2 }
 0x282   :  { %v3134_v3 = vpop.f32.mrf.mxu0  ;;  %3373 = vmatmul.mubr.f32.gmra.mxu0 %v10869_v40  ;;  %v3626_v48 = vpop.f32.mrf.mxu1  ;;  %v6138_v40 = vld [vmem:[%s13183_s3 + $0xe0] sm:$0xff] }
 0x283   :  { %v11139_v49 = vadd.f32 %v3134_v3, %v10979_v32  ;;  %3377 = vmatprep.mubr.f32.mxu0 %v11132_v24  ;;  %v11154_v3 = vld [vmem:[#allocation2 + $0x302] sm:$0xff]  ;;  %6316 = vmatpush2.msra.mxu1 %v6138_v40 }
 0x284   :  { %v3136_v55 = vpop.f32.mrf.mxu0  ;;  %v11144_v61 = vpop.f32.mrf.mxu1  ;;  %6317 = vmatprep.subr.mxu1 %v10740_v4 }
 0x285   :  { %13309 = vst [vmem:[#allocation66_spill] sm:$0xff] %v11144_v61 }
 0x286   :  { %v3139_v58 = vpop.f32.mrf.mxu0  ;;  %3378 = vmatmul.mubr.f32.gmra.mxu0 %v10882_v54  ;;  %v3631_v22 = vpop.f32.mrf.mxu1 }
 0x287   :  { %v11148_v2 = vadd.f32 %v3139_v58, %v10986_v43  ;;  %3382 = vmatprep.mubr.f32.mxu0 %v11142_v38  ;;  %v11164_v22 = vld [vmem:[#allocation2 + $0x30a] sm:$0xff] }
 0x288   :  { %v3141_v32 = vpop.f32.mrf.mxu0  ;;  %v11156_v48 = vpop.f32.mrf.mxu1 }
 0x289   :  { %13310 = vst [vmem:[#allocation67_spill] sm:$0xff] %v11156_v48 }
 0x28a   :  { %v3144_v55 = vpop.f32.mrf.mxu0  ;;  %3383 = vmatmul.mubr.f32.gmra.mxu0 %v10894_v35  ;;  %v3636_v54 = vpop.f32.mrf.mxu1  ;;  %v6137_v35 = vld [vmem:[%s13183_s3 + $0xd8] sm:$0xff] }
 0x28b   :  { %v11161_v43 = vadd.f32 %v3144_v55, %v10997_v39  ;;  %3387 = vmatprep.mubr.f32.mxu0 %v11154_v3  ;;  %v11176_v55 = vld [vmem:[#allocation2 + $0x31a] sm:$0xff]  ;;  %6318 = vmatpush2.msra.mxu1 %v6137_v35 }
 0x28c   :  { %v3146_v58 = vpop.f32.mrf.mxu0  ;;  %v11166_v32 = vpop.f32.mrf.mxu1  ;;  %6319 = vmatprep.subr.mxu1 %v10740_v4 }
 0x28d   :  { %13311 = vst [vmem:[#allocation68_spill] sm:$0xff] %v11166_v32 }
 0x28e   :  { %v3149_v61 = vpop.f32.mrf.mxu0  ;;  %3388 = vmatmul.mubr.f32.gmra.mxu0 %v10906_v31  ;;  %v3641_v40 = vpop.f32.mrf.mxu1 }
 0x28f   :  { %v11170_v48 = vadd.f32 %v3149_v61, %v11005_v0  ;;  %3392 = vmatprep.mubr.f32.mxu0 %v11164_v22  ;;  %v11186_v40 = vld [vmem:[#allocation2 + $0x322] sm:$0xff] }
 0x290   :  { %v3151_v39 = vpop.f32.mrf.mxu0  ;;  %v11178_v54 = vpop.f32.mrf.mxu1 }
 0x291   :  { %13312 = vst [vmem:[#allocation69_spill] sm:$0xff] %v11178_v54 }
 0x292   :  { %v3154_v58 = vpop.f32.mrf.mxu0  ;;  %3393 = vmatmul.mubr.f32.gmra.mxu0 %v10917_v45  ;;  %v3646_v31 = vpop.f32.mrf.mxu1  ;;  %v6136_v45 = vld [vmem:[%s13183_s3 + $0xd0] sm:$0xff] }
 0x293   :  { %v11183_v0 = vadd.f32 %v3154_v58, %v11016_v20  ;;  %3397 = vmatprep.mubr.f32.mxu0 %v11176_v55  ;;  %v11198_v58 = vld [vmem:[#allocation2 + $0x332] sm:$0xff]  ;;  %6320 = vmatpush2.msra.mxu1 %v6136_v45 }
 0x294   :  { %v3156_v61 = vpop.f32.mrf.mxu0  ;;  %v11188_v39 = vpop.f32.mrf.mxu1 }
 0x295   :  { %13313 = vst [vmem:[#allocation70_spill] sm:$0xff] %v11188_v39  ;;  %v11202_v61 = vld [vmem:[#allocation2 + $0x8] sm:$0xff] }
 0x296   :  { %v3159_v32 = vpop.f32.mrf.mxu0  ;;  %3398 = vmatmul.mubr.f32.gmra.mxu0 %v10930_v15  ;;  %v3651_v35 = vpop.f32.mrf.mxu1  ;;  %6321 = vmatprep.subr.mxu1 %v11202_v61 }
 0x297   :  { %v11192_v4 = vadd.f32 %v3159_v32, %v11023_v62  ;;  %3402 = vmatprep.mubr.f32.mxu0 %v11186_v40 }
 0x298   :  { %v3161_v20 = vpop.f32.mrf.mxu0  ;;  %v11200_v31 = vpop.f32.mrf.mxu1 }
 0x299   :  { %13314 = vst [vmem:[#allocation71_spill] sm:$0xff] %v11200_v31  ;;  %v11210_v20 = vld [vmem:[#allocation2 + $0x33a] sm:$0xff] }
 0x29a   :  { %v3164_v15 = vpop.f32.mrf.mxu0  ;;  %3403 = vmatmul.mubr.f32.gmra.mxu0 %v10941_v53  ;;  %v3656_v62 = vpop.f32.mrf.mxu1  ;;  %v6135_v53 = vld [vmem:[%s13183_s3 + $0xc8] sm:$0xff] }
 0x29b   :  { %v11207_v32 = vadd.f32 %v3164_v15, %v11034_v41  ;;  %3407 = vmatprep.mubr.f32.mxu0 %v11198_v58  ;;  %v1408_v15 = vld [vmem:[#allocation2 + $0x32] sm:$0xff]  ;;  %6322 = vmatpush2.msra.mxu1 %v6135_v53 }
 0x29c   :  { %v3166_v35 = vpop.f32.mrf.mxu0  ;;  %v11212_v54 = vpop.f32.mrf.mxu1  ;;  %6323 = vmatprep.subr.mxu1 %v11202_v61 }
 0x29d   :  { %13315 = vst [vmem:[#allocation72_spill] sm:$0xff] %v11212_v54  ;;  %v1410_v54 = vld [vmem:[#allocation2 + $0x4a] sm:$0xff] }
 0x29e   :  { %v3169_v31 = vpop.f32.mrf.mxu0  ;;  %3408 = vmatmul.mubr.f32.gmra.mxu0 %v10954_v60  ;;  %v3661_v45 = vpop.f32.mrf.mxu1 }
 0x29f   :  { %v11216_v39 = vadd.f32 %v3169_v31, %v11041_v10  ;;  %3412 = vmatprep.mubr.f32.mxu0 %v11210_v20  ;;  %v1409_v31 = vld [vmem:[#allocation2 + $0x3a] sm:$0xff] }
 0x2a0   :  { %v3171_v41 = vpop.f32.mrf.mxu0  ;;  %v11222_v62 = vpop.f32.mrf.mxu1 }
 0x2a1   :  { %13316 = vst [vmem:[#allocation73_spill] sm:$0xff] %v11222_v62  ;;  %v13318_v62 = vld [vmem:[#allocation20_spill] sm:$0xff] }
 0x2a2   :  { %v3174_v35 = vpop.f32.mrf.mxu0  ;;  %3413 = vmatmul.mubr.f32.gmra.mxu0 %v10965_v33  ;;  %v3666_v60 = vpop.f32.mrf.mxu1  ;;  %v6134_v33 = vld [vmem:[%s13183_s3 + $0xc0] sm:$0xff] }
 0x2a3   :  { %v11227_v10 = vadd.f32 %v3174_v35, %v11052_v12  ;;  %8448 = vmatprep.mubr.f32.mxu0 %v1408_v15  ;;  %v1412_v35 = vld [vmem:[#allocation2 + $0x62] sm:$0xff]  ;;  %6324 = vmatpush2.msra.mxu1 %v6134_v33 }
 0x2a4   :  { %v3176_v45 = vpop.f32.mrf.mxu0  ;;  %v11229_v29 = vpop.f32.mrf.mxu1  ;;  %6325 = vmatprep.subr.mxu1 %v11202_v61  ;;  %v1415_v33 = vld [vmem:[#allocation2 + $0x82] sm:$0xff] }
 0x2a5   :  { %13317 = vst [vmem:[#allocation74_spill] sm:$0xff] %v11229_v29 }
 0x2a6   :  { %v3179_v41 = vpop.f32.mrf.mxu0  ;;  %8449 = vmatmul.mubr.f32.vlgmr.msra.gmra.mxu0 %v1409_v31  ;;  %v3671_v21 = vpop.f32.mrf.mxu1 }
 0x2a7   :  { %v11232_v53 = vadd.f32 %v3179_v41, %v13318_v62  ;;  %8451 = vmatprep.mubr.f32.mxu0 %v1410_v54  ;;  %v13321_v21 = vld [vmem:[#allocation21_spill] sm:$0xff]  ;;  %v1413_v54 = vld [vmem:[#allocation2 + $0x6a] sm:$0xff] }
 0x2a8   :  { %v3181_v12 = vpop.f32.mrf.mxu0  ;;  %v11237_v15 = vpop.f32.mrf.mxu1  ;;  %v1414_v41 = vld [vmem:[#allocation2 + $0x7a] sm:$0xff] }
 0x2a9   :  { %13319 = vst [vmem:[#allocation20_spill] sm:$0xff] %v11232_v53  ;;  %13320 = vst [vmem:[#allocation75_spill] sm:$0xff] %v11237_v15  ;;  %v13324_v53 = vld [vmem:[#allocation22_spill] sm:$0xff] }
 0x2aa   :  { %v3184_v60 = vpop.f32.mrf.mxu0  ;;  %8452 = vmatmul.mubr.f32.gmra.mxu0 %v1411_v30  ;;  %v3676_v31 = vpop.f32.mrf.mxu1  ;;  %v6133_v30 = vld [vmem:[%s13183_s3 + $0xb8] sm:$0xff] }
 0x2ab   :  { %v11241_v45 = vadd.f32 %v3184_v60, %v13321_v21  ;;  %8454 = vmatprep.mubr.f32.mxu0 %v1412_v35  ;;  %v1416_v31 = vld [vmem:[#allocation2 + $0x92] sm:$0xff]  ;;  %6326 = vmatpush2.msra.mxu1 %v6133_v30 }
 0x2ac   :  { %v3186_v62 = vpop.f32.mrf.mxu0  ;;  %v11243_v29 = vpop.f32.mrf.mxu1  ;;  %6327 = vmatprep.subr.mxu1 %v11202_v61  ;;  %v6157_v30 = vld [vmem:[%s13183_s3 + $0x178] sm:$0xff] }
 0x2ad   :  { %13322 = vst [vmem:[#allocation21_spill] sm:$0xff] %v11241_v45  ;;  %13323 = vst [vmem:[#allocation76_spill] sm:$0xff] %v11243_v29  ;;  %v13327_v62 = vld [vmem:[#allocation23_spill] sm:$0xff]  ;;  %6663 = vmatpush1.msra.mxu0 %v6157_v30 }
 0x2ae   :  { %v3189_v11 = vpop.f32.mrf.mxu0  ;;  %8455 = vmatmul.mubr.f32.gmra.mxu0 %v1413_v54  ;;  %v3681_v12 = vpop.f32.mrf.mxu1  ;;  %6664 = vmatprep.subr.mxu0 %v11202_v61  ;;  %v1421_v30 = vld [vmem:[#allocation2 + $0xca] sm:$0xff] }
 0x2af   :  { %v11246_v15 = vadd.f32 %v3189_v11, %v13324_v53  ;;  %8457 = vmatprep.mubr.f32.mxu0 %v1414_v41  ;;  %v1417_v11 = vld [vmem:[#allocation2 + $0x9a] sm:$0xff]  ;;  %v1418_v41 = vld [vmem:[#allocation2 + $0xaa] sm:$0xff] }
 0x2b0   :  { %v3191_v60 = vpop.f32.mrf.mxu0  ;;  %v11251_v35 = vpop.f32.mrf.mxu1 }
 0x2b1   :  { %13325 = vst [vmem:[#allocation22_spill] sm:$0xff] %v11246_v15  ;;  %13326 = vst [vmem:[#allocation77_spill] sm:$0xff] %v11251_v35  ;;  %v13329_v35 = vld [vmem:[#allocation24_spill] sm:$0xff] }
 0x2b2   :  { %v3194_v21 = vpop.f32.mrf.mxu0  ;;  %8458 = vmatmul.mubr.f32.gmra.mxu0 %v1415_v33  ;;  %v3686_v54 = vpop.f32.mrf.mxu1  ;;  %v1419_v33 = vld [vmem:[#allocation2 + $0xb2] sm:$0xff] }
 0x2b3   :  { %v11255_v12 = vadd.f32 %v3194_v21, %v13327_v62  ;;  %8460 = vmatprep.mubr.f32.mxu0 %v1416_v31  ;;  %v6132_v31 = vld [vmem:[%s13183_s3 + $0xb0] sm:$0xff]  ;;  %v1420_v54 = vld [vmem:[#allocation2 + $0xc2] sm:$0xff] }
 0x2b4   :  { %v3196_v53 = vpop.f32.mrf.mxu0  ;;  %v11257_v29 = vpop.f32.mrf.mxu1  ;;  %6328 = vmatpush2.msra.mxu1 %v6132_v31 }
 0x2b5   :  { %13328 = vst [vmem:[#allocation23_spill] sm:$0xff] %v11257_v29  ;;  %6329 = vmatprep.subr.mxu1 %v11202_v61  ;;  %v6155_v53 = vld [vmem:[%s13183_s3 + $0x168] sm:$0xff] }
 0x2b6   :  { %v3199_v15 = vpop.f32.mrf.mxu0  ;;  %8461 = vmatmul.mubr.f32.gmra.mxu0 %v1417_v11  ;;  %v3691_v60 = vpop.f32.mrf.mxu1  ;;  %v6156_v11 = vld [vmem:[%s13183_s3 + $0x170] sm:$0xff] }
 0x2b7   :  { %v11263_v45 = vadd.f32 %v3199_v15, %v13329_v35  ;;  %8463 = vmatprep.mubr.f32.mxu0 %v1418_v41  ;;  %6665 = vmatpush1.msra.mxu0 %v6156_v11  ;;  %v13332_v41 = vld [vmem:[#allocation25_spill] sm:$0xff]  ;;  %v1426_v29 = vld [vmem:[#allocation2 + $0x10a] sm:$0xff] }
 0x2b8   :  { %v3201_v21 = vpop.f32.mrf.mxu0  ;;  %v11268_v62 = vpop.f32.mrf.mxu1  ;;  %6666 = vmatprep.subr.mxu0 %v11202_v61 }
 0x2b9   :  { %13330 = vst [vmem:[#allocation24_spill] sm:$0xff] %v11263_v45  ;;  %13331 = vst [vmem:[#allocation78_spill] sm:$0xff] %v11268_v62  ;;  %6667 = vmatpush1.msra.mxu0 %v6155_v53  ;;  %v1422_v21 = vld [vmem:[#allocation2 + $0xda] sm:$0xff] }
 0x2ba   :  { %v3204_v15 = vpop.f32.mrf.mxu0  ;;  %8464 = vmatmul.mubr.f32.gmra.mxu0 %v1419_v33  ;;  %v3696_v35 = vpop.f32.mrf.mxu1  ;;  %6668 = vmatprep.subr.mxu0 %v11202_v61  ;;  %v6154_v33 = vld [vmem:[%s13183_s3 + $0x160] sm:$0xff] }
 0x2bb   :  { %v11280_v60 = vadd.f32 %v3204_v15, %v13332_v41  ;;  %8466 = vmatprep.mubr.f32.mxu0 %v1420_v54  ;;  %6669 = vmatpush1.msra.mxu0 %v6154_v33  ;;  %v6153_v54 = vld [vmem:[%s13183_s3 + $0x158] sm:$0xff]  ;;  %v13334_v15 = vld [vmem:[#allocation26_spill] sm:$0xff] }
 0x2bc   :  { %v3206_v31 = vpop.f32.mrf.mxu0  ;;  %v11282_v11 = vpop.f32.mrf.mxu1  ;;  %6670 = vmatprep.subr.mxu0 %v11202_v61  ;;  %v1423_v41 = vld [vmem:[#allocation2 + $0xe2] sm:$0xff] }
 0x2bd   :  { %13333 = vst [vmem:[#allocation25_spill] sm:$0xff] %v11282_v11  ;;  %v6131_v31 = vld [vmem:[%s13183_s3 + $0xa8] sm:$0xff]  ;;  %6671 = vmatpush1.msra.mxu0 %v6153_v54  ;;  %v1424_v11 = vld [vmem:[#allocation2 + $0xf2] sm:$0xff] }
 0x2be   :  { %v3209_v35 = vpop.f32.mrf.mxu0  ;;  %8467 = vmatmul.mubr.f32.gmra.mxu0 %v1421_v30  ;;  %v3701_v62 = vpop.f32.mrf.mxu1  ;;  %6330 = vmatpush2.msra.mxu1 %v6131_v31  ;;  %v6151_v54 = vld [vmem:[%s13183_s3 + $0x148] sm:$0xff] }
 0x2bf   :  { %v11293_v53 = vadd.f32 %v3209_v35, %v13334_v15  ;;  %8469 = vmatprep.mubr.f32.mxu0 %v1422_v21  ;;  %6672 = vmatprep.subr.mxu0 %v11202_v61  ;;  %v6152_v62 = vld [vmem:[%s13183_s3 + $0x150] sm:$0xff]  ;;  %v13337_v15 = vld [vmem:[#allocation27_spill] sm:$0xff] }
 0x2c0   :  { %v3211_v33 = vpop.f32.mrf.mxu0  ;;  %v11298_v30 = vpop.f32.mrf.mxu1  ;;  %6673 = vmatpush1.msra.mxu0 %v6152_v62  ;;  %6331 = vmatprep.subr.mxu1 %v11202_v61 }
 0x2c1   :  { %13335 = vst [vmem:[#allocation26_spill] sm:$0xff] %v11293_v53  ;;  %13336 = vst [vmem:[#allocation79_spill] sm:$0xff] %v11298_v30  ;;  %6674 = vmatprep.subr.mxu0 %v11202_v61  ;;  %v1425_v33 = vld [vmem:[#allocation2 + $0xfa] sm:$0xff] }
 0x2c2   :  { %v3214_v21 = vpop.f32.mrf.mxu0  ;;  %8470 = vmatmul.mubr.f32.gmra.mxu0 %v1423_v41  ;;  %v3706_v35 = vpop.f32.mrf.mxu1  ;;  %v6150_v41 = vld [vmem:[%s13183_s3 + $0x140] sm:$0xff] }
 0x2c3   :  { %v11310_v31 = vadd.f32 %v3214_v21, %v13337_v15  ;;  %8472 = vmatprep.mubr.f32.mxu0 %v1424_v11  ;;  %6675 = vmatpush1.msra.mxu0 %v6151_v54  ;;  %v6149_v11 = vld [vmem:[%s13183_s3 + $0x138] sm:$0xff]  ;;  %v6130_v15 = vld [vmem:[%s13183_s3 + $0xa0] sm:$0xff] }
 0x2c4   :  { %v3216_v30 = vpop.f32.mrf.mxu0  ;;  %v11312_v62 = vpop.f32.mrf.mxu1  ;;  %6676 = vmatprep.subr.mxu0 %v11202_v61  ;;  %v1427_v54 = vld [vmem:[#allocation2 + $0x112] sm:$0xff]  ;;  %6332 = vmatpush2.msra.mxu1 %v6130_v15 }
 0x2c5   :  { %13338 = vst [vmem:[#allocation27_spill] sm:$0xff] %v11310_v31  ;;  %13339 = vst [vmem:[#allocation80_spill] sm:$0xff] %v11312_v62  ;;  %6677 = vmatpush1.msra.mxu0 %v6150_v41  ;;  %v13340_v30 = vld [vmem:[#allocation28_spill] sm:$0xff]  ;;  %v1428_v62 = vld [vmem:[#allocation2 + $0x122] sm:$0xff]  ;;  %6333 = vmatprep.subr.mxu1 %v11202_v61 }
 0x2c6   :  { %v3219_v35 = vpop.f32.mrf.mxu0  ;;  %8473 = vmatmul.mubr.f32.gmra.mxu0 %v1425_v33  ;;  %v3711_v53 = vpop.f32.mrf.mxu1  ;;  %6678 = vmatprep.subr.mxu0 %v11202_v61 }
 0x2c7   :  { %v11323_v21 = vadd.f32 %v3219_v35, %v13340_v30  ;;  %8475 = vmatprep.mubr.f32.mxu0 %v1426_v29  ;;  %6679 = vmatpush1.msra.mxu0 %v6149_v11  ;;  %v6148_v53 = vld [vmem:[%s13183_s3 + $0x130] sm:$0xff]  ;;  %v6147_v11 = vld [vmem:[%s13183_s3 + $0x128] sm:$0xff]  ;;  %v13343_v30 = vld [vmem:[#allocation29_spill] sm:$0xff] }
 0x2c8   :  { %v3221_v41 = vpop.f32.mrf.mxu0  ;;  %v11328_v33 = vpop.f32.mrf.mxu1  ;;  %6680 = vmatprep.subr.mxu0 %v11202_v61 }
 0x2c9   :  { %13341 = vst [vmem:[#allocation28_spill] sm:$0xff] %v11323_v21  ;;  %13342 = vst [vmem:[#allocation81_spill] sm:$0xff] %v11328_v33  ;;  %6681 = vmatpush1.msra.mxu0 %v6148_v53  ;;  %v1429_v41 = vld [vmem:[#allocation2 + $0x12a] sm:$0xff]  ;;  %v1430_v21 = vld [vmem:[#allocation2 + $0x13a] sm:$0xff] }
 0x2ca   :  { %v3224_v29 = vpop.f32.mrf.mxu0  ;;  %8476 = vmatmul.mubr.f32.gmra.mxu0 %v1427_v54  ;;  %v3716_v35 = vpop.f32.mrf.mxu1  ;;  %6682 = vmatprep.subr.mxu0 %v11202_v61  ;;  %v6146_v54 = vld [vmem:[%s13183_s3 + $0x120] sm:$0xff] }
 0x2cb   :  { %v11340_v15 = vadd.f32 %v3224_v29, %v13343_v30  ;;  %8478 = vmatprep.mubr.f32.mxu0 %v1428_v62  ;;  %6683 = vmatpush1.msra.mxu0 %v6147_v11  ;;  %v6145_v62 = vld [vmem:[%s13183_s3 + $0x118] sm:$0xff]  ;;  %v1431_v11 = vld [vmem:[#allocation2 + $0x142] sm:$0xff] }
 0x2cc   :  { %v3226_v33 = vpop.f32.mrf.mxu0  ;;  %v11342_v53 = vpop.f32.mrf.mxu1  ;;  %6684 = vmatprep.subr.mxu0 %v11202_v61  ;;  %v6129_v30 = vld [vmem:[%s13183_s3 + $0x98] sm:$0xff] }
 0x2cd   :  { %13344 = vst [vmem:[#allocation29_spill] sm:$0xff] %v11340_v15  ;;  %13345 = vst [vmem:[#allocation82_spill] sm:$0xff] %v11342_v53  ;;  %6685 = vmatpush1.msra.mxu0 %v6146_v54  ;;  %v13346_v33 = vld [vmem:[#allocation30_spill] sm:$0xff]  ;;  %v1432_v53 = vld [vmem:[#allocation2 + $0x152] sm:$0xff]  ;;  %6334 = vmatpush2.msra.mxu1 %v6129_v30 }
 0x2ce   :  { %v3229_v35 = vpop.f32.mrf.mxu0  ;;  %8479 = vmatmul.mubr.f32.gmra.mxu0 %v1429_v41  ;;  %v3721_v31 = vpop.f32.mrf.mxu1  ;;  %6686 = vmatprep.subr.mxu0 %v11202_v61 }
 0x2cf   :  { %v11353_v29 = vadd.f32 %v3229_v35, %v13346_v33  ;;  %8481 = vmatprep.mubr.f32.mxu0 %v1430_v21  ;;  %6687 = vmatpush1.msra.mxu0 %v6145_v62  ;;  %v6144_v31 = vld [vmem:[%s13183_s3 + $0x110] sm:$0xff]  ;;  %v6143_v62 = vld [vmem:[%s13183_s3 + $0x108] sm:$0xff] }
 0x2d0   :  { %v3231_v54 = vpop.f32.mrf.mxu0  ;;  %v11358_v41 = vpop.f32.mrf.mxu1  ;;  %6688 = vmatprep.subr.mxu0 %v11202_v61  ;;  %6335 = vmatprep.subr.mxu1 %v11202_v61  ;;  %v13349_v33 = vld [vmem:[#allocation31_spill] sm:$0xff] }
 0x2d1   :  { %13347 = vst [vmem:[#allocation30_spill] sm:$0xff] %v11353_v29  ;;  %13348 = vst [vmem:[#allocation83_spill] sm:$0xff] %v11358_v41  ;;  %6689 = vmatpush1.msra.mxu0 %v6144_v31  ;;  %v1433_v54 = vld [vmem:[#allocation2 + $0x15a] sm:$0xff]  ;;  %v1434_v29 = vld [vmem:[#allocation2 + $0x16a] sm:$0xff] }
 0x2d2   :  { %v3234_v21 = vpop.f32.mrf.mxu0  ;;  %8482 = vmatmul.mubr.f32.gmra.mxu0 %v1431_v11  ;;  %v3726_v35 = vpop.f32.mrf.mxu1  ;;  %6690 = vmatprep.subr.mxu0 %v11202_v61  ;;  %v6142_v11 = vld [vmem:[%s13183_s3 + $0x100] sm:$0xff] }
 0x2d3   :  { %v11370_v30 = vadd.f32 %v3234_v21, %v13349_v33  ;;  %8484 = vmatprep.mubr.f32.mxu0 %v1432_v53  ;;  %6691 = vmatpush1.msra.mxu0 %v6143_v62  ;;  %v6173_v53 = vld [vmem:[%s13183_s3 + $0x1f8] sm:$0xff]  ;;  %v6128_v33 = vld [vmem:[%s13183_s3 + $0x90] sm:$0xff] }
 0x2d4   :  { %v3236_v41 = vpop.f32.mrf.mxu0  ;;  %v11372_v31 = vpop.f32.mrf.mxu1  ;;  %6692 = vmatprep.subr.mxu0 %v11202_v61  ;;  %v1435_v62 = vld [vmem:[#allocation2 + $0x172] sm:$0xff]  ;;  %6336 = vmatpush2.msra.mxu1 %v6128_v33 }
 0x2d5   :  { %13350 = vst [vmem:[#allocation31_spill] sm:$0xff] %v11370_v30  ;;  %13351 = vst [vmem:[#allocation84_spill] sm:$0xff] %v11372_v31  ;;  %6693 = vmatpush1.msra.mxu0 %v6142_v11  ;;  %v13352_v41 = vld [vmem:[#allocation32_spill] sm:$0xff]  ;;  %v1436_v31 = vld [vmem:[#allocation2 + $0x182] sm:$0xff]  ;;  %6337 = vmatprep.subr.mxu1 %v11202_v61 }
 0x2d6   :  { %v3239_v35 = vpop.f32.mrf.mxu0  ;;  %8485 = vmatmul.mubr.f32.gmra.mxu0 %v1433_v54  ;;  %v3731_v15 = vpop.f32.mrf.mxu1  ;;  %6694 = vmatprep.subr.mxu0 %v11202_v61 }
 0x2d7   :  { %v11383_v21 = vadd.f32 %v3239_v35, %v13352_v41  ;;  %8487 = vmatprep.mubr.f32.mxu0 %v1434_v29  ;;  %6695 = vmatpush2.msra.mxu0 %v6173_v53  ;;  %v6172_v15 = vld [vmem:[%s13183_s3 + $0x1f0] sm:$0xff]  ;;  %v6171_v53 = vld [vmem:[%s13183_s3 + $0x1e8] sm:$0xff]  ;;  %v13355_v41 = vld [vmem:[#allocation33_spill] sm:$0xff] }
 0x2d8   :  { %v3241_v11 = vpop.f32.mrf.mxu0  ;;  %v11388_v54 = vpop.f32.mrf.mxu1  ;;  %6696 = vmatprep.subr.mxu0 %v11202_v61 }
 0x2d9   :  { %13353 = vst [vmem:[#allocation32_spill] sm:$0xff] %v11383_v21  ;;  %13354 = vst [vmem:[#allocation85_spill] sm:$0xff] %v11388_v54  ;;  %6697 = vmatpush2.msra.mxu0 %v6172_v15  ;;  %v1437_v11 = vld [vmem:[#allocation2 + $0x18a] sm:$0xff]  ;;  %v1438_v21 = vld [vmem:[#allocation2 + $0x19a] sm:$0xff] }
 0x2da   :  { %v3244_v29 = vpop.f32.mrf.mxu0  ;;  %8488 = vmatmul.mubr.f32.gmra.mxu0 %v1435_v62  ;;  %v3736_v35 = vpop.f32.mrf.mxu1  ;;  %6698 = vmatprep.subr.mxu0 %v11202_v61  ;;  %v6170_v62 = vld [vmem:[%s13183_s3 + $0x1e0] sm:$0xff] }
 0x2db   :  { %v11400_v33 = vadd.f32 %v3244_v29, %v13355_v41  ;;  %8490 = vmatprep.mubr.f32.mxu0 %v1436_v31  ;;  %6699 = vmatpush2.msra.mxu0 %v6171_v53  ;;  %v6169_v31 = vld [vmem:[%s13183_s3 + $0x1d8] sm:$0xff]  ;;  %v1439_v53 = vld [vmem:[#allocation2 + $0x1a2] sm:$0xff] }
 0x2dc   :  { %v3246_v54 = vpop.f32.mrf.mxu0  ;;  %v11402_v15 = vpop.f32.mrf.mxu1  ;;  %6700 = vmatprep.subr.mxu0 %v11202_v61  ;;  %v6127_v41 = vld [vmem:[%s13183_s3 + $0x88] sm:$0xff] }
 0x2dd   :  { %13356 = vst [vmem:[#allocation33_spill] sm:$0xff] %v11400_v33  ;;  %13357 = vst [vmem:[#allocation86_spill] sm:$0xff] %v11402_v15  ;;  %6701 = vmatpush2.msra.mxu0 %v6170_v62  ;;  %v13358_v54 = vld [vmem:[#allocation34_spill] sm:$0xff]  ;;  %6338 = vmatpush2.msra.mxu1 %v6127_v41 }
 0x2de   :  { %v3249_v35 = vpop.f32.mrf.mxu0  ;;  %8491 = vmatmul.mubr.f32.gmra.mxu0 %v1437_v11  ;;  %v3741_v30 = vpop.f32.mrf.mxu1  ;;  %6702 = vmatprep.subr.mxu0 %v11202_v61  ;;  %v1440_v15 = vld [vmem:[#allocation2 + $0x1e2] sm:$0xff] }
 0x2df   :  { %v11413_v29 = vadd.f32 %v3249_v35, %v13358_v54  ;;  %8493 = vmatprep.mubr.f32.mxu0 %v1438_v21  ;;  %6703 = vmatpush2.msra.mxu0 %v6169_v31  ;;  %v6168_v30 = vld [vmem:[%s13183_s3 + $0x1d0] sm:$0xff]  ;;  %v6167_v31 = vld [vmem:[%s13183_s3 + $0x1c8] sm:$0xff] }
 0x2e0   :  { %v3251_v62 = vpop.f32.mrf.mxu0  ;;  %v11418_v11 = vpop.f32.mrf.mxu1  ;;  %6704 = vmatprep.subr.mxu0 %v11202_v61  ;;  %6339 = vmatprep.subr.mxu1 %v11202_v61  ;;  %v13361_v54 = vld [vmem:[#allocation35_spill] sm:$0xff] }
 0x2e1   :  { %13359 = vst [vmem:[#allocation34_spill] sm:$0xff] %v11413_v29  ;;  %13360 = vst [vmem:[#allocation87_spill] sm:$0xff] %v11418_v11  ;;  %6705 = vmatpush2.msra.mxu0 %v6168_v30  ;;  %v1441_v62 = vld [vmem:[#allocation2 + $0x1ea] sm:$0xff]  ;;  %v1442_v29 = vld [vmem:[#allocation2 + $0x1fa] sm:$0xff] }
 0x2e2   :  { %v3254_v21 = vpop.f32.mrf.mxu0  ;;  %8494 = vmatmul.mubr.f32.gmra.mxu0 %v1439_v53  ;;  %v3746_v35 = vpop.f32.mrf.mxu1  ;;  %6706 = vmatprep.subr.mxu0 %v11202_v61  ;;  %v6166_v53 = vld [vmem:[%s13183_s3 + $0x1c0] sm:$0xff] }
 0x2e3   :  { %v11430_v41 = vadd.f32 %v3254_v21, %v13361_v54  ;;  %8496 = vmatprep.mubr.f32.mxu0 %v1440_v15  ;;  %6707 = vmatpush2.msra.mxu0 %v6167_v31  ;;  %v6126_v15 = vld [vmem:[%s13183_s3 + $0x80] sm:$0xff] }
 0x2e4   :  { %v3256_v11 = vpop.f32.mrf.mxu0  ;;  %v11432_v30 = vpop.f32.mrf.mxu1  ;;  %6708 = vmatprep.subr.mxu0 %v11202_v61  ;;  %v4445_v21 = vld [vmem:[#allocation3 + $0x1] sm:$0xff]  ;;  %6340 = vmatpush2.msra.mxu1 %v6126_v15 }
 0x2e5   :  { %13362 = vst [vmem:[#allocation35_spill] sm:$0xff] %v11430_v41  ;;  %13363 = vst [vmem:[#allocation88_spill] sm:$0xff] %v11432_v30  ;;  %6709 = vmatpush2.msra.mxu0 %v6166_v53  ;;  %v6165_v11 = vld [vmem:[%s13183_s3 + $0x1b8] sm:$0xff]  ;;  %v1443_v54 = vld [vmem:[#allocation2 + $0x202] sm:$0xff]  ;;  %6341 = vmatprep.mubr.f32.mxu1 %v4445_v21 }
 0x2e6   :  { %v3259_v35 = vpop.f32.mrf.mxu0  ;;  %8497 = vmatmul.mubr.f32.gmra.mxu0 %v1441_v62  ;;  %v3751_v33 = vpop.f32.mrf.mxu1  ;;  %6710 = vmatprep.subr.mxu0 %v11202_v61  ;;  %v4317_v53 = vld [vmem:[#allocation3] sm:$0xff]  ;;  %v6164_v41 = vld [vmem:[%s13183_s3 + $0x1b0] sm:$0xff] }
 0x2e7   :  { %v11446_v31 = vadd.f32 %v3259_v35, %v10508_v25  ;;  %8499 = vmatprep.mubr.f32.mxu0 %v1442_v29  ;;  %v1444_v33 = vld [vmem:[#allocation2 + $0x212] sm:$0xff]  ;;  %6711 = vmatpush2.msra.mxu0 %v6165_v11  ;;  %v6163_v29 = vld [vmem:[%s13183_s3 + $0x1a8] sm:$0xff]  ;;  %v1445_v11 = vld [vmem:[#allocation2 + $0x21a] sm:$0xff] }
 0x2e8   :  { %v3261_v62 = vpop.f32.mrf.mxu0  ;;  %v11448_v30 = vpop.f32.mrf.mxu1  ;;  %6712 = vmatprep.subr.mxu0 %v11202_v61  ;;  %6342 = vmatmul.mubr.f32.vlgmr.msra.gmra.mxu1 %v4317_v53  ;;  %v4446_v35 = vld [vmem:[#allocation3 + $0x9] sm:$0xff] }
 0x2e9   :  { %13364 = vst [vmem:[#allocation89_spill] sm:$0xff] %v11448_v30  ;;  %7047 = vmatprep.subr.mxu1 %v11202_v61  ;;  %6713 = vmatpush2.msra.mxu0 %v6164_v41  ;;  %v1446_v62 = vld [vmem:[#allocation2 + $0x22a] sm:$0xff] }
 0x2ea   :  { %v3264_v45 = vpop.f32.mrf.mxu0  ;;  %8500 = vmatmul.mubr.f32.gmra.mxu0 %v1443_v54  ;;  %v3756_v25 = vpop.f32.mrf.mxu1  ;;  %6714 = vmatprep.subr.mxu0 %v11202_v61  ;;  %v6162_v54 = vld [vmem:[%s13183_s3 + $0x1a0] sm:$0xff]  ;;  %v13366_v41 = vld [vmem:[#allocation36_spill] sm:$0xff] }
 0x2eb   :  { %v11459_v15 = vadd.f32 %v3264_v45, %v10524_v9  ;;  %8502 = vmatprep.mubr.f32.mxu0 %v1444_v33  ;;  %6346 = vmatprep.mubr.f32.mxu1 %v4446_v35  ;;  %v6161_v45 = vld [vmem:[%s13183_s3 + $0x198] sm:$0xff]  ;;  %v1448_v35 = vld [vmem:[#allocation2 + $0x242] sm:$0xff] }
 0x2ec   :  { %v3266_v21 = vpop.f32.mrf.mxu0  ;;  %v11461_v30 = vpop.f32.mrf.mxu1  ;;  %6715 = vmatpush2.msra.mxu0 %v6163_v29  ;;  %6347 = vmatmul.mubr.f32.gmra.mxu1 %v11202_v61  ;;  %v1447_v25 = vld [vmem:[#allocation2 + $0x232] sm:$0xff] }
 0x2ed   :  { %13365 = vst [vmem:[#allocation90_spill] sm:$0xff] %v11461_v30  ;;  %6716 = vmatprep.subr.mxu0 %v11202_v61 }
 0x2ee   :  { %v3269_v53 = vpop.f32.mrf.mxu0  ;;  %8503 = vmatmul.mubr.f32.gmra.mxu0 %v1445_v11  ;;  %v3761_v9 = vpop.f32.mrf.mxu1  ;;  %v6160_v11 = vld [vmem:[%s13183_s3 + $0x190] sm:$0xff] }
 0x2ef   :  { %v11473_v33 = vadd.f32 %v3269_v53, %v13366_v41  ;;  %8505 = vmatprep.mubr.f32.mxu0 %v1446_v62  ;;  %6717 = vmatpush2.msra.mxu0 %v6162_v54  ;;  %v6159_v62 = vld [vmem:[%s13183_s3 + $0x188] sm:$0xff]  ;;  %v6189_v41 = vld [vmem:[%s13183_s3 + $0x278] sm:$0xff] }
 0x2f0   :  { %v3271_v21 = vpop.f32.mrf.mxu0  ;;  %v11475_v29 = vpop.f32.mrf.mxu1  ;;  %6718 = vmatprep.subr.mxu0 %v11202_v61  ;;  %v1449_v53 = vld [vmem:[#allocation2 + $0x24a] sm:$0xff]  ;;  %7048 = vmatpush1.msra.mxu1 %v6189_v41 }
 0x2f1   :  { %13367 = vst [vmem:[#allocation36_spill] sm:$0xff] %v11475_v29  ;;  %6719 = vmatpush2.msra.mxu0 %v6161_v45  ;;  %v1450_v21 = vld [vmem:[#allocation2 + $0x25a] sm:$0xff]  ;;  %7049 = vmatprep.subr.mxu1 %v11202_v61 }
 0x2f2   :  { %v3274_v9 = vpop.f32.mrf.mxu0  ;;  %8506 = vmatmul.mubr.f32.gmra.mxu0 %v1447_v25  ;;  %v3766_v30 = vpop.f32.mrf.mxu1  ;;  %6720 = vmatprep.subr.mxu0 %v11202_v61 }
 0x2f3   :  { %v11486_v54 = vadd.f32 %v3274_v9, %v10558_v50  ;;  %8508 = vmatprep.mubr.f32.mxu0 %v1448_v35  ;;  %6721 = vmatpush2.msra.mxu0 %v6160_v11  ;;  %v6158_v30 = vld [vmem:[%s13183_s3 + $0x180] sm:$0xff] }
 0x2f4   :  { %v3276_v45 = vpop.f32.mrf.mxu0  ;;  %v11491_v25 = vpop.f32.mrf.mxu1  ;;  %6722 = vmatprep.subr.mxu0 %v11202_v61  ;;  %v1451_v9 = vld [vmem:[#allocation2 + $0x262] sm:$0xff] }
 0x2f5   :  { %13368 = vst [vmem:[#allocation91_spill] sm:$0xff] %v11491_v25  ;;  %6723 = vmatpush2.msra.mxu0 %v6159_v62  ;;  %v1452_v45 = vld [vmem:[#allocation2 + $0x272] sm:$0xff] }
 0x2f6   :  { %v3279_v50 = vpop.f32.mrf.mxu0  ;;  %8509 = vmatmul.mubr.f32.gmra.mxu0 %v1449_v53  ;;  %v3771_v35 = vpop.f32.mrf.mxu1  ;;  %6724 = vmatprep.subr.mxu0 %v11202_v61 }
 0x2f7   :  { %v11500_v11 = vadd.f32 %v3279_v50, %v10572_v52  ;;  %8511 = vmatprep.mubr.f32.mxu0 %v1450_v21  ;;  %6725 = vmatpush2.msra.mxu0 %v6158_v30  ;;  %v1453_v35 = vld [vmem:[#allocation2 + $0x27a] sm:$0xff]  ;;  %v6188_v52 = vld [vmem:[%s13183_s3 + $0x270] sm:$0xff] }
 0x2f8   :  { %v3281_v41 = vpop.f32.mrf.mxu0  ;;  %v11502_v29 = vpop.f32.mrf.mxu1  ;;  %7432 = vmatprep.subr.mxu0 %v11202_v61  ;;  %v1454_v30 = vld [vmem:[#allocation2 + $0x28a] sm:$0xff]  ;;  %7050 = vmatpush1.msra.mxu1 %v6188_v52 }
 0x2f9   :  { %13369 = vst [vmem:[#allocation92_spill] sm:$0xff] %v11502_v29  ;;  %7051 = vmatprep.subr.mxu1 %v11202_v61 }
 0x2fa   :  { %v3284_v62 = vpop.f32.mrf.mxu0  ;;  %8512 = vmatmul.mubr.f32.gmra.mxu0 %v1451_v9  ;;  %v3776_v25 = vpop.f32.mrf.mxu1 }
 0x2fb   :  { %v11506_v53 = vadd.f32 %v3284_v62, %v10583_v17  ;;  %8514 = vmatprep.mubr.f32.mxu0 %v1452_v45 }
 0x2fc   :  { %v3286_v21 = vpop.f32.mrf.mxu0  ;;  %v11511_v50 = vpop.f32.mrf.mxu1 }
 0x2fe   :  { %v3289_v41 = vpop.f32.mrf.mxu0  ;;  %8515 = vmatmul.mubr.f32.gmra.mxu0 %v1453_v35  ;;  %v3781_v9 = vpop.f32.mrf.mxu1  ;;  %v6187_v35 = vld [vmem:[%s13183_s3 + $0x268] sm:$0xff] }
 0x2ff   :  { %v11515_v25 = vadd.f32 %v3289_v41, %v10594_v36  ;;  %8517 = vmatprep.mubr.f32.mxu0 %v1454_v30  ;;  %7052 = vmatpush1.msra.mxu1 %v6187_v35 }
 0x300   :  { %v3291_v17 = vpop.f32.mrf.mxu0  ;;  %v11517_v45 = vpop.f32.mrf.mxu1  ;;  %7053 = vmatprep.subr.mxu1 %v11202_v61 }
 0x301   :  { %13370 = vst [vmem:[#allocation93_spill] sm:$0xff] %v11517_v45 }
 0x302   :  { %v3294_v62 = vpop.f32.mrf.mxu0  ;;  %8518 = vmatmul.mubr.f32.gmra.mxu0 %v11054_v16  ;;  %v3786_v21 = vpop.f32.mrf.mxu1 }
 0x303   :  { %v11521_v29 = vadd.f32 %v3294_v62, %v10603_v7  ;;  %8520 = vmatprep.mubr.f32.mxu0 %v11066_v14 }
 0x304   :  { %v3296_v52 = vpop.f32.mrf.mxu0  ;;  %v11527_v36 = vpop.f32.mrf.mxu1 }
 0x305   :  { %13371 = vst [vmem:[#allocation94_spill] sm:$0xff] %v11527_v36 }
 0x306   :  { %v3299_v30 = vpop.f32.mrf.mxu0  ;;  %8521 = vmatmul.mubr.f32.gmra.mxu0 %v11076_v6  ;;  %v3791_v16 = vpop.f32.mrf.mxu1  ;;  %v6186_v6 = vld [vmem:[%s13183_s3 + $0x260] sm:$0xff] }
 0x307   :  { %v11532_v41 = vadd.f32 %v3299_v30, %v10614_v1  ;;  %8523 = vmatprep.mubr.f32.mxu0 %v11088_v19  ;;  %7054 = vmatpush1.msra.mxu1 %v6186_v6  ;;  %v6185_v30 = vld [vmem:[%s13183_s3 + $0x258] sm:$0xff]  ;;  %v6184_v16 = vld [vmem:[%s13183_s3 + $0x250] sm:$0xff] }
 0x308   :  { %v3301_v7 = vpop.f32.mrf.mxu0  ;;  %v11535_v14 = vpop.f32.mrf.mxu1  ;;  %7055 = vmatprep.subr.mxu1 %v11202_v61 }
 0x309   :  { %13372 = vst [vmem:[#allocation95_spill] sm:$0xff] %v11535_v14  ;;  %7056 = vmatpush1.msra.mxu1 %v6185_v30 }
 0x30a   :  { %v3304_v9 = vpop.f32.mrf.mxu0  ;;  %8524 = vmatmul.mubr.f32.gmra.mxu0 %v11098_v26  ;;  %v3796_v17 = vpop.f32.mrf.mxu1  ;;  %7057 = vmatprep.subr.mxu1 %v11202_v61 }
 0x30b   :  { %v11539_v62 = vadd.f32 %v3304_v9, %v10625_v42  ;;  %8526 = vmatprep.mubr.f32.mxu0 %v11110_v46  ;;  %7058 = vmatpush1.msra.mxu1 %v6184_v16 }
 0x30c   :  { %v3306_v1 = vpop.f32.mrf.mxu0  ;;  %v11545_v21 = vpop.f32.mrf.mxu1  ;;  %7059 = vmatprep.subr.mxu1 %v11202_v61 }
 0x30d   :  { %13373 = vst [vmem:[#allocation96_spill] sm:$0xff] %v11545_v21  ;;  %v6183_v1 = vld [vmem:[%s13183_s3 + $0x248] sm:$0xff] }
 0x30e   :  { %v3309_v19 = vpop.f32.mrf.mxu0  ;;  %8527 = vmatmul.mubr.f32.gmra.mxu0 %v11120_v28  ;;  %v3801_v26 = vpop.f32.mrf.mxu1  ;;  %7060 = vmatpush1.msra.mxu1 %v6183_v1 }
 0x30f   :  { %v11550_v35 = vadd.f32 %v3309_v19, %v10636_v13  ;;  %8529 = vmatprep.mubr.f32.mxu0 %v11132_v24  ;;  %7061 = vmatprep.subr.mxu1 %v11202_v61  ;;  %v13376_v26 = vld [vmem:[#allocation39_spill] sm:$0xff] }
 0x310   :  { %v3311_v42 = vpop.f32.mrf.mxu0 }
 0x312   :  { %v3314_v46 = vpop.f32.mrf.mxu0  ;;  %8530 = vmatmul.mubr.f32.gmra.mxu0 %v11142_v38 }
 0x313   :  { %v11555_v52 = vadd.f32 %v3314_v46, %v10647_v34  ;;  %8532 = vmatprep.mubr.f32.mxu0 %v11154_v3 }
 0x314   :  { %v3316_v28 = vpop.f32.mrf.mxu0 }
 0x315   :  { %v13377_v28 = vld [vmem:[#allocation40_spill] sm:$0xff] }
 0x316   :  { %v3319_v13 = vpop.f32.mrf.mxu0  ;;  %8533 = vmatmul.mubr.f32.gmra.mxu0 %v11164_v22  ;;  %v1470_v22 = vld [vmem:[#allocation2 + $0x34a] sm:$0xff] }
 0x317   :  { %v11564_v24 = vadd.f32 %v3319_v13, %v10661_v51  ;;  %8535 = vmatprep.mubr.f32.mxu0 %v11176_v55  ;;  %v13374_v55 = vld [vmem:[#allocation37_spill] sm:$0xff] }
 0x318   :  { %v3321_v34 = vpop.f32.mrf.mxu0 }
 0x319   :  { %v6182_v34 = vld [vmem:[%s13183_s3 + $0x240] sm:$0xff] }
 0x31a   :  { %v3324_v38 = vpop.f32.mrf.mxu0  ;;  %8536 = vmatmul.mubr.f32.gmra.mxu0 %v11186_v40  ;;  %7062 = vmatpush1.msra.mxu1 %v6182_v34 }
 0x31b   :  { %v11569_v3 = vadd.f32 %v3324_v38, %v10671_v18  ;;  %8538 = vmatprep.mubr.f32.mxu0 %v11198_v58  ;;  %v1471_v18 = vld [vmem:[#allocation2 + $0x352] sm:$0xff]  ;;  %v13375_v58 = vld [vmem:[#allocation38_spill] sm:$0xff]  ;;  %7063 = vmatprep.subr.mxu1 %v11202_v61 }
 0x31c   :  { %v3326_v7 = vpop.f32.mrf.mxu0 }
 0x31d   :  { %v13378_v7 = vld [vmem:[#allocation41_spill] sm:$0xff] }
 0x31e   :  { %v3329_v51 = vpop.f32.mrf.mxu0  ;;  %8539 = vmatmul.mubr.f32.gmra.mxu0 %v11210_v20 }
 0x31f   :  { %v11578_v9 = vadd.f32 %v3329_v51, %v13374_v55  ;;  %8541 = vmatprep.mubr.f32.mxu0 %v1470_v22 }
 0x320   :  { %v3331_v40 = vpop.f32.mrf.mxu0 }
 0x322   :  { %v3334_v17 = vpop.f32.mrf.mxu0  ;;  %8542 = vmatmul.mubr.f32.gmra.mxu0 %v1471_v18  ;;  %v13379_v18 = vld [vmem:[#allocation42_spill] sm:$0xff] }
 0x323   :  { %v11581_v6 = vadd.f32 %v3334_v17, %v13375_v58  ;;  %v6181_v17 = vld [vmem:[%s13183_s3 + $0x238] sm:$0xff] }
 0x324   :  { %v3336_v19 = vpop.f32.mrf.mxu0  ;;  %7064 = vmatpush1.msra.mxu1 %v6181_v17 }
 0x325   :  { %7065 = vmatprep.subr.mxu1 %v11202_v61 }
 0x326   :  { %v3339_v20 = vpop.f32.mrf.mxu0 }
 0x327   :  { %v11588_v42 = vadd.f32 %v3339_v20, %v13376_v26 }
 0x328   :  { %v3341_v46 = vpop.f32.mrf.mxu0 }
 0x32a   :  { %v3344_v30 = vpop.f32.mrf.mxu0 }
 0x32b   :  { %v11591_v13 = vadd.f32 %v3344_v30, %v13377_v28  ;;  %v6180_v30 = vld [vmem:[%s13183_s3 + $0x230] sm:$0xff] }
 0x32c   :  { %v3346_v38 = vpop.f32.mrf.mxu0  ;;  %7066 = vmatpush1.msra.mxu1 %v6180_v30  ;;  %v13383_v30 = vld [vmem:[#allocation46_spill] sm:$0xff] }
 0x32d   :  { %7067 = vmatprep.subr.mxu1 %v11202_v61  ;;  %v13380_v38 = vld [vmem:[#allocation43_spill] sm:$0xff] }
 0x32e   :  { %v3349_v16 = vpop.f32.mrf.mxu0 }
 0x32f   :  { %v11598_v22 = vadd.f32 %v3349_v16, %v13378_v7 }
 0x330   :  { %v3351_v51 = vpop.f32.mrf.mxu0 }
 0x331   :  { %v13381_v51 = vld [vmem:[#allocation44_spill] sm:$0xff] }
 0x332   :  { %v3354_v55 = vpop.f32.mrf.mxu0 }
 0x333   :  { %v11601_v40 = vadd.f32 %v3354_v55, %v13379_v18 }
 0x334   :  { %v3356_v58 = vpop.f32.mrf.mxu0 }
 0x335   :  { %v13382_v58 = vld [vmem:[#allocation45_spill] sm:$0xff] }
 0x336   :  { %v3359_v1 = vpop.f32.mrf.mxu0 }
 0x337   :  { %v11608_v19 = vadd.f32 %v3359_v1, %v10761_v59 }
 0x338   :  { %v3361_v20 = vpop.f32.mrf.mxu0 }
 0x33a   :  { %v3364_v26 = vpop.f32.mrf.mxu0 }
 0x33b   :  { %v11611_v46 = vadd.f32 %v3364_v26, %v10770_v37  ;;  %v6179_v37 = vld [vmem:[%s13183_s3 + $0x228] sm:$0xff] }
 0x33c   :  { %v3366_v28 = vpop.f32.mrf.mxu0  ;;  %7068 = vmatpush1.msra.mxu1 %v6179_v37 }
 0x33d   :  { %7069 = vmatprep.subr.mxu1 %v11202_v61 }
 0x33e   :  { %v3369_v34 = vpop.f32.mrf.mxu0 }
 0x33f   :  { %v11618_v16 = vadd.f32 %v3369_v34, %v13380_v38  ;;  %v6178_v34 = vld [vmem:[%s13183_s3 + $0x220] sm:$0xff] }
 0x340   :  { %v3371_v7 = vpop.f32.mrf.mxu0  ;;  %7070 = vmatpush1.msra.mxu1 %v6178_v34  ;;  %v13386_v34 = vld [vmem:[#allocation52_spill] sm:$0xff] }
 0x341   :  { %7071 = vmatprep.subr.mxu1 %v11202_v61 }
 0x342   :  { %v3374_v59 = vpop.f32.mrf.mxu0 }
 0x343   :  { %v11621_v55 = vadd.f32 %v3374_v59, %v13381_v51  ;;  %v13384_v59 = vld [vmem:[#allocation48_spill] sm:$0xff] }
 0x344   :  { %v3376_v18 = vpop.f32.mrf.mxu0 }
 0x346   :  { %v3379_v17 = vpop.f32.mrf.mxu0 }
 0x347   :  { %v11628_v1 = vadd.f32 %v3379_v17, %v13382_v58  ;;  %v13385_v17 = vld [vmem:[#allocation50_spill] sm:$0xff] }
 0x348   :  { %v3381_v20 = vpop.f32.mrf.mxu0 }
 0x349   :  { %v6177_v20 = vld [vmem:[%s13183_s3 + $0x218] sm:$0xff] }
 0x34a   :  { %v3384_v26 = vpop.f32.mrf.mxu0  ;;  %7072 = vmatpush1.msra.mxu1 %v6177_v20 }
 0x34b   :  { %v11631_v28 = vadd.f32 %v3384_v26, %v13383_v30  ;;  %7073 = vmatprep.subr.mxu1 %v11202_v61 }
 0x34c   :  { %v3386_v38 = vpop.f32.mrf.mxu0 }
 0x34e   :  { %v3389_v7 = vpop.f32.mrf.mxu0 }
 0x34f   :  { %v11638_v51 = vadd.f32 %v3389_v7, %v13384_v59  ;;  %v13388_v59 = vld [vmem:[#allocation54_spill] sm:$0xff] }
 0x350   :  { %v3391_v37 = vpop.f32.mrf.mxu0 }
 0x352   :  { %v3394_v18 = vpop.f32.mrf.mxu0 }
 0x353   :  { %v11641_v58 = vadd.f32 %v3394_v18, %v13385_v17  ;;  %v6176_v18 = vld [vmem:[%s13183_s3 + $0x210] sm:$0xff] }
 0x354   :  { %v3396_v26 = vpop.f32.mrf.mxu0  ;;  %7074 = vmatpush1.msra.mxu1 %v6176_v18 }
 0x355   :  { %7075 = vmatprep.subr.mxu1 %v11202_v61  ;;  %v13390_v26 = vld [vmem:[#allocation56_spill] sm:$0xff] }
 0x356   :  { %v3399_v30 = vpop.f32.mrf.mxu0 }
 0x357   :  { %v11648_v38 = vadd.f32 %v3399_v30, %v13386_v34  ;;  %v13392_v34 = vld [vmem:[#allocation58_spill] sm:$0xff] }
 0x358   :  { %v3401_v14 = vpop.f32.mrf.mxu0 }
 0x359   :  { %13387 = vst [vmem:[#allocation37_spill] sm:$0xff] %v11648_v38 }
 0x35a   :  { %v3404_v7 = vpop.f32.mrf.mxu0 }
 0x35b   :  { %v11651_v37 = vadd.f32 %v3404_v7, %v13388_v59  ;;  %v6175_v7 = vld [vmem:[%s13183_s3 + $0x208] sm:$0xff] }
 0x35c   :  { %v3406_v17 = vpop.f32.mrf.mxu0  ;;  %7076 = vmatpush1.msra.mxu1 %v6175_v7  ;;  %v6174_v7 = vld [vmem:[%s13183_s3 + $0x200] sm:$0xff] }
 0x35d   :  { %13389 = vst [vmem:[#allocation38_spill] sm:$0xff] %v11651_v37  ;;  %v13394_v17 = vld [vmem:[#allocation49_spill] sm:$0xff]  ;;  %7077 = vmatprep.subr.mxu1 %v11202_v61 }
 0x35e   :  { %v3409_v20 = vpop.f32.mrf.mxu0  ;;  %v3490_v18 = vadd.f32 %v13394_v17, %v11073_v57  ;;  %7078 = vmatpush1.msra.mxu1 %v6174_v7  ;;  %v13397_v57 = vld [vmem:[#allocation51_spill] sm:$0xff]  ;;  %v13400_v7 = vld [vmem:[#allocation60_spill] sm:$0xff] }
 0x35f   :  { %v11658_v21 = vadd.f32 %v3409_v20, %v13390_v26  ;;  %v13395_v20 = vld [vmem:[#allocation47_spill] sm:$0xff]  ;;  %v3495_v61 = vadd.f32 %v13397_v57, %v11082_v23 }
 0x360   :  { %v3411_v45 = vpop.f32.mrf.mxu0  ;;  %v3485_v26 = vadd.f32 %v13395_v20, %v11060_v8  ;;  %v11680_v8 = vld [vmem:[#allocation2 + $0x8] sm:$0xff] }
 0x361   :  { %13391 = vst [vmem:[#allocation39_spill] sm:$0xff] %v11658_v21  ;;  %7079 = vmatprep.subr.mxu1 %v11680_v8  ;;  %v13399_v23 = vld [vmem:[#allocation55_spill] sm:$0xff] }
 0x362   :  { %v3414_v30 = vpop.f32.mrf.mxu0 }
 0x363   :  { %v11661_v14 = vadd.f32 %v3414_v30, %v13392_v34  ;;  %v13396_v30 = vld [vmem:[#allocation53_spill] sm:$0xff] }
 0x364   :  { %v3416_v59 = vpop.f32.mrf.mxu0  ;;  %v3500_v34 = vadd.f32 %v13396_v30, %v11095_v47 }
 0x365   :  { %13393 = vst [vmem:[#allocation40_spill] sm:$0xff] %v11661_v14 }
 0x366   :  { %v8450_v38 = vpop.f32.mrf.mxu0 }
 0x367   :  { %v3875_v45 = vadd.f32 %v8450_v38, %v3490_v18 }
 0x368   :  { %v3869_v21 = vpop.f32.mrf.mxu0 }
 0x369   :  { %v4189_v14 = vmax.f32 %v3875_v45, 0.0  ;;  %v3870_v36 = vadd.f32 %v3869_v21, %v3485_v26  ;;  %v13398_v21 = vld [vmem:[#allocation57_spill] sm:$0xff]  ;;  %v3505_v45 = vadd.f32 %v13399_v23, %v11104_v63  ;;  %v13402_v23 = vld [vmem:[#allocation7_spill] sm:$0xff] }
 0x36a   :  { %v8453_v59 = vpop.f32.mrf.mxu0  ;;  %v3510_v38 = vadd.f32 %v13398_v21, %v11117_v56 }
 0x36b   :  { %4254 = vst [vmem:[#allocation3 + $0x21] sm:$0xff] %v4189_v14  ;;  %v4188_v17 = vmax.f32 %v3870_v36, 0.0  ;;  %v11678_v37 = vadd.f32 %v8453_v59, %v3500_v34  ;;  %v6205_v34 = vld [vmem:[%s13183_s3 + $0x2f8] sm:$0xff]  ;;  %v3520_v59 = vadd.f32 %v13400_v7, %v11139_v49 }
 0x36c   :  { %v3879_v47 = vpop.f32.mrf.mxu0  ;;  %7080 = vmatpush2.msra.mxu1 %v6205_v34 }
 0x36d   :  { %4253 = vst [vmem:[#allocation3 + $0x19] sm:$0xff] %v4188_v17  ;;  %v4191_v18 = vmax.f32 %v11678_v37, 0.0  ;;  %v3880_v20 = vadd.f32 %v3879_v47, %v3495_v61  ;;  %6351 = vmatprep.mubr.f32.mxu1 %v4188_v17  ;;  %7081 = vmatprep.subr.mxu1 %v11680_v8  ;;  %v13401_v17 = vld [vmem:[#allocation59_spill] sm:$0xff]  ;;  %v3560_v37 = vadd.f32 %v10999_v27, %v11227_v10 }
 0x36e   :  { %v8456_v26 = vpop.f32.mrf.mxu0  ;;  %v3515_v47 = vadd.f32 %v13401_v17, %v11126_v5 }
 0x36f   :  { %4256 = vst [vmem:[#allocation3 + $0x39] sm:$0xff] %v4191_v18  ;;  %v4190_v36 = vmax.f32 %v3880_v20, 0.0  ;;  %v11690_v30 = vadd.f32 %v8456_v26, %v3510_v38  ;;  %v4573_v20 = vld [vmem:[#allocation3 + $0x2] sm:$0xff] }
 0x370   :  { %v3889_v56 = vpop.f32.mrf.mxu0 }
 0x371   :  { %4255 = vst [vmem:[#allocation3 + $0x31] sm:$0xff] %v4190_v36  ;;  %v4193_v57 = vmax.f32 %v11690_v30, 0.0  ;;  %v11698_v61 = vadd.f32 %v3889_v56, %v3505_v45  ;;  %v3530_v45 = vadd.f32 %v13402_v23, %v11161_v43  ;;  %v4574_v23 = vld [vmem:[#allocation3 + $0xa] sm:$0xff] }
 0x372   :  { %v8459_v63 = vpop.f32.mrf.mxu0  ;;  %v13412_v30 = vld [vmem:[#allocation15_spill] sm:$0xff] }
 0x373   :  { %4258 = vst [vmem:[#allocation3 + $0x51] sm:$0xff] %v4193_v57  ;;  %v4192_v21 = vmax.f32 %v11698_v61, 0.0  ;;  %v11706_v38 = vadd.f32 %v8459_v63, %v3520_v59  ;;  %v13403_v59 = vld [vmem:[#allocation6_spill] sm:$0xff] }
 0x374   :  { %v3899_v49 = vpop.f32.mrf.mxu0  ;;  %v4701_v26 = vld [vmem:[#allocation3 + $0x18] sm:$0xff]  ;;  %v4702_v7 = vld [vmem:[#allocation3 + $0x20] sm:$0xff]  ;;  %v3525_v63 = vadd.f32 %v13403_v59, %v11148_v2  ;;  %v13405_v59 = vld [vmem:[#allocation8_spill] sm:$0xff] }
 0x375   :  { %4257 = vst [vmem:[#allocation3 + $0x49] sm:$0xff] %v4192_v21  ;;  %v4195_v34 = vmax.f32 %v11706_v38, 0.0  ;;  %v11713_v56 = vadd.f32 %v3899_v49, %v3515_v47  ;;  %6726 = vmatprep.mubr.f32.mxu0 %v4701_v26  ;;  %6352 = vmatmul.mubr.f32.gmra.mxu1 %v4701_v26  ;;  %v6204_v47 = vld [vmem:[%s13183_s3 + $0x2f0] sm:$0xff]  ;;  %v13418_v38 = vld [vmem:[#allocation27_spill] sm:$0xff] }
 0x376   :  { %v8462_v5 = vpop.f32.mrf.mxu0  ;;  %6727 = vmatmul.mubr.f32.vlgmr.msra.gmra.mxu0 %v4573_v20  ;;  %6356 = vmatprep.mubr.f32.mxu1 %v4189_v14  ;;  %v13404_v14 = vld [vmem:[#allocation9_spill] sm:$0xff] }
 0x377   :  { %4260 = vst [vmem:[#allocation3 + $0x69] sm:$0xff] %v4195_v34  ;;  %v4194_v43 = vmax.f32 %v11713_v56, 0.0  ;;  %v11720_v17 = vadd.f32 %v8462_v5, %v3530_v45  ;;  %6731 = vmatprep.mubr.f32.mxu0 %v4702_v7  ;;  %7082 = vmatpush2.msra.mxu1 %v6204_v47  ;;  %v3540_v20 = vadd.f32 %v13404_v14, %v11183_v0 }
 0x378   :  { %v3909_v49 = vpop.f32.mrf.mxu0  ;;  %7083 = vmatprep.subr.mxu1 %v11680_v8  ;;  %v4703_v5 = vld [vmem:[#allocation3 + $0x30] sm:$0xff]  ;;  %v3535_v47 = vadd.f32 %v13405_v59, %v11170_v48  ;;  %v4575_v48 = vld [vmem:[#allocation3 + $0x1a] sm:$0xff] }
 0x379   :  { %4259 = vst [vmem:[#allocation3 + $0x61] sm:$0xff] %v4194_v43  ;;  %v4197_v2 = vmax.f32 %v11720_v17, 0.0  ;;  %v11730_v26 = vadd.f32 %v3909_v49, %v3525_v63  ;;  %6357 = vmatmul.mubr.f32.gmra.mxu1 %v4702_v7  ;;  %v3550_v7 = vadd.f32 %v10981_v44, %v11207_v32  ;;  %v13426_v17 = vld [vmem:[#allocation31_spill] sm:$0xff] }
 0x37a   :  { %v8465_v45 = vpop.f32.mrf.mxu0  ;;  %6732 = vmatmul.mubr.f32.gmra.mxu0 %v4574_v23  ;;  %6361 = vmatprep.mubr.f32.mxu1 %v4190_v36 }
 0x37b   :  { %4262 = vst [vmem:[#allocation3 + $0x81] sm:$0xff] %v4197_v2  ;;  %v4196_v0 = vmax.f32 %v11730_v26, 0.0  ;;  %v11738_v14 = vadd.f32 %v8465_v45, %v3540_v20  ;;  %6736 = vmatprep.mubr.f32.mxu0 %v4703_v5  ;;  %v4704_v20 = vld [vmem:[#allocation3 + $0x38] sm:$0xff]  ;;  %v13406_v45 = vld [vmem:[#allocation10_spill] sm:$0xff] }
 0x37c   :  { %v3919_v63 = vpop.f32.mrf.mxu0  ;;  %v3545_v59 = vadd.f32 %v13406_v45, %v11192_v4 }
 0x37d   :  { %4261 = vst [vmem:[#allocation3 + $0x79] sm:$0xff] %v4196_v0  ;;  %v4199_v36 = vmax.f32 %v11738_v14, 0.0  ;;  %v11745_v23 = vadd.f32 %v3919_v63, %v3535_v47  ;;  %6362 = vmatmul.mubr.f32.gmra.mxu1 %v4703_v5  ;;  %v6203_v5 = vld [vmem:[%s13183_s3 + $0x2e8] sm:$0xff] }
 0x37e   :  { %v8468_v49 = vpop.f32.mrf.mxu0  ;;  %6737 = vmatmul.mubr.f32.gmra.mxu0 %v4575_v48  ;;  %6366 = vmatprep.mubr.f32.mxu1 %v4191_v18  ;;  %v4576_v63 = vld [vmem:[#allocation3 + $0x22] sm:$0xff] }
 0x37f   :  { %4264 = vst [vmem:[#allocation3 + $0x99] sm:$0xff] %v4199_v36  ;;  %v4198_v44 = vmax.f32 %v11745_v23, 0.0  ;;  %v11754_v32 = vadd.f32 %v8468_v49, %v3550_v7  ;;  %6741 = vmatprep.mubr.f32.mxu0 %v4704_v20  ;;  %7084 = vmatpush2.msra.mxu1 %v6203_v5  ;;  %v4705_v48 = vld [vmem:[#allocation3 + $0x48] sm:$0xff]  ;;  %v13409_v5 = vld [vmem:[#allocation13_spill] sm:$0xff] }
 0x380   :  { %v3929_v47 = vpop.f32.mrf.mxu0  ;;  %7085 = vmatprep.subr.mxu1 %v11680_v8  ;;  %v13407_v49 = vld [vmem:[#allocation11_spill] sm:$0xff] }
 0x381   :  { %4263 = vst [vmem:[#allocation3 + $0x91] sm:$0xff] %v4198_v44  ;;  %v13188_v4 = vmax.f32 %v11754_v32, 0.0  ;;  %v11764_v18 = vadd.f32 %v3929_v47, %v3545_v59  ;;  %6367 = vmatmul.mubr.f32.gmra.mxu1 %v4704_v20  ;;  %v3555_v27 = vadd.f32 %v13407_v49, %v11216_v39  ;;  %v13408_v59 = vld [vmem:[#allocation21_spill] sm:$0xff]  ;;  %v13411_v49 = vld [vmem:[#allocation12_spill] sm:$0xff]  ;;  %v13434_v14 = vld [vmem:[#allocation35_spill] sm:$0xff] }
 0x382   :  { %v8471_v7 = vpop.f32.mrf.mxu0  ;;  %6742 = vmatmul.mubr.f32.gmra.mxu0 %v4576_v63  ;;  %6371 = vmatprep.mubr.f32.mxu1 %v4192_v21  ;;  %v3570_v47 = vadd.f32 %v13409_v5, %v13408_v59  ;;  %v4577_v39 = vld [vmem:[#allocation3 + $0x32] sm:$0xff] }
 0x383   :  { %4266 = vst [vmem:[#allocation3 + $0xb1] sm:$0xff] %v13188_v4  ;;  %v4200_v10 = vmax.f32 %v11764_v18, 0.0  ;;  %v11774_v45 = vadd.f32 %v8471_v7, %v3560_v37  ;;  %6746 = vmatprep.mubr.f32.mxu0 %v4705_v48  ;;  %v4706_v37 = vld [vmem:[#allocation3 + $0x50] sm:$0xff] }
 0x384   :  { %v3939_v20 = vpop.f32.mrf.mxu0  ;;  %v13410_v7 = vld [vmem:[#allocation20_spill] sm:$0xff] }
 0x385   :  { %4265 = vst [vmem:[#allocation3 + $0xa9] sm:$0xff] %v4200_v10  ;;  %v13189_v61 = vmax.f32 %v11774_v45, 0.0  ;;  %v11781_v21 = vadd.f32 %v3939_v20, %v3555_v27  ;;  %6372 = vmatmul.mubr.f32.gmra.mxu1 %v4705_v48  ;;  %v3565_v4 = vadd.f32 %v13411_v49, %v13410_v7  ;;  %v6202_v48 = vld [vmem:[%s13183_s3 + $0x2e0] sm:$0xff] }
 0x386   :  { %v8474_v63 = vpop.f32.mrf.mxu0  ;;  %6747 = vmatmul.mubr.f32.gmra.mxu0 %v4577_v39  ;;  %6376 = vmatprep.mubr.f32.mxu1 %v4193_v57  ;;  %v3580_v57 = vadd.f32 %v13412_v30, %v11255_v12  ;;  %v4707_v7 = vld [vmem:[#allocation3 + $0x60] sm:$0xff] }
 0x387   :  { %4268 = vst [vmem:[#allocation3 + $0xc9] sm:$0xff] %v13189_v61  ;;  %v13203_v59 = vmax.f32 %v11781_v21, 0.0  ;;  %v11790_v5 = vadd.f32 %v8474_v63, %v3570_v47  ;;  %6751 = vmatprep.mubr.f32.mxu0 %v4706_v37  ;;  %7086 = vmatpush2.msra.mxu1 %v6202_v48  ;;  %v4578_v47 = vld [vmem:[#allocation3 + $0x3a] sm:$0xff] }
 0x388   :  { %v3949_v27 = vpop.f32.mrf.mxu0  ;;  %7087 = vmatprep.subr.mxu1 %v11680_v8  ;;  %v13413_v49 = vld [vmem:[#allocation22_spill] sm:$0xff] }
 0x389   :  { %4267 = vst [vmem:[#allocation3 + $0xc1] sm:$0xff] %v13203_v59  ;;  %v13190_v20 = vmax.f32 %v11790_v5, 0.0  ;;  %v11800_v39 = vadd.f32 %v3949_v27, %v3565_v4  ;;  %6377 = vmatmul.mubr.f32.gmra.mxu1 %v4706_v37  ;;  %v13414_v48 = vld [vmem:[#allocation14_spill] sm:$0xff]  ;;  %v13415_v27 = vld [vmem:[#allocation17_spill] sm:$0xff] }
 0x38a   :  { %v8477_v63 = vpop.f32.mrf.mxu0  ;;  %6752 = vmatmul.mubr.f32.gmra.mxu0 %v4578_v47  ;;  %6381 = vmatprep.mubr.f32.mxu1 %v4194_v43  ;;  %v3575_v12 = vadd.f32 %v13414_v48, %v13413_v49  ;;  %v3590_v61 = vadd.f32 %v13415_v27, %v11280_v60  ;;  %v4579_v47 = vld [vmem:[#allocation3 + $0x4a] sm:$0xff] }
 0x38b   :  { %4270 = vst [vmem:[#allocation3 + $0xe1] sm:$0xff] %v13190_v20  ;;  %v13193_v30 = vmax.f32 %v11800_v39, 0.0  ;;  %v11810_v4 = vadd.f32 %v8477_v63, %v3580_v57  ;;  %6756 = vmatprep.mubr.f32.mxu0 %v4707_v7  ;;  %v4708_v57 = vld [vmem:[#allocation3 + $0x68] sm:$0xff]  ;;  %v13416_v63 = vld [vmem:[#allocation24_spill] sm:$0xff] }
 0x38c   :  { %v3959_v37 = vpop.f32.mrf.mxu0  ;;  %v13417_v48 = vld [vmem:[#allocation16_spill] sm:$0xff] }
 0x38d   :  { %4269 = vst [vmem:[#allocation3 + $0xd9] sm:$0xff] %v13193_v30  ;;  %v13191_v56 = vmax.f32 %v11810_v4, 0.0  ;;  %v11817_v43 = vadd.f32 %v3959_v37, %v3575_v12  ;;  %6382 = vmatmul.mubr.f32.gmra.mxu1 %v4707_v7  ;;  %v3585_v20 = vadd.f32 %v13417_v48, %v13416_v63  ;;  %v6201_v7 = vld [vmem:[%s13183_s3 + $0x2d8] sm:$0xff] }
 0x38e   :  { %v8480_v49 = vpop.f32.mrf.mxu0  ;;  %6757 = vmatmul.mubr.f32.gmra.mxu0 %v4579_v47  ;;  %6386 = vmatprep.mubr.f32.mxu1 %v4195_v34  ;;  %v13419_v34 = vld [vmem:[#allocation19_spill] sm:$0xff]  ;;  %v4709_v48 = vld [vmem:[#allocation3 + $0x78] sm:$0xff] }
 0x38f   :  { %4272 = vst [vmem:[#allocation3 + $0xf9] sm:$0xff] %v13191_v56  ;;  %v13192_v60 = vmax.f32 %v11817_v43, 0.0  ;;  %v11826_v27 = vadd.f32 %v8480_v49, %v3590_v61  ;;  %6761 = vmatprep.mubr.f32.mxu0 %v4708_v57  ;;  %7088 = vmatpush2.msra.mxu1 %v6201_v7  ;;  %v3600_v37 = vadd.f32 %v13419_v34, %v13418_v38  ;;  %v4580_v61 = vld [vmem:[#allocation3 + $0x52] sm:$0xff]  ;;  %v13420_v7 = vld [vmem:[#allocation26_spill] sm:$0xff] }
 0x390   :  { %v3969_v12 = vpop.f32.mrf.mxu0  ;;  %7089 = vmatprep.subr.mxu1 %v11680_v8  ;;  %v13421_v56 = vld [vmem:[#allocation18_spill] sm:$0xff] }
 0x391   :  { %4271 = vst [vmem:[#allocation3 + $0xf1] sm:$0xff] %v13192_v60  ;;  %v13194_v47 = vmax.f32 %v11826_v27, 0.0  ;;  %v11836_v63 = vadd.f32 %v3969_v12, %v3585_v20  ;;  %6387 = vmatmul.mubr.f32.gmra.mxu1 %v4708_v57  ;;  %v3595_v38 = vadd.f32 %v13421_v56, %v13420_v7  ;;  %v13422_v12 = vld [vmem:[#allocation29_spill] sm:$0xff]  ;;  %v13423_v60 = vld [vmem:[#allocation62_spill] sm:$0xff] }
 0x392   :  { %v8483_v49 = vpop.f32.mrf.mxu0  ;;  %6762 = vmatmul.mubr.f32.gmra.mxu0 %v4580_v61  ;;  %6391 = vmatprep.mubr.f32.mxu1 %v4196_v0  ;;  %v3610_v30 = vadd.f32 %v13423_v60, %v13422_v12  ;;  %v4581_v56 = vld [vmem:[#allocation3 + $0x62] sm:$0xff]  ;;  %v13425_v7 = vld [vmem:[#allocation61_spill] sm:$0xff] }
 0x393   :  { %4274 = vst [vmem:[#allocation3 + $0x111] sm:$0xff] %v13194_v47  ;;  %v13197_v34 = vmax.f32 %v11836_v63, 0.0  ;;  %v11846_v20 = vadd.f32 %v8483_v49, %v3600_v37  ;;  %6766 = vmatprep.mubr.f32.mxu0 %v4709_v48  ;;  %v4710_v37 = vld [vmem:[#allocation3 + $0x80] sm:$0xff]  ;;  %v13424_v49 = vld [vmem:[#allocation28_spill] sm:$0xff] }
 0x394   :  { %v3979_v57 = vpop.f32.mrf.mxu0  ;;  %v3605_v47 = vadd.f32 %v13425_v7, %v13424_v49  ;;  %v4711_v7 = vld [vmem:[#allocation3 + $0x90] sm:$0xff] }
 0x395   :  { %4273 = vst [vmem:[#allocation3 + $0x109] sm:$0xff] %v13197_v34  ;;  %v13195_v26 = vmax.f32 %v11846_v20, 0.0  ;;  %v11853_v0 = vadd.f32 %v3979_v57, %v3595_v38  ;;  %6392 = vmatmul.mubr.f32.gmra.mxu1 %v4709_v48  ;;  %v6200_v48 = vld [vmem:[%s13183_s3 + $0x2d0] sm:$0xff] }
 0x396   :  { %v8486_v61 = vpop.f32.mrf.mxu0  ;;  %6767 = vmatmul.mubr.f32.gmra.mxu0 %v4581_v56  ;;  %6396 = vmatprep.mubr.f32.mxu1 %v4197_v2  ;;  %v13427_v2 = vld [vmem:[#allocation64_spill] sm:$0xff] }
 0x397   :  { %4276 = vst [vmem:[#allocation3 + $0x129] sm:$0xff] %v13195_v26  ;;  %v13196_v60 = vmax.f32 %v11853_v0, 0.0  ;;  %v11862_v12 = vadd.f32 %v8486_v61, %v3610_v30  ;;  %6771 = vmatprep.mubr.f32.mxu0 %v4710_v37  ;;  %7090 = vmatpush2.msra.mxu1 %v6200_v48  ;;  %v3620_v57 = vadd.f32 %v13427_v2, %v13426_v17  ;;  %v4582_v30 = vld [vmem:[#allocation3 + $0x6a] sm:$0xff]  ;;  %v13428_v48 = vld [vmem:[#allocation30_spill] sm:$0xff] }
 0x398   :  { %v3989_v38 = vpop.f32.mrf.mxu0  ;;  %7091 = vmatprep.subr.mxu1 %v11680_v8  ;;  %v13429_v26 = vld [vmem:[#allocation63_spill] sm:$0xff] }
 0x399   :  { %4275 = vst [vmem:[#allocation3 + $0x121] sm:$0xff] %v13196_v60  ;;  %v13198_v56 = vmax.f32 %v11862_v12, 0.0  ;;  %v11872_v49 = vadd.f32 %v3989_v38, %v3605_v47  ;;  %6397 = vmatmul.mubr.f32.gmra.mxu1 %v4710_v37  ;;  %v3615_v17 = vadd.f32 %v13429_v26, %v13428_v48  ;;  %v13430_v38 = vld [vmem:[#allocation33_spill] sm:$0xff]  ;;  %v13431_v60 = vld [vmem:[#allocation66_spill] sm:$0xff] }
 0x39a   :  { %v8489_v61 = vpop.f32.mrf.mxu0  ;;  %6772 = vmatmul.mubr.f32.gmra.mxu0 %v4582_v30  ;;  %6401 = vmatprep.mubr.f32.mxu1 %v4198_v44  ;;  %v3630_v34 = vadd.f32 %v13431_v60, %v13430_v38  ;;  %v4583_v26 = vld [vmem:[#allocation3 + $0x7a] sm:$0xff] }
 0x39b   :  { %4278 = vst [vmem:[#allocation3 + $0x141] sm:$0xff] %v13198_v56  ;;  %v13201_v2 = vmax.f32 %v11872_v49, 0.0  ;;  %v11882_v47 = vadd.f32 %v8489_v61, %v3620_v57  ;;  %6776 = vmatprep.mubr.f32.mxu0 %v4711_v7  ;;  %v4712_v57 = vld [vmem:[#allocation3 + $0x98] sm:$0xff]  ;;  %v13432_v61 = vld [vmem:[#allocation32_spill] sm:$0xff] }
 0x39c   :  { %v3999_v37 = vpop.f32.mrf.mxu0  ;;  %v13433_v48 = vld [vmem:[#allocation65_spill] sm:$0xff] }
 0x39d   :  { %4277 = vst [vmem:[#allocation3 + $0x139] sm:$0xff] %v13201_v2  ;;  %v13199_v23 = vmax.f32 %v11882_v47, 0.0  ;;  %v11889_v44 = vadd.f32 %v3999_v37, %v3615_v17  ;;  %6402 = vmatmul.mubr.f32.gmra.mxu1 %v4711_v7  ;;  %v3625_v56 = vadd.f32 %v13433_v48, %v13432_v61  ;;  %v6199_v7 = vld [vmem:[%s13183_s3 + $0x2c8] sm:$0xff] }
 0x39e   :  { %v8492_v30 = vpop.f32.mrf.mxu0  ;;  %6777 = vmatmul.mubr.f32.gmra.mxu0 %v4583_v26  ;;  %6406 = vmatprep.mubr.f32.mxu1 %v4199_v36  ;;  %v13435_v36 = vld [vmem:[#allocation68_spill] sm:$0xff]  ;;  %v4713_v48 = vld [vmem:[#allocation3 + $0xa8] sm:$0xff] }
 0x39f   :  { %4280 = vst [vmem:[#allocation3 + $0x159] sm:$0xff] %v13199_v23  ;;  %v13200_v60 = vmax.f32 %v11889_v44, 0.0  ;;  %v11898_v38 = vadd.f32 %v8492_v30, %v3630_v34  ;;  %6781 = vmatprep.mubr.f32.mxu0 %v4712_v57  ;;  %7092 = vmatpush2.msra.mxu1 %v6199_v7  ;;  %v3640_v37 = vadd.f32 %v13435_v36, %v13434_v14  ;;  %v4584_v34 = vld [vmem:[#allocation3 + $0x82] sm:$0xff] }
 0x3a0   :  { %v4009_v17 = vpop.f32.mrf.mxu0  ;;  %7093 = vmatprep.subr.mxu1 %v11680_v8  ;;  %v13436_v7 = vld [vmem:[#allocation34_spill] sm:$0xff]  ;;  %v13437_v23 = vld [vmem:[#allocation67_spill] sm:$0xff] }
 0x3a1   :  { %4279 = vst [vmem:[#allocation3 + $0x151] sm:$0xff] %v13200_v60  ;;  %v13202_v26 = vmax.f32 %v11898_v38, 0.0  ;;  %v11908_v61 = vadd.f32 %v4009_v17, %v3625_v56  ;;  %6407 = vmatmul.mubr.f32.gmra.mxu1 %v4712_v57  ;;  %v3635_v14 = vadd.f32 %v13437_v23, %v13436_v7  ;;  %v13438_v17 = vld [vmem:[#allocation70_spill] sm:$0xff]  ;;  %v13439_v23 = vmax.f32 %v11754_v32, 0.0  ;;  %v4714_v7 = vld [vmem:[#allocation3 + $0xb0] sm:$0xff] }
 0x3a2   :  { %v8495_v30 = vpop.f32.mrf.mxu0  ;;  %6782 = vmatmul.mubr.f32.gmra.mxu0 %v4584_v34  ;;  %6411 = vmatprep.mubr.f32.mxu1 %v4200_v10  ;;  %v3650_v60 = vadd.f32 %v13438_v17, %v11459_v15  ;;  %v4585_v34 = vld [vmem:[#allocation3 + $0x92] sm:$0xff]  ;;  %v6198_v15 = vld [vmem:[%s13183_s3 + $0x2c0] sm:$0xff] }
 0x3a3   :  { %4282 = vst [vmem:[#allocation3 + $0x171] sm:$0xff] %v13202_v26  ;;  %v4216_v36 = vmax.f32 %v11908_v61, 0.0  ;;  %v4025_v56 = vadd.f32 %v8495_v30, %v3640_v37  ;;  %6786 = vmatprep.mubr.f32.mxu0 %v4713_v48  ;;  %v13440_v37 = vld [vmem:[#allocation69_spill] sm:$0xff]  ;;  %7094 = vmatpush2.msra.mxu1 %v6198_v15  ;;  %v4715_v17 = vld [vmem:[#allocation3 + $0xc0] sm:$0xff] }
 0x3a4   :  { %v4019_v57 = vpop.f32.mrf.mxu0  ;;  %v3645_v30 = vadd.f32 %v13440_v37, %v11446_v31  ;;  %v4586_v31 = vld [vmem:[#allocation3 + $0x9a] sm:$0xff]  ;;  %7095 = vmatprep.subr.mxu1 %v11680_v8 }
 0x3a5   :  { %4281 = vst [vmem:[#allocation3 + $0x169] sm:$0xff] %v4216_v36  ;;  %v4219_v18 = vmax.f32 %v4025_v56, 0.0  ;;  %v4020_v10 = vadd.f32 %v4019_v57, %v3635_v14  ;;  %6412 = vmatmul.mubr.f32.gmra.mxu1 %v4713_v48  ;;  %v13441_v14 = vld [vmem:[#allocation72_spill] sm:$0xff] }
 0x3a6   :  { %v8498_v2 = vpop.f32.mrf.mxu0  ;;  %6787 = vmatmul.mubr.f32.gmra.mxu0 %v4585_v34  ;;  %6416 = vmatprep.mubr.f32.mxu1 %v13439_v23  ;;  %v3660_v56 = vadd.f32 %v13441_v14, %v11486_v54  ;;  %v13445_v14 = vmax.f32 %v11774_v45, 0.0 }
 0x3a7   :  { %4284 = vst [vmem:[#allocation3 + $0x189] sm:$0xff] %v4219_v18  ;;  %v4218_v26 = vmax.f32 %v4020_v10, 0.0  ;;  %v11926_v59 = vadd.f32 %v8498_v2, %v3650_v60  ;;  %6791 = vmatprep.mubr.f32.mxu0 %v4714_v7  ;;  %v13442_v60 = vmax.f32 %v11781_v21, 0.0  ;;  %v13443_v18 = vld [vmem:[#allocation71_spill] sm:$0xff] }
 0x3a8   :  { %v4029_v48 = vpop.f32.mrf.mxu0  ;;  %v3655_v10 = vadd.f32 %v13443_v18, %v11473_v33  ;;  %v11946_v34 = vpop.f32.mrf.mxu1 }
 0x3a9   :  { %4283 = vst [vmem:[#allocation3 + $0x181] sm:$0xff] %v4218_v26  ;;  %v4221_v32 = vmax.f32 %v11926_v59, 0.0  ;;  %v11934_v57 = vadd.f32 %v4029_v48, %v3645_v30  ;;  %6417 = vmatmul.mubr.f32.gmra.mxu1 %v4714_v7  ;;  %v13444_v7 = vld [vmem:[#allocation74_spill] sm:$0xff]  ;;  %v4587_v30 = vld [vmem:[#allocation3 + $0xaa] sm:$0xff] }
 0x3aa   :  { %v8501_v2 = vpop.f32.mrf.mxu0  ;;  %6792 = vmatmul.mubr.f32.gmra.mxu0 %v4586_v31  ;;  %6421 = vmatprep.mubr.f32.mxu1 %v13442_v60  ;;  %v3670_v37 = vadd.f32 %v13444_v7, %v11506_v53  ;;  %v6345_v15 = vpop.f32.mrf.mxu1  ;;  %v13446_v31 = vld [vmem:[#allocation73_spill] sm:$0xff]  ;;  %v6227_v59 = vld [vmem:[%s13183_s3 + $0x3a8] sm:$0xff] }
 0x3ab   :  { %4286 = vst [vmem:[#allocation3 + $0x1d1] sm:$0xff] %v4221_v32  ;;  %v4220_v54 = vmax.f32 %v11934_v57, 0.0  ;;  %v11944_v26 = vadd.f32 %v8501_v2, %v3660_v56  ;;  %6796 = vmatprep.mubr.f32.mxu0 %v4715_v17  ;;  %v4716_v56 = vld [vmem:[#allocation3 + $0xc8] sm:$0xff]  ;;  %v3665_v2 = vadd.f32 %v13446_v31, %v11500_v11 }
 0x3ac   :  { %v4039_v23 = vpop.f32.mrf.mxu0  ;;  %v11967_v18 = vpop.f32.mrf.mxu1 }
 0x3ad   :  { %4285 = vst [vmem:[#allocation3 + $0x1c9] sm:$0xff] %v4220_v54  ;;  %v4223_v21 = vmax.f32 %v11944_v26, 0.0  ;;  %v11953_v33 = vadd.f32 %v4039_v23, %v3655_v10  ;;  %6422 = vmatmul.mubr.f32.gmra.mxu1 %v4715_v17  ;;  %v6197_v17 = vld [vmem:[%s13183_s3 + $0x2b8] sm:$0xff]  ;;  %v13447_v10 = vld [vmem:[#allocation76_spill] sm:$0xff] }
 0x3ae   :  { %v8504_v48 = vpop.f32.mrf.mxu0  ;;  %6797 = vmatmul.mubr.f32.gmra.mxu0 %v4587_v30  ;;  %6426 = vmatprep.mubr.f32.mxu1 %v13445_v14  ;;  %v3680_v23 = vadd.f32 %v13447_v10, %v11521_v29  ;;  %v6350_v30 = vpop.f32.mrf.mxu1  ;;  %v4717_v14 = vld [vmem:[#allocation3 + $0xd8] sm:$0xff]  ;;  %v13449_v29 = vld [vmem:[#allocation75_spill] sm:$0xff]  ;;  %v6224_v26 = vld [vmem:[%s13183_s3 + $0x390] sm:$0xff] }
 0x3af   :  { %4288 = vst [vmem:[#allocation3 + $0x1e9] sm:$0xff] %v4223_v21  ;;  %v4222_v53 = vmax.f32 %v11953_v33, 0.0  ;;  %v11962_v60 = vadd.f32 %v8504_v48, %v3670_v37  ;;  %6801 = vmatprep.mubr.f32.mxu0 %v4716_v56  ;;  %7096 = vmatpush2.msra.mxu1 %v6197_v17  ;;  %v4588_v37 = vld [vmem:[#allocation3 + $0xb2] sm:$0xff]  ;;  %v13448_v48 = vmax.f32 %v11800_v39, 0.0  ;;  %v3675_v31 = vadd.f32 %v13449_v29, %v11515_v25  ;;  %v4589_v25 = vld [vmem:[#allocation3 + $0xc2] sm:$0xff] }
 0x3b0   :  { %v4049_v45 = vpop.f32.mrf.mxu0  ;;  %7097 = vmatprep.subr.mxu1 %v11680_v8 }
 0x3b1   :  { %4287 = vst [vmem:[#allocation3 + $0x1e1] sm:$0xff] %v4222_v53  ;;  %v4225_v11 = vmax.f32 %v11962_v60, 0.0  ;;  %v11974_v7 = vadd.f32 %v4049_v45, %v3665_v2  ;;  %6427 = vmatmul.mubr.f32.gmra.mxu1 %v4716_v56  ;;  %v13450_v45 = vld [vmem:[#allocation23_spill] sm:$0xff] }
 0x3b2   :  { %v8507_v15 = vpop.f32.mrf.mxu0  ;;  %6802 = vmatmul.mubr.f32.gmra.mxu0 %v4588_v37  ;;  %6431 = vmatprep.mubr.f32.mxu1 %v13448_v48  ;;  %v3690_v10 = vadd.f32 %v13450_v45, %v11539_v62  ;;  %v13451_v48 = vmax.f32 %v11790_v5, 0.0  ;;  %v13452_v62 = vld [vmem:[#allocation77_spill] sm:$0xff]  ;;  %v6196_v5 = vld [vmem:[%s13183_s3 + $0x2b0] sm:$0xff] }
 0x3b3   :  { %4290 = vst [vmem:[#allocation3 + $0x201] sm:$0xff] %v4225_v11  ;;  %v4224_v2 = vmax.f32 %v11974_v7, 0.0  ;;  %v11984_v17 = vadd.f32 %v8507_v15, %v3680_v23  ;;  %6806 = vmatprep.mubr.f32.mxu0 %v4717_v14  ;;  %v4718_v23 = vld [vmem:[#allocation3 + $0xe0] sm:$0xff]  ;;  %v6221_v15 = vld [vmem:[%s13183_s3 + $0x378] sm:$0xff]  ;;  %v3685_v29 = vadd.f32 %v13452_v62, %v11532_v41  ;;  %7098 = vmatpush2.msra.mxu1 %v6196_v5  ;;  %v13454_v62 = vmax.f32 %v11817_v43, 0.0  ;;  %v6219_v5 = vld [vmem:[%s13183_s3 + $0x368] sm:$0xff] }
 0x3b4   :  { %v4059_v56 = vpop.f32.mrf.mxu0  ;;  %7433 = vmatpush1.msra.mxu0 %v6221_v15  ;;  %v13453_v45 = vld [vmem:[#allocation25_spill] sm:$0xff]  ;;  %7099 = vmatprep.subr.mxu1 %v11680_v8  ;;  %v13456_v43 = vld [vmem:[#allocation80_spill] sm:$0xff] }
 0x3b5   :  { %4289 = vst [vmem:[#allocation3 + $0x1f9] sm:$0xff] %v4224_v2  ;;  %v4227_v39 = vmax.f32 %v11984_v17, 0.0  ;;  %v11991_v37 = vadd.f32 %v4059_v56, %v3675_v31  ;;  %6432 = vmatmul.mubr.f32.gmra.mxu1 %v4717_v14  ;;  %7434 = vmatprep.subr.mxu0 %v11680_v8  ;;  %v3700_v41 = vadd.f32 %v13453_v45, %v11555_v52  ;;  %v4719_v52 = vld [vmem:[#allocation3 + $0xf0] sm:$0xff] }
 0x3b6   :  { %v8510_v30 = vpop.f32.mrf.mxu0  ;;  %6807 = vmatmul.mubr.f32.gmra.mxu0 %v4589_v25  ;;  %6436 = vmatprep.mubr.f32.mxu1 %v13451_v48  ;;  %v6220_v48 = vld [vmem:[%s13183_s3 + $0x370] sm:$0xff] }
 0x3b7   :  { %4292 = vst [vmem:[#allocation3 + $0x219] sm:$0xff] %v4227_v39  ;;  %v4226_v31 = vmax.f32 %v11991_v37, 0.0  ;;  %v12003_v14 = vadd.f32 %v8510_v30, %v3690_v10  ;;  %6811 = vmatprep.mubr.f32.mxu0 %v4718_v23  ;;  %v4590_v30 = vld [vmem:[#allocation3 + $0xca] sm:$0xff]  ;;  %7435 = vmatpush1.msra.mxu0 %v6220_v48 }
 0x3b8   :  { %v4069_v56 = vpop.f32.mrf.mxu0  ;;  %7436 = vmatprep.subr.mxu0 %v11680_v8  ;;  %v4734_v57 = vld [vmem:[#allocation3 + $0x1d0] sm:$0xff]  ;;  %v4736_v33 = vld [vmem:[#allocation3 + $0x1e8] sm:$0xff] }
 0x3b9   :  { %4291 = vst [vmem:[#allocation3 + $0x211] sm:$0xff] %v4226_v31  ;;  %v13204_v25 = vmax.f32 %v12003_v14, 0.0  ;;  %v12014_v10 = vadd.f32 %v4069_v56, %v3685_v29  ;;  %6437 = vmatmul.mubr.f32.gmra.mxu1 %v4718_v23  ;;  %v13455_v29 = vld [vmem:[#allocation78_spill] sm:$0xff]  ;;  %7437 = vmatpush1.msra.mxu0 %v6219_v5 }
 0x3ba   :  { %v8513_v15 = vpop.f32.mrf.mxu0  ;;  %6812 = vmatmul.mubr.f32.gmra.mxu0 %v4590_v30  ;;  %6441 = vmatprep.mubr.f32.mxu1 %v13454_v62  ;;  %v3695_v23 = vadd.f32 %v13455_v29, %v11550_v35  ;;  %v3710_v62 = vadd.f32 %v13456_v43, %v11569_v3  ;;  %v4720_v3 = vld [vmem:[#allocation3 + $0xf8] sm:$0xff]  ;;  %v13458_v43 = vld [vmem:[#allocation79_spill] sm:$0xff]  ;;  %v13459_v5 = vld [vmem:[#allocation82_spill] sm:$0xff] }
 0x3bb   :  { %4294 = vst [vmem:[#allocation3 + $0x231] sm:$0xff] %v13204_v25  ;;  %v13205_v56 = vmax.f32 %v12014_v10, 0.0  ;;  %v12030_v45 = vadd.f32 %v8513_v15, %v3700_v41  ;;  %6816 = vmatprep.mubr.f32.mxu0 %v4719_v52  ;;  %v4591_v25 = vld [vmem:[#allocation3 + $0xda] sm:$0xff]  ;;  %v13457_v15 = vmax.f32 %v11810_v4, 0.0  ;;  %7438 = vmatprep.subr.mxu0 %v11680_v8 }
 0x3bc   :  { %v4079_v30 = vpop.f32.mrf.mxu0  ;;  %v6218_v41 = vld [vmem:[%s13183_s3 + $0x360] sm:$0xff] }
 0x3bd   :  { %4293 = vst [vmem:[#allocation3 + $0x229] sm:$0xff] %v13205_v56  ;;  %v13206_v35 = vmax.f32 %v12030_v45, 0.0  ;;  %v12038_v29 = vadd.f32 %v4079_v30, %v3695_v23  ;;  %6442 = vmatmul.mubr.f32.gmra.mxu1 %v4719_v52  ;;  %v3705_v56 = vadd.f32 %v13458_v43, %v11564_v24  ;;  %7439 = vmatpush1.msra.mxu0 %v6218_v41  ;;  %v6217_v24 = vld [vmem:[%s13183_s3 + $0x358] sm:$0xff]  ;;  %v13460_v43 = vmax.f32 %v11836_v63, 0.0  ;;  %v13462_v63 = vld [vmem:[#allocation84_spill] sm:$0xff]  ;;  %v4738_v7 = vld [vmem:[#allocation3 + $0x200] sm:$0xff] }
 0x3be   :  { %v8516_v48 = vpop.f32.mrf.mxu0  ;;  %6817 = vmatmul.mubr.f32.gmra.mxu0 %v4591_v25  ;;  %6446 = vmatprep.mubr.f32.mxu1 %v13457_v15  ;;  %v6195_v25 = vld [vmem:[%s13183_s3 + $0x2a8] sm:$0xff]  ;;  %v3720_v30 = vadd.f32 %v13459_v5, %v11581_v6  ;;  %v6216_v6 = vld [vmem:[%s13183_s3 + $0x350] sm:$0xff]  ;;  %v13461_v5 = vld [vmem:[#allocation81_spill] sm:$0xff] }
 0x3bf   :  { %4296 = vst [vmem:[#allocation3 + $0x249] sm:$0xff] %v13206_v35  ;;  %v4230_v52 = vmax.f32 %v12038_v29, 0.0  ;;  %v12050_v23 = vadd.f32 %v8516_v48, %v3710_v62  ;;  %6821 = vmatprep.mubr.f32.mxu0 %v4720_v3  ;;  %7100 = vmatpush2.msra.mxu1 %v6195_v25  ;;  %v4592_v15 = vld [vmem:[#allocation3 + $0xe2] sm:$0xff]  ;;  %v3715_v35 = vadd.f32 %v13461_v5, %v11578_v9  ;;  %v13463_v5 = vmax.f32 %v11826_v27, 0.0  ;;  %v4611_v60 = vld [vmem:[#allocation3 + $0x1fa] sm:$0xff] }
 0x3c0   :  { %v4089_v4 = vpop.f32.mrf.mxu0  ;;  %7440 = vmatprep.subr.mxu0 %v11680_v8  ;;  %v4721_v25 = vld [vmem:[#allocation3 + $0x108] sm:$0xff]  ;;  %7101 = vmatprep.subr.mxu1 %v11680_v8  ;;  %v4613_v37 = vld [vmem:[#allocation3 + $0x212] sm:$0xff]  ;;  %v4614_v17 = vld [vmem:[#allocation3 + $0x21a] sm:$0xff] }
 0x3c1   :  { %4295 = vst [vmem:[#allocation3 + $0x241] sm:$0xff] %v4230_v52  ;;  %v13207_v62 = vmax.f32 %v12050_v23, 0.0  ;;  %v12064_v48 = vadd.f32 %v4089_v4, %v3705_v56  ;;  %6447 = vmatmul.mubr.f32.gmra.mxu1 %v4720_v3  ;;  %7441 = vmatpush1.msra.mxu0 %v6217_v24  ;;  %v6215_v24 = vld [vmem:[%s13183_s3 + $0x348] sm:$0xff] }
 0x3c2   :  { %v8519_v41 = vpop.f32.mrf.mxu0  ;;  %6822 = vmatmul.mubr.f32.gmra.mxu0 %v4592_v15  ;;  %6451 = vmatprep.mubr.f32.mxu1 %v13460_v43  ;;  %v3730_v15 = vadd.f32 %v13462_v63, %v11591_v13  ;;  %v4722_v13 = vld [vmem:[#allocation3 + $0x110] sm:$0xff]  ;;  %v13464_v63 = vld [vmem:[#allocation83_spill] sm:$0xff] }
 0x3c3   :  { %4298 = vst [vmem:[#allocation3 + $0x261] sm:$0xff] %v13207_v62  ;;  %v4232_v56 = vmax.f32 %v12064_v48, 0.0  ;;  %v12077_v3 = vadd.f32 %v8519_v41, %v3720_v30  ;;  %6826 = vmatprep.mubr.f32.mxu0 %v4721_v25  ;;  %7442 = vmatprep.subr.mxu0 %v11680_v8  ;;  %v4593_v30 = vld [vmem:[#allocation3 + $0xf2] sm:$0xff]  ;;  %v3725_v62 = vadd.f32 %v13464_v63, %v11588_v42  ;;  %v6214_v42 = vld [vmem:[%s13183_s3 + $0x340] sm:$0xff]  ;;  %v13466_v63 = vmax.f32 %v11853_v0, 0.0 }
 0x3c4   :  { %v4099_v4 = vpop.f32.mrf.mxu0  ;;  %7443 = vmatpush1.msra.mxu0 %v6216_v6  ;;  %v6194_v6 = vld [vmem:[%s13183_s3 + $0x2a0] sm:$0xff]  ;;  %v13468_v0 = vld [vmem:[#allocation88_spill] sm:$0xff] }
 0x3c5   :  { %4297 = vst [vmem:[#allocation3 + $0x259] sm:$0xff] %v4232_v56  ;;  %v13208_v9 = vmax.f32 %v12077_v3, 0.0  ;;  %v12086_v43 = vadd.f32 %v4099_v4, %v3715_v35  ;;  %6452 = vmatmul.mubr.f32.gmra.mxu1 %v4721_v25  ;;  %7444 = vmatprep.subr.mxu0 %v11680_v8  ;;  %v13465_v4 = vld [vmem:[#allocation86_spill] sm:$0xff] }
 0x3c6   :  { %v8522_v41 = vpop.f32.mrf.mxu0  ;;  %6827 = vmatmul.mubr.f32.gmra.mxu0 %v4593_v30  ;;  %6456 = vmatprep.mubr.f32.mxu1 %v13463_v5  ;;  %v3740_v30 = vadd.f32 %v13465_v4, %v11601_v40  ;;  %v4594_v5 = vld [vmem:[#allocation3 + $0xfa] sm:$0xff] }
 0x3c7   :  { %4300 = vst [vmem:[#allocation3 + $0x279] sm:$0xff] %v13208_v9  ;;  %v4234_v35 = vmax.f32 %v12086_v43, 0.0  ;;  %v12098_v25 = vadd.f32 %v8522_v41, %v3730_v15  ;;  %6831 = vmatprep.mubr.f32.mxu0 %v4722_v13  ;;  %7445 = vmatpush1.msra.mxu0 %v6215_v24  ;;  %v6213_v40 = vld [vmem:[%s13183_s3 + $0x338] sm:$0xff] }
 0x3c8   :  { %v4109_v27 = vpop.f32.mrf.mxu0  ;;  %7102 = vmatpush2.msra.mxu1 %v6194_v6  ;;  %7446 = vmatprep.subr.mxu0 %v11680_v8  ;;  %v4723_v6 = vld [vmem:[#allocation3 + $0x120] sm:$0xff]  ;;  %v13467_v4 = vld [vmem:[#allocation85_spill] sm:$0xff] }
 0x3c9   :  { %4299 = vst [vmem:[#allocation3 + $0x271] sm:$0xff] %v4234_v35  ;;  %v13209_v15 = vmax.f32 %v12098_v25, 0.0  ;;  %v12112_v41 = vadd.f32 %v4109_v27, %v3725_v62  ;;  %6457 = vmatmul.mubr.f32.gmra.mxu1 %v4722_v13  ;;  %v3735_v9 = vadd.f32 %v13467_v4, %v11598_v22  ;;  %7447 = vmatpush1.msra.mxu0 %v6214_v42  ;;  %v6212_v42 = vld [vmem:[%s13183_s3 + $0x330] sm:$0xff]  ;;  %v13469_v4 = vmax.f32 %v11846_v20, 0.0  ;;  %v4617_v29 = vld [vmem:[#allocation3 + $0x242] sm:$0xff] }
 0x3ca   :  { %v8525_v24 = vpop.f32.mrf.mxu0  ;;  %6832 = vmatmul.mubr.f32.gmra.mxu0 %v4594_v5  ;;  %6461 = vmatprep.mubr.f32.mxu1 %v13466_v63  ;;  %v3750_v5 = vadd.f32 %v13468_v0, %v11611_v46  ;;  %v4724_v46 = vld [vmem:[#allocation3 + $0x128] sm:$0xff] }
 0x3cb   :  { %4302 = vst [vmem:[#allocation3 + $0x291] sm:$0xff] %v13209_v15  ;;  %v4236_v62 = vmax.f32 %v12112_v41, 0.0  ;;  %v12125_v13 = vadd.f32 %v8525_v24, %v3740_v30  ;;  %6836 = vmatprep.mubr.f32.mxu0 %v4723_v6  ;;  %7448 = vmatprep.subr.mxu0 %v11680_v8  ;;  %v4595_v30 = vld [vmem:[#allocation3 + $0x10a] sm:$0xff] }
 0x3cc   :  { %v4119_v27 = vpop.f32.mrf.mxu0  ;;  %7103 = vmatprep.subr.mxu1 %v11680_v8  ;;  %7449 = vmatpush1.msra.mxu0 %v6213_v40  ;;  %v13470_v0 = vld [vmem:[#allocation87_spill] sm:$0xff]  ;;  %v6193_v40 = vld [vmem:[%s13183_s3 + $0x298] sm:$0xff] }
 0x3cd   :  { %4301 = vst [vmem:[#allocation3 + $0x289] sm:$0xff] %v4236_v62  ;;  %v13210_v22 = vmax.f32 %v12125_v13, 0.0  ;;  %v12134_v63 = vadd.f32 %v4119_v27, %v3735_v9  ;;  %6462 = vmatmul.mubr.f32.gmra.mxu1 %v4723_v6  ;;  %v3745_v15 = vadd.f32 %v13470_v0, %v11608_v19  ;;  %7450 = vmatprep.subr.mxu0 %v11680_v8  ;;  %v6211_v19 = vld [vmem:[%s13183_s3 + $0x328] sm:$0xff]  ;;  %v13471_v27 = vld [vmem:[#allocation90_spill] sm:$0xff]  ;;  %v13472_v0 = vmax.f32 %v11872_v49, 0.0 }
 0x3ce   :  { %v8528_v24 = vpop.f32.mrf.mxu0  ;;  %6837 = vmatmul.mubr.f32.gmra.mxu0 %v4595_v30  ;;  %6466 = vmatprep.mubr.f32.mxu1 %v13469_v4  ;;  %v3760_v30 = vadd.f32 %v13471_v27, %v11621_v55  ;;  %v4596_v4 = vld [vmem:[#allocation3 + $0x112] sm:$0xff]  ;;  %v6210_v55 = vld [vmem:[%s13183_s3 + $0x320] sm:$0xff]  ;;  %v13474_v49 = vld [vmem:[#allocation91_spill] sm:$0xff] }
 0x3cf   :  { %4304 = vst [vmem:[#allocation3 + $0x2a9] sm:$0xff] %v13210_v22  ;;  %v4238_v9 = vmax.f32 %v12134_v63, 0.0  ;;  %v12146_v6 = vadd.f32 %v8528_v24, %v3750_v5  ;;  %6841 = vmatprep.mubr.f32.mxu0 %v4724_v46  ;;  %7451 = vmatpush1.msra.mxu0 %v6212_v42  ;;  %v13473_v27 = vld [vmem:[#allocation89_spill] sm:$0xff] }
 0x3d0   :  { %v4129_v20 = vpop.f32.mrf.mxu0  ;;  %7104 = vmatpush2.msra.mxu1 %v6193_v40  ;;  %7452 = vmatprep.subr.mxu0 %v11680_v8  ;;  %v4725_v40 = vld [vmem:[#allocation3 + $0x138] sm:$0xff]  ;;  %v3755_v22 = vadd.f32 %v13473_v27, %v11618_v16  ;;  %v13475_v27 = vmax.f32 %v11862_v12, 0.0 }
 0x3d1   :  { %4303 = vst [vmem:[#allocation3 + $0x2a1] sm:$0xff] %v4238_v9  ;;  %v13211_v5 = vmax.f32 %v12146_v6, 0.0  ;;  %v12160_v24 = vadd.f32 %v4129_v20, %v3745_v15  ;;  %6467 = vmatmul.mubr.f32.gmra.mxu1 %v4724_v46  ;;  %7453 = vmatpush1.msra.mxu0 %v6211_v19  ;;  %v6209_v19 = vld [vmem:[%s13183_s3 + $0x318] sm:$0xff] }
 0x3d2   :  { %v8531_v42 = vpop.f32.mrf.mxu0  ;;  %6842 = vmatmul.mubr.f32.gmra.mxu0 %v4596_v4  ;;  %6471 = vmatprep.mubr.f32.mxu1 %v13472_v0  ;;  %v3770_v4 = vadd.f32 %v13474_v49, %v11631_v28  ;;  %v4726_v28 = vld [vmem:[#allocation3 + $0x140] sm:$0xff]  ;;  %v13476_v49 = vld [vmem:[#allocation36_spill] sm:$0xff] }
 0x3d3   :  { %4306 = vst [vmem:[#allocation3 + $0x2c1] sm:$0xff] %v13211_v5  ;;  %v4240_v15 = vmax.f32 %v12160_v24, 0.0  ;;  %v12173_v46 = vadd.f32 %v8531_v42, %v3760_v30  ;;  %6846 = vmatprep.mubr.f32.mxu0 %v4725_v40  ;;  %7454 = vmatprep.subr.mxu0 %v11680_v8  ;;  %v4597_v30 = vld [vmem:[#allocation3 + $0x122] sm:$0xff]  ;;  %v3765_v5 = vadd.f32 %v13476_v49, %v11628_v1  ;;  %v6208_v1 = vld [vmem:[%s13183_s3 + $0x310] sm:$0xff]  ;;  %v4619_v48 = vld [vmem:[#allocation3 + $0x25a] sm:$0xff] }
 0x3d4   :  { %v4139_v20 = vpop.f32.mrf.mxu0  ;;  %7105 = vmatprep.subr.mxu1 %v11680_v8  ;;  %7455 = vmatpush1.msra.mxu0 %v6210_v55  ;;  %v6192_v55 = vld [vmem:[%s13183_s3 + $0x290] sm:$0xff]  ;;  %v4749_v43 = vld [vmem:[#allocation3 + $0x288] sm:$0xff] }
 0x3d5   :  { %4305 = vst [vmem:[#allocation3 + $0x2b9] sm:$0xff] %v4240_v15  ;;  %v13213_v16 = vmax.f32 %v12173_v46, 0.0  ;;  %v12182_v0 = vadd.f32 %v4139_v20, %v3755_v22  ;;  %6472 = vmatmul.mubr.f32.gmra.mxu1 %v4725_v40  ;;  %7456 = vmatprep.subr.mxu0 %v11680_v8  ;;  %v3780_v20 = vadd.f32 %v11511_v50, %v11641_v58  ;;  %v4727_v49 = vld [vmem:[#allocation3 + $0x150] sm:$0xff]  ;;  %v6207_v50 = vld [vmem:[%s13183_s3 + $0x308] sm:$0xff] }
 0x3d6   :  { %v8534_v42 = vpop.f32.mrf.mxu0  ;;  %6847 = vmatmul.mubr.f32.gmra.mxu0 %v4597_v30  ;;  %6476 = vmatprep.mubr.f32.mxu1 %v13475_v27  ;;  %v4598_v30 = vld [vmem:[#allocation3 + $0x12a] sm:$0xff]  ;;  %v13477_v27 = vmax.f32 %v11889_v44, 0.0  ;;  %v13479_v44 = vld [vmem:[#allocation38_spill] sm:$0xff] }
 0x3d7   :  { %4308 = vst [vmem:[#allocation3 + $0x2d9] sm:$0xff] %v13213_v16  ;;  %v4242_v22 = vmax.f32 %v12182_v0, 0.0  ;;  %v12194_v40 = vadd.f32 %v8534_v42, %v3770_v4  ;;  %6851 = vmatprep.mubr.f32.mxu0 %v4726_v28  ;;  %7457 = vmatpush1.msra.mxu0 %v6209_v19  ;;  %v12210_v42 = vld [vmem:[#allocation2 + $0x8] sm:$0xff]  ;;  %v13478_v58 = vld [vmem:[#allocation92_spill] sm:$0xff]  ;;  %v13483_v16 = vld [vmem:[#allocation93_spill] sm:$0xff] }
 0x3d8   :  { %v4149_v12 = vpop.f32.mrf.mxu0  ;;  %7106 = vmatpush2.msra.mxu1 %v6192_v55  ;;  %7458 = vmatprep.subr.mxu0 %v12210_v42 }
 0x3d9   :  { %4307 = vst [vmem:[#allocation3 + $0x2d1] sm:$0xff] %v4242_v22  ;;  %v13212_v4 = vmax.f32 %v12194_v40, 0.0  ;;  %v12208_v8 = vadd.f32 %v4149_v12, %v3765_v5  ;;  %6477 = vmatmul.mubr.f32.gmra.mxu1 %v4726_v28  ;;  %v3775_v5 = vadd.f32 %v13478_v58, %v11638_v51  ;;  %7459 = vmatpush1.msra.mxu0 %v6208_v1  ;;  %v6206_v1 = vld [vmem:[%s13183_s3 + $0x300] sm:$0xff] }
 0x3da   :  { %v8537_v19 = vpop.f32.mrf.mxu0  ;;  %6852 = vmatmul.mubr.f32.gmra.mxu0 %v4598_v30  ;;  %6481 = vmatprep.mubr.f32.mxu1 %v13477_v27  ;;  %v13480_v30 = vld [vmem:[#allocation94_spill] sm:$0xff] }
 0x3db   :  { %4310 = vst [vmem:[#allocation3 + $0x2f1] sm:$0xff] %v13212_v4  ;;  %v13214_v28 = vmax.f32 %v12208_v8, 0.0  ;;  %v12223_v55 = vadd.f32 %v8537_v19, %v3780_v20  ;;  %6856 = vmatprep.mubr.f32.mxu0 %v4727_v49  ;;  %7460 = vmatprep.subr.mxu0 %v12210_v42  ;;  %v3790_v27 = vadd.f32 %v13480_v30, %v13479_v44  ;;  %v4599_v20 = vld [vmem:[#allocation3 + $0x13a] sm:$0xff]  ;;  %v13481_v4 = vmax.f32 %v11882_v47, 0.0 }
 0x3dc   :  { %v4159_v12 = vpop.f32.mrf.mxu0  ;;  %7107 = vmatprep.subr.mxu1 %v12210_v42  ;;  %7461 = vmatpush1.msra.mxu0 %v6207_v50  ;;  %v4728_v44 = vld [vmem:[#allocation3 + $0x158] sm:$0xff]  ;;  %v6191_v50 = vld [vmem:[%s13183_s3 + $0x288] sm:$0xff] }
 0x3dd   :  { %4309 = vst [vmem:[#allocation3 + $0x2e9] sm:$0xff] %v13214_v28  ;;  %v13215_v51 = vmax.f32 %v12223_v55, 0.0  ;;  %v12232_v58 = vadd.f32 %v4159_v12, %v3775_v5  ;;  %6482 = vmatmul.mubr.f32.gmra.mxu1 %v4727_v49  ;;  %v13482_v30 = vld [vmem:[#allocation37_spill] sm:$0xff]  ;;  %7462 = vmatprep.subr.mxu0 %v12210_v42  ;;  %v13485_v12 = vld [vmem:[#allocation96_spill] sm:$0xff] }
 0x3de   :  { %v8540_v19 = vpop.f32.mrf.mxu0  ;;  %6857 = vmatmul.mubr.f32.gmra.mxu0 %v4599_v20  ;;  %6486 = vmatprep.mubr.f32.mxu1 %v13481_v4  ;;  %v3785_v28 = vadd.f32 %v13483_v16, %v13482_v30  ;;  %v6237_v16 = vld [vmem:[%s13183_s3 + $0x3f8] sm:$0xff]  ;;  %v13484_v4 = vld [vmem:[#allocation40_spill] sm:$0xff]  ;;  %v4600_v30 = vld [vmem:[#allocation3 + $0x142] sm:$0xff] }
 0x3df   :  { %4312 = vst [vmem:[#allocation3 + $0x309] sm:$0xff] %v13215_v51  ;;  %v13216_v49 = vmax.f32 %v12232_v58, 0.0  ;;  %v12244_v5 = vadd.f32 %v8540_v19, %v3790_v27  ;;  %6861 = vmatprep.mubr.f32.mxu0 %v4728_v44  ;;  %7463 = vmatpush1.msra.mxu0 %v6206_v1  ;;  %v3800_v20 = vadd.f32 %v13485_v12, %v13484_v4  ;;  %v6236_v4 = vld [vmem:[%s13183_s3 + $0x3f0] sm:$0xff]  ;;  %v13486_v12 = vld [vmem:[#allocation39_spill] sm:$0xff] }
 0x3e0   :  { %v4169_v47 = vpop.f32.mrf.mxu0  ;;  %7108 = vmatpush2.msra.mxu1 %v6191_v50  ;;  %7464 = vmatprep.subr.mxu0 %v12210_v42  ;;  %v4729_v50 = vld [vmem:[#allocation3 + $0x168] sm:$0xff] }
 0x3e1   :  { %4311 = vst [vmem:[#allocation3 + $0x301] sm:$0xff] %v13216_v49  ;;  %v4249_v27 = vmax.f32 %v12244_v5, 0.0  ;;  %v12258_v19 = vadd.f32 %v4169_v47, %v3785_v28  ;;  %6487 = vmatmul.mubr.f32.gmra.mxu1 %v4728_v44  ;;  %v13487_v51 = vld [vmem:[#allocation95_spill] sm:$0xff]  ;;  %7465 = vmatpush2.msra.mxu0 %v6237_v16  ;;  %v13488_v16 = vmax.f32 %v11898_v38, 0.0  ;;  %v4602_v38 = vld [vmem:[#allocation3 + $0x15a] sm:$0xff] }
 0x3e2   :  { %v8543_v1 = vpop.f32.mrf.mxu0  ;;  %6862 = vmatmul.mubr.f32.gmra.mxu0 %v4600_v30  ;;  %6491 = vmatprep.mubr.f32.mxu1 %v4216_v36  ;;  %v3795_v49 = vadd.f32 %v13487_v51, %v13486_v12  ;;  %v4601_v51 = vld [vmem:[#allocation3 + $0x152] sm:$0xff]  ;;  %v6235_v30 = vld [vmem:[%s13183_s3 + $0x3e8] sm:$0xff] }
 0x3e3   :  { %4314 = vst [vmem:[#allocation3 + $0x321] sm:$0xff] %v4249_v27  ;;  %v4248_v28 = vmax.f32 %v12258_v19, 0.0  ;;  %v4185_v44 = vadd.f32 %v8543_v1, %v3800_v20  ;;  %6866 = vmatprep.mubr.f32.mxu0 %v4729_v50  ;;  %7466 = vmatprep.subr.mxu0 %v12210_v42  ;;  %v4730_v20 = vld [vmem:[#allocation3 + $0x170] sm:$0xff] }
 0x3e4   :  { %v4179_v47 = vpop.f32.mrf.mxu0  ;;  %7109 = vmatprep.subr.mxu1 %v12210_v42  ;;  %7467 = vmatpush2.msra.mxu0 %v6236_v4  ;;  %v4477_v12 = vld [vmem:[#allocation3 + $0x1b1] sm:$0xff]  ;;  %v4731_v4 = vld [vmem:[#allocation3 + $0x180] sm:$0xff] }
 0x3e5   :  { %4313 = vst [vmem:[#allocation3 + $0x319] sm:$0xff] %v4248_v28  ;;  %v4251_v61 = vmax.f32 %v4185_v44, 0.0  ;;  %v4180_v36 = vadd.f32 %v4179_v47, %v3795_v49  ;;  %6492 = vmatmul.mubr.f32.gmra.mxu1 %v4729_v50  ;;  %7468 = vmatprep.subr.mxu0 %v12210_v42  ;;  %v6190_v49 = vld [vmem:[%s13183_s3 + $0x280] sm:$0xff]  ;;  %v4349_v44 = vld [vmem:[#allocation3 + $0x1b0] sm:$0xff]  ;;  %v6233_v47 = vld [vmem:[%s13183_s3 + $0x3d8] sm:$0xff] }
 0x3e6   :  { %6867 = vmatmul.mubr.f32.gmra.mxu0 %v4601_v51  ;;  %6496 = vmatprep.mubr.f32.mxu1 %v13488_v16  ;;  %v6234_v50 = vld [vmem:[%s13183_s3 + $0x3e0] sm:$0xff]  ;;  %v6232_v51 = vld [vmem:[%s13183_s3 + $0x3d0] sm:$0xff]  ;;  %v6231_v16 = vld [vmem:[%s13183_s3 + $0x3c8] sm:$0xff] }
 0x3e7   :  { %4316 = vst [vmem:[#allocation3 + $0x339] sm:$0xff] %v4251_v61  ;;  %v4250_v1 = vmax.f32 %v4180_v36, 0.0  ;;  %6871 = vmatprep.mubr.f32.mxu0 %v4730_v20  ;;  %7469 = vmatpush2.msra.mxu0 %v6235_v30  ;;  %v4478_v61 = vld [vmem:[#allocation3 + $0x1b9] sm:$0xff]  ;;  %v4603_v36 = vld [vmem:[#allocation3 + $0x16a] sm:$0xff] }
 0x3e8   :  { %7110 = vmatpush2.msra.mxu1 %v6190_v49  ;;  %7470 = vmatprep.subr.mxu0 %v12210_v42  ;;  %v4732_v30 = vld [vmem:[#allocation3 + $0x188] sm:$0xff]  ;;  %v4605_v49 = vld [vmem:[#allocation3 + $0x1b2] sm:$0xff] }
 0x3e9   :  { %4315 = vst [vmem:[#allocation3 + $0x331] sm:$0xff] %v4250_v1  ;;  %6497 = vmatmul.mubr.f32.gmra.mxu1 %v4730_v20  ;;  %7471 = vmatpush2.msra.mxu0 %v6234_v50  ;;  %v4604_v20 = vld [vmem:[#allocation3 + $0x172] sm:$0xff]  ;;  %v4733_v1 = vld [vmem:[#allocation3 + $0x1c8] sm:$0xff] }
 0x3ea   :  { %6872 = vmatmul.mubr.f32.gmra.mxu0 %v4602_v38  ;;  %6501 = vmatprep.mubr.f32.mxu1 %v4477_v12  ;;  %v6230_v12 = vld [vmem:[%s13183_s3 + $0x3c0] sm:$0xff]  ;;  %v6229_v50 = vld [vmem:[%s13183_s3 + $0x3b8] sm:$0xff]  ;;  %v6228_v38 = vld [vmem:[%s13183_s3 + $0x3b0] sm:$0xff] }
 0x3eb   :  { %6876 = vmatprep.mubr.f32.mxu0 %v4731_v4  ;;  %7472 = vmatprep.subr.mxu0 %v12210_v42  ;;  %v4735_v4 = vld [vmem:[#allocation3 + $0x1e0] sm:$0xff] }
 0x3ec   :  { %7817 = vmatprep.subr.mxu1 %v12210_v42  ;;  %7473 = vmatpush2.msra.mxu0 %v6233_v47  ;;  %v4608_v47 = vld [vmem:[#allocation3 + $0x1d2] sm:$0xff] }
 0x3ed   :  { %6502 = vmatmul.mubr.f32.gmra.mxu1 %v4349_v44  ;;  %7474 = vmatprep.subr.mxu0 %v12210_v42  ;;  %v6226_v44 = vld [vmem:[%s13183_s3 + $0x3a0] sm:$0xff] }
 0x3ee   :  { %6877 = vmatmul.mubr.f32.gmra.mxu0 %v4603_v36  ;;  %6506 = vmatprep.mubr.f32.mxu1 %v4478_v61  ;;  %v4737_v61 = vld [vmem:[#allocation3 + $0x1f8] sm:$0xff]  ;;  %v6223_v36 = vld [vmem:[%s13183_s3 + $0x388] sm:$0xff] }
 0x3ef   :  { %6881 = vmatprep.mubr.f32.mxu0 %v4732_v30  ;;  %7475 = vmatpush2.msra.mxu0 %v6232_v51  ;;  %v4610_v51 = vld [vmem:[#allocation3 + $0x1ea] sm:$0xff] }
 0x3f0   :  { %7476 = vmatprep.subr.mxu0 %v12210_v42  ;;  %v4739_v30 = vld [vmem:[#allocation3 + $0x210] sm:$0xff] }
 0x3f1   :  { %6507 = vmatmul.mubr.f32.gmra.mxu1 %v12210_v42  ;;  %7477 = vmatpush2.msra.mxu0 %v6231_v16  ;;  %v4612_v16 = vld [vmem:[#allocation3 + $0x202] sm:$0xff] }
 0x3f2   :  { %6882 = vmatmul.mubr.f32.gmra.mxu0 %v4604_v20  ;;  %6511 = vmatprep.mubr.f32.mxu1 %v4220_v54  ;;  %v4606_v54 = vld [vmem:[#allocation3 + $0x1ba] sm:$0xff]  ;;  %v13489_v20 = vmax.f32 %v12014_v10, 0.0  ;;  %v4615_v10 = vld [vmem:[#allocation3 + $0x22a] sm:$0xff] }
 0x3f3   :  { %6886 = vmatprep.mubr.f32.mxu0 %v4733_v1  ;;  %7478 = vmatprep.subr.mxu0 %v12210_v42 }
 0x3f4   :  { %7479 = vmatpush2.msra.mxu0 %v6230_v12  ;;  %v4742_v12 = vld [vmem:[#allocation3 + $0x230] sm:$0xff] }
 0x3f5   :  { %6512 = vmatmul.mubr.f32.gmra.mxu1 %v4733_v1  ;;  %7480 = vmatprep.subr.mxu0 %v12210_v42  ;;  %v4741_v1 = vld [vmem:[#allocation3 + $0x228] sm:$0xff] }
 0x3f6   :  { %6887 = vmatmul.mubr.f32.gmra.mxu0 %v4605_v49  ;;  %6516 = vmatprep.mubr.f32.mxu1 %v4221_v32  ;;  %v4607_v32 = vld [vmem:[#allocation3 + $0x1ca] sm:$0xff]  ;;  %v13491_v49 = vmax.f32 %v12030_v45, 0.0 }
 0x3f7   :  { %6891 = vmatprep.mubr.f32.mxu0 %v4734_v57  ;;  %7481 = vmatpush2.msra.mxu0 %v6229_v50  ;;  %v4744_v50 = vld [vmem:[#allocation3 + $0x248] sm:$0xff] }
 0x3f8   :  { %7482 = vmatprep.subr.mxu0 %v12210_v42  ;;  %v4618_v45 = vld [vmem:[#allocation3 + $0x24a] sm:$0xff] }
 0x3f9   :  { %6517 = vmatmul.mubr.f32.gmra.mxu1 %v4734_v57  ;;  %7483 = vmatpush2.msra.mxu0 %v6228_v38  ;;  %v4745_v57 = vld [vmem:[#allocation3 + $0x258] sm:$0xff]  ;;  %v4747_v38 = vld [vmem:[#allocation3 + $0x270] sm:$0xff] }
 0x3fa   :  { %6892 = vmatmul.mubr.f32.gmra.mxu0 %v4606_v54  ;;  %6521 = vmatprep.mubr.f32.mxu1 %v4222_v53  ;;  %v6225_v53 = vld [vmem:[%s13183_s3 + $0x398] sm:$0xff]  ;;  %v4746_v54 = vld [vmem:[#allocation3 + $0x260] sm:$0xff] }
 0x3fb   :  { %6896 = vmatprep.mubr.f32.mxu0 %v4735_v4  ;;  %7484 = vmatprep.subr.mxu0 %v12210_v42 }
 0x3fc   :  { %7485 = vmatpush2.msra.mxu0 %v6227_v59  ;;  %v12373_v59 = vld [vmem:[%s13184_s4] ss:$0 sm:$0xff] }
 0x3fd   :  { %6522 = vmatmul.mubr.f32.gmra.mxu1 %v4735_v4  ;;  %7486 = vmatprep.subr.mxu0 %v12210_v42  ;;  %v4748_v4 = vld [vmem:[#allocation3 + $0x278] sm:$0xff] }
 0x3fe   :  { %6897 = vmatmul.mubr.f32.gmra.mxu0 %v4607_v32  ;;  %6526 = vmatprep.mubr.f32.mxu1 %v4223_v21  ;;  %v4609_v21 = vld [vmem:[#allocation3 + $0x1e2] sm:$0xff]  ;;  %v4621_v32 = vld [vmem:[#allocation3 + $0x272] sm:$0xff] }
 0x3ff   :  { %6901 = vmatprep.mubr.f32.mxu0 %v4736_v33  ;;  %7487 = vmatpush2.msra.mxu0 %v6226_v44 }
 0x400   :  { %7488 = vmatprep.subr.mxu0 %v12210_v42 }
 0x401   :  { %6527 = vmatmul.mubr.f32.gmra.mxu1 %v4736_v33  ;;  %7489 = vmatpush2.msra.mxu0 %v6225_v53  ;;  %v13494_v33 = vmax.f32 %v12098_v25, 0.0  ;;  %v4750_v53 = vld [vmem:[#allocation3 + $0x290] sm:$0xff] }
 0x402   :  { %6902 = vmatmul.mubr.f32.gmra.mxu0 %v4608_v47  ;;  %6531 = vmatprep.mubr.f32.mxu1 %v4224_v2  ;;  %v6222_v2 = vld [vmem:[%s13183_s3 + $0x380] sm:$0xff] }
 0x403   :  { %6906 = vmatprep.mubr.f32.mxu0 %v4737_v61  ;;  %7490 = vmatprep.subr.mxu0 %v12210_v42 }
 0x404   :  { %7491 = vmatpush2.msra.mxu0 %v6224_v26 }
 0x405   :  { %6532 = vmatmul.mubr.f32.gmra.mxu1 %v4737_v61  ;;  %7492 = vmatprep.subr.mxu0 %v12210_v42 }
 0x406   :  { %6907 = vmatmul.mubr.f32.gmra.mxu0 %v4609_v21  ;;  %6536 = vmatprep.mubr.f32.mxu1 %v4225_v11  ;;  %v4740_v11 = vld [vmem:[#allocation3 + $0x218] sm:$0xff] }
 0x407   :  { %6911 = vmatprep.mubr.f32.mxu0 %v4738_v7  ;;  %7493 = vmatpush2.msra.mxu0 %v6223_v36  ;;  %v4751_v36 = vld [vmem:[#allocation3 + $0x2a0] sm:$0xff] }
 0x408   :  { %7494 = vmatprep.subr.mxu0 %v12210_v42 }
 0x409   :  { %6537 = vmatmul.mubr.f32.gmra.mxu1 %v4738_v7  ;;  %7495 = vmatpush2.msra.mxu0 %v6222_v2 }
 0x40a   :  { %6912 = vmatmul.mubr.f32.gmra.mxu0 %v4610_v51  ;;  %6541 = vmatprep.mubr.f32.mxu1 %v4226_v31  ;;  %v13490_v31 = vmax.f32 %v12003_v14, 0.0  ;;  %v4616_v14 = vld [vmem:[#allocation3 + $0x232] sm:$0xff] }
 0x40b   :  { %6916 = vmatprep.mubr.f32.mxu0 %v4739_v30 }
 0x40d   :  { %6542 = vmatmul.mubr.f32.gmra.mxu1 %v4739_v30 }
 0x40e   :  { %6917 = vmatmul.mubr.f32.gmra.mxu0 %v4611_v60  ;;  %6546 = vmatprep.mubr.f32.mxu1 %v4227_v39  ;;  %v4743_v39 = vld [vmem:[#allocation3 + $0x240] sm:$0xff]  ;;  %v4623_v60 = vld [vmem:[#allocation3 + $0x28a] sm:$0xff] }
 0x40f   :  { %6921 = vmatprep.mubr.f32.mxu0 %v4740_v11 }
 0x411   :  { %6547 = vmatmul.mubr.f32.gmra.mxu1 %v4740_v11  ;;  %v13495_v11 = vmax.f32 %v12125_v13, 0.0 }
 0x412   :  { %6922 = vmatmul.mubr.f32.gmra.mxu0 %v4612_v16  ;;  %6551 = vmatprep.mubr.f32.mxu1 %v13489_v20  ;;  %v4752_v16 = vld [vmem:[#allocation3 + $0x2a8] sm:$0xff] }
 0x413   :  { %6926 = vmatprep.mubr.f32.mxu0 %v4741_v1 }
 0x415   :  { %6552 = vmatmul.mubr.f32.gmra.mxu1 %v4741_v1 }
 0x416   :  { %6927 = vmatmul.mubr.f32.gmra.mxu0 %v4613_v37  ;;  %6556 = vmatprep.mubr.f32.mxu1 %v13490_v31  ;;  %v4624_v31 = vld [vmem:[#allocation3 + $0x292] sm:$0xff] }
 0x417   :  { %6931 = vmatprep.mubr.f32.mxu0 %v4742_v12 }
 0x419   :  { %6557 = vmatmul.mubr.f32.gmra.mxu1 %v4742_v12 }
 0x41a   :  { %6932 = vmatmul.mubr.f32.gmra.mxu0 %v4614_v17  ;;  %6561 = vmatprep.mubr.f32.mxu1 %v4230_v52  ;;  %v13492_v52 = vmax.f32 %v12050_v23, 0.0  ;;  %v4620_v23 = vld [vmem:[#allocation3 + $0x262] sm:$0xff]  ;;  %v4753_v17 = vld [vmem:[#allocation3 + $0x2b8] sm:$0xff] }
 0x41b   :  { %6936 = vmatprep.mubr.f32.mxu0 %v4743_v39 }
 0x41d   :  { %6562 = vmatmul.mubr.f32.gmra.mxu1 %v4743_v39 }
 0x41e   :  { %6937 = vmatmul.mubr.f32.gmra.mxu0 %v4615_v10  ;;  %6566 = vmatprep.mubr.f32.mxu1 %v13491_v49 }
 0x41f   :  { %6941 = vmatprep.mubr.f32.mxu0 %v4744_v50 }
 0x421   :  { %6567 = vmatmul.mubr.f32.gmra.mxu1 %v4744_v50 }
 0x422   :  { %6942 = vmatmul.mubr.f32.gmra.mxu0 %v4616_v14  ;;  %6571 = vmatprep.mubr.f32.mxu1 %v4232_v56  ;;  %v13493_v56 = vmax.f32 %v12077_v3, 0.0  ;;  %v4625_v14 = vld [vmem:[#allocation3 + $0x2a2] sm:$0xff] }
 0x423   :  { %6946 = vmatprep.mubr.f32.mxu0 %v4745_v57 }
 0x425   :  { %6572 = vmatmul.mubr.f32.gmra.mxu1 %v4745_v57 }
 0x426   :  { %6947 = vmatmul.mubr.f32.gmra.mxu0 %v4617_v29  ;;  %6576 = vmatprep.mubr.f32.mxu1 %v13492_v52  ;;  %v13496_v29 = vmax.f32 %v12146_v6, 0.0  ;;  %v4754_v52 = vld [vmem:[#allocation3 + $0x2c0] sm:$0xff] }
 0x427   :  { %6951 = vmatprep.mubr.f32.mxu0 %v4746_v54 }
 0x429   :  { %6577 = vmatmul.mubr.f32.gmra.mxu1 %v4746_v54 }
 0x42a   :  { %6952 = vmatmul.mubr.f32.gmra.mxu0 %v4618_v45  ;;  %6581 = vmatprep.mubr.f32.mxu1 %v4234_v35  ;;  %v6344_v35 = vadd.f32 %v12373_v59, %v11946_v34  ;;  %v4622_v34 = vld [vmem:[#allocation3 + $0x27a] sm:$0xff] }
 0x42b   :  { %6956 = vmatprep.mubr.f32.mxu0 %v4747_v38 }
 0x42d   :  { %6582 = vmatmul.mubr.f32.gmra.mxu1 %v4747_v38 }
 0x42e   :  { %6957 = vmatmul.mubr.f32.gmra.mxu0 %v4619_v48  ;;  %6586 = vmatprep.mubr.f32.mxu1 %v13493_v56  ;;  %v4626_v48 = vld [vmem:[#allocation3 + $0x2aa] sm:$0xff] }
 0x42f   :  { %6961 = vmatprep.mubr.f32.mxu0 %v4748_v4 }
 0x431   :  { %6587 = vmatmul.mubr.f32.gmra.mxu1 %v4748_v4  ;;  %v4755_v4 = vld [vmem:[#allocation3 + $0x2d0] sm:$0xff] }
 0x432   :  { %6962 = vmatmul.mubr.f32.gmra.mxu0 %v4620_v23  ;;  %6591 = vmatprep.mubr.f32.mxu1 %v4236_v62  ;;  %v6349_v62 = vadd.f32 %v12373_v59, %v11967_v18 }
 0x433   :  { %6966 = vmatprep.mubr.f32.mxu0 %v4749_v43 }
 0x435   :  { %v6353_v3 = vpop.f32.mrf.mxu1  ;;  %6592 = vmatmul.mubr.f32.gmra.mxu1 %v4749_v43 }
 0x436   :  { %v6728_v44 = vpop.f32.mrf.mxu0  ;;  %6967 = vmatmul.mubr.f32.gmra.mxu0 %v4621_v32  ;;  %6596 = vmatprep.mubr.f32.mxu1 %v13494_v33  ;;  %v6354_v51 = vadd.f32 %v12373_v59, %v6353_v3  ;;  %v4627_v32 = vld [vmem:[#allocation3 + $0x2ba] sm:$0xff]  ;;  %v13497_v33 = vmax.f32 %v12173_v46, 0.0 }
 0x437   :  { %v12381_v47 = vadd.f32 %v6728_v44, %v6344_v35  ;;  %6971 = vmatprep.mubr.f32.mxu0 %v4750_v53  ;;  %v6355_v61 = vpop.f32.mrf.mxu1 }
 0x438   :  { %v6730_v41 = vpop.f32.mrf.mxu0 }
 0x439   :  { %v6358_v26 = vpop.f32.mrf.mxu1  ;;  %6597 = vmatmul.mubr.f32.gmra.mxu1 %v4750_v53  ;;  %v4756_v53 = vld [vmem:[#allocation3 + $0x2d8] sm:$0xff] }
 0x43a   :  { %v6733_v21 = vpop.f32.mrf.mxu0  ;;  %6972 = vmatmul.mubr.f32.gmra.mxu0 %v4622_v34  ;;  %6601 = vmatprep.mubr.f32.mxu1 %v4238_v9  ;;  %v6359_v1 = vadd.f32 %v12373_v59, %v6358_v26  ;;  %v4628_v26 = vld [vmem:[#allocation3 + $0x2c2] sm:$0xff] }
 0x43b   :  { %v12387_v25 = vadd.f32 %v6733_v21, %v6349_v62  ;;  %6976 = vmatprep.mubr.f32.mxu0 %v4751_v36  ;;  %v6360_v7 = vpop.f32.mrf.mxu1  ;;  %v13498_v21 = vmax.f32 %v12208_v8, 0.0 }
 0x43c   :  { %v6735_v2 = vpop.f32.mrf.mxu0 }
 0x43d   :  { %v6363_v30 = vpop.f32.mrf.mxu1  ;;  %6602 = vmatmul.mubr.f32.gmra.mxu1 %v4751_v36  ;;  %v4757_v36 = vld [vmem:[#allocation3 + $0x2e8] sm:$0xff] }
 0x43e   :  { %v6738_v18 = vpop.f32.mrf.mxu0  ;;  %6977 = vmatmul.mubr.f32.gmra.mxu0 %v4623_v60  ;;  %6606 = vmatprep.mubr.f32.mxu1 %v13495_v11  ;;  %v6364_v49 = vadd.f32 %v12373_v59, %v6363_v30  ;;  %v4629_v60 = vld [vmem:[#allocation3 + $0x2d2] sm:$0xff]  ;;  %v13499_v11 = vmax.f32 %v12194_v40, 0.0 }
 0x43f   :  { %v12392_v20 = vadd.f32 %v6738_v18, %v6354_v51  ;;  %6981 = vmatprep.mubr.f32.mxu0 %v4752_v16  ;;  %v6365_v63 = vpop.f32.mrf.mxu1 }
 0x440   :  { %v6740_v9 = vpop.f32.mrf.mxu0 }
 0x441   :  { %v6368_v37 = vpop.f32.mrf.mxu1  ;;  %6607 = vmatmul.mubr.f32.gmra.mxu1 %v4752_v16  ;;  %v4758_v16 = vld [vmem:[#allocation3 + $0x2f0] sm:$0xff] }
 0x442   :  { %v6743_v12 = vpop.f32.mrf.mxu0  ;;  %6982 = vmatmul.mubr.f32.gmra.mxu0 %v4624_v31  ;;  %6611 = vmatprep.mubr.f32.mxu1 %v4240_v15  ;;  %v6369_v45 = vadd.f32 %v12373_v59, %v6368_v37  ;;  %v4630_v31 = vld [vmem:[#allocation3 + $0x2da] sm:$0xff] }
 0x443   :  { %v12397_v39 = vadd.f32 %v6743_v12, %v6359_v1  ;;  %6986 = vmatprep.mubr.f32.mxu0 %v4753_v17  ;;  %v6370_v13 = vpop.f32.mrf.mxu1 }
 0x444   :  { %v6745_v10 = vpop.f32.mrf.mxu0  ;;  %v4759_v13 = vld [vmem:[#allocation3 + $0x300] sm:$0xff] }
 0x445   :  { %v6373_v50 = vpop.f32.mrf.mxu1  ;;  %6612 = vmatmul.mubr.f32.gmra.mxu1 %v4753_v17  ;;  %v13500_v17 = vmax.f32 %v12232_v58, 0.0 }
 0x446   :  { %v6748_v57 = vpop.f32.mrf.mxu0  ;;  %6987 = vmatmul.mubr.f32.gmra.mxu0 %v4625_v14  ;;  %6616 = vmatprep.mubr.f32.mxu1 %v13496_v29  ;;  %v6374_v35 = vadd.f32 %v12373_v59, %v6373_v50 }
 0x447   :  { %v12402_v54 = vadd.f32 %v6748_v57, %v6364_v49  ;;  %6991 = vmatprep.mubr.f32.mxu0 %v4754_v52  ;;  %v6375_v24 = vpop.f32.mrf.mxu1  ;;  %v4631_v57 = vld [vmem:[#allocation3 + $0x2ea] sm:$0xff] }
 0x448   :  { %v6750_v15 = vpop.f32.mrf.mxu0  ;;  %v4760_v24 = vld [vmem:[#allocation3 + $0x308] sm:$0xff] }
 0x449   :  { %v6378_v38 = vpop.f32.mrf.mxu1  ;;  %6617 = vmatmul.mubr.f32.gmra.mxu1 %v4754_v52  ;;  %v13501_v52 = vmax.f32 %v12223_v55, 0.0 }
 0x44a   :  { %v6753_v56 = vpop.f32.mrf.mxu0  ;;  %6992 = vmatmul.mubr.f32.gmra.mxu0 %v4626_v48  ;;  %6621 = vmatprep.mubr.f32.mxu1 %v4242_v22  ;;  %v6379_v41 = vadd.f32 %v12373_v59, %v6378_v38 }
 0x44b   :  { %v12407_v23 = vadd.f32 %v6753_v56, %v6369_v45  ;;  %6996 = vmatprep.mubr.f32.mxu0 %v4755_v4  ;;  %v6380_v6 = vpop.f32.mrf.mxu1  ;;  %v4632_v56 = vld [vmem:[#allocation3 + $0x2f2] sm:$0xff] }
 0x44c   :  { %v6755_v43 = vpop.f32.mrf.mxu0  ;;  %v4761_v6 = vld [vmem:[#allocation3 + $0x318] sm:$0xff] }
 0x44d   :  { %v6383_v3 = vpop.f32.mrf.mxu1  ;;  %6622 = vmatmul.mubr.f32.gmra.mxu1 %v4755_v4 }
 0x44e   :  { %v6758_v44 = vpop.f32.mrf.mxu0  ;;  %6997 = vmatmul.mubr.f32.gmra.mxu0 %v4627_v32  ;;  %6626 = vmatprep.mubr.f32.mxu1 %v13497_v33  ;;  %v6384_v51 = vadd.f32 %v12373_v59, %v6383_v3 }
 0x44f   :  { %v12412_v61 = vadd.f32 %v6758_v44, %v6374_v35  ;;  %7001 = vmatprep.mubr.f32.mxu0 %v4756_v53  ;;  %v6385_v0 = vpop.f32.mrf.mxu1  ;;  %v4633_v44 = vld [vmem:[#allocation3 + $0x302] sm:$0xff] }
 0x450   :  { %v6760_v22 = vpop.f32.mrf.mxu0 }
 0x451   :  { %v6388_v62 = vpop.f32.mrf.mxu1  ;;  %6627 = vmatmul.mubr.f32.gmra.mxu1 %v4756_v53  ;;  %v4762_v53 = vld [vmem:[#allocation3 + $0x320] sm:$0xff] }
 0x452   :  { %v6763_v34 = vpop.f32.mrf.mxu0  ;;  %7002 = vmatmul.mubr.f32.gmra.mxu0 %v4628_v26  ;;  %6631 = vmatprep.mubr.f32.mxu1 %v13498_v21  ;;  %v6389_v1 = vadd.f32 %v12373_v59, %v6388_v62  ;;  %v4634_v62 = vld [vmem:[#allocation3 + $0x30a] sm:$0xff]  ;;  %v4957_v26 = vld [vmem:[#allocation3 + $0x1a] sm:$0xff] }
 0x453   :  { %v12417_v7 = vadd.f32 %v6763_v34, %v6379_v41  ;;  %7006 = vmatprep.mubr.f32.mxu0 %v4757_v36  ;;  %v6390_v46 = vpop.f32.mrf.mxu1  ;;  %v4763_v21 = vld [vmem:[#allocation3 + $0x330] sm:$0xff] }
 0x454   :  { %v6765_v2 = vpop.f32.mrf.mxu0  ;;  %v4829_v46 = vld [vmem:[#allocation3 + $0x19] sm:$0xff] }
 0x455   :  { %v6393_v30 = vpop.f32.mrf.mxu1  ;;  %6632 = vmatmul.mubr.f32.gmra.mxu1 %v4757_v36  ;;  %v6253_v2 = vld [vmem:[%s13183_s3 + $0x478] sm:$0xff] }
 0x456   :  { %v6768_v18 = vpop.f32.mrf.mxu0  ;;  %7007 = vmatmul.mubr.f32.gmra.mxu0 %v4629_v60  ;;  %6636 = vmatprep.mubr.f32.mxu1 %v13499_v11  ;;  %v6394_v50 = vadd.f32 %v12373_v59, %v6393_v30  ;;  %v4635_v60 = vld [vmem:[#allocation3 + $0x31a] sm:$0xff] }
 0x457   :  { %v12422_v63 = vadd.f32 %v6768_v18, %v6384_v51  ;;  %7011 = vmatprep.mubr.f32.mxu0 %v4758_v16  ;;  %v6395_v8 = vpop.f32.mrf.mxu1  ;;  %v4958_v18 = vld [vmem:[#allocation3 + $0x22] sm:$0xff] }
 0x458   :  { %v6770_v9 = vpop.f32.mrf.mxu0 }
 0x459   :  { %v6398_v37 = vpop.f32.mrf.mxu1  ;;  %6637 = vmatmul.mubr.f32.gmra.mxu1 %v4758_v16  ;;  %v4764_v16 = vld [vmem:[#allocation3 + $0x338] sm:$0xff] }
 0x45a   :  { %v6773_v12 = vpop.f32.mrf.mxu0  ;;  %7012 = vmatmul.mubr.f32.gmra.mxu0 %v4630_v31  ;;  %6641 = vmatprep.mubr.f32.mxu1 %v13500_v17  ;;  %v6399_v38 = vadd.f32 %v12373_v59, %v6398_v37  ;;  %v4830_v37 = vld [vmem:[#allocation3 + $0x21] sm:$0xff]  ;;  %v6252_v31 = vld [vmem:[%s13183_s3 + $0x470] sm:$0xff] }
 0x45b   :  { %v12427_v10 = vadd.f32 %v6773_v12, %v6389_v1  ;;  %7016 = vmatprep.mubr.f32.mxu0 %v4759_v13  ;;  %v6400_v40 = vpop.f32.mrf.mxu1 }
 0x45c   :  { %v6775_v49 = vpop.f32.mrf.mxu0  ;;  %v4959_v40 = vld [vmem:[#allocation3 + $0x32] sm:$0xff] }
 0x45d   :  { %v6403_v14 = vpop.f32.mrf.mxu1  ;;  %6642 = vmatmul.mubr.f32.gmra.mxu1 %v4759_v13  ;;  %v4636_v13 = vld [vmem:[#allocation3 + $0x322] sm:$0xff] }
 0x45e   :  { %v6778_v29 = vpop.f32.mrf.mxu0  ;;  %7017 = vmatmul.mubr.f32.gmra.mxu0 %v4631_v57  ;;  %6646 = vmatprep.mubr.f32.mxu1 %v13501_v52  ;;  %v6404_v3 = vadd.f32 %v12373_v59, %v6403_v14  ;;  %v6251_v52 = vld [vmem:[%s13183_s3 + $0x468] sm:$0xff] }
 0x45f   :  { %v12432_v15 = vadd.f32 %v6778_v29, %v6394_v50  ;;  %7021 = vmatprep.mubr.f32.mxu0 %v4760_v24  ;;  %v6405_v58 = vpop.f32.mrf.mxu1  ;;  %v5214_v50 = vld [vmem:[#allocation3 + $0x31] sm:$0xff] }
 0x460   :  { %v6780_v45 = vpop.f32.mrf.mxu0 }
 0x461   :  { %v6408_v48 = vpop.f32.mrf.mxu1  ;;  %6647 = vmatmul.mubr.f32.gmra.mxu1 %v4760_v24  ;;  %v5086_v45 = vld [vmem:[#allocation3 + $0x30] sm:$0xff] }
 0x462   :  { %v6783_v4 = vpop.f32.mrf.mxu0  ;;  %7022 = vmatmul.mubr.f32.gmra.mxu0 %v4632_v56  ;;  %6651 = vmatprep.mubr.f32.mxu1 %v4248_v28  ;;  %v6409_v22 = vadd.f32 %v12373_v59, %v6408_v48  ;;  %v5215_v56 = vld [vmem:[#allocation3 + $0x39] sm:$0xff] }
 0x463   :  { %v12437_v43 = vadd.f32 %v6783_v4, %v6399_v38  ;;  %7026 = vmatprep.mubr.f32.mxu0 %v4761_v6  ;;  %v6410_v55 = vpop.f32.mrf.mxu1  ;;  %v4960_v38 = vld [vmem:[#allocation3 + $0x3a] sm:$0xff] }
 0x464   :  { %v6785_v35 = vpop.f32.mrf.mxu0 }
 0x465   :  { %v6413_v32 = vpop.f32.mrf.mxu1  ;;  %6652 = vmatmul.mubr.f32.gmra.mxu1 %v4761_v6  ;;  %v6250_v35 = vld [vmem:[%s13183_s3 + $0x460] sm:$0xff] }
 0x466   :  { %v6788_v33 = vpop.f32.mrf.mxu0  ;;  %7027 = vmatmul.mubr.f32.gmra.mxu0 %v4633_v44  ;;  %6656 = vmatprep.mubr.f32.mxu1 %v4249_v27  ;;  %v6414_v51 = vadd.f32 %v12373_v59, %v6413_v32  ;;  %v5087_v44 = vld [vmem:[#allocation3 + $0x38] sm:$0xff] }
 0x467   :  { %v12442_v0 = vadd.f32 %v6788_v33, %v6404_v3  ;;  %7031 = vmatprep.mubr.f32.mxu0 %v4762_v53  ;;  %v6415_v19 = vpop.f32.mrf.mxu1  ;;  %v4961_v33 = vld [vmem:[#allocation3 + $0x4a] sm:$0xff] }
 0x468   :  { %v6790_v28 = vpop.f32.mrf.mxu0  ;;  %v5216_v19 = vld [vmem:[#allocation3 + $0x49] sm:$0xff] }
 0x469   :  { %v6418_v41 = vpop.f32.mrf.mxu1  ;;  %6657 = vmatmul.mubr.f32.gmra.mxu1 %v4762_v53 }
 0x46a   :  { %v6793_v34 = vpop.f32.mrf.mxu0  ;;  %7032 = vmatmul.mubr.f32.gmra.mxu0 %v4634_v62  ;;  %7111 = vmatprep.mubr.f32.mxu1 %v4957_v26  ;;  %v6419_v12 = vadd.f32 %v12373_v59, %v6418_v41  ;;  %v6249_v62 = vld [vmem:[%s13183_s3 + $0x458] sm:$0xff] }
 0x46b   :  { %v12445_v36 = vadd.f32 %v6793_v34, %v6409_v22  ;;  %7036 = vmatprep.mubr.f32.mxu0 %v4763_v21  ;;  %v6420_v5 = vpop.f32.mrf.mxu1  ;;  %v5088_v21 = vld [vmem:[#allocation3 + $0x48] sm:$0xff] }
 0x46c   :  { %v6795_v27 = vpop.f32.mrf.mxu0  ;;  %v4962_v5 = vld [vmem:[#allocation3 + $0x52] sm:$0xff] }
 0x46d   :  { %v6423_v30 = vpop.f32.mrf.mxu1  ;;  %7112 = vmatmul.mubr.f32.vlgmr.msra.gmra.mxu1 %v4829_v46  ;;  %v5217_v46 = vld [vmem:[#allocation3 + $0x51] sm:$0xff] }
 0x46e   :  { %v6798_v11 = vpop.f32.mrf.mxu0  ;;  %7037 = vmatmul.mubr.f32.gmra.mxu0 %v4635_v60  ;;  %7116 = vmatprep.mubr.f32.mxu1 %v4958_v18  ;;  %v6424_v24 = vadd.f32 %v12373_v59, %v6423_v30  ;;  %v6248_v60 = vld [vmem:[%s13183_s3 + $0x450] sm:$0xff] }
 0x46f   :  { %v12451_v8 = vadd.f32 %v6798_v11, %v6414_v51  ;;  %7041 = vmatprep.mubr.f32.mxu0 %v4764_v16  ;;  %7818 = vmatpush1.msra.mxu1 %v6253_v2  ;;  %v6425_v9 = vpop.f32.mrf.mxu1  ;;  %v5089_v16 = vld [vmem:[#allocation3 + $0x50] sm:$0xff] }
 0x470   :  { %v6800_v1 = vpop.f32.mrf.mxu0  ;;  %7819 = vmatprep.subr.mxu1 %v12210_v42  ;;  %v4963_v9 = vld [vmem:[#allocation3 + $0x62] sm:$0xff] }
 0x471   :  { %v6428_v17 = vpop.f32.mrf.mxu1  ;;  %7117 = vmatmul.mubr.f32.gmra.mxu1 %v4830_v37  ;;  %v5218_v37 = vld [vmem:[#allocation3 + $0x61] sm:$0xff] }
 0x472   :  { %v6803_v49 = vpop.f32.mrf.mxu0  ;;  %7042 = vmatmul.mubr.f32.gmra.mxu0 %v4636_v13  ;;  %7121 = vmatprep.mubr.f32.mxu1 %v4959_v40  ;;  %v6429_v3 = vadd.f32 %v12373_v59, %v6428_v17  ;;  %v6247_v13 = vld [vmem:[%s13183_s3 + $0x448] sm:$0xff] }
 0x473   :  { %v12458_v14 = vadd.f32 %v6803_v49, %v6419_v12  ;;  %7496 = vmatprep.mubr.f32.mxu0 %v5214_v50  ;;  %v6430_v57 = vpop.f32.mrf.mxu1  ;;  %7820 = vmatpush1.msra.mxu1 %v6252_v31 }
 0x474   :  { %v6805_v29 = vpop.f32.mrf.mxu0  ;;  %7821 = vmatprep.subr.mxu1 %v12210_v42  ;;  %v4964_v57 = vld [vmem:[#allocation3 + $0x6a] sm:$0xff] }
 0x475   :  { %v6433_v58 = vpop.f32.mrf.mxu1  ;;  %7122 = vmatmul.mubr.f32.gmra.mxu1 %v5214_v50  ;;  %v5090_v50 = vld [vmem:[#allocation3 + $0x60] sm:$0xff] }
 0x476   :  { %v6808_v48 = vpop.f32.mrf.mxu0  ;;  %7497 = vmatmul.mubr.f32.vlgmr.msra.gmra.mxu0 %v5086_v45  ;;  %7126 = vmatprep.mubr.f32.mxu1 %v4960_v38  ;;  %v6434_v26 = vadd.f32 %v12373_v59, %v6433_v58  ;;  %v12495_v45 = vld [vmem:[#allocation2 + $0x8] sm:$0xff]  ;;  %v6246_v38 = vld [vmem:[%s13183_s3 + $0x440] sm:$0xff] }
 0x477   :  { %v12465_v4 = vadd.f32 %v6808_v48, %v6424_v24  ;;  %7501 = vmatprep.mubr.f32.mxu0 %v5215_v56  ;;  %v6435_v6 = vpop.f32.mrf.mxu1  ;;  %7822 = vmatpush1.msra.mxu1 %v6251_v52  ;;  %v5219_v52 = vld [vmem:[#allocation3 + $0x69] sm:$0xff] }
 0x478   :  { %v6810_v55 = vpop.f32.mrf.mxu0  ;;  %7823 = vmatprep.subr.mxu1 %v12210_v42  ;;  %v5091_v6 = vld [vmem:[#allocation3 + $0x68] sm:$0xff] }
 0x479   :  { %v6438_v32 = vpop.f32.mrf.mxu1  ;;  %7127 = vmatmul.mubr.f32.gmra.mxu1 %v5215_v56  ;;  %v4965_v55 = vld [vmem:[#allocation3 + $0x7a] sm:$0xff] }
 0x47a   :  { %v6813_v53 = vpop.f32.mrf.mxu0  ;;  %7502 = vmatmul.mubr.f32.gmra.mxu0 %v5087_v44  ;;  %7131 = vmatprep.mubr.f32.mxu1 %v4961_v33  ;;  %v6439_v18 = vadd.f32 %v12373_v59, %v6438_v32 }
 0x47b   :  { %v12472_v28 = vadd.f32 %v6813_v53, %v6429_v3  ;;  %7506 = vmatprep.mubr.f32.mxu0 %v5216_v19  ;;  %v6440_v22 = vpop.f32.mrf.mxu1  ;;  %7824 = vmatpush1.msra.mxu1 %v6250_v35  ;;  %v5220_v3 = vld [vmem:[#allocation3 + $0x79] sm:$0xff] }
 0x47c   :  { %v6815_v41 = vpop.f32.mrf.mxu0  ;;  %7825 = vmatprep.subr.mxu1 %v12210_v42  ;;  %v6245_v53 = vld [vmem:[%s13183_s3 + $0x438] sm:$0xff] }
 0x47d   :  { %v6443_v34 = vpop.f32.mrf.mxu1  ;;  %7132 = vmatmul.mubr.f32.gmra.mxu1 %v5216_v19  ;;  %v5092_v41 = vld [vmem:[#allocation3 + $0x78] sm:$0xff] }
 0x47e   :  { %v6818_v27 = vpop.f32.mrf.mxu0  ;;  %7507 = vmatmul.mubr.f32.gmra.mxu0 %v5088_v21  ;;  %7136 = vmatprep.mubr.f32.mxu1 %v4962_v5  ;;  %v6444_v40 = vadd.f32 %v12373_v59, %v6443_v34  ;;  %v5221_v34 = vld [vmem:[#allocation3 + $0x81] sm:$0xff] }
 0x47f   :  { %v12479_v2 = vadd.f32 %v6818_v27, %v6434_v26  ;;  %7511 = vmatprep.mubr.f32.mxu0 %v5217_v46  ;;  %v6445_v51 = vpop.f32.mrf.mxu1  ;;  %7826 = vmatpush1.msra.mxu1 %v6249_v62  ;;  %v4966_v62 = vld [vmem:[#allocation3 + $0x82] sm:$0xff] }
 0x480   :  { %v6820_v30 = vpop.f32.mrf.mxu0  ;;  %7827 = vmatprep.subr.mxu1 %v12210_v42 }
 0x481   :  { %v6448_v11 = vpop.f32.mrf.mxu1  ;;  %7137 = vmatmul.mubr.f32.gmra.mxu1 %v5217_v46  ;;  %v6244_v46 = vld [vmem:[%s13183_s3 + $0x430] sm:$0xff] }
 0x482   :  { %v6823_v1 = vpop.f32.mrf.mxu0  ;;  %7512 = vmatmul.mubr.f32.gmra.mxu0 %v5089_v16  ;;  %7141 = vmatprep.mubr.f32.mxu1 %v4963_v9  ;;  %v6449_v48 = vadd.f32 %v12373_v59, %v6448_v11  ;;  %v5222_v16 = vld [vmem:[#allocation3 + $0x91] sm:$0xff] }
 0x483   :  { %v12486_v31 = vadd.f32 %v6823_v1, %v6439_v18  ;;  %7516 = vmatprep.mubr.f32.mxu0 %v5218_v37  ;;  %v6450_v12 = vpop.f32.mrf.mxu1  ;;  %7828 = vmatpush1.msra.mxu1 %v6248_v60  ;;  %v5093_v60 = vld [vmem:[#allocation3 + $0x80] sm:$0xff]  ;;  %v4967_v18 = vld [vmem:[#allocation3 + $0x92] sm:$0xff] }
 0x484   :  { %v6825_v17 = vpop.f32.mrf.mxu0  ;;  %7829 = vmatprep.subr.mxu1 %v12210_v42  ;;  %v6243_v12 = vld [vmem:[%s13183_s3 + $0x428] sm:$0xff] }
 0x485   :  { %v6453_v49 = vpop.f32.mrf.mxu1  ;;  %7142 = vmatmul.mubr.f32.gmra.mxu1 %v5218_v37 }
 0x486   :  { %v6828_v29 = vpop.f32.mrf.mxu0  ;;  %7517 = vmatmul.mubr.f32.gmra.mxu0 %v5090_v50  ;;  %7146 = vmatprep.mubr.f32.mxu1 %v4964_v57  ;;  %v6454_v19 = vadd.f32 %v12373_v59, %v6453_v49  ;;  %v4968_v49 = vld [vmem:[#allocation3 + $0x9a] sm:$0xff] }
 0x487   :  { %v12493_v24 = vadd.f32 %v6828_v29, %v6444_v40  ;;  %7521 = vmatprep.mubr.f32.mxu0 %v5219_v52  ;;  %v6455_v58 = vpop.f32.mrf.mxu1  ;;  %7830 = vmatpush1.msra.mxu1 %v6247_v13  ;;  %v5094_v40 = vld [vmem:[#allocation3 + $0x90] sm:$0xff]  ;;  %v5223_v57 = vld [vmem:[#allocation3 + $0x99] sm:$0xff] }
 0x488   :  { %v6830_v42 = vpop.f32.mrf.mxu0  ;;  %7831 = vmatprep.subr.mxu1 %v12495_v45 }
 0x489   :  { %v6458_v56 = vpop.f32.mrf.mxu1  ;;  %7147 = vmatmul.mubr.f32.gmra.mxu1 %v5219_v52  ;;  %v6242_v42 = vld [vmem:[%s13183_s3 + $0x420] sm:$0xff] }
 0x48a   :  { %v6833_v35 = vpop.f32.mrf.mxu0  ;;  %7522 = vmatmul.mubr.f32.gmra.mxu0 %v5091_v6  ;;  %7151 = vmatprep.mubr.f32.mxu1 %v4965_v55  ;;  %v6459_v51 = vadd.f32 %v12373_v59, %v6458_v56  ;;  %v5095_v56 = vld [vmem:[#allocation3 + $0x98] sm:$0xff]  ;;  %v4969_v6 = vld [vmem:[#allocation3 + $0xaa] sm:$0xff] }
 0x48b   :  { %v12502_v32 = vadd.f32 %v6833_v35, %v6449_v48  ;;  %7526 = vmatprep.mubr.f32.mxu0 %v5220_v3  ;;  %v6460_v44 = vpop.f32.mrf.mxu1  ;;  %7832 = vmatpush1.msra.mxu1 %v6246_v38  ;;  %v5224_v35 = vld [vmem:[#allocation3 + $0xa9] sm:$0xff] }
 0x48c   :  { %v6835_v33 = vpop.f32.mrf.mxu0  ;;  %7833 = vmatprep.subr.mxu1 %v12495_v45 }
 0x48d   :  { %v6463_v22 = vpop.f32.mrf.mxu1  ;;  %7152 = vmatmul.mubr.f32.gmra.mxu1 %v5220_v3 }
 0x48e   :  { %v6838_v26 = vpop.f32.mrf.mxu0  ;;  %7527 = vmatmul.mubr.f32.gmra.mxu0 %v5092_v41  ;;  %7156 = vmatprep.mubr.f32.mxu1 %v4966_v62  ;;  %v6464_v17 = vadd.f32 %v12373_v59, %v6463_v22  ;;  %v5096_v41 = vld [vmem:[#allocation3 + $0xa8] sm:$0xff]  ;;  %v4970_v62 = vld [vmem:[#allocation3 + $0xb2] sm:$0xff] }
 0x48f   :  { %v12509_v21 = vadd.f32 %v6838_v26, %v6454_v19  ;;  %7531 = vmatprep.mubr.f32.mxu0 %v5221_v34  ;;  %v6465_v5 = vpop.f32.mrf.mxu1  ;;  %7834 = vmatpush1.msra.mxu1 %v6245_v53  ;;  %v6241_v53 = vld [vmem:[%s13183_s3 + $0x418] sm:$0xff] }
 0x490   :  { %v6840_v27 = vpop.f32.mrf.mxu0  ;;  %7835 = vmatprep.subr.mxu1 %v12495_v45 }
 0x491   :  { %v6468_v30 = vpop.f32.mrf.mxu1  ;;  %7157 = vmatmul.mubr.f32.gmra.mxu1 %v5221_v34  ;;  %v5225_v34 = vld [vmem:[#allocation3 + $0xb1] sm:$0xff] }
 0x492   :  { %v6843_v11 = vpop.f32.mrf.mxu0  ;;  %7532 = vmatmul.mubr.f32.gmra.mxu0 %v5093_v60  ;;  %7161 = vmatprep.mubr.f32.mxu1 %v4967_v18  ;;  %v6469_v38 = vadd.f32 %v12373_v59, %v6468_v30  ;;  %v5097_v18 = vld [vmem:[#allocation3 + $0xb0] sm:$0xff] }
 0x493   :  { %v12516_v9 = vadd.f32 %v6843_v11, %v6459_v51  ;;  %7536 = vmatprep.mubr.f32.mxu0 %v5222_v16  ;;  %v6470_v1 = vpop.f32.mrf.mxu1  ;;  %7836 = vmatpush1.msra.mxu1 %v6244_v46  ;;  %v6240_v51 = vld [vmem:[%s13183_s3 + $0x410] sm:$0xff]  ;;  %v4971_v11 = vld [vmem:[#allocation3 + $0xc2] sm:$0xff] }
 0x494   :  { %v6845_v37 = vpop.f32.mrf.mxu0  ;;  %7837 = vmatprep.subr.mxu1 %v12495_v45  ;;  %v5226_v1 = vld [vmem:[#allocation3 + $0xc1] sm:$0xff] }
 0x495   :  { %v6473_v13 = vpop.f32.mrf.mxu1  ;;  %7162 = vmatmul.mubr.f32.gmra.mxu1 %v5222_v16 }
 0x496   :  { %v6848_v50 = vpop.f32.mrf.mxu0  ;;  %7537 = vmatmul.mubr.f32.gmra.mxu0 %v5094_v40  ;;  %7166 = vmatprep.mubr.f32.mxu1 %v4968_v49  ;;  %v6474_v19 = vadd.f32 %v12373_v59, %v6473_v13  ;;  %v6239_v13 = vld [vmem:[%s13183_s3 + $0x408] sm:$0xff] }
 0x497   :  { %v12523_v29 = vadd.f32 %v6848_v50, %v6464_v17  ;;  %7541 = vmatprep.mubr.f32.mxu0 %v5223_v57  ;;  %v6475_v52 = vpop.f32.mrf.mxu1  ;;  %7838 = vmatpush1.msra.mxu1 %v6243_v12  ;;  %v5098_v50 = vld [vmem:[#allocation3 + $0xc0] sm:$0xff] }
 0x498   :  { %v6850_v58 = vpop.f32.mrf.mxu0  ;;  %7839 = vmatprep.subr.mxu1 %v12495_v45 }
 0x499   :  { %v6478_v48 = vpop.f32.mrf.mxu1  ;;  %7167 = vmatmul.mubr.f32.gmra.mxu1 %v5223_v57  ;;  %v4972_v57 = vld [vmem:[#allocation3 + $0xca] sm:$0xff] }
 0x49a   :  { %v6853_v55 = vpop.f32.mrf.mxu0  ;;  %7542 = vmatmul.mubr.f32.gmra.mxu0 %v5095_v56  ;;  %7171 = vmatprep.mubr.f32.mxu1 %v4969_v6  ;;  %v6479_v30 = vadd.f32 %v12373_v59, %v6478_v48  ;;  %v5227_v58 = vld [vmem:[#allocation3 + $0xc9] sm:$0xff]  ;;  %v6238_v56 = vld [vmem:[%s13183_s3 + $0x400] sm:$0xff] }
 0x49b   :  { %v12530_v3 = vadd.f32 %v6853_v55, %v6469_v38  ;;  %7546 = vmatprep.mubr.f32.mxu0 %v5224_v35  ;;  %v6480_v44 = vpop.f32.mrf.mxu1  ;;  %7840 = vmatpush1.msra.mxu1 %v6242_v42 }
 0x49c   :  { %v6855_v33 = vpop.f32.mrf.mxu0  ;;  %7841 = vmatprep.subr.mxu1 %v12495_v45  ;;  %v4973_v44 = vld [vmem:[#allocation3 + $0xda] sm:$0xff] }
 0x49d   :  { %v6483_v22 = vpop.f32.mrf.mxu1  ;;  %7172 = vmatmul.mubr.f32.gmra.mxu1 %v5224_v35  ;;  %v5099_v35 = vld [vmem:[#allocation3 + $0xc8] sm:$0xff] }
 0x49e   :  { %v6858_v26 = vpop.f32.mrf.mxu0  ;;  %7547 = vmatmul.mubr.f32.gmra.mxu0 %v5096_v41  ;;  %7176 = vmatprep.mubr.f32.mxu1 %v4970_v62  ;;  %v6484_v40 = vadd.f32 %v12373_v59, %v6483_v22  ;;  %v6269_v62 = vld [vmem:[%s13183_s3 + $0x4f8] sm:$0xff] }
 0x49f   :  { %v12537_v5 = vadd.f32 %v6858_v26, %v6474_v19  ;;  %7551 = vmatprep.mubr.f32.mxu0 %v5225_v34  ;;  %v6485_v27 = vpop.f32.mrf.mxu1  ;;  %7842 = vmatpush1.msra.mxu1 %v6241_v53  ;;  %v5228_v53 = vld [vmem:[#allocation3 + $0xd9] sm:$0xff] }
 0x4a0   :  { %v6860_v46 = vpop.f32.mrf.mxu0  ;;  %7843 = vmatprep.subr.mxu1 %v12495_v45  ;;  %v5100_v27 = vld [vmem:[#allocation3 + $0xd8] sm:$0xff] }
 0x4a1   :  { %v6488_v60 = vpop.f32.mrf.mxu1  ;;  %7177 = vmatmul.mubr.f32.gmra.mxu1 %v5225_v34  ;;  %v4974_v46 = vld [vmem:[#allocation3 + $0xe2] sm:$0xff] }
 0x4a2   :  { %v6863_v16 = vpop.f32.mrf.mxu0  ;;  %7552 = vmatmul.mubr.f32.gmra.mxu0 %v5097_v18  ;;  %7181 = vmatprep.mubr.f32.mxu1 %v4971_v11  ;;  %v6489_v6 = vadd.f32 %v12373_v59, %v6488_v60 }
 0x4a3   :  { %v12544_v37 = vadd.f32 %v6863_v16, %v6479_v30  ;;  %7556 = vmatprep.mubr.f32.mxu0 %v5226_v1  ;;  %v6490_v12 = vpop.f32.mrf.mxu1  ;;  %7844 = vmatpush1.msra.mxu1 %v6240_v51  ;;  %v5229_v30 = vld [vmem:[#allocation3 + $0xe1] sm:$0xff]  ;;  %v6268_v16 = vld [vmem:[%s13183_s3 + $0x4f0] sm:$0xff] }
 0x4a4   :  { %v6865_v17 = vpop.f32.mrf.mxu0  ;;  %7845 = vmatprep.subr.mxu1 %v12495_v45 }
 0x4a5   :  { %v6493_v49 = vpop.f32.mrf.mxu1  ;;  %7182 = vmatmul.mubr.f32.gmra.mxu1 %v5226_v1  ;;  %v5101_v17 = vld [vmem:[#allocation3 + $0xe0] sm:$0xff] }
 0x4a6   :  { %v6868_v52 = vpop.f32.mrf.mxu0  ;;  %7557 = vmatmul.mubr.f32.gmra.mxu0 %v5098_v50  ;;  %7186 = vmatprep.mubr.f32.mxu1 %v4972_v57  ;;  %v6494_v26 = vadd.f32 %v12373_v59, %v6493_v49  ;;  %v5230_v49 = vld [vmem:[#allocation3 + $0xf1] sm:$0xff] }
 0x4a7   :  { %v12551_v42 = vadd.f32 %v6868_v52, %v6484_v40  ;;  %7561 = vmatprep.mubr.f32.mxu0 %v5227_v58  ;;  %v6495_v38 = vpop.f32.mrf.mxu1  ;;  %7846 = vmatpush1.msra.mxu1 %v6239_v13  ;;  %v4975_v13 = vld [vmem:[#allocation3 + $0xf2] sm:$0xff] }
 0x4a8   :  { %v6870_v48 = vpop.f32.mrf.mxu0  ;;  %7847 = vmatprep.subr.mxu1 %v12495_v45 }
 0x4a9   :  { %v6498_v55 = vpop.f32.mrf.mxu1  ;;  %7187 = vmatmul.mubr.f32.gmra.mxu1 %v5227_v58  ;;  %v6267_v58 = vld [vmem:[%s13183_s3 + $0x4e8] sm:$0xff] }
 0x4aa   :  { %v6873_v33 = vpop.f32.mrf.mxu0  ;;  %7562 = vmatmul.mubr.f32.gmra.mxu0 %v5099_v35  ;;  %7191 = vmatprep.mubr.f32.mxu1 %v4973_v44  ;;  %v6499_v1 = vadd.f32 %v12373_v59, %v6498_v55  ;;  %v5231_v35 = vld [vmem:[#allocation3 + $0xf9] sm:$0xff] }
 0x4ab   :  { %v12558_v19 = vadd.f32 %v6873_v33, %v6489_v6  ;;  %7566 = vmatprep.mubr.f32.mxu0 %v5228_v53  ;;  %v6500_v22 = vpop.f32.mrf.mxu1  ;;  %7848 = vmatpush1.msra.mxu1 %v6238_v56  ;;  %v5102_v56 = vld [vmem:[#allocation3 + $0xf0] sm:$0xff]  ;;  %v4976_v6 = vld [vmem:[#allocation3 + $0xfa] sm:$0xff] }
 0x4ac   :  { %v6875_v41 = vpop.f32.mrf.mxu0  ;;  %7849 = vmatprep.subr.mxu1 %v12495_v45  ;;  %v6266_v22 = vld [vmem:[%s13183_s3 + $0x4e0] sm:$0xff] }
 0x4ad   :  { %v6503_v34 = vpop.f32.mrf.mxu1  ;;  %7192 = vmatmul.mubr.f32.gmra.mxu1 %v5228_v53 }
 0x4ae   :  { %v6878_v51 = vpop.f32.mrf.mxu0  ;;  %7567 = vmatmul.mubr.f32.gmra.mxu0 %v5100_v27  ;;  %7196 = vmatprep.mubr.f32.mxu1 %v4974_v46  ;;  %v6504_v38 = vadd.f32 %v12373_v59, %v6503_v34  ;;  %v4977_v34 = vld [vmem:[#allocation3 + $0x10a] sm:$0xff] }
 0x4af   :  { %v12565_v60 = vadd.f32 %v6878_v51, %v6494_v26  ;;  %7571 = vmatprep.mubr.f32.mxu0 %v5229_v30  ;;  %v6505_v18 = vpop.f32.mrf.mxu1  ;;  %7850 = vmatpush2.msra.mxu1 %v6269_v62  ;;  %v5103_v26 = vld [vmem:[#allocation3 + $0xf8] sm:$0xff]  ;;  %v5232_v46 = vld [vmem:[#allocation3 + $0x109] sm:$0xff] }
 0x4b0   :  { %v6880_v11 = vpop.f32.mrf.mxu0  ;;  %7851 = vmatprep.subr.mxu1 %v12495_v45 }
 0x4b1   :  { %v6508_v12 = vpop.f32.mrf.mxu1  ;;  %7197 = vmatmul.mubr.f32.gmra.mxu1 %v5229_v30  ;;  %v6265_v11 = vld [vmem:[%s13183_s3 + $0x4d8] sm:$0xff] }
 0x4b2   :  { %v6883_v40 = vpop.f32.mrf.mxu0  ;;  %7572 = vmatmul.mubr.f32.gmra.mxu0 %v5101_v17  ;;  %7201 = vmatprep.mubr.f32.mxu1 %v4975_v13  ;;  %v6509_v41 = vadd.f32 %v12373_v59, %v6508_v12  ;;  %v5104_v12 = vld [vmem:[#allocation3 + $0x108] sm:$0xff]  ;;  %v4978_v17 = vld [vmem:[#allocation3 + $0x112] sm:$0xff] }
 0x4b3   :  { %v12572_v50 = vadd.f32 %v6883_v40, %v6499_v1  ;;  %7576 = vmatprep.mubr.f32.mxu0 %v5230_v49  ;;  %v6510_v57 = vpop.f32.mrf.mxu1  ;;  %7852 = vmatpush2.msra.mxu1 %v6268_v16  ;;  %v5233_v40 = vld [vmem:[#allocation3 + $0x111] sm:$0xff] }
 0x4b4   :  { %v6885_v52 = vpop.f32.mrf.mxu0  ;;  %7853 = vmatprep.subr.mxu1 %v12495_v45 }
 0x4b5   :  { %v6513_v48 = vpop.f32.mrf.mxu1  ;;  %7202 = vmatmul.mubr.f32.gmra.mxu1 %v5230_v49 }
 0x4b6   :  { %v6888_v55 = vpop.f32.mrf.mxu0  ;;  %7577 = vmatmul.mubr.f32.gmra.mxu0 %v5102_v56  ;;  %7206 = vmatprep.mubr.f32.mxu1 %v4976_v6  ;;  %v6514_v16 = vadd.f32 %v12373_v59, %v6513_v48  ;;  %v6264_v59 = vld [vmem:[%s13183_s3 + $0x4d0] sm:$0xff]  ;;  %v4979_v6 = vld [vmem:[#allocation3 + $0x122] sm:$0xff] }
 0x4b7   :  { %v12579_v44 = vadd.f32 %v6888_v55, %v6504_v38  ;;  %7581 = vmatprep.mubr.f32.mxu0 %v5231_v35  ;;  %v6515_v33 = vpop.f32.mrf.mxu1  ;;  %7854 = vmatpush2.msra.mxu1 %v6267_v58  ;;  %v12602_v58 = vld [vmem:[%s13184_s4] ss:$0 sm:$0xff]  ;;  %v5105_v56 = vld [vmem:[#allocation3 + $0x110] sm:$0xff] }
 0x4b8   :  { %v6890_v53 = vpop.f32.mrf.mxu0  ;;  %7855 = vmatprep.subr.mxu1 %v12495_v45 }
 0x4b9   :  { %v6518_v62 = vpop.f32.mrf.mxu1  ;;  %7207 = vmatmul.mubr.f32.gmra.mxu1 %v5231_v35  ;;  %v5234_v35 = vld [vmem:[#allocation3 + $0x121] sm:$0xff] }
 0x4ba   :  { %v6893_v27 = vpop.f32.mrf.mxu0  ;;  %7582 = vmatmul.mubr.f32.gmra.mxu0 %v5103_v26  ;;  %7211 = vmatprep.mubr.f32.mxu1 %v4977_v34  ;;  %v6519_v38 = vadd.f32 %v12602_v58, %v6518_v62  ;;  %v5106_v34 = vld [vmem:[#allocation3 + $0x120] sm:$0xff] }
 0x4bb   :  { %v12586_v51 = vadd.f32 %v6893_v27, %v6509_v41  ;;  %7586 = vmatprep.mubr.f32.mxu0 %v5232_v46  ;;  %v6520_v30 = vpop.f32.mrf.mxu1  ;;  %7856 = vmatpush2.msra.mxu1 %v6266_v22  ;;  %v6263_v41 = vld [vmem:[%s13183_s3 + $0x4c8] sm:$0xff] }
 0x4bc   :  { %v6895_v18 = vpop.f32.mrf.mxu0  ;;  %7857 = vmatprep.subr.mxu1 %v12495_v45  ;;  %v4980_v27 = vld [vmem:[#allocation3 + $0x12a] sm:$0xff] }
 0x4bd   :  { %v6523_v1 = vpop.f32.mrf.mxu1  ;;  %7212 = vmatmul.mubr.f32.gmra.mxu1 %v5232_v46  ;;  %v5235_v30 = vld [vmem:[#allocation3 + $0x129] sm:$0xff] }
 0x4be   :  { %v6898_v13 = vpop.f32.mrf.mxu0  ;;  %7587 = vmatmul.mubr.f32.gmra.mxu0 %v5104_v12  ;;  %7216 = vmatprep.mubr.f32.mxu1 %v4978_v17  ;;  %v6524_v62 = vadd.f32 %v12602_v58, %v6523_v1  ;;  %v6262_v1 = vld [vmem:[%s13183_s3 + $0x4c0] sm:$0xff] }
 0x4bf   :  { %v12593_v49 = vadd.f32 %v6898_v13, %v6514_v16  ;;  %7591 = vmatprep.mubr.f32.mxu0 %v5233_v40  ;;  %v6525_v57 = vpop.f32.mrf.mxu1  ;;  %7858 = vmatpush2.msra.mxu1 %v6265_v11  ;;  %v5107_v13 = vld [vmem:[#allocation3 + $0x128] sm:$0xff] }
 0x4c0   :  { %v6900_v52 = vpop.f32.mrf.mxu0  ;;  %7859 = vmatprep.subr.mxu1 %v12495_v45 }
 0x4c1   :  { %v6528_v48 = vpop.f32.mrf.mxu1  ;;  %7217 = vmatmul.mubr.f32.gmra.mxu1 %v5233_v40  ;;  %v4981_v40 = vld [vmem:[#allocation3 + $0x13a] sm:$0xff] }
 0x4c2   :  { %v6903_v55 = vpop.f32.mrf.mxu0  ;;  %7592 = vmatmul.mubr.f32.gmra.mxu0 %v5105_v56  ;;  %7221 = vmatprep.mubr.f32.mxu1 %v4979_v6  ;;  %v6529_v12 = vadd.f32 %v12602_v58, %v6528_v48  ;;  %v5236_v52 = vld [vmem:[#allocation3 + $0x139] sm:$0xff] }
 0x4c3   :  { %v12605_v33 = vadd.f32 %v6903_v55, %v6519_v38  ;;  %7596 = vmatprep.mubr.f32.mxu0 %v5234_v35  ;;  %v6530_v53 = vpop.f32.mrf.mxu1  ;;  %7860 = vmatpush2.msra.mxu1 %v6264_v59  ;;  %v6261_v48 = vld [vmem:[%s13183_s3 + $0x4b8] sm:$0xff] }
 0x4c4   :  { %v6905_v22 = vpop.f32.mrf.mxu0  ;;  %7861 = vmatprep.subr.mxu1 %v12495_v45  ;;  %v4982_v53 = vld [vmem:[#allocation3 + $0x142] sm:$0xff] }
 0x4c5   :  { %v6533_v26 = vpop.f32.mrf.mxu1  ;;  %7222 = vmatmul.mubr.f32.gmra.mxu1 %v5234_v35  ;;  %v5108_v35 = vld [vmem:[#allocation3 + $0x138] sm:$0xff] }
 0x4c6   :  { %v6908_v46 = vpop.f32.mrf.mxu0  ;;  %7597 = vmatmul.mubr.f32.gmra.mxu0 %v5106_v34  ;;  %7226 = vmatprep.mubr.f32.mxu1 %v4980_v27  ;;  %v6534_v6 = vadd.f32 %v12602_v58, %v6533_v26  ;;  %v6260_v26 = vld [vmem:[%s13183_s3 + $0x4b0] sm:$0xff] }
 0x4c7   :  { %v12612_v18 = vadd.f32 %v6908_v46, %v6524_v62  ;;  %7601 = vmatprep.mubr.f32.mxu0 %v5235_v30  ;;  %v6535_v11 = vpop.f32.mrf.mxu1  ;;  %7862 = vmatpush2.msra.mxu1 %v6263_v41  ;;  %v5237_v41 = vld [vmem:[#allocation3 + $0x141] sm:$0xff] }
 0x4c8   :  { %v6910_v16 = vpop.f32.mrf.mxu0  ;;  %7863 = vmatprep.subr.mxu1 %v12495_v45  ;;  %v5109_v11 = vld [vmem:[#allocation3 + $0x140] sm:$0xff] }
 0x4c9   :  { %v6538_v17 = vpop.f32.mrf.mxu1  ;;  %7227 = vmatmul.mubr.f32.gmra.mxu1 %v5235_v30  ;;  %v4983_v16 = vld [vmem:[#allocation3 + $0x152] sm:$0xff] }
 0x4ca   :  { %v6913_v57 = vpop.f32.mrf.mxu0  ;;  %7602 = vmatmul.mubr.f32.gmra.mxu0 %v5107_v13  ;;  %7231 = vmatprep.mubr.f32.mxu1 %v4981_v40  ;;  %v6539_v46 = vadd.f32 %v12602_v58, %v6538_v17  ;;  %v6259_v17 = vld [vmem:[%s13183_s3 + $0x4a8] sm:$0xff] }
 0x4cb   :  { %v12619_v59 = vadd.f32 %v6913_v57, %v6529_v12  ;;  %7606 = vmatprep.mubr.f32.mxu0 %v5236_v52  ;;  %v6540_v38 = vpop.f32.mrf.mxu1  ;;  %7864 = vmatpush2.msra.mxu1 %v6262_v1  ;;  %v5238_v12 = vld [vmem:[#allocation3 + $0x151] sm:$0xff] }
 0x4cc   :  { %v6915_v56 = vpop.f32.mrf.mxu0  ;;  %7865 = vmatprep.subr.mxu1 %v12495_v45 }
 0x4cd   :  { %v6543_v55 = vpop.f32.mrf.mxu1  ;;  %7232 = vmatmul.mubr.f32.gmra.mxu1 %v5236_v52  ;;  %v5110_v56 = vld [vmem:[#allocation3 + $0x150] sm:$0xff] }
 0x4ce   :  { %v6918_v22 = vpop.f32.mrf.mxu0  ;;  %7607 = vmatmul.mubr.f32.gmra.mxu0 %v5108_v35  ;;  %7236 = vmatprep.mubr.f32.mxu1 %v4982_v53  ;;  %v6544_v52 = vadd.f32 %v12602_v58, %v6543_v55  ;;  %v5239_v35 = vld [vmem:[#allocation3 + $0x159] sm:$0xff] }
 0x4cf   :  { %v12626_v62 = vadd.f32 %v6918_v22, %v6534_v6  ;;  %7611 = vmatprep.mubr.f32.mxu0 %v5237_v41  ;;  %v6545_v34 = vpop.f32.mrf.mxu1  ;;  %7866 = vmatpush2.msra.mxu1 %v6261_v48  ;;  %v4984_v48 = vld [vmem:[#allocation3 + $0x15a] sm:$0xff] }
 0x4d0   :  { %v6920_v27 = vpop.f32.mrf.mxu0  ;;  %7867 = vmatprep.subr.mxu1 %v12495_v45  ;;  %v6258_v55 = vld [vmem:[%s13183_s3 + $0x4a0] sm:$0xff] }
 0x4d1   :  { %v6548_v30 = vpop.f32.mrf.mxu1  ;;  %7237 = vmatmul.mubr.f32.gmra.mxu1 %v5237_v41 }
 0x4d2   :  { %v6923_v1 = vpop.f32.mrf.mxu0  ;;  %7612 = vmatmul.mubr.f32.gmra.mxu0 %v5109_v11  ;;  %7241 = vmatprep.mubr.f32.mxu1 %v4983_v16  ;;  %v6549_v34 = vadd.f32 %v12602_v58, %v6548_v30  ;;  %v5240_v16 = vld [vmem:[#allocation3 + $0x169] sm:$0xff]  ;;  %v6257_v30 = vld [vmem:[%s13183_s3 + $0x498] sm:$0xff] }
 0x4d3   :  { %v12633_v13 = vadd.f32 %v6923_v1, %v6539_v46  ;;  %7616 = vmatprep.mubr.f32.mxu0 %v5238_v12  ;;  %v6550_v40 = vpop.f32.mrf.mxu1  ;;  %7868 = vmatpush2.msra.mxu1 %v6260_v26  ;;  %v5111_v26 = vld [vmem:[#allocation3 + $0x158] sm:$0xff]  ;;  %v4985_v46 = vld [vmem:[#allocation3 + $0x16a] sm:$0xff] }
 0x4d4   :  { %v6925_v57 = vpop.f32.mrf.mxu0  ;;  %7869 = vmatprep.subr.mxu1 %v12495_v45 }
 0x4d5   :  { %v6553_v38 = vpop.f32.mrf.mxu1  ;;  %7242 = vmatmul.mubr.f32.gmra.mxu1 %v5238_v12 }
 0x4d6   :  { %v6928_v6 = vpop.f32.mrf.mxu0  ;;  %7617 = vmatmul.mubr.f32.gmra.mxu0 %v5110_v56  ;;  %7246 = vmatprep.mubr.f32.mxu1 %v4984_v48  ;;  %v6554_v57 = vadd.f32 %v12602_v58, %v6553_v38  ;;  %v4986_v56 = vld [vmem:[#allocation3 + $0x172] sm:$0xff] }
 0x4d7   :  { %v12640_v53 = vadd.f32 %v6928_v6, %v6544_v52  ;;  %7621 = vmatprep.mubr.f32.mxu0 %v5239_v35  ;;  %v6555_v22 = vpop.f32.mrf.mxu1  ;;  %7870 = vmatpush2.msra.mxu1 %v6259_v17  ;;  %v5112_v52 = vld [vmem:[#allocation3 + $0x168] sm:$0xff]  ;;  %v5241_v6 = vld [vmem:[#allocation3 + $0x171] sm:$0xff] }
 0x4d8   :  { %v6930_v41 = vpop.f32.mrf.mxu0  ;;  %7871 = vmatprep.subr.mxu1 %v12495_v45  ;;  %v6256_v38 = vld [vmem:[%s13183_s3 + $0x490] sm:$0xff] }
 0x4d9   :  { %v6558_v27 = vpop.f32.mrf.mxu1  ;;  %7247 = vmatmul.mubr.f32.gmra.mxu1 %v5239_v35 }
 0x4da   :  { %v6933_v11 = vpop.f32.mrf.mxu0  ;;  %7622 = vmatmul.mubr.f32.gmra.mxu0 %v5111_v26  ;;  %7251 = vmatprep.mubr.f32.mxu1 %v4985_v46  ;;  %v5113_v26 = vld [vmem:[#allocation3 + $0x170] sm:$0xff]  ;;  %v4987_v46 = vld [vmem:[#allocation3 + $0x182] sm:$0xff] }
 0x4db   :  { %v12647_v1 = vadd.f32 %v6933_v11, %v6549_v34  ;;  %7626 = vmatprep.mubr.f32.mxu0 %v5240_v16  ;;  %v6560_v12 = vpop.f32.mrf.mxu1  ;;  %7872 = vmatpush2.msra.mxu1 %v6258_v55  ;;  %v6559_v55 = vadd.f32 %v12602_v58, %v6558_v27  ;;  %v6255_v27 = vld [vmem:[%s13183_s3 + $0x488] sm:$0xff] }
 0x4dc   :  { %v6935_v40 = vpop.f32.mrf.mxu0  ;;  %7873 = vmatprep.subr.mxu1 %v12495_v45 }
 0x4dd   :  { %v6563_v17 = vpop.f32.mrf.mxu1  ;;  %7252 = vmatmul.mubr.f32.gmra.mxu1 %v5240_v16  ;;  %v5242_v16 = vld [vmem:[#allocation3 + $0x181] sm:$0xff] }
 0x4de   :  { %v6938_v48 = vpop.f32.mrf.mxu0  ;;  %7627 = vmatmul.mubr.f32.gmra.mxu0 %v5112_v52  ;;  %7256 = vmatprep.mubr.f32.mxu1 %v4986_v56  ;;  %v5114_v56 = vld [vmem:[#allocation3 + $0x180] sm:$0xff] }
 0x4df   :  { %v12654_v35 = vadd.f32 %v6938_v48, %v6554_v57  ;;  %7631 = vmatprep.mubr.f32.mxu0 %v5241_v6  ;;  %v6565_v22 = vpop.f32.mrf.mxu1  ;;  %7874 = vmatpush2.msra.mxu1 %v6257_v30  ;;  %v6564_v57 = vadd.f32 %v12602_v58, %v6563_v17  ;;  %v4988_v48 = vld [vmem:[#allocation3 + $0x18a] sm:$0xff]  ;;  %v6254_v17 = vld [vmem:[%s13183_s3 + $0x480] sm:$0xff] }
 0x4e0   :  { %v6940_v41 = vpop.f32.mrf.mxu0  ;;  %7875 = vmatprep.subr.mxu1 %v12495_v45  ;;  %v5243_v22 = vld [vmem:[#allocation3 + $0x189] sm:$0xff] }
 0x4e1   :  { %v6568_v34 = vpop.f32.mrf.mxu1  ;;  %7257 = vmatmul.mubr.f32.gmra.mxu1 %v5241_v6 }
 0x4e2   :  { %v6943_v11 = vpop.f32.mrf.mxu0  ;;  %7632 = vmatmul.mubr.f32.gmra.mxu0 %v5113_v26  ;;  %7261 = vmatprep.mubr.f32.mxu1 %v4987_v46  ;;  %v5244_v26 = vld [vmem:[#allocation3 + $0x199] sm:$0xff]  ;;  %v6569_v46 = vadd.f32 %v12602_v58, %v6568_v34 }
 0x4e3   :  { %v12661_v12 = vadd.f32 %v6943_v11, %v6559_v55  ;;  %7636 = vmatprep.mubr.f32.mxu0 %v5242_v16  ;;  %v6570_v40 = vpop.f32.mrf.mxu1  ;;  %7876 = vmatpush2.msra.mxu1 %v6256_v38  ;;  %v4990_v34 = vld [vmem:[#allocation3 + $0x1d2] sm:$0xff] }
 0x4e4   :  { %v6945_v30 = vpop.f32.mrf.mxu0  ;;  %7877 = vmatprep.subr.mxu1 %v12495_v45  ;;  %v4989_v40 = vld [vmem:[#allocation3 + $0x1ca] sm:$0xff] }
 0x4e5   :  { %13502 = vst [vmem:[#allocation41_spill] sm:$0xff] %v12661_v12  ;;  %v6573_v52 = vpop.f32.mrf.mxu1  ;;  %7262 = vmatmul.mubr.f32.gmra.mxu1 %v5242_v16  ;;  %v5115_v16 = vld [vmem:[#allocation3 + $0x188] sm:$0xff] }
 0x4e6   :  { %v6948_v6 = vpop.f32.mrf.mxu0  ;;  %7637 = vmatmul.mubr.f32.gmra.mxu0 %v5114_v56  ;;  %7266 = vmatprep.mubr.f32.mxu1 %v4988_v48  ;;  %v5116_v56 = vld [vmem:[#allocation3 + $0x198] sm:$0xff] }
 0x4e7   :  { %v12668_v41 = vadd.f32 %v6948_v6, %v6564_v57  ;;  %7641 = vmatprep.mubr.f32.mxu0 %v5243_v22  ;;  %v6575_v38 = vpop.f32.mrf.mxu1  ;;  %7878 = vmatpush2.msra.mxu1 %v6255_v27  ;;  %v4861_v6 = vld [vmem:[#allocation3 + $0x1c9] sm:$0xff] }
 0x4e8   :  { %v6950_v55 = vpop.f32.mrf.mxu0  ;;  %7879 = vmatprep.subr.mxu1 %v12495_v45  ;;  %v5245_v38 = vld [vmem:[#allocation3 + $0x1a1] sm:$0xff] }
 0x4e9   :  { %13503 = vst [vmem:[#allocation42_spill] sm:$0xff] %v12668_v41  ;;  %v6578_v11 = vpop.f32.mrf.mxu1  ;;  %7267 = vmatmul.mubr.f32.gmra.mxu1 %v5243_v22  ;;  %v6574_v55 = vadd.f32 %v12602_v58, %v6573_v52  ;;  %v5246_v52 = vld [vmem:[#allocation3 + $0x1e1] sm:$0xff] }
 0x4ea   :  { %v6953_v30 = vpop.f32.mrf.mxu0  ;;  %7642 = vmatmul.mubr.f32.gmra.mxu0 %v5115_v16  ;;  %7271 = vmatprep.mubr.f32.mxu1 %v4989_v40  ;;  %v4862_v40 = vld [vmem:[#allocation3 + $0x1d1] sm:$0xff] }
 0x4eb   :  { %v12675_v57 = vadd.f32 %v6953_v30, %v6569_v46  ;;  %v6580_v27 = vpop.f32.mrf.mxu1  ;;  %7646 = vmatprep.mubr.f32.mxu0 %v5244_v26  ;;  %7880 = vmatpush2.msra.mxu1 %v6254_v17  ;;  %v6579_v26 = vadd.f32 %v12602_v58, %v6578_v11  ;;  %v4991_v30 = vld [vmem:[#allocation3 + $0x1e2] sm:$0xff] }
 0x4ec   :  { %v6955_v48 = vpop.f32.mrf.mxu0 }
 0x4ed   :  { %v6583_v41 = vpop.f32.mrf.mxu1  ;;  %7272 = vmatmul.mubr.f32.gmra.mxu1 %v4861_v6 }
 0x4ee   :  { %v6958_v22 = vpop.f32.mrf.mxu0  ;;  %7647 = vmatmul.mubr.f32.gmra.mxu0 %v5116_v56  ;;  %7276 = vmatprep.mubr.f32.mxu1 %v4990_v34  ;;  %v5118_v34 = vld [vmem:[#allocation3 + $0x1e0] sm:$0xff] }
 0x4ef   :  { %v12678_v12 = vadd.f32 %v6958_v22, %v6574_v55  ;;  %v6585_v16 = vpop.f32.mrf.mxu1  ;;  %7651 = vmatprep.mubr.f32.mxu0 %v5245_v38  ;;  %v6584_v55 = vadd.f32 %v12602_v58, %v6583_v41  ;;  %v4992_v22 = vld [vmem:[#allocation3 + $0x1ea] sm:$0xff] }
 0x4f0   :  { %v6960_v46 = vpop.f32.mrf.mxu0  ;;  %v5247_v16 = vld [vmem:[#allocation3 + $0x1e9] sm:$0xff] }
 0x4f1   :  { %v6588_v17 = vpop.f32.mrf.mxu1  ;;  %7277 = vmatmul.mubr.f32.gmra.mxu1 %v4862_v40 }
 0x4f2   :  { %v6963_v27 = vpop.f32.mrf.mxu0  ;;  %7652 = vmatmul.mubr.f32.gmra.mxu0 %v12495_v45  ;;  %7281 = vmatprep.mubr.f32.mxu1 %v4991_v30 }
 0x4f3   :  { %v12682_v48 = vadd.f32 %v6963_v27, %v6579_v26  ;;  %7656 = vmatprep.mubr.f32.mxu0 %v5246_v52  ;;  %v6590_v56 = vpop.f32.mrf.mxu1  ;;  %v6589_v26 = vadd.f32 %v12602_v58, %v6588_v17  ;;  %v5119_v27 = vld [vmem:[#allocation3 + $0x1e8] sm:$0xff] }
 0x4f4   :  { %v6965_v6 = vpop.f32.mrf.mxu0  ;;  %v4993_v56 = vld [vmem:[#allocation3 + $0x1fa] sm:$0xff] }
 0x4f5   :  { %v6593_v38 = vpop.f32.mrf.mxu1  ;;  %7282 = vmatmul.mubr.f32.gmra.mxu1 %v5246_v52  ;;  %v5248_v52 = vld [vmem:[#allocation3 + $0x1f9] sm:$0xff] }
 0x4f6   :  { %v6968_v11 = vpop.f32.mrf.mxu0  ;;  %7657 = vmatmul.mubr.f32.gmra.mxu0 %v5118_v34  ;;  %7286 = vmatprep.mubr.f32.mxu1 %v4992_v22 }
 0x4f7   :  { %v12685_v46 = vadd.f32 %v6968_v11, %v6584_v55  ;;  %7661 = vmatprep.mubr.f32.mxu0 %v5247_v16  ;;  %v6595_v45 = vpop.f32.mrf.mxu1  ;;  %v6594_v55 = vadd.f32 %v12602_v58, %v6593_v38 }
 0x4f8   :  { %v6970_v40 = vpop.f32.mrf.mxu0  ;;  %v5120_v45 = vld [vmem:[#allocation3 + $0x1f8] sm:$0xff] }
 0x4f9   :  { %13504 = vst [vmem:[#allocation43_spill] sm:$0xff] %v12685_v46  ;;  %v6598_v30 = vpop.f32.mrf.mxu1  ;;  %7287 = vmatmul.mubr.f32.gmra.mxu1 %v5247_v16  ;;  %v4994_v40 = vld [vmem:[#allocation3 + $0x202] sm:$0xff] }
 0x4fa   :  { %v6973_v41 = vpop.f32.mrf.mxu0  ;;  %7662 = vmatmul.mubr.f32.gmra.mxu0 %v5119_v27  ;;  %7291 = vmatprep.mubr.f32.mxu1 %v4993_v56  ;;  %v5249_v16 = vld [vmem:[#allocation3 + $0x201] sm:$0xff] }
 0x4fb   :  { %v12688_v6 = vadd.f32 %v6973_v41, %v6589_v26  ;;  %7666 = vmatprep.mubr.f32.mxu0 %v5248_v52  ;;  %v6600_v34 = vpop.f32.mrf.mxu1  ;;  %v6599_v26 = vadd.f32 %v12602_v58, %v6598_v30 }
 0x4fc   :  { %v6975_v22 = vpop.f32.mrf.mxu0  ;;  %v5121_v34 = vld [vmem:[#allocation3 + $0x200] sm:$0xff] }
 0x4fd   :  { %13505 = vst [vmem:[#allocation44_spill] sm:$0xff] %v12688_v6  ;;  %v6603_v11 = vpop.f32.mrf.mxu1  ;;  %7292 = vmatmul.mubr.f32.gmra.mxu1 %v5248_v52  ;;  %v4995_v22 = vld [vmem:[#allocation3 + $0x212] sm:$0xff] }
 0x4fe   :  { %v6978_v17 = vpop.f32.mrf.mxu0  ;;  %7667 = vmatmul.mubr.f32.gmra.mxu0 %v5120_v45  ;;  %7296 = vmatprep.mubr.f32.mxu1 %v4994_v40  ;;  %v5250_v52 = vld [vmem:[#allocation3 + $0x211] sm:$0xff] }
 0x4ff   :  { %v12691_v46 = vadd.f32 %v6978_v17, %v6594_v55  ;;  %7671 = vmatprep.mubr.f32.mxu0 %v5249_v16  ;;  %v6605_v27 = vpop.f32.mrf.mxu1  ;;  %v6604_v55 = vadd.f32 %v12602_v58, %v6603_v11 }
 0x500   :  { %v6980_v56 = vpop.f32.mrf.mxu0  ;;  %v5122_v27 = vld [vmem:[#allocation3 + $0x210] sm:$0xff] }
 0x501   :  { %13506 = vst [vmem:[#allocation45_spill] sm:$0xff] %v12691_v46  ;;  %v6608_v41 = vpop.f32.mrf.mxu1  ;;  %7297 = vmatmul.mubr.f32.gmra.mxu1 %v5249_v16  ;;  %v4996_v56 = vld [vmem:[#allocation3 + $0x21a] sm:$0xff] }
 0x502   :  { %v6983_v38 = vpop.f32.mrf.mxu0  ;;  %7672 = vmatmul.mubr.f32.gmra.mxu0 %v5121_v34  ;;  %7301 = vmatprep.mubr.f32.mxu1 %v4995_v22  ;;  %v5251_v16 = vld [vmem:[#allocation3 + $0x219] sm:$0xff] }
 0x503   :  { %v12694_v6 = vadd.f32 %v6983_v38, %v6599_v26  ;;  %7676 = vmatprep.mubr.f32.mxu0 %v5250_v52  ;;  %v6610_v45 = vpop.f32.mrf.mxu1  ;;  %v6609_v26 = vadd.f32 %v12602_v58, %v6608_v41 }
 0x504   :  { %v6985_v40 = vpop.f32.mrf.mxu0  ;;  %v5123_v45 = vld [vmem:[#allocation3 + $0x218] sm:$0xff] }
 0x505   :  { %13507 = vst [vmem:[#allocation46_spill] sm:$0xff] %v12694_v6  ;;  %v6613_v17 = vpop.f32.mrf.mxu1  ;;  %7302 = vmatmul.mubr.f32.gmra.mxu1 %v5250_v52  ;;  %v4997_v40 = vld [vmem:[#allocation3 + $0x22a] sm:$0xff] }
 0x506   :  { %v6988_v30 = vpop.f32.mrf.mxu0  ;;  %7677 = vmatmul.mubr.f32.gmra.mxu0 %v5122_v27  ;;  %7306 = vmatprep.mubr.f32.mxu1 %v4996_v56  ;;  %v5252_v52 = vld [vmem:[#allocation3 + $0x229] sm:$0xff] }
 0x507   :  { %v12697_v46 = vadd.f32 %v6988_v30, %v6604_v55  ;;  %7681 = vmatprep.mubr.f32.mxu0 %v5251_v16  ;;  %v6615_v34 = vpop.f32.mrf.mxu1  ;;  %v6614_v55 = vadd.f32 %v12602_v58, %v6613_v17 }
 0x508   :  { %v6990_v22 = vpop.f32.mrf.mxu0  ;;  %v5124_v34 = vld [vmem:[#allocation3 + $0x228] sm:$0xff] }
 0x509   :  { %13508 = vst [vmem:[#allocation48_spill] sm:$0xff] %v12697_v46  ;;  %v6618_v38 = vpop.f32.mrf.mxu1  ;;  %7307 = vmatmul.mubr.f32.gmra.mxu1 %v5251_v16  ;;  %v4998_v22 = vld [vmem:[#allocation3 + $0x232] sm:$0xff] }
 0x50a   :  { %v6993_v11 = vpop.f32.mrf.mxu0  ;;  %7682 = vmatmul.mubr.f32.gmra.mxu0 %v5123_v45  ;;  %7311 = vmatprep.mubr.f32.mxu1 %v4997_v40  ;;  %v5253_v16 = vld [vmem:[#allocation3 + $0x231] sm:$0xff] }
 0x50b   :  { %v12700_v6 = vadd.f32 %v6993_v11, %v6609_v26  ;;  %7686 = vmatprep.mubr.f32.mxu0 %v5252_v52  ;;  %v6620_v27 = vpop.f32.mrf.mxu1  ;;  %v6619_v26 = vadd.f32 %v12602_v58, %v6618_v38 }
 0x50c   :  { %v6995_v56 = vpop.f32.mrf.mxu0  ;;  %v5125_v27 = vld [vmem:[#allocation3 + $0x230] sm:$0xff] }
 0x50d   :  { %13509 = vst [vmem:[#allocation50_spill] sm:$0xff] %v12700_v6  ;;  %v6623_v30 = vpop.f32.mrf.mxu1  ;;  %7312 = vmatmul.mubr.f32.gmra.mxu1 %v5252_v52  ;;  %v4999_v56 = vld [vmem:[#allocation3 + $0x242] sm:$0xff] }
 0x50e   :  { %v6998_v41 = vpop.f32.mrf.mxu0  ;;  %7687 = vmatmul.mubr.f32.gmra.mxu0 %v5124_v34  ;;  %7316 = vmatprep.mubr.f32.mxu1 %v4998_v22  ;;  %v5254_v52 = vld [vmem:[#allocation3 + $0x241] sm:$0xff] }
 0x50f   :  { %v12703_v46 = vadd.f32 %v6998_v41, %v6614_v55  ;;  %7691 = vmatprep.mubr.f32.mxu0 %v5253_v16  ;;  %v6625_v45 = vpop.f32.mrf.mxu1  ;;  %v6624_v55 = vadd.f32 %v12602_v58, %v6623_v30 }
 0x510   :  { %v7000_v40 = vpop.f32.mrf.mxu0  ;;  %v5126_v45 = vld [vmem:[#allocation3 + $0x240] sm:$0xff] }
 0x511   :  { %13510 = vst [vmem:[#allocation52_spill] sm:$0xff] %v12703_v46  ;;  %v6628_v11 = vpop.f32.mrf.mxu1  ;;  %7317 = vmatmul.mubr.f32.gmra.mxu1 %v5253_v16  ;;  %v5000_v40 = vld [vmem:[#allocation3 + $0x24a] sm:$0xff] }
 0x512   :  { %v7003_v17 = vpop.f32.mrf.mxu0  ;;  %7692 = vmatmul.mubr.f32.gmra.mxu0 %v5125_v27  ;;  %7321 = vmatprep.mubr.f32.mxu1 %v4999_v56  ;;  %v5255_v16 = vld [vmem:[#allocation3 + $0x249] sm:$0xff] }
 0x513   :  { %v12706_v6 = vadd.f32 %v7003_v17, %v6619_v26  ;;  %7696 = vmatprep.mubr.f32.mxu0 %v5254_v52  ;;  %v6630_v34 = vpop.f32.mrf.mxu1  ;;  %v6629_v26 = vadd.f32 %v12602_v58, %v6628_v11 }
 0x514   :  { %v7005_v22 = vpop.f32.mrf.mxu0  ;;  %v5127_v34 = vld [vmem:[#allocation3 + $0x248] sm:$0xff] }
 0x515   :  { %13511 = vst [vmem:[#allocation54_spill] sm:$0xff] %v12706_v6  ;;  %v6633_v41 = vpop.f32.mrf.mxu1  ;;  %7322 = vmatmul.mubr.f32.gmra.mxu1 %v5254_v52  ;;  %v5001_v22 = vld [vmem:[#allocation3 + $0x25a] sm:$0xff] }
 0x516   :  { %v7008_v38 = vpop.f32.mrf.mxu0  ;;  %7697 = vmatmul.mubr.f32.gmra.mxu0 %v5126_v45  ;;  %7326 = vmatprep.mubr.f32.mxu1 %v5000_v40  ;;  %v5256_v52 = vld [vmem:[#allocation3 + $0x259] sm:$0xff] }
 0x517   :  { %v12709_v46 = vadd.f32 %v7008_v38, %v6624_v55  ;;  %7701 = vmatprep.mubr.f32.mxu0 %v5255_v16  ;;  %v6635_v27 = vpop.f32.mrf.mxu1  ;;  %v6634_v55 = vadd.f32 %v12602_v58, %v6633_v41 }
 0x518   :  { %v7010_v56 = vpop.f32.mrf.mxu0  ;;  %v5128_v27 = vld [vmem:[#allocation3 + $0x258] sm:$0xff] }
 0x519   :  { %13512 = vst [vmem:[#allocation56_spill] sm:$0xff] %v12709_v46  ;;  %v6638_v17 = vpop.f32.mrf.mxu1  ;;  %7327 = vmatmul.mubr.f32.gmra.mxu1 %v5255_v16  ;;  %v5002_v56 = vld [vmem:[#allocation3 + $0x262] sm:$0xff] }
 0x51a   :  { %v7013_v30 = vpop.f32.mrf.mxu0  ;;  %7702 = vmatmul.mubr.f32.gmra.mxu0 %v5127_v34  ;;  %7331 = vmatprep.mubr.f32.mxu1 %v5001_v22  ;;  %v5257_v16 = vld [vmem:[#allocation3 + $0x261] sm:$0xff] }
 0x51b   :  { %v12712_v6 = vadd.f32 %v7013_v30, %v6629_v26  ;;  %7706 = vmatprep.mubr.f32.mxu0 %v5256_v52  ;;  %v6640_v45 = vpop.f32.mrf.mxu1  ;;  %v6639_v26 = vadd.f32 %v12602_v58, %v6638_v17 }
 0x51c   :  { %v7015_v40 = vpop.f32.mrf.mxu0  ;;  %v5129_v45 = vld [vmem:[#allocation3 + $0x260] sm:$0xff] }
 0x51d   :  { %13513 = vst [vmem:[#allocation58_spill] sm:$0xff] %v12712_v6  ;;  %v6643_v38 = vpop.f32.mrf.mxu1  ;;  %7332 = vmatmul.mubr.f32.gmra.mxu1 %v5256_v52  ;;  %v5003_v40 = vld [vmem:[#allocation3 + $0x272] sm:$0xff] }
 0x51e   :  { %v7018_v11 = vpop.f32.mrf.mxu0  ;;  %7707 = vmatmul.mubr.f32.gmra.mxu0 %v5128_v27  ;;  %7336 = vmatprep.mubr.f32.mxu1 %v5002_v56  ;;  %v5258_v52 = vld [vmem:[#allocation3 + $0x271] sm:$0xff] }
 0x51f   :  { %v12715_v46 = vadd.f32 %v7018_v11, %v6634_v55  ;;  %7711 = vmatprep.mubr.f32.mxu0 %v5257_v16  ;;  %v6645_v34 = vpop.f32.mrf.mxu1  ;;  %v6644_v55 = vadd.f32 %v12602_v58, %v6643_v38 }
 0x520   :  { %v7020_v22 = vpop.f32.mrf.mxu0  ;;  %v5130_v34 = vld [vmem:[#allocation3 + $0x270] sm:$0xff] }
 0x521   :  { %13514 = vst [vmem:[#allocation49_spill] sm:$0xff] %v12715_v46  ;;  %v6648_v30 = vpop.f32.mrf.mxu1  ;;  %7337 = vmatmul.mubr.f32.gmra.mxu1 %v5257_v16  ;;  %v5004_v22 = vld [vmem:[#allocation3 + $0x27a] sm:$0xff] }
 0x522   :  { %v7023_v41 = vpop.f32.mrf.mxu0  ;;  %7712 = vmatmul.mubr.f32.gmra.mxu0 %v5129_v45  ;;  %7341 = vmatprep.mubr.f32.mxu1 %v5003_v40  ;;  %v5259_v16 = vld [vmem:[#allocation3 + $0x279] sm:$0xff] }
 0x523   :  { %v12718_v6 = vadd.f32 %v7023_v41, %v6639_v26  ;;  %7716 = vmatprep.mubr.f32.mxu0 %v5258_v52  ;;  %v6650_v27 = vpop.f32.mrf.mxu1  ;;  %v6649_v26 = vadd.f32 %v12602_v58, %v6648_v30 }
 0x524   :  { %v7025_v56 = vpop.f32.mrf.mxu0  ;;  %v5131_v27 = vld [vmem:[#allocation3 + $0x278] sm:$0xff] }
 0x525   :  { %13515 = vst [vmem:[#allocation47_spill] sm:$0xff] %v12718_v6  ;;  %v6653_v11 = vpop.f32.mrf.mxu1  ;;  %7342 = vmatmul.mubr.f32.gmra.mxu1 %v5258_v52  ;;  %v5005_v56 = vld [vmem:[#allocation3 + $0x28a] sm:$0xff] }
 0x526   :  { %v7028_v17 = vpop.f32.mrf.mxu0  ;;  %7717 = vmatmul.mubr.f32.gmra.mxu0 %v5130_v34  ;;  %7346 = vmatprep.mubr.f32.mxu1 %v5004_v22  ;;  %v5260_v52 = vld [vmem:[#allocation3 + $0x289] sm:$0xff] }
 0x527   :  { %v12721_v46 = vadd.f32 %v7028_v17, %v6644_v55  ;;  %7721 = vmatprep.mubr.f32.mxu0 %v5259_v16  ;;  %v6655_v45 = vpop.f32.mrf.mxu1  ;;  %v6654_v55 = vadd.f32 %v12602_v58, %v6653_v11  ;;  %v5133_v11 = vld [vmem:[#allocation3 + $0x290] sm:$0xff] }
 0x528   :  { %v7030_v40 = vpop.f32.mrf.mxu0  ;;  %v5132_v45 = vld [vmem:[#allocation3 + $0x288] sm:$0xff] }
 0x529   :  { %13516 = vst [vmem:[#allocation53_spill] sm:$0xff] %v12721_v46  ;;  %v6658_v41 = vpop.f32.mrf.mxu1  ;;  %7347 = vmatmul.mubr.f32.gmra.mxu1 %v5259_v16  ;;  %v5006_v40 = vld [vmem:[#allocation3 + $0x292] sm:$0xff] }
 0x52a   :  { %v7033_v38 = vpop.f32.mrf.mxu0  ;;  %7722 = vmatmul.mubr.f32.gmra.mxu0 %v5131_v27  ;;  %7351 = vmatprep.mubr.f32.mxu1 %v5005_v56  ;;  %v5261_v46 = vld [vmem:[#allocation3 + $0x291] sm:$0xff] }
 0x52b   :  { %v12724_v6 = vadd.f32 %v7033_v38, %v6649_v26  ;;  %7726 = vmatprep.mubr.f32.mxu0 %v5260_v52  ;;  %v6660_v34 = vpop.f32.mrf.mxu1  ;;  %v6659_v38 = vadd.f32 %v12602_v58, %v6658_v41  ;;  %v5263_v41 = vld [vmem:[#allocation3 + $0x2a9] sm:$0xff] }
 0x52c   :  { %v7035_v22 = vpop.f32.mrf.mxu0 }
 0x52d   :  { %13517 = vst [vmem:[#allocation51_spill] sm:$0xff] %v12724_v6  ;;  %v7113_v17 = vpop.f32.mrf.mxu1  ;;  %7352 = vmatmul.mubr.f32.gmra.mxu1 %v5260_v52  ;;  %v5007_v22 = vld [vmem:[#allocation3 + $0x2a2] sm:$0xff] }
 0x52e   :  { %v7038_v30 = vpop.f32.mrf.mxu0  ;;  %v7114_v16 = vadd.f32 %v7113_v17, %v12381_v47  ;;  %7727 = vmatmul.mubr.f32.gmra.mxu0 %v5132_v45  ;;  %7356 = vmatprep.mubr.f32.mxu1 %v5006_v40  ;;  %v5262_v47 = vld [vmem:[#allocation3 + $0x2a1] sm:$0xff] }
 0x52f   :  { %v12728_v27 = vadd.f32 %v7038_v30, %v6654_v55  ;;  %7731 = vmatprep.mubr.f32.mxu0 %v5261_v46  ;;  %v7115_v26 = vpop.f32.mrf.mxu1  ;;  %v5134_v30 = vld [vmem:[#allocation3 + $0x2a0] sm:$0xff] }
 0x530   :  { %v7040_v56 = vpop.f32.mrf.mxu0  ;;  %v5008_v26 = vld [vmem:[#allocation3 + $0x2aa] sm:$0xff] }
 0x531   :  { %v7118_v34 = vpop.f32.mrf.mxu1  ;;  %7357 = vmatmul.mubr.f32.gmra.mxu1 %v5261_v46 }
 0x532   :  { %v7043_v52 = vpop.f32.mrf.mxu0  ;;  %v7119_v6 = vadd.f32 %v7118_v34, %v12387_v25  ;;  %7732 = vmatmul.mubr.f32.gmra.mxu0 %v5133_v11  ;;  %7361 = vmatprep.mubr.f32.mxu1 %v5007_v22  ;;  %v5135_v11 = vld [vmem:[#allocation3 + $0x2a8] sm:$0xff]  ;;  %v5009_v22 = vld [vmem:[#allocation3 + $0x2ba] sm:$0xff] }
 0x533   :  { %v12732_v17 = vadd.f32 %v7043_v52, %v6659_v38  ;;  %7736 = vmatprep.mubr.f32.mxu0 %v5262_v47  ;;  %v7120_v55 = vpop.f32.mrf.mxu1 }
 0x534   :  { %v7045_v45 = vpop.f32.mrf.mxu0  ;;  %v5264_v55 = vld [vmem:[#allocation3 + $0x2b9] sm:$0xff] }
 0x535   :  { %v7123_v40 = vpop.f32.mrf.mxu1  ;;  %7362 = vmatmul.mubr.f32.gmra.mxu1 %v5262_v47 }
 0x536   :  { %v7124_v58 = vadd.f32 %v7123_v40, %v12392_v20  ;;  %v7498_v46 = vpop.f32.mrf.mxu0  ;;  %7737 = vmatmul.mubr.f32.gmra.mxu0 %v5134_v30  ;;  %7366 = vmatprep.mubr.f32.mxu1 %v5008_v26  ;;  %v5136_v30 = vld [vmem:[#allocation3 + $0x2b8] sm:$0xff]  ;;  %v5010_v26 = vld [vmem:[#allocation3 + $0x2c2] sm:$0xff] }
 0x537   :  { %v12735_v56 = vadd.f32 %v7498_v46, %v7114_v16  ;;  %7741 = vmatprep.mubr.f32.mxu0 %v5263_v41  ;;  %v7125_v25 = vpop.f32.mrf.mxu1 }
 0x538   :  { %v7500_v34 = vpop.f32.mrf.mxu0  ;;  %v5265_v25 = vld [vmem:[#allocation3 + $0x2c1] sm:$0xff] }
 0x539   :  { %v7128_v38 = vpop.f32.mrf.mxu1  ;;  %7367 = vmatmul.mubr.f32.gmra.mxu1 %v5263_v41 }
 0x53a   :  { %v7129_v52 = vadd.f32 %v7128_v38, %v12397_v39  ;;  %v7503_v47 = vpop.f32.mrf.mxu0  ;;  %7742 = vmatmul.mubr.f32.gmra.mxu0 %v5135_v11  ;;  %7371 = vmatprep.mubr.f32.mxu1 %v5009_v22  ;;  %v5137_v11 = vld [vmem:[#allocation3 + $0x2c0] sm:$0xff]  ;;  %v5011_v22 = vld [vmem:[#allocation3 + $0x2d2] sm:$0xff] }
 0x53b   :  { %v12738_v20 = vadd.f32 %v7503_v47, %v7119_v6  ;;  %7746 = vmatprep.mubr.f32.mxu0 %v5264_v55  ;;  %v7130_v45 = vpop.f32.mrf.mxu1 }
 0x53c   :  { %v7505_v40 = vpop.f32.mrf.mxu0  ;;  %v5266_v45 = vld [vmem:[#allocation3 + $0x2d1] sm:$0xff] }
 0x53d   :  { %v7133_v16 = vpop.f32.mrf.mxu1  ;;  %7372 = vmatmul.mubr.f32.gmra.mxu1 %v5264_v55 }
 0x53e   :  { %v7134_v46 = vadd.f32 %v7133_v16, %v12402_v54  ;;  %v7508_v41 = vpop.f32.mrf.mxu0  ;;  %7747 = vmatmul.mubr.f32.gmra.mxu0 %v5136_v30  ;;  %7376 = vmatprep.mubr.f32.mxu1 %v5010_v26  ;;  %v5138_v30 = vld [vmem:[#allocation3 + $0x2d0] sm:$0xff]  ;;  %v5012_v26 = vld [vmem:[#allocation3 + $0x2da] sm:$0xff] }
 0x53f   :  { %v12741_v39 = vadd.f32 %v7508_v41, %v7124_v58  ;;  %7751 = vmatprep.mubr.f32.mxu0 %v5265_v25  ;;  %v7135_v34 = vpop.f32.mrf.mxu1 }
 0x540   :  { %v7510_v38 = vpop.f32.mrf.mxu0  ;;  %v5267_v34 = vld [vmem:[#allocation3 + $0x2d9] sm:$0xff] }
 0x541   :  { %v7138_v6 = vpop.f32.mrf.mxu1  ;;  %7377 = vmatmul.mubr.f32.gmra.mxu1 %v5265_v25 }
 0x542   :  { %v7139_v47 = vadd.f32 %v7138_v6, %v12407_v23  ;;  %v7513_v55 = vpop.f32.mrf.mxu0  ;;  %7752 = vmatmul.mubr.f32.gmra.mxu0 %v5137_v11  ;;  %7381 = vmatprep.mubr.f32.mxu1 %v5011_v22  ;;  %v5139_v11 = vld [vmem:[#allocation3 + $0x2d8] sm:$0xff]  ;;  %v5013_v22 = vld [vmem:[#allocation3 + $0x2ea] sm:$0xff] }
 0x543   :  { %v12744_v54 = vadd.f32 %v7513_v55, %v7129_v52  ;;  %7756 = vmatprep.mubr.f32.mxu0 %v5266_v45  ;;  %v7140_v40 = vpop.f32.mrf.mxu1 }
 0x544   :  { %v7515_v16 = vpop.f32.mrf.mxu0  ;;  %v5268_v40 = vld [vmem:[#allocation3 + $0x2e9] sm:$0xff] }
 0x545   :  { %v7143_v58 = vpop.f32.mrf.mxu1  ;;  %7382 = vmatmul.mubr.f32.gmra.mxu1 %v5266_v45 }
 0x546   :  { %v7144_v41 = vadd.f32 %v7143_v58, %v12412_v61  ;;  %v7518_v25 = vpop.f32.mrf.mxu0  ;;  %7757 = vmatmul.mubr.f32.gmra.mxu0 %v5138_v30  ;;  %7386 = vmatprep.mubr.f32.mxu1 %v5012_v26  ;;  %v5140_v30 = vld [vmem:[#allocation3 + $0x2e8] sm:$0xff]  ;;  %v5014_v26 = vld [vmem:[#allocation3 + $0x2f2] sm:$0xff] }
 0x547   :  { %v12747_v23 = vadd.f32 %v7518_v25, %v7134_v46  ;;  %7761 = vmatprep.mubr.f32.mxu0 %v5267_v34  ;;  %v7145_v38 = vpop.f32.mrf.mxu1 }
 0x548   :  { %v7520_v6 = vpop.f32.mrf.mxu0  ;;  %v5269_v38 = vld [vmem:[#allocation3 + $0x2f1] sm:$0xff] }
 0x549   :  { %v7148_v52 = vpop.f32.mrf.mxu1  ;;  %7387 = vmatmul.mubr.f32.gmra.mxu1 %v5267_v34 }
 0x54a   :  { %v7149_v55 = vadd.f32 %v7148_v52, %v12417_v7  ;;  %v7523_v45 = vpop.f32.mrf.mxu0  ;;  %7762 = vmatmul.mubr.f32.gmra.mxu0 %v5139_v11  ;;  %7391 = vmatprep.mubr.f32.mxu1 %v5013_v22  ;;  %v5141_v11 = vld [vmem:[#allocation3 + $0x2f0] sm:$0xff]  ;;  %v5015_v22 = vld [vmem:[#allocation3 + $0x302] sm:$0xff] }
 0x54b   :  { %v12750_v61 = vadd.f32 %v7523_v45, %v7139_v47  ;;  %7766 = vmatprep.mubr.f32.mxu0 %v5268_v40  ;;  %v7150_v16 = vpop.f32.mrf.mxu1 }
 0x54c   :  { %v7525_v58 = vpop.f32.mrf.mxu0  ;;  %v5270_v16 = vld [vmem:[#allocation3 + $0x301] sm:$0xff] }
 0x54d   :  { %v7153_v46 = vpop.f32.mrf.mxu1  ;;  %7392 = vmatmul.mubr.f32.gmra.mxu1 %v5268_v40 }
 0x54e   :  { %v7154_v25 = vadd.f32 %v7153_v46, %v12422_v63  ;;  %v7528_v34 = vpop.f32.mrf.mxu0  ;;  %7767 = vmatmul.mubr.f32.gmra.mxu0 %v5140_v30  ;;  %7396 = vmatprep.mubr.f32.mxu1 %v5014_v26  ;;  %v5142_v30 = vld [vmem:[#allocation3 + $0x300] sm:$0xff]  ;;  %v5016_v26 = vld [vmem:[#allocation3 + $0x30a] sm:$0xff] }
 0x54f   :  { %v12753_v7 = vadd.f32 %v7528_v34, %v7144_v41  ;;  %7771 = vmatprep.mubr.f32.mxu0 %v5269_v38  ;;  %v7155_v6 = vpop.f32.mrf.mxu1 }
 0x550   :  { %v7530_v52 = vpop.f32.mrf.mxu0  ;;  %v5271_v6 = vld [vmem:[#allocation3 + $0x309] sm:$0xff] }
 0x551   :  { %v7158_v47 = vpop.f32.mrf.mxu1  ;;  %7397 = vmatmul.mubr.f32.gmra.mxu1 %v5269_v38 }
 0x552   :  { %v7159_v45 = vadd.f32 %v7158_v47, %v12427_v10  ;;  %v7533_v40 = vpop.f32.mrf.mxu0  ;;  %7772 = vmatmul.mubr.f32.gmra.mxu0 %v5141_v11  ;;  %7401 = vmatprep.mubr.f32.mxu1 %v5015_v22  ;;  %v5143_v11 = vld [vmem:[#allocation3 + $0x308] sm:$0xff]  ;;  %v5017_v22 = vld [vmem:[#allocation3 + $0x31a] sm:$0xff] }
 0x553   :  { %v12756_v63 = vadd.f32 %v7533_v40, %v7149_v55  ;;  %7776 = vmatprep.mubr.f32.mxu0 %v5270_v16  ;;  %v7160_v58 = vpop.f32.mrf.mxu1 }
 0x554   :  { %v7535_v46 = vpop.f32.mrf.mxu0  ;;  %v5272_v58 = vld [vmem:[#allocation3 + $0x319] sm:$0xff] }
 0x555   :  { %v7163_v41 = vpop.f32.mrf.mxu1  ;;  %7402 = vmatmul.mubr.f32.gmra.mxu1 %v5270_v16 }
 0x556   :  { %v7164_v34 = vadd.f32 %v7163_v41, %v12432_v15  ;;  %v7538_v38 = vpop.f32.mrf.mxu0  ;;  %7777 = vmatmul.mubr.f32.gmra.mxu0 %v5142_v30  ;;  %7406 = vmatprep.mubr.f32.mxu1 %v5016_v26  ;;  %v5144_v30 = vld [vmem:[#allocation3 + $0x318] sm:$0xff]  ;;  %v5018_v26 = vld [vmem:[#allocation3 + $0x322] sm:$0xff] }
 0x557   :  { %v12759_v10 = vadd.f32 %v7538_v38, %v7154_v25  ;;  %7781 = vmatprep.mubr.f32.mxu0 %v5271_v6  ;;  %v7165_v52 = vpop.f32.mrf.mxu1 }
 0x558   :  { %v7540_v47 = vpop.f32.mrf.mxu0  ;;  %v5273_v52 = vld [vmem:[#allocation3 + $0x321] sm:$0xff] }
 0x559   :  { %v7168_v55 = vpop.f32.mrf.mxu1  ;;  %7407 = vmatmul.mubr.f32.gmra.mxu1 %v5271_v6 }
 0x55a   :  { %v7169_v40 = vadd.f32 %v7168_v55, %v12437_v43  ;;  %v7543_v16 = vpop.f32.mrf.mxu0  ;;  %7782 = vmatmul.mubr.f32.gmra.mxu0 %v5143_v11  ;;  %7411 = vmatprep.mubr.f32.mxu1 %v5017_v22  ;;  %v5145_v11 = vld [vmem:[#allocation3 + $0x320] sm:$0xff]  ;;  %v5019_v22 = vld [vmem:[#allocation3 + $0x332] sm:$0xff] }
 0x55b   :  { %v12762_v15 = vadd.f32 %v7543_v16, %v7159_v45  ;;  %7786 = vmatprep.mubr.f32.mxu0 %v5272_v58  ;;  %v7170_v46 = vpop.f32.mrf.mxu1 }
 0x55c   :  { %v7545_v41 = vpop.f32.mrf.mxu0  ;;  %v5274_v46 = vld [vmem:[#allocation3 + $0x331] sm:$0xff] }
 0x55d   :  { %v7173_v25 = vpop.f32.mrf.mxu1  ;;  %7412 = vmatmul.mubr.f32.gmra.mxu1 %v5272_v58 }
 0x55e   :  { %v7174_v38 = vadd.f32 %v7173_v25, %v12442_v0  ;;  %v7548_v6 = vpop.f32.mrf.mxu0  ;;  %7787 = vmatmul.mubr.f32.gmra.mxu0 %v5144_v30  ;;  %7416 = vmatprep.mubr.f32.mxu1 %v5018_v26  ;;  %v5146_v30 = vld [vmem:[#allocation3 + $0x330] sm:$0xff]  ;;  %v5020_v26 = vld [vmem:[#allocation3 + $0x33a] sm:$0xff] }
 0x55f   :  { %v12765_v43 = vadd.f32 %v7548_v6, %v7164_v34  ;;  %7791 = vmatprep.mubr.f32.mxu0 %v5273_v52  ;;  %v7175_v47 = vpop.f32.mrf.mxu1 }
 0x560   :  { %v7550_v55 = vpop.f32.mrf.mxu0  ;;  %v5275_v47 = vld [vmem:[#allocation3 + $0x339] sm:$0xff] }
 0x561   :  { %v7178_v45 = vpop.f32.mrf.mxu1  ;;  %7417 = vmatmul.mubr.f32.gmra.mxu1 %v5273_v52 }
 0x562   :  { %v7179_v16 = vadd.f32 %v7178_v45, %v12445_v36  ;;  %v7553_v58 = vpop.f32.mrf.mxu0  ;;  %7792 = vmatmul.mubr.f32.gmra.mxu0 %v5145_v11  ;;  %7421 = vmatprep.mubr.f32.mxu1 %v5019_v22  ;;  %v5147_v22 = vld [vmem:[#allocation3 + $0x338] sm:$0xff] }
 0x563   :  { %v12768_v0 = vadd.f32 %v7553_v58, %v7169_v40  ;;  %7796 = vmatprep.mubr.f32.mxu0 %v5274_v46  ;;  %v7180_v41 = vpop.f32.mrf.mxu1  ;;  %v5276_v40 = vld [vmem:[#allocation3 + $0x349] sm:$0xff] }
 0x564   :  { %v7555_v25 = vpop.f32.mrf.mxu0  ;;  %v8618_v41 = vld [vmem:[#allocation2 + $0x19] sm:$0xff] }
 0x565   :  { %v7183_v34 = vpop.f32.mrf.mxu1  ;;  %7422 = vmatmul.mubr.f32.gmra.mxu1 %v5274_v46 }
 0x566   :  { %v7184_v6 = vadd.f32 %v7183_v34, %v12451_v8  ;;  %v7558_v52 = vpop.f32.mrf.mxu0  ;;  %7797 = vmatmul.mubr.f32.gmra.mxu0 %v5146_v30  ;;  %7426 = vmatprep.mubr.f32.mxu1 %v5020_v26  ;;  %v5148_v34 = vld [vmem:[#allocation3 + $0x348] sm:$0xff]  ;;  %v5342_v30 = vld [vmem:[#allocation3 + $0x32] sm:$0xff] }
 0x567   :  { %v12771_v36 = vadd.f32 %v7558_v52, %v7174_v38  ;;  %7801 = vmatprep.mubr.f32.mxu0 %v5275_v47  ;;  %v7185_v55 = vpop.f32.mrf.mxu1  ;;  %v5277_v26 = vld [vmem:[#allocation3 + $0x351] sm:$0xff] }
 0x568   :  { %v7560_v45 = vpop.f32.mrf.mxu0 }
 0x569   :  { %v7188_v11 = vpop.f32.mrf.mxu1  ;;  %7427 = vmatmul.mubr.f32.gmra.mxu1 %v5275_v47  ;;  %v8619_v45 = vld [vmem:[#allocation2 + $0x21] sm:$0xff] }
 0x56a   :  { %v7189_v58 = vadd.f32 %v7188_v11, %v12458_v14  ;;  %v7563_v46 = vpop.f32.mrf.mxu0  ;;  %7802 = vmatmul.mubr.f32.gmra.mxu0 %v5147_v22  ;;  %7881 = vmatprep.mubr.f32.mxu1 %v8618_v41  ;;  %v5343_v22 = vld [vmem:[#allocation3 + $0x3a] sm:$0xff] }
 0x56b   :  { %v12774_v8 = vadd.f32 %v7563_v46, %v7179_v16  ;;  %v7190_v25 = vpop.f32.mrf.mxu1  ;;  %7806 = vmatprep.mubr.f32.mxu0 %v5276_v40 }
 0x56c   :  { %v7565_v38 = vpop.f32.mrf.mxu0  ;;  %v8620_v25 = vld [vmem:[#allocation2 + $0x8] sm:$0xff] }
 0x56d   :  { %v7193_v52 = vpop.f32.mrf.mxu1  ;;  %7882 = vmatmul.mubr.f32.vlgmr.msra.gmra.mxu1 %v5342_v30  ;;  %v8621_v38 = vld [vmem:[#allocation2 + $0x31] sm:$0xff] }
 0x56e   :  { %v7194_v55 = vadd.f32 %v7193_v52, %v12465_v4  ;;  %v7568_v47 = vpop.f32.mrf.mxu0  ;;  %7807 = vmatmul.mubr.f32.gmra.mxu0 %v5148_v34  ;;  %7886 = vmatprep.mubr.f32.mxu1 %v8619_v45  ;;  %v5344_v52 = vld [vmem:[#allocation3 + $0x4a] sm:$0xff]  ;;  %v8622_v45 = vld [vmem:[#allocation2 + $0x39] sm:$0xff] }
 0x56f   :  { %v12777_v14 = vadd.f32 %v7568_v47, %v7184_v6  ;;  %v7195_v11 = vpop.f32.mrf.mxu1  ;;  %7811 = vmatprep.mubr.f32.mxu0 %v5277_v26 }
 0x570   :  { %v7570_v16 = vpop.f32.mrf.mxu0 }
 0x571   :  { %v7198_v46 = vpop.f32.mrf.mxu1  ;;  %7887 = vmatmul.mubr.f32.gmra.mxu1 %v5343_v22  ;;  %v5345_v22 = vld [vmem:[#allocation3 + $0x52] sm:$0xff] }
 0x572   :  { %v7199_v40 = vadd.f32 %v7198_v46, %v12472_v28  ;;  %v7573_v41 = vpop.f32.mrf.mxu0  ;;  %7812 = vmatmul.mubr.f32.gmra.mxu0 %v8620_v25  ;;  %7891 = vmatprep.mubr.f32.mxu1 %v8621_v38  ;;  %v8623_v25 = vld [vmem:[#allocation2 + $0x49] sm:$0xff] }
 0x573   :  { %v12780_v4 = vadd.f32 %v7573_v41, %v7189_v58  ;;  %v7200_v34 = vpop.f32.mrf.mxu1 }
 0x574   :  { %v7575_v30 = vpop.f32.mrf.mxu0 }
 0x575   :  { %v7203_v6 = vpop.f32.mrf.mxu1  ;;  %7892 = vmatmul.mubr.f32.gmra.mxu1 %v5344_v52 }
 0x576   :  { %v7204_v26 = vadd.f32 %v7203_v6, %v12479_v2  ;;  %v7578_v47 = vpop.f32.mrf.mxu0  ;;  %7896 = vmatprep.mubr.f32.mxu1 %v8622_v45  ;;  %v5346_v2 = vld [vmem:[#allocation3 + $0x62] sm:$0xff] }
 0x577   :  { %v12783_v11 = vadd.f32 %v7578_v47, %v7194_v55  ;;  %v7205_v28 = vpop.f32.mrf.mxu1  ;;  %v8624_v47 = vld [vmem:[#allocation2 + $0x51] sm:$0xff] }
 0x578   :  { %v7580_v16 = vpop.f32.mrf.mxu0 }
 0x579   :  { %v7208_v46 = vpop.f32.mrf.mxu1  ;;  %7897 = vmatmul.mubr.f32.gmra.mxu1 %v5345_v22 }
 0x57a   :  { %v7209_v58 = vadd.f32 %v7208_v46, %v12486_v31  ;;  %v7583_v41 = vpop.f32.mrf.mxu0  ;;  %7901 = vmatprep.mubr.f32.mxu1 %v8623_v25  ;;  %v5347_v31 = vld [vmem:[#allocation3 + $0x6a] sm:$0xff] }
 0x57b   :  { %v12786_v38 = vadd.f32 %v7583_v41, %v7199_v40  ;;  %v7210_v34 = vpop.f32.mrf.mxu1  ;;  %v8625_v41 = vld [vmem:[#allocation2 + $0x61] sm:$0xff] }
 0x57c   :  { %v7585_v30 = vpop.f32.mrf.mxu0 }
 0x57d   :  { %v7213_v52 = vpop.f32.mrf.mxu1  ;;  %7902 = vmatmul.mubr.f32.gmra.mxu1 %v5346_v2 }
 0x57e   :  { %v7214_v55 = vadd.f32 %v7213_v52, %v12493_v24  ;;  %v7588_v6 = vpop.f32.mrf.mxu0  ;;  %7906 = vmatprep.mubr.f32.mxu1 %v8624_v47  ;;  %v5348_v24 = vld [vmem:[#allocation3 + $0x7a] sm:$0xff] }
 0x57f   :  { %v12789_v45 = vadd.f32 %v7588_v6, %v7204_v26  ;;  %v7215_v28 = vpop.f32.mrf.mxu1  ;;  %v8626_v6 = vld [vmem:[#allocation2 + $0x69] sm:$0xff] }
 0x580   :  { %v7590_v16 = vpop.f32.mrf.mxu0 }
 0x581   :  { %v7218_v22 = vpop.f32.mrf.mxu1  ;;  %7907 = vmatmul.mubr.f32.gmra.mxu1 %v5347_v31 }
 0x582   :  { %v7219_v40 = vadd.f32 %v7218_v22, %v12502_v32  ;;  %v7593_v46 = vpop.f32.mrf.mxu0  ;;  %7911 = vmatprep.mubr.f32.mxu1 %v8625_v41  ;;  %v5349_v32 = vld [vmem:[#allocation3 + $0x82] sm:$0xff] }
 0x583   :  { %v12792_v25 = vadd.f32 %v7593_v46, %v7209_v58  ;;  %v7220_v34 = vpop.f32.mrf.mxu1  ;;  %v8627_v46 = vld [vmem:[#allocation2 + $0x79] sm:$0xff] }
 0x584   :  { %v7595_v30 = vpop.f32.mrf.mxu0 }
 0x585   :  { %v7223_v2 = vpop.f32.mrf.mxu1  ;;  %7912 = vmatmul.mubr.f32.gmra.mxu1 %v5348_v24 }
 0x586   :  { %v7224_v26 = vadd.f32 %v7223_v2, %v12509_v21  ;;  %v7598_v52 = vpop.f32.mrf.mxu0  ;;  %7916 = vmatprep.mubr.f32.mxu1 %v8626_v6  ;;  %v5350_v21 = vld [vmem:[#allocation3 + $0x92] sm:$0xff] }
 0x587   :  { %v12795_v47 = vadd.f32 %v7598_v52, %v7214_v55  ;;  %v7225_v28 = vpop.f32.mrf.mxu1  ;;  %v8628_v52 = vld [vmem:[#allocation2 + $0x81] sm:$0xff] }
 0x588   :  { %v7600_v16 = vpop.f32.mrf.mxu0 }
 0x589   :  { %v7228_v31 = vpop.f32.mrf.mxu1  ;;  %7917 = vmatmul.mubr.f32.gmra.mxu1 %v5349_v32 }
 0x58a   :  { %v7229_v58 = vadd.f32 %v7228_v31, %v12516_v9  ;;  %v7603_v22 = vpop.f32.mrf.mxu0  ;;  %7921 = vmatprep.mubr.f32.mxu1 %v8627_v46  ;;  %v5351_v9 = vld [vmem:[#allocation3 + $0x9a] sm:$0xff] }
 0x58b   :  { %v12798_v41 = vadd.f32 %v7603_v22, %v7219_v40  ;;  %v7230_v34 = vpop.f32.mrf.mxu1  ;;  %v8629_v22 = vld [vmem:[#allocation2 + $0x91] sm:$0xff] }
 0x58c   :  { %v7605_v30 = vpop.f32.mrf.mxu0 }
 0x58d   :  { %v7233_v24 = vpop.f32.mrf.mxu1  ;;  %7922 = vmatmul.mubr.f32.gmra.mxu1 %v5350_v21 }
 0x58e   :  { %v7234_v55 = vadd.f32 %v7233_v24, %v12523_v29  ;;  %v7608_v2 = vpop.f32.mrf.mxu0  ;;  %7926 = vmatprep.mubr.f32.mxu1 %v8628_v52  ;;  %v5352_v29 = vld [vmem:[#allocation3 + $0xaa] sm:$0xff] }
 0x58f   :  { %v12801_v6 = vadd.f32 %v7608_v2, %v7224_v26  ;;  %v7235_v28 = vpop.f32.mrf.mxu1  ;;  %v8630_v2 = vld [vmem:[#allocation2 + $0x99] sm:$0xff] }
 0x590   :  { %v7610_v16 = vpop.f32.mrf.mxu0 }
 0x591   :  { %v7238_v32 = vpop.f32.mrf.mxu1  ;;  %7927 = vmatmul.mubr.f32.gmra.mxu1 %v5351_v9 }
 0x592   :  { %v7239_v40 = vadd.f32 %v7238_v32, %v12530_v3  ;;  %v7613_v31 = vpop.f32.mrf.mxu0  ;;  %7931 = vmatprep.mubr.f32.mxu1 %v8629_v22  ;;  %v5353_v3 = vld [vmem:[#allocation3 + $0xb2] sm:$0xff] }
 0x593   :  { %v12804_v46 = vadd.f32 %v7613_v31, %v7229_v58  ;;  %v7240_v34 = vpop.f32.mrf.mxu1  ;;  %v8631_v31 = vld [vmem:[#allocation2 + $0xa9] sm:$0xff] }
 0x594   :  { %v7615_v30 = vpop.f32.mrf.mxu0 }
 0x595   :  { %v7243_v21 = vpop.f32.mrf.mxu1  ;;  %7932 = vmatmul.mubr.f32.gmra.mxu1 %v5352_v29 }
 0x596   :  { %v7244_v26 = vadd.f32 %v7243_v21, %v12537_v5  ;;  %v7618_v24 = vpop.f32.mrf.mxu0  ;;  %7936 = vmatprep.mubr.f32.mxu1 %v8630_v2  ;;  %v5354_v5 = vld [vmem:[#allocation3 + $0xc2] sm:$0xff] }
 0x597   :  { %v12807_v52 = vadd.f32 %v7618_v24, %v7234_v55  ;;  %v7245_v28 = vpop.f32.mrf.mxu1  ;;  %v8632_v24 = vld [vmem:[#allocation2 + $0xb1] sm:$0xff] }
 0x598   :  { %v7620_v16 = vpop.f32.mrf.mxu0 }
 0x599   :  { %v7248_v9 = vpop.f32.mrf.mxu1  ;;  %7937 = vmatmul.mubr.f32.gmra.mxu1 %v5353_v3 }
 0x59a   :  { %v7249_v58 = vadd.f32 %v7248_v9, %v12544_v37  ;;  %v7623_v32 = vpop.f32.mrf.mxu0  ;;  %7941 = vmatprep.mubr.f32.mxu1 %v8631_v31  ;;  %v5355_v37 = vld [vmem:[#allocation3 + $0xca] sm:$0xff] }
 0x59b   :  { %v12810_v22 = vadd.f32 %v7623_v32, %v7239_v40  ;;  %v7250_v34 = vpop.f32.mrf.mxu1  ;;  %v8633_v32 = vld [vmem:[#allocation2 + $0xc1] sm:$0xff] }
 0x59c   :  { %v7625_v30 = vpop.f32.mrf.mxu0 }
 0x59d   :  { %v7253_v29 = vpop.f32.mrf.mxu1  ;;  %7942 = vmatmul.mubr.f32.gmra.mxu1 %v5354_v5 }
 0x59e   :  { %v7254_v55 = vadd.f32 %v7253_v29, %v12551_v42  ;;  %v7628_v21 = vpop.f32.mrf.mxu0  ;;  %7946 = vmatprep.mubr.f32.mxu1 %v8632_v24  ;;  %v5356_v42 = vld [vmem:[#allocation3 + $0xda] sm:$0xff] }
 0x59f   :  { %v12813_v2 = vadd.f32 %v7628_v21, %v7244_v26  ;;  %v7255_v28 = vpop.f32.mrf.mxu1  ;;  %v8634_v21 = vld [vmem:[#allocation2 + $0xc9] sm:$0xff] }
 0x5a0   :  { %v7630_v16 = vpop.f32.mrf.mxu0 }
 0x5a1   :  { %v7258_v3 = vpop.f32.mrf.mxu1  ;;  %7947 = vmatmul.mubr.f32.gmra.mxu1 %v5355_v37 }
 0x5a2   :  { %v7259_v40 = vadd.f32 %v7258_v3, %v12558_v19  ;;  %v7633_v9 = vpop.f32.mrf.mxu0  ;;  %7951 = vmatprep.mubr.f32.mxu1 %v8633_v32  ;;  %v5357_v19 = vld [vmem:[#allocation3 + $0xe2] sm:$0xff] }
 0x5a3   :  { %v12816_v31 = vadd.f32 %v7633_v9, %v7249_v58  ;;  %v7260_v34 = vpop.f32.mrf.mxu1  ;;  %v8635_v9 = vld [vmem:[#allocation2 + $0xd9] sm:$0xff] }
 0x5a4   :  { %v7635_v30 = vpop.f32.mrf.mxu0 }
 0x5a5   :  { %v7263_v5 = vpop.f32.mrf.mxu1  ;;  %7952 = vmatmul.mubr.f32.gmra.mxu1 %v5356_v42 }
 0x5a6   :  { %v7264_v26 = vadd.f32 %v7263_v5, %v12565_v60  ;;  %v7638_v29 = vpop.f32.mrf.mxu0  ;;  %7956 = vmatprep.mubr.f32.mxu1 %v8634_v21  ;;  %v5358_v60 = vld [vmem:[#allocation3 + $0xf2] sm:$0xff] }
 0x5a7   :  { %v12819_v24 = vadd.f32 %v7638_v29, %v7254_v55  ;;  %v7265_v28 = vpop.f32.mrf.mxu1  ;;  %v8636_v29 = vld [vmem:[#allocation2 + $0xe1] sm:$0xff] }
 0x5a8   :  { %v7640_v16 = vpop.f32.mrf.mxu0 }
 0x5a9   :  { %v7268_v37 = vpop.f32.mrf.mxu1  ;;  %7957 = vmatmul.mubr.f32.gmra.mxu1 %v5357_v19 }
 0x5aa   :  { %v7269_v58 = vadd.f32 %v7268_v37, %v12572_v50  ;;  %v7643_v3 = vpop.f32.mrf.mxu0  ;;  %7961 = vmatprep.mubr.f32.mxu1 %v8635_v9  ;;  %v5359_v50 = vld [vmem:[#allocation3 + $0xfa] sm:$0xff] }
 0x5ab   :  { %v12822_v32 = vadd.f32 %v7643_v3, %v7259_v40  ;;  %v7270_v34 = vpop.f32.mrf.mxu1  ;;  %v8637_v3 = vld [vmem:[#allocation2 + $0xf1] sm:$0xff] }
 0x5ac   :  { %v7645_v30 = vpop.f32.mrf.mxu0 }
 0x5ad   :  { %v7273_v42 = vpop.f32.mrf.mxu1  ;;  %7962 = vmatmul.mubr.f32.gmra.mxu1 %v5358_v60 }
 0x5ae   :  { %v7274_v55 = vadd.f32 %v7273_v42, %v12579_v44  ;;  %v7648_v5 = vpop.f32.mrf.mxu0  ;;  %7966 = vmatprep.mubr.f32.mxu1 %v8636_v29  ;;  %v5360_v44 = vld [vmem:[#allocation3 + $0x10a] sm:$0xff] }
 0x5af   :  { %v12825_v21 = vadd.f32 %v7648_v5, %v7264_v26  ;;  %v7275_v28 = vpop.f32.mrf.mxu1  ;;  %v8638_v5 = vld [vmem:[#allocation2 + $0xf9] sm:$0xff] }
 0x5b0   :  { %v7650_v16 = vpop.f32.mrf.mxu0 }
 0x5b1   :  { %v7278_v19 = vpop.f32.mrf.mxu1  ;;  %7967 = vmatmul.mubr.f32.gmra.mxu1 %v5359_v50 }
 0x5b2   :  { %v7279_v40 = vadd.f32 %v7278_v19, %v12586_v51  ;;  %v7653_v37 = vpop.f32.mrf.mxu0  ;;  %7971 = vmatprep.mubr.f32.mxu1 %v8637_v3  ;;  %v5361_v51 = vld [vmem:[#allocation3 + $0x112] sm:$0xff] }
 0x5b3   :  { %v12828_v9 = vadd.f32 %v7653_v37, %v7269_v58  ;;  %v7280_v34 = vpop.f32.mrf.mxu1  ;;  %v8639_v37 = vld [vmem:[#allocation2 + $0x109] sm:$0xff] }
 0x5b4   :  { %v7655_v30 = vpop.f32.mrf.mxu0 }
 0x5b5   :  { %v7283_v60 = vpop.f32.mrf.mxu1  ;;  %7972 = vmatmul.mubr.f32.gmra.mxu1 %v5360_v44 }
 0x5b6   :  { %v7284_v26 = vadd.f32 %v7283_v60, %v12593_v49  ;;  %v7658_v42 = vpop.f32.mrf.mxu0  ;;  %7976 = vmatprep.mubr.f32.mxu1 %v8638_v5  ;;  %v5362_v49 = vld [vmem:[#allocation3 + $0x122] sm:$0xff] }
 0x5b7   :  { %v12831_v29 = vadd.f32 %v7658_v42, %v7274_v55  ;;  %v7285_v28 = vpop.f32.mrf.mxu1  ;;  %v8640_v42 = vld [vmem:[#allocation2 + $0x111] sm:$0xff] }
 0x5b8   :  { %v7660_v16 = vpop.f32.mrf.mxu0 }
 0x5b9   :  { %v7288_v50 = vpop.f32.mrf.mxu1  ;;  %7977 = vmatmul.mubr.f32.gmra.mxu1 %v5361_v51 }
 0x5ba   :  { %v7289_v58 = vadd.f32 %v7288_v50, %v12605_v33  ;;  %v7663_v19 = vpop.f32.mrf.mxu0  ;;  %7981 = vmatprep.mubr.f32.mxu1 %v8639_v37  ;;  %v5363_v33 = vld [vmem:[#allocation3 + $0x12a] sm:$0xff] }
 0x5bb   :  { %v12834_v3 = vadd.f32 %v7663_v19, %v7279_v40  ;;  %v7290_v34 = vpop.f32.mrf.mxu1  ;;  %v8641_v19 = vld [vmem:[#allocation2 + $0x121] sm:$0xff] }
 0x5bc   :  { %v7665_v30 = vpop.f32.mrf.mxu0 }
 0x5bd   :  { %v7293_v44 = vpop.f32.mrf.mxu1  ;;  %7982 = vmatmul.mubr.f32.gmra.mxu1 %v5362_v49 }
 0x5be   :  { %v7294_v55 = vadd.f32 %v7293_v44, %v12612_v18  ;;  %v7668_v60 = vpop.f32.mrf.mxu0  ;;  %7986 = vmatprep.mubr.f32.mxu1 %v8640_v42  ;;  %v5364_v18 = vld [vmem:[#allocation3 + $0x13a] sm:$0xff] }
 0x5bf   :  { %v12837_v5 = vadd.f32 %v7668_v60, %v7284_v26  ;;  %v7295_v28 = vpop.f32.mrf.mxu1  ;;  %v8642_v60 = vld [vmem:[#allocation2 + $0x129] sm:$0xff] }
 0x5c0   :  { %v7670_v16 = vpop.f32.mrf.mxu0 }
 0x5c1   :  { %v7298_v51 = vpop.f32.mrf.mxu1  ;;  %7987 = vmatmul.mubr.f32.gmra.mxu1 %v5363_v33 }
 0x5c2   :  { %v7299_v40 = vadd.f32 %v7298_v51, %v12619_v59  ;;  %v7673_v50 = vpop.f32.mrf.mxu0  ;;  %7991 = vmatprep.mubr.f32.mxu1 %v8641_v19  ;;  %v5365_v59 = vld [vmem:[#allocation3 + $0x142] sm:$0xff] }
 0x5c3   :  { %v12840_v37 = vadd.f32 %v7673_v50, %v7289_v58  ;;  %v7300_v34 = vpop.f32.mrf.mxu1  ;;  %v8643_v50 = vld [vmem:[#allocation2 + $0x139] sm:$0xff] }
 0x5c4   :  { %v7675_v30 = vpop.f32.mrf.mxu0 }
 0x5c5   :  { %v7303_v49 = vpop.f32.mrf.mxu1  ;;  %7992 = vmatmul.mubr.f32.gmra.mxu1 %v5364_v18 }
 0x5c6   :  { %v7304_v26 = vadd.f32 %v7303_v49, %v12626_v62  ;;  %v7678_v44 = vpop.f32.mrf.mxu0  ;;  %7996 = vmatprep.mubr.f32.mxu1 %v8642_v60  ;;  %v5366_v62 = vld [vmem:[#allocation3 + $0x152] sm:$0xff] }
 0x5c7   :  { %v12843_v42 = vadd.f32 %v7678_v44, %v7294_v55  ;;  %v7305_v28 = vpop.f32.mrf.mxu1  ;;  %v8644_v44 = vld [vmem:[#allocation2 + $0x141] sm:$0xff] }
 0x5c8   :  { %v7680_v16 = vpop.f32.mrf.mxu0 }
 0x5c9   :  { %v7308_v33 = vpop.f32.mrf.mxu1  ;;  %7997 = vmatmul.mubr.f32.gmra.mxu1 %v5365_v59 }
 0x5ca   :  { %v7309_v58 = vadd.f32 %v7308_v33, %v12633_v13  ;;  %v7683_v51 = vpop.f32.mrf.mxu0  ;;  %8001 = vmatprep.mubr.f32.mxu1 %v8643_v50  ;;  %v5367_v13 = vld [vmem:[#allocation3 + $0x15a] sm:$0xff] }
 0x5cb   :  { %v12846_v19 = vadd.f32 %v7683_v51, %v7299_v40  ;;  %v7310_v34 = vpop.f32.mrf.mxu1  ;;  %v8645_v51 = vld [vmem:[#allocation2 + $0x151] sm:$0xff] }
 0x5cc   :  { %v7685_v30 = vpop.f32.mrf.mxu0 }
 0x5cd   :  { %v7313_v18 = vpop.f32.mrf.mxu1  ;;  %8002 = vmatmul.mubr.f32.gmra.mxu1 %v5366_v62 }
 0x5ce   :  { %v7314_v55 = vadd.f32 %v7313_v18, %v12640_v53  ;;  %v7688_v49 = vpop.f32.mrf.mxu0  ;;  %8006 = vmatprep.mubr.f32.mxu1 %v8644_v44  ;;  %v5368_v53 = vld [vmem:[#allocation3 + $0x16a] sm:$0xff] }
 0x5cf   :  { %v12849_v60 = vadd.f32 %v7688_v49, %v7304_v26  ;;  %v7315_v28 = vpop.f32.mrf.mxu1  ;;  %v8646_v49 = vld [vmem:[#allocation2 + $0x159] sm:$0xff] }
 0x5d0   :  { %v7690_v16 = vpop.f32.mrf.mxu0 }
 0x5d1   :  { %v7318_v59 = vpop.f32.mrf.mxu1  ;;  %8007 = vmatmul.mubr.f32.gmra.mxu1 %v5367_v13 }
 0x5d2   :  { %v7319_v40 = vadd.f32 %v7318_v59, %v12647_v1  ;;  %v7693_v33 = vpop.f32.mrf.mxu0  ;;  %8011 = vmatprep.mubr.f32.mxu1 %v8645_v51  ;;  %v5369_v1 = vld [vmem:[#allocation3 + $0x172] sm:$0xff]  ;;  %v8647_v51 = vld [vmem:[#allocation2 + $0x169] sm:$0xff] }
 0x5d3   :  { %v12852_v50 = vadd.f32 %v7693_v33, %v7309_v58  ;;  %v7320_v34 = vpop.f32.mrf.mxu1  ;;  %v13519_v59 = vld [vmem:[#allocation41_spill] sm:$0xff] }
 0x5d4   :  { %v7695_v30 = vpop.f32.mrf.mxu0 }
 0x5d5   :  { %v7323_v62 = vpop.f32.mrf.mxu1  ;;  %8012 = vmatmul.mubr.f32.gmra.mxu1 %v5368_v53 }
 0x5d6   :  { %v7324_v26 = vadd.f32 %v7323_v62, %v12654_v35  ;;  %v7698_v18 = vpop.f32.mrf.mxu0  ;;  %8016 = vmatprep.mubr.f32.mxu1 %v8646_v49  ;;  %v5370_v35 = vld [vmem:[#allocation3 + $0x182] sm:$0xff] }
 0x5d7   :  { %v12855_v44 = vadd.f32 %v7698_v18, %v7314_v55  ;;  %v7325_v28 = vpop.f32.mrf.mxu1  ;;  %v13520_v49 = vld [vmem:[#allocation42_spill] sm:$0xff] }
 0x5d8   :  { %v7700_v16 = vpop.f32.mrf.mxu0  ;;  %v8648_v28 = vld [vmem:[#allocation2 + $0x171] sm:$0xff] }
 0x5d9   :  { %13518 = vst [vmem:[#allocation57_spill] sm:$0xff] %v12855_v44  ;;  %v7328_v13 = vpop.f32.mrf.mxu1  ;;  %8017 = vmatmul.mubr.f32.gmra.mxu1 %v5369_v1 }
 0x5da   :  { %v7329_v58 = vadd.f32 %v7328_v13, %v13519_v59  ;;  %v7703_v33 = vpop.f32.mrf.mxu0  ;;  %8021 = vmatprep.mubr.f32.mxu1 %v8647_v51  ;;  %v5371_v13 = vld [vmem:[#allocation3 + $0x18a] sm:$0xff]  ;;  %v8649_v51 = vld [vmem:[#allocation2 + $0x181] sm:$0xff] }
 0x5db   :  { %v12858_v34 = vadd.f32 %v7703_v33, %v7319_v40  ;;  %v7330_v30 = vpop.f32.mrf.mxu1 }
 0x5dc   :  { %v7705_v53 = vpop.f32.mrf.mxu0  ;;  %v5372_v30 = vld [vmem:[#allocation3 + $0x19a] sm:$0xff] }
 0x5dd   :  { %v7333_v62 = vpop.f32.mrf.mxu1  ;;  %8022 = vmatmul.mubr.f32.gmra.mxu1 %v5370_v35 }
 0x5de   :  { %v7334_v55 = vadd.f32 %v7333_v62, %v13520_v49  ;;  %v7708_v18 = vpop.f32.mrf.mxu0  ;;  %8026 = vmatprep.mubr.f32.mxu1 %v8648_v28  ;;  %v8650_v28 = vld [vmem:[#allocation2 + $0x189] sm:$0xff] }
 0x5df   :  { %v12861_v16 = vadd.f32 %v7708_v18, %v7324_v26  ;;  %v7335_v1 = vpop.f32.mrf.mxu1 }
 0x5e0   :  { %v7710_v44 = vpop.f32.mrf.mxu0 }
 0x5e1   :  { %v7338_v59 = vpop.f32.mrf.mxu1  ;;  %8027 = vmatmul.mubr.f32.gmra.mxu1 %v5371_v13  ;;  %v5373_v44 = vld [vmem:[#allocation3 + $0x1a2] sm:$0xff] }
 0x5e2   :  { %v7339_v40 = vadd.f32 %v7338_v59, %v12675_v57  ;;  %v7713_v33 = vpop.f32.mrf.mxu0  ;;  %8031 = vmatprep.mubr.f32.mxu1 %v8649_v51 }
 0x5e3   :  { %v12864_v53 = vadd.f32 %v7713_v33, %v7329_v58  ;;  %v7340_v35 = vpop.f32.mrf.mxu1  ;;  %v8651_v33 = vld [vmem:[#allocation2 + $0x1c9] sm:$0xff] }
 0x5e4   :  { %v7715_v62 = vpop.f32.mrf.mxu0 }
 0x5e5   :  { %13521 = vst [vmem:[#allocation55_spill] sm:$0xff] %v12864_v53  ;;  %v7343_v49 = vpop.f32.mrf.mxu1  ;;  %8032 = vmatmul.mubr.f32.gmra.mxu1 %v5372_v30 }
 0x5e6   :  { %v7344_v26 = vadd.f32 %v7343_v49, %v12678_v12  ;;  %v7718_v18 = vpop.f32.mrf.mxu0  ;;  %8036 = vmatprep.mubr.f32.mxu1 %v8650_v28  ;;  %v5374_v12 = vld [vmem:[#allocation3 + $0x1e2] sm:$0xff] }
 0x5e7   :  { %v12867_v1 = vadd.f32 %v7718_v18, %v7334_v55  ;;  %v7345_v13 = vpop.f32.mrf.mxu1  ;;  %v13523_v28 = vld [vmem:[#allocation43_spill] sm:$0xff]  ;;  %v8652_v18 = vld [vmem:[#allocation2 + $0x1d1] sm:$0xff] }
 0x5e8   :  { %v7720_v57 = vpop.f32.mrf.mxu0 }
 0x5e9   :  { %v7348_v59 = vpop.f32.mrf.mxu1  ;;  %8037 = vmatmul.mubr.f32.gmra.mxu1 %v5373_v44 }
 0x5ea   :  { %v7349_v51 = vadd.f32 %v7348_v59, %v12682_v48  ;;  %v7723_v58 = vpop.f32.mrf.mxu0  ;;  %8041 = vmatprep.mubr.f32.mxu1 %v8651_v33  ;;  %v5375_v48 = vld [vmem:[#allocation3 + $0x1ea] sm:$0xff] }
 0x5eb   :  { %v12870_v35 = vadd.f32 %v7723_v58, %v7339_v40  ;;  %v7350_v30 = vpop.f32.mrf.mxu1  ;;  %v13525_v33 = vld [vmem:[#allocation44_spill] sm:$0xff] }
 0x5ec   :  { %v7725_v62 = vpop.f32.mrf.mxu0  ;;  %v8653_v30 = vld [vmem:[#allocation2 + $0x1e1] sm:$0xff] }
 0x5ed   :  { %13522 = vst [vmem:[#allocation60_spill] sm:$0xff] %v12870_v35  ;;  %v7353_v49 = vpop.f32.mrf.mxu1  ;;  %8042 = vmatmul.mubr.f32.gmra.mxu1 %v5374_v12 }
 0x5ee   :  { %v7354_v53 = vadd.f32 %v7353_v49, %v13523_v28  ;;  %v7728_v55 = vpop.f32.mrf.mxu0  ;;  %8046 = vmatprep.mubr.f32.mxu1 %v8652_v18  ;;  %v5376_v49 = vld [vmem:[#allocation3 + $0x1fa] sm:$0xff] }
 0x5ef   :  { %v12873_v13 = vadd.f32 %v7728_v55, %v7344_v26  ;;  %v7355_v44 = vpop.f32.mrf.mxu1  ;;  %v13527_v18 = vld [vmem:[#allocation45_spill] sm:$0xff] }
 0x5f0   :  { %v7730_v57 = vpop.f32.mrf.mxu0  ;;  %v8654_v44 = vld [vmem:[#allocation2 + $0x1e9] sm:$0xff] }
 0x5f1   :  { %13524 = vst [vmem:[#allocation59_spill] sm:$0xff] %v12873_v13  ;;  %v7358_v59 = vpop.f32.mrf.mxu1  ;;  %8047 = vmatmul.mubr.f32.gmra.mxu1 %v5375_v48 }
 0x5f2   :  { %v7359_v40 = vadd.f32 %v7358_v59, %v13525_v33  ;;  %v7733_v58 = vpop.f32.mrf.mxu0  ;;  %8051 = vmatprep.mubr.f32.mxu1 %v8653_v30  ;;  %v5377_v59 = vld [vmem:[#allocation3 + $0x202] sm:$0xff] }
 0x5f3   :  { %v12876_v62 = vadd.f32 %v7733_v58, %v7349_v51  ;;  %v7360_v12 = vpop.f32.mrf.mxu1  ;;  %v13529_v30 = vld [vmem:[#allocation46_spill] sm:$0xff] }
 0x5f4   :  { %v7735_v35 = vpop.f32.mrf.mxu0  ;;  %v8655_v12 = vld [vmem:[#allocation2 + $0x1f9] sm:$0xff] }
 0x5f5   :  { %13526 = vst [vmem:[#allocation7_spill] sm:$0xff] %v12876_v62  ;;  %v7363_v28 = vpop.f32.mrf.mxu1  ;;  %8052 = vmatmul.mubr.f32.gmra.mxu1 %v5376_v49 }
 0x5f6   :  { %v7364_v26 = vadd.f32 %v7363_v28, %v13527_v18  ;;  %v7738_v55 = vpop.f32.mrf.mxu0  ;;  %8056 = vmatprep.mubr.f32.mxu1 %v8654_v44  ;;  %v5378_v28 = vld [vmem:[#allocation3 + $0x212] sm:$0xff] }
 0x5f7   :  { %v12879_v57 = vadd.f32 %v7738_v55, %v7354_v53  ;;  %v7365_v48 = vpop.f32.mrf.mxu1  ;;  %v13531_v44 = vld [vmem:[#allocation48_spill] sm:$0xff] }
 0x5f8   :  { %v7740_v13 = vpop.f32.mrf.mxu0  ;;  %v8656_v48 = vld [vmem:[#allocation2 + $0x201] sm:$0xff] }
 0x5f9   :  { %13528 = vst [vmem:[#allocation6_spill] sm:$0xff] %v12879_v57  ;;  %v7368_v33 = vpop.f32.mrf.mxu1  ;;  %8057 = vmatmul.mubr.f32.gmra.mxu1 %v5377_v59 }
 0x5fa   :  { %v7369_v51 = vadd.f32 %v7368_v33, %v13529_v30  ;;  %v7743_v58 = vpop.f32.mrf.mxu0  ;;  %8061 = vmatprep.mubr.f32.mxu1 %v8655_v12  ;;  %v5379_v33 = vld [vmem:[#allocation3 + $0x21a] sm:$0xff] }
 0x5fb   :  { %v12882_v35 = vadd.f32 %v7743_v58, %v7359_v40  ;;  %v7370_v49 = vpop.f32.mrf.mxu1  ;;  %v13533_v12 = vld [vmem:[#allocation50_spill] sm:$0xff] }
 0x5fc   :  { %v7745_v62 = vpop.f32.mrf.mxu0  ;;  %v8657_v49 = vld [vmem:[#allocation2 + $0x211] sm:$0xff] }
 0x5fd   :  { %13530 = vst [vmem:[#allocation9_spill] sm:$0xff] %v12882_v35  ;;  %v7373_v18 = vpop.f32.mrf.mxu1  ;;  %8062 = vmatmul.mubr.f32.gmra.mxu1 %v5378_v28 }
 0x5fe   :  { %v7374_v53 = vadd.f32 %v7373_v18, %v13531_v44  ;;  %v7748_v55 = vpop.f32.mrf.mxu0  ;;  %8066 = vmatprep.mubr.f32.mxu1 %v8656_v48  ;;  %v5380_v18 = vld [vmem:[#allocation3 + $0x22a] sm:$0xff] }
 0x5ff   :  { %v12885_v13 = vadd.f32 %v7748_v55, %v7364_v26  ;;  %v7375_v59 = vpop.f32.mrf.mxu1  ;;  %v13535_v48 = vld [vmem:[#allocation52_spill] sm:$0xff] }
 0x600   :  { %v7750_v57 = vpop.f32.mrf.mxu0  ;;  %v8658_v59 = vld [vmem:[#allocation2 + $0x219] sm:$0xff] }
 0x601   :  { %13532 = vst [vmem:[#allocation8_spill] sm:$0xff] %v12885_v13  ;;  %v7378_v30 = vpop.f32.mrf.mxu1  ;;  %8067 = vmatmul.mubr.f32.gmra.mxu1 %v5379_v33 }
 0x602   :  { %v7379_v40 = vadd.f32 %v7378_v30, %v13533_v12  ;;  %v7753_v58 = vpop.f32.mrf.mxu0  ;;  %8071 = vmatprep.mubr.f32.mxu1 %v8657_v49  ;;  %v5381_v30 = vld [vmem:[#allocation3 + $0x232] sm:$0xff]  ;;  %v13537_v49 = vld [vmem:[#allocation54_spill] sm:$0xff] }
 0x603   :  { %v12888_v62 = vadd.f32 %v7753_v58, %v7369_v51  ;;  %v7380_v28 = vpop.f32.mrf.mxu1 }
 0x604   :  { %v7755_v35 = vpop.f32.mrf.mxu0  ;;  %v8659_v28 = vld [vmem:[#allocation2 + $0x229] sm:$0xff] }
 0x605   :  { %13534 = vst [vmem:[#allocation10_spill] sm:$0xff] %v12888_v62  ;;  %v7383_v44 = vpop.f32.mrf.mxu1  ;;  %8072 = vmatmul.mubr.f32.gmra.mxu1 %v5380_v18 }
 0x606   :  { %v7384_v26 = vadd.f32 %v7383_v44, %v13535_v48  ;;  %v7758_v55 = vpop.f32.mrf.mxu0  ;;  %8076 = vmatprep.mubr.f32.mxu1 %v8658_v59  ;;  %v5382_v44 = vld [vmem:[#allocation3 + $0x242] sm:$0xff]  ;;  %v13539_v59 = vld [vmem:[#allocation56_spill] sm:$0xff] }
 0x607   :  { %v12891_v57 = vadd.f32 %v7758_v55, %v7374_v53  ;;  %v7385_v33 = vpop.f32.mrf.mxu1 }
 0x608   :  { %v7760_v13 = vpop.f32.mrf.mxu0  ;;  %v8660_v33 = vld [vmem:[#allocation2 + $0x231] sm:$0xff] }
 0x609   :  { %13536 = vst [vmem:[#allocation11_spill] sm:$0xff] %v12891_v57  ;;  %v7388_v12 = vpop.f32.mrf.mxu1  ;;  %8077 = vmatmul.mubr.f32.gmra.mxu1 %v5381_v30 }
 0x60a   :  { %v7389_v51 = vadd.f32 %v7388_v12, %v13537_v49  ;;  %v7763_v58 = vpop.f32.mrf.mxu0  ;;  %8081 = vmatprep.mubr.f32.mxu1 %v8659_v28  ;;  %v5383_v12 = vld [vmem:[#allocation3 + $0x24a] sm:$0xff]  ;;  %v13541_v28 = vld [vmem:[#allocation58_spill] sm:$0xff] }
 0x60b   :  { %v12894_v35 = vadd.f32 %v7763_v58, %v7379_v40  ;;  %v7390_v18 = vpop.f32.mrf.mxu1 }
 0x60c   :  { %v7765_v62 = vpop.f32.mrf.mxu0  ;;  %v8661_v18 = vld [vmem:[#allocation2 + $0x241] sm:$0xff] }
 0x60d   :  { %13538 = vst [vmem:[#allocation21_spill] sm:$0xff] %v12894_v35  ;;  %v7393_v48 = vpop.f32.mrf.mxu1  ;;  %8082 = vmatmul.mubr.f32.gmra.mxu1 %v5382_v44 }
 0x60e   :  { %v7394_v53 = vadd.f32 %v7393_v48, %v13539_v59  ;;  %v7768_v55 = vpop.f32.mrf.mxu0  ;;  %8086 = vmatprep.mubr.f32.mxu1 %v8660_v33  ;;  %v5384_v48 = vld [vmem:[#allocation3 + $0x25a] sm:$0xff] }
 0x60f   :  { %v12897_v13 = vadd.f32 %v7768_v55, %v7384_v26  ;;  %v7395_v30 = vpop.f32.mrf.mxu1  ;;  %v13543_v33 = vld [vmem:[#allocation49_spill] sm:$0xff] }
 0x610   :  { %v7770_v57 = vpop.f32.mrf.mxu0  ;;  %v8662_v30 = vld [vmem:[#allocation2 + $0x249] sm:$0xff] }
 0x611   :  { %13540 = vst [vmem:[#allocation13_spill] sm:$0xff] %v12897_v13  ;;  %v7398_v49 = vpop.f32.mrf.mxu1  ;;  %8087 = vmatmul.mubr.f32.gmra.mxu1 %v5383_v12 }
 0x612   :  { %v7399_v40 = vadd.f32 %v7398_v49, %v13541_v28  ;;  %v7773_v58 = vpop.f32.mrf.mxu0  ;;  %8091 = vmatprep.mubr.f32.mxu1 %v8661_v18  ;;  %v5385_v49 = vld [vmem:[#allocation3 + $0x262] sm:$0xff] }
 0x613   :  { %v12900_v62 = vadd.f32 %v7773_v58, %v7389_v51  ;;  %v7400_v44 = vpop.f32.mrf.mxu1  ;;  %v13545_v18 = vld [vmem:[#allocation47_spill] sm:$0xff] }
 0x614   :  { %v7775_v35 = vpop.f32.mrf.mxu0  ;;  %v8663_v44 = vld [vmem:[#allocation2 + $0x259] sm:$0xff] }
 0x615   :  { %13542 = vst [vmem:[#allocation20_spill] sm:$0xff] %v12900_v62  ;;  %v7403_v59 = vpop.f32.mrf.mxu1  ;;  %8092 = vmatmul.mubr.f32.gmra.mxu1 %v5384_v48 }
 0x616   :  { %v7404_v26 = vadd.f32 %v7403_v59, %v13543_v33  ;;  %v7778_v55 = vpop.f32.mrf.mxu0  ;;  %8096 = vmatprep.mubr.f32.mxu1 %v8662_v30  ;;  %v5386_v59 = vld [vmem:[#allocation3 + $0x272] sm:$0xff] }
 0x617   :  { %v12903_v57 = vadd.f32 %v7778_v55, %v7394_v53  ;;  %v7405_v12 = vpop.f32.mrf.mxu1  ;;  %v13547_v30 = vld [vmem:[#allocation53_spill] sm:$0xff] }
 0x618   :  { %v7780_v13 = vpop.f32.mrf.mxu0  ;;  %v8664_v12 = vld [vmem:[#allocation2 + $0x261] sm:$0xff] }
 0x619   :  { %13544 = vst [vmem:[#allocation12_spill] sm:$0xff] %v12903_v57  ;;  %v7408_v28 = vpop.f32.mrf.mxu1  ;;  %8097 = vmatmul.mubr.f32.gmra.mxu1 %v5385_v49 }
 0x61a   :  { %v7409_v51 = vadd.f32 %v7408_v28, %v13545_v18  ;;  %v7783_v58 = vpop.f32.mrf.mxu0  ;;  %8101 = vmatprep.mubr.f32.mxu1 %v8663_v44  ;;  %v5387_v28 = vld [vmem:[#allocation3 + $0x27a] sm:$0xff]  ;;  %v13548_v44 = vld [vmem:[#allocation51_spill] sm:$0xff] }
 0x61b   :  { %v12906_v35 = vadd.f32 %v7783_v58, %v7399_v40  ;;  %v7410_v48 = vpop.f32.mrf.mxu1 }
 0x61c   :  { %v7785_v62 = vpop.f32.mrf.mxu0  ;;  %v8665_v48 = vld [vmem:[#allocation2 + $0x271] sm:$0xff] }
 0x61d   :  { %13546 = vst [vmem:[#allocation15_spill] sm:$0xff] %v12906_v35  ;;  %v7413_v33 = vpop.f32.mrf.mxu1  ;;  %8102 = vmatmul.mubr.f32.gmra.mxu1 %v5386_v59 }
 0x61e   :  { %v7414_v53 = vadd.f32 %v7413_v33, %v13547_v30  ;;  %v7788_v55 = vpop.f32.mrf.mxu0  ;;  %8106 = vmatprep.mubr.f32.mxu1 %v8664_v12  ;;  %v5388_v33 = vld [vmem:[#allocation3 + $0x28a] sm:$0xff]  ;;  %v8666_v12 = vld [vmem:[#allocation2 + $0x279] sm:$0xff] }
 0x61f   :  { %v12909_v13 = vadd.f32 %v7788_v55, %v7404_v26  ;;  %v7415_v49 = vpop.f32.mrf.mxu1 }
 0x620   :  { %v7790_v57 = vpop.f32.mrf.mxu0 }
 0x621   :  { %v7418_v18 = vpop.f32.mrf.mxu1  ;;  %8107 = vmatmul.mubr.f32.gmra.mxu1 %v5387_v28 }
 0x622   :  { %v7419_v40 = vadd.f32 %v7418_v18, %v13548_v44  ;;  %v7793_v58 = vpop.f32.mrf.mxu0  ;;  %8111 = vmatprep.mubr.f32.mxu1 %v8665_v48  ;;  %v5389_v18 = vld [vmem:[#allocation3 + $0x292] sm:$0xff]  ;;  %v8667_v48 = vld [vmem:[#allocation2 + $0x289] sm:$0xff] }
 0x623   :  { %v12912_v62 = vadd.f32 %v7793_v58, %v7409_v51  ;;  %v7420_v59 = vpop.f32.mrf.mxu1 }
 0x624   :  { %v7795_v35 = vpop.f32.mrf.mxu0 }
 0x625   :  { %v7423_v30 = vpop.f32.mrf.mxu1  ;;  %8112 = vmatmul.mubr.f32.gmra.mxu1 %v5388_v33 }
 0x626   :  { %v7424_v26 = vadd.f32 %v7423_v30, %v12728_v27  ;;  %v7798_v55 = vpop.f32.mrf.mxu0  ;;  %8116 = vmatprep.mubr.f32.mxu1 %v8666_v12  ;;  %v5390_v27 = vld [vmem:[#allocation3 + $0x2a2] sm:$0xff] }
 0x627   :  { %v12915_v57 = vadd.f32 %v7798_v55, %v7414_v53  ;;  %v7425_v49 = vpop.f32.mrf.mxu1  ;;  %v8668_v55 = vld [vmem:[#allocation2 + $0x291] sm:$0xff] }
 0x628   :  { %v7800_v28 = vpop.f32.mrf.mxu0 }
 0x629   :  { %13549 = vst [vmem:[#allocation22_spill] sm:$0xff] %v12915_v57  ;;  %v7428_v44 = vpop.f32.mrf.mxu1  ;;  %8117 = vmatmul.mubr.f32.gmra.mxu1 %v5389_v18 }
 0x62a   :  { %v7429_v51 = vadd.f32 %v7428_v44, %v12732_v17  ;;  %v7803_v58 = vpop.f32.mrf.mxu0  ;;  %8121 = vmatprep.mubr.f32.mxu1 %v8667_v48  ;;  %v5391_v44 = vld [vmem:[#allocation3 + $0x2aa] sm:$0xff]  ;;  %v8669_v48 = vld [vmem:[#allocation2 + $0x2a1] sm:$0xff] }
 0x62b   :  { %v12918_v35 = vadd.f32 %v7803_v58, %v7419_v40  ;;  %v7430_v59 = vpop.f32.mrf.mxu1 }
 0x62c   :  { %v7805_v33 = vpop.f32.mrf.mxu0 }
 0x62d   :  { %v7883_v30 = vpop.f32.mrf.mxu1  ;;  %8122 = vmatmul.mubr.f32.gmra.mxu1 %v5390_v27  ;;  %v5392_v33 = vld [vmem:[#allocation3 + $0x2ba] sm:$0xff] }
 0x62e   :  { %v7808_v12 = vpop.f32.mrf.mxu0  ;;  %v7884_v53 = vadd.f32 %v7883_v30, %v12735_v56  ;;  %8126 = vmatprep.mubr.f32.mxu1 %v8668_v55 }
 0x62f   :  { %v12921_v49 = vadd.f32 %v7808_v12, %v7424_v26  ;;  %v7885_v28 = vpop.f32.mrf.mxu1 }
 0x630   :  { %v8202_v18 = vmax.f32 %v7884_v53, 0.0  ;;  %v7810_v17 = vpop.f32.mrf.mxu0  ;;  %v8670_v53 = vld [vmem:[#allocation2 + $0x2a9] sm:$0xff] }
 0x631   :  { %v7888_v57 = vpop.f32.mrf.mxu1  ;;  %8127 = vmatmul.mubr.f32.gmra.mxu1 %v5391_v44 }
 0x632   :  { %8266 = vst [vmem:[%s13185_s5] sm:$0xff] %v8202_v18  ;;  %v7813_v40 = vpop.f32.mrf.mxu0  ;;  %v7889_v58 = vadd.f32 %v7888_v57, %v12738_v20  ;;  %8131 = vmatprep.mubr.f32.mxu1 %v8669_v48  ;;  %v5393_v57 = vld [vmem:[#allocation3 + $0x2c2] sm:$0xff]  ;;  %v8671_v18 = vld [vmem:[#allocation2 + $0x2b9] sm:$0xff] }
 0x633   :  { %v12927_v56 = vadd.f32 %v7813_v40, %v7429_v51  ;;  %v7890_v59 = vpop.f32.mrf.mxu1  ;;  %v5394_v40 = vld [vmem:[#allocation3 + $0x2d2] sm:$0xff]  ;;  %v8672_v48 = vld [vmem:[#allocation2 + $0x2c1] sm:$0xff] }
 0x634   :  { %v8203_v26 = vmax.f32 %v7889_v58, 0.0  ;;  %v7815_v27 = vpop.f32.mrf.mxu0 }
 0x635   :  { %v7893_v30 = vpop.f32.mrf.mxu1  ;;  %8132 = vmatmul.mubr.f32.gmra.mxu1 %v5392_v33  ;;  %v5395_v33 = vld [vmem:[#allocation3 + $0x2da] sm:$0xff] }
 0x636   :  { %8267 = vst [vmem:[%s13185_s5 + $0x8] sm:$0xff] %v8203_v26  ;;  %v7894_v12 = vadd.f32 %v7893_v30, %v12741_v39  ;;  %8136 = vmatprep.mubr.f32.mxu1 %v8670_v53  ;;  %v8673_v30 = vld [vmem:[#allocation2 + $0x2d1] sm:$0xff] }
 0x637   :  { %v7895_v55 = vpop.f32.mrf.mxu1 }
 0x638   :  { %v8204_v20 = vmax.f32 %v7894_v12, 0.0  ;;  %v5396_v55 = vld [vmem:[#allocation3 + $0x2ea] sm:$0xff] }
 0x639   :  { %v7898_v28 = vpop.f32.mrf.mxu1  ;;  %8137 = vmatmul.mubr.f32.gmra.mxu1 %v5393_v57  ;;  %v8674_v57 = vld [vmem:[#allocation2 + $0x2d9] sm:$0xff] }
 0x63a   :  { %8268 = vst [vmem:[%s13185_s5 + $0x10] sm:$0xff] %v8204_v20  ;;  %v7899_v51 = vadd.f32 %v7898_v28, %v12744_v54  ;;  %8141 = vmatprep.mubr.f32.mxu1 %v8671_v18  ;;  %v5397_v18 = vld [vmem:[#allocation3 + $0x2f2] sm:$0xff] }
 0x63b   :  { %v7900_v17 = vpop.f32.mrf.mxu1 }
 0x63c   :  { %v8205_v44 = vmax.f32 %v7899_v51, 0.0 }
 0x63d   :  { %v7903_v58 = vpop.f32.mrf.mxu1  ;;  %8142 = vmatmul.mubr.f32.gmra.mxu1 %v5394_v40 }
 0x63e   :  { %8269 = vst [vmem:[%s13185_s5 + $0x18] sm:$0xff] %v8205_v44  ;;  %v7904_v39 = vadd.f32 %v7903_v58, %v12747_v23  ;;  %8146 = vmatprep.mubr.f32.mxu1 %v8672_v48  ;;  %v8675_v44 = vld [vmem:[#allocation2 + $0x2e9] sm:$0xff] }
 0x63f   :  { %v7905_v59 = vpop.f32.mrf.mxu1 }
 0x640   :  { %v8206_v26 = vmax.f32 %v7904_v39, 0.0  ;;  %v5398_v39 = vld [vmem:[#allocation3 + $0x302] sm:$0xff]  ;;  %v8676_v59 = vld [vmem:[#allocation2 + $0x2f1] sm:$0xff] }
 0x641   :  { %v7908_v27 = vpop.f32.mrf.mxu1  ;;  %8147 = vmatmul.mubr.f32.gmra.mxu1 %v5395_v33 }
 0x642   :  { %8270 = vst [vmem:[%s13185_s5 + $0x20] sm:$0xff] %v8206_v26  ;;  %v7909_v54 = vadd.f32 %v7908_v27, %v12750_v61  ;;  %8151 = vmatprep.mubr.f32.mxu1 %v8673_v30  ;;  %v5399_v27 = vld [vmem:[#allocation3 + $0x30a] sm:$0xff]  ;;  %v8677_v30 = vld [vmem:[#allocation2 + $0x301] sm:$0xff] }
 0x643   :  { %v7910_v12 = vpop.f32.mrf.mxu1 }
 0x644   :  { %v8207_v53 = vmax.f32 %v7909_v54, 0.0 }
 0x645   :  { %v7913_v20 = vpop.f32.mrf.mxu1  ;;  %8152 = vmatmul.mubr.f32.gmra.mxu1 %v5396_v55  ;;  %v5400_v55 = vld [vmem:[#allocation3 + $0x31a] sm:$0xff] }
 0x646   :  { %8271 = vst [vmem:[%s13185_s5 + $0x28] sm:$0xff] %v8207_v53  ;;  %v7914_v23 = vadd.f32 %v7913_v20, %v12753_v7  ;;  %8156 = vmatprep.mubr.f32.mxu1 %v8674_v57 }
 0x647   :  { %v7915_v28 = vpop.f32.mrf.mxu1 }
 0x648   :  { %v8208_v51 = vmax.f32 %v7914_v23, 0.0  ;;  %v8678_v23 = vld [vmem:[#allocation2 + $0x309] sm:$0xff] }
 0x649   :  { %v7918_v17 = vpop.f32.mrf.mxu1  ;;  %8157 = vmatmul.mubr.f32.gmra.mxu1 %v5397_v18 }
 0x64a   :  { %8272 = vst [vmem:[%s13185_s5 + $0x30] sm:$0xff] %v8208_v51  ;;  %v7919_v61 = vadd.f32 %v7918_v17, %v12756_v63  ;;  %8161 = vmatprep.mubr.f32.mxu1 %v8675_v44  ;;  %v5401_v51 = vld [vmem:[#allocation3 + $0x322] sm:$0xff]  ;;  %v8679_v17 = vld [vmem:[#allocation2 + $0x319] sm:$0xff] }
 0x64b   :  { %v7920_v40 = vpop.f32.mrf.mxu1 }
 0x64c   :  { %v8209_v58 = vmax.f32 %v7919_v61, 0.0  ;;  %v5402_v40 = vld [vmem:[#allocation3 + $0x332] sm:$0xff] }
 0x64d   :  { %v7923_v48 = vpop.f32.mrf.mxu1  ;;  %8162 = vmatmul.mubr.f32.gmra.mxu1 %v5398_v39  ;;  %v8680_v39 = vld [vmem:[#allocation2 + $0x321] sm:$0xff] }
 0x64e   :  { %8273 = vst [vmem:[%s13185_s5 + $0x38] sm:$0xff] %v8209_v58  ;;  %v7924_v7 = vadd.f32 %v7923_v48, %v12759_v10  ;;  %8166 = vmatprep.mubr.f32.mxu1 %v8676_v59  ;;  %v5403_v59 = vld [vmem:[#allocation3 + $0x33a] sm:$0xff] }
 0x64f   :  { %v7925_v26 = vpop.f32.mrf.mxu1 }
 0x650   :  { %v8210_v33 = vmax.f32 %v7924_v7, 0.0 }
 0x651   :  { %v7928_v54 = vpop.f32.mrf.mxu1  ;;  %8167 = vmatmul.mubr.f32.gmra.mxu1 %v5399_v27  ;;  %v5404_v27 = vld [vmem:[#allocation3 + $0x34a] sm:$0xff] }
 0x652   :  { %8274 = vst [vmem:[%s13185_s5 + $0x40] sm:$0xff] %v8210_v33  ;;  %v7929_v63 = vadd.f32 %v7928_v54, %v12762_v15  ;;  %8171 = vmatprep.mubr.f32.mxu1 %v8677_v30  ;;  %v8681_v33 = vld [vmem:[#allocation2 + $0x331] sm:$0xff] }
 0x653   :  { %v7930_v12 = vpop.f32.mrf.mxu1 }
 0x654   :  { %v8211_v53 = vmax.f32 %v7929_v63, 0.0  ;;  %v8682_v12 = vld [vmem:[#allocation2 + $0x339] sm:$0xff] }
 0x655   :  { %v7933_v20 = vpop.f32.mrf.mxu1  ;;  %8172 = vmatmul.mubr.f32.gmra.mxu1 %v5400_v55 }
 0x656   :  { %8275 = vst [vmem:[%s13185_s5 + $0x48] sm:$0xff] %v8211_v53  ;;  %v7934_v10 = vadd.f32 %v7933_v20, %v12765_v43  ;;  %8176 = vmatprep.mubr.f32.mxu1 %v8678_v23  ;;  %v5405_v53 = vld [vmem:[#allocation3 + $0x352] sm:$0xff] }
 0x657   :  { %v7935_v57 = vpop.f32.mrf.mxu1 }
 0x658   :  { %v8212_v28 = vmax.f32 %v7934_v10, 0.0 }
 0x659   :  { %v7938_v18 = vpop.f32.mrf.mxu1  ;;  %8177 = vmatmul.mubr.f32.gmra.mxu1 %v5401_v51 }
 0x65a   :  { %8276 = vst [vmem:[%s13185_s5 + $0x50] sm:$0xff] %v8212_v28  ;;  %v7939_v15 = vadd.f32 %v7938_v18, %v12768_v0  ;;  %8181 = vmatprep.mubr.f32.mxu1 %v8679_v17 }
 0x65b   :  { %v7940_v61 = vpop.f32.mrf.mxu1 }
 0x65c   :  { %v8213_v44 = vmax.f32 %v7939_v15, 0.0 }
 0x65d   :  { %v7943_v58 = vpop.f32.mrf.mxu1  ;;  %8182 = vmatmul.mubr.f32.gmra.mxu1 %v5402_v40 }
 0x65e   :  { %8277 = vst [vmem:[%s13185_s5 + $0x58] sm:$0xff] %v8213_v44  ;;  %v7944_v43 = vadd.f32 %v7943_v58, %v12771_v36  ;;  %8186 = vmatprep.mubr.f32.mxu1 %v8680_v39 }
 0x65f   :  { %v7945_v48 = vpop.f32.mrf.mxu1 }
 0x660   :  { %v8214_v7 = vmax.f32 %v7944_v43, 0.0 }
 0x661   :  { %v7948_v26 = vpop.f32.mrf.mxu1  ;;  %8187 = vmatmul.mubr.f32.gmra.mxu1 %v5403_v59 }
 0x662   :  { %8278 = vst [vmem:[%s13185_s5 + $0x60] sm:$0xff] %v8214_v7  ;;  %v7949_v0 = vadd.f32 %v7948_v26, %v12774_v8  ;;  %8191 = vmatprep.mubr.f32.mxu1 %v8681_v33 }
 0x663   :  { %v7950_v54 = vpop.f32.mrf.mxu1 }
 0x664   :  { %v8215_v63 = vmax.f32 %v7949_v0, 0.0 }
 0x665   :  { %v7953_v30 = vpop.f32.mrf.mxu1  ;;  %8192 = vmatmul.mubr.f32.gmra.mxu1 %v5404_v27 }
 0x666   :  { %8279 = vst [vmem:[%s13185_s5 + $0x68] sm:$0xff] %v8215_v63  ;;  %v7954_v36 = vadd.f32 %v7953_v30, %v12777_v14  ;;  %8196 = vmatprep.mubr.f32.mxu1 %v8682_v12 }
 0x667   :  { %v7955_v55 = vpop.f32.mrf.mxu1 }
 0x668   :  { %v8216_v20 = vmax.f32 %v7954_v36, 0.0 }
 0x669   :  { %v7958_v10 = vpop.f32.mrf.mxu1  ;;  %8197 = vmatmul.mubr.f32.gmra.mxu1 %v5405_v53 }
 0x66a   :  { %8280 = vst [vmem:[%s13185_s5 + $0x70] sm:$0xff] %v8216_v20  ;;  %v7959_v8 = vadd.f32 %v7958_v10, %v12780_v4 }
 0x66b   :  { %v7960_v23 = vpop.f32.mrf.mxu1 }
 0x66c   :  { %v8217_v57 = vmax.f32 %v7959_v8, 0.0 }
 0x66d   :  { %v7963_v28 = vpop.f32.mrf.mxu1 }
 0x66e   :  { %8281 = vst [vmem:[%s13185_s5 + $0x78] sm:$0xff] %v8217_v57  ;;  %v7964_v14 = vadd.f32 %v7963_v28, %v12783_v11 }
 0x66f   :  { %v7965_v51 = vpop.f32.mrf.mxu1 }
 0x670   :  { %v8218_v18 = vmax.f32 %v7964_v14, 0.0 }
 0x671   :  { %v7968_v15 = vpop.f32.mrf.mxu1 }
 0x672   :  { %8282 = vst [vmem:[%s13185_s5 + $0x80] sm:$0xff] %v8218_v18  ;;  %v7969_v17 = vadd.f32 %v7968_v15, %v12786_v38 }
 0x673   :  { %v7970_v61 = vpop.f32.mrf.mxu1 }
 0x674   :  { %v8219_v4 = vmax.f32 %v7969_v17, 0.0 }
 0x675   :  { %v7973_v44 = vpop.f32.mrf.mxu1 }
 0x676   :  { %8283 = vst [vmem:[%s13185_s5 + $0x88] sm:$0xff] %v8219_v4  ;;  %v7974_v40 = vadd.f32 %v7973_v44, %v12789_v45 }
 0x677   :  { %v7975_v58 = vpop.f32.mrf.mxu1 }
 0x678   :  { %v8220_v11 = vmax.f32 %v7974_v40, 0.0 }
 0x679   :  { %v7978_v43 = vpop.f32.mrf.mxu1 }
 0x67a   :  { %8284 = vst [vmem:[%s13185_s5 + $0x90] sm:$0xff] %v8220_v11  ;;  %v7979_v39 = vadd.f32 %v7978_v43, %v12792_v25 }
 0x67b   :  { %v7980_v48 = vpop.f32.mrf.mxu1 }
 0x67c   :  { %v8221_v38 = vmax.f32 %v7979_v39, 0.0 }
 0x67d   :  { %v7983_v7 = vpop.f32.mrf.mxu1 }
 0x67e   :  { %8285 = vst [vmem:[%s13185_s5 + $0x98] sm:$0xff] %v8221_v38  ;;  %v7984_v59 = vadd.f32 %v7983_v7, %v12795_v47 }
 0x67f   :  { %v7985_v26 = vpop.f32.mrf.mxu1 }
 0x680   :  { %v8222_v45 = vmax.f32 %v7984_v59, 0.0 }
 0x681   :  { %v7988_v0 = vpop.f32.mrf.mxu1 }
 0x682   :  { %8286 = vst [vmem:[%s13185_s5 + $0xa0] sm:$0xff] %v8222_v45  ;;  %v7989_v33 = vadd.f32 %v7988_v0, %v12798_v41 }
 0x683   :  { %v7990_v27 = vpop.f32.mrf.mxu1 }
 0x684   :  { %v8223_v25 = vmax.f32 %v7989_v33, 0.0 }
 0x685   :  { %v7993_v54 = vpop.f32.mrf.mxu1 }
 0x686   :  { %8287 = vst [vmem:[%s13185_s5 + $0xa8] sm:$0xff] %v8223_v25  ;;  %v7994_v63 = vadd.f32 %v7993_v54, %v12801_v6 }
 0x687   :  { %v7995_v30 = vpop.f32.mrf.mxu1 }
 0x688   :  { %v8224_v47 = vmax.f32 %v7994_v63, 0.0 }
 0x689   :  { %v7998_v36 = vpop.f32.mrf.mxu1 }
 0x68a   :  { %8288 = vst [vmem:[%s13185_s5 + $0xb0] sm:$0xff] %v8224_v47  ;;  %v7999_v12 = vadd.f32 %v7998_v36, %v12804_v46 }
 0x68b   :  { %v8000_v53 = vpop.f32.mrf.mxu1 }
 0x68c   :  { %v8225_v41 = vmax.f32 %v7999_v12, 0.0 }
 0x68d   :  { %v8003_v55 = vpop.f32.mrf.mxu1 }
 0x68e   :  { %8289 = vst [vmem:[%s13185_s5 + $0xb8] sm:$0xff] %v8225_v41  ;;  %v8004_v20 = vadd.f32 %v8003_v55, %v12807_v52 }
 0x68f   :  { %v8005_v10 = vpop.f32.mrf.mxu1 }
 0x690   :  { %v8226_v6 = vmax.f32 %v8004_v20, 0.0 }
 0x691   :  { %v8008_v8 = vpop.f32.mrf.mxu1 }
 0x692   :  { %8290 = vst [vmem:[%s13185_s5 + $0xc0] sm:$0xff] %v8226_v6  ;;  %v8009_v23 = vadd.f32 %v8008_v8, %v12810_v22 }
 0x693   :  { %v8010_v57 = vpop.f32.mrf.mxu1 }
 0x694   :  { %v8227_v46 = vmax.f32 %v8009_v23, 0.0 }
 0x695   :  { %v8013_v28 = vpop.f32.mrf.mxu1 }
 0x696   :  { %8291 = vst [vmem:[%s13185_s5 + $0xc8] sm:$0xff] %v8227_v46  ;;  %v8014_v14 = vadd.f32 %v8013_v28, %v12813_v2 }
 0x697   :  { %v8015_v51 = vpop.f32.mrf.mxu1 }
 0x698   :  { %v8228_v52 = vmax.f32 %v8014_v14, 0.0 }
 0x699   :  { %v8018_v18 = vpop.f32.mrf.mxu1 }
 0x69a   :  { %8292 = vst [vmem:[%s13185_s5 + $0xd0] sm:$0xff] %v8228_v52  ;;  %v8019_v15 = vadd.f32 %v8018_v18, %v12816_v31  ;;  %v13550_v52 = vld [vmem:[#allocation57_spill] sm:$0xff] }
 0x69b   :  { %v8020_v17 = vpop.f32.mrf.mxu1 }
 0x69c   :  { %v8229_v22 = vmax.f32 %v8019_v15, 0.0 }
 0x69d   :  { %v8023_v61 = vpop.f32.mrf.mxu1 }
 0x69e   :  { %8293 = vst [vmem:[%s13185_s5 + $0xd8] sm:$0xff] %v8229_v22  ;;  %v8024_v4 = vadd.f32 %v8023_v61, %v12819_v24 }
 0x69f   :  { %v8025_v44 = vpop.f32.mrf.mxu1 }
 0x6a0   :  { %v8230_v2 = vmax.f32 %v8024_v4, 0.0 }
 0x6a1   :  { %v8028_v40 = vpop.f32.mrf.mxu1 }
 0x6a2   :  { %8294 = vst [vmem:[%s13185_s5 + $0xe0] sm:$0xff] %v8230_v2  ;;  %v8029_v58 = vadd.f32 %v8028_v40, %v12822_v32 }
 0x6a3   :  { %v8030_v11 = vpop.f32.mrf.mxu1 }
 0x6a4   :  { %v8231_v31 = vmax.f32 %v8029_v58, 0.0  ;;  %v13551_v11 = vld [vmem:[#allocation55_spill] sm:$0xff] }
 0x6a5   :  { %v8033_v43 = vpop.f32.mrf.mxu1 }
 0x6a6   :  { %8295 = vst [vmem:[%s13185_s5 + $0xe8] sm:$0xff] %v8231_v31  ;;  %v8034_v39 = vadd.f32 %v8033_v43, %v12825_v21 }
 0x6a7   :  { %v8035_v48 = vpop.f32.mrf.mxu1 }
 0x6a8   :  { %v8232_v24 = vmax.f32 %v8034_v39, 0.0 }
 0x6a9   :  { %v8038_v38 = vpop.f32.mrf.mxu1 }
 0x6aa   :  { %8296 = vst [vmem:[%s13185_s5 + $0xf0] sm:$0xff] %v8232_v24  ;;  %v8039_v7 = vadd.f32 %v8038_v38, %v12828_v9 }
 0x6ab   :  { %v8040_v59 = vpop.f32.mrf.mxu1 }
 0x6ac   :  { %v8233_v32 = vmax.f32 %v8039_v7, 0.0  ;;  %v13552_v7 = vld [vmem:[#allocation60_spill] sm:$0xff] }
 0x6ad   :  { %v8043_v26 = vpop.f32.mrf.mxu1 }
 0x6ae   :  { %8297 = vst [vmem:[%s13185_s5 + $0xf8] sm:$0xff] %v8233_v32  ;;  %v8044_v45 = vadd.f32 %v8043_v26, %v12831_v29 }
 0x6af   :  { %v8045_v0 = vpop.f32.mrf.mxu1 }
 0x6b0   :  { %v8234_v21 = vmax.f32 %v8044_v45, 0.0  ;;  %v13553_v0 = vld [vmem:[#allocation59_spill] sm:$0xff] }
 0x6b1   :  { %v8048_v33 = vpop.f32.mrf.mxu1 }
 0x6b2   :  { %8298 = vst [vmem:[%s13185_s5 + $0x100] sm:$0xff] %v8234_v21  ;;  %v8049_v27 = vadd.f32 %v8048_v33, %v12834_v3 }
 0x6b3   :  { %v8050_v25 = vpop.f32.mrf.mxu1 }
 0x6b4   :  { %v8235_v9 = vmax.f32 %v8049_v27, 0.0  ;;  %v13554_v25 = vld [vmem:[#allocation7_spill] sm:$0xff] }
 0x6b5   :  { %v8053_v54 = vpop.f32.mrf.mxu1 }
 0x6b6   :  { %8299 = vst [vmem:[%s13185_s5 + $0x108] sm:$0xff] %v8235_v9  ;;  %v8054_v63 = vadd.f32 %v8053_v54, %v12837_v5 }
 0x6b7   :  { %v8055_v30 = vpop.f32.mrf.mxu1 }
 0x6b8   :  { %v8236_v29 = vmax.f32 %v8054_v63, 0.0 }
 0x6b9   :  { %v8058_v47 = vpop.f32.mrf.mxu1 }
 0x6ba   :  { %8300 = vst [vmem:[%s13185_s5 + $0x110] sm:$0xff] %v8236_v29  ;;  %v8059_v36 = vadd.f32 %v8058_v47, %v12840_v37  ;;  %v13555_v29 = vld [vmem:[#allocation6_spill] sm:$0xff] }
 0x6bb   :  { %v8060_v12 = vpop.f32.mrf.mxu1 }
 0x6bc   :  { %v8237_v3 = vmax.f32 %v8059_v36, 0.0 }
 0x6bd   :  { %v8063_v53 = vpop.f32.mrf.mxu1 }
 0x6be   :  { %8301 = vst [vmem:[%s13185_s5 + $0x118] sm:$0xff] %v8237_v3  ;;  %v8064_v41 = vadd.f32 %v8063_v53, %v12843_v42  ;;  %v13556_v53 = vld [vmem:[#allocation9_spill] sm:$0xff] }
 0x6bf   :  { %v8065_v55 = vpop.f32.mrf.mxu1 }
 0x6c0   :  { %v8238_v5 = vmax.f32 %v8064_v41, 0.0 }
 0x6c1   :  { %v8068_v20 = vpop.f32.mrf.mxu1 }
 0x6c2   :  { %8302 = vst [vmem:[%s13185_s5 + $0x120] sm:$0xff] %v8238_v5  ;;  %v8069_v10 = vadd.f32 %v8068_v20, %v12846_v19 }
 0x6c3   :  { %v8070_v6 = vpop.f32.mrf.mxu1 }
 0x6c4   :  { %v8239_v37 = vmax.f32 %v8069_v10, 0.0  ;;  %v13557_v10 = vld [vmem:[#allocation8_spill] sm:$0xff] }
 0x6c5   :  { %v8073_v8 = vpop.f32.mrf.mxu1 }
 0x6c6   :  { %8303 = vst [vmem:[%s13185_s5 + $0x128] sm:$0xff] %v8239_v37  ;;  %v8074_v23 = vadd.f32 %v8073_v8, %v12849_v60 }
 0x6c7   :  { %v8075_v57 = vpop.f32.mrf.mxu1 }
 0x6c8   :  { %v8240_v42 = vmax.f32 %v8074_v23, 0.0  ;;  %v13558_v57 = vld [vmem:[#allocation10_spill] sm:$0xff] }
 0x6c9   :  { %v8078_v46 = vpop.f32.mrf.mxu1 }
 0x6ca   :  { %8304 = vst [vmem:[%s13185_s5 + $0x130] sm:$0xff] %v8240_v42  ;;  %v8079_v28 = vadd.f32 %v8078_v46, %v12852_v50 }
 0x6cb   :  { %v8080_v14 = vpop.f32.mrf.mxu1 }
 0x6cc   :  { %v8241_v19 = vmax.f32 %v8079_v28, 0.0 }
 0x6cd   :  { %v8083_v51 = vpop.f32.mrf.mxu1 }
 0x6ce   :  { %8305 = vst [vmem:[%s13185_s5 + $0x138] sm:$0xff] %v8241_v19  ;;  %v8084_v18 = vadd.f32 %v8083_v51, %v13550_v52  ;;  %v13559_v19 = vld [vmem:[#allocation11_spill] sm:$0xff] }
 0x6cf   :  { %v8085_v15 = vpop.f32.mrf.mxu1 }
 0x6d0   :  { %v8242_v60 = vmax.f32 %v8084_v18, 0.0 }
 0x6d1   :  { %v8088_v17 = vpop.f32.mrf.mxu1 }
 0x6d2   :  { %8306 = vst [vmem:[%s13185_s5 + $0x140] sm:$0xff] %v8242_v60  ;;  %v8089_v22 = vadd.f32 %v8088_v17, %v12858_v34  ;;  %v13560_v60 = vld [vmem:[#allocation21_spill] sm:$0xff] }
 0x6d3   :  { %v8090_v61 = vpop.f32.mrf.mxu1 }
 0x6d4   :  { %v8243_v50 = vmax.f32 %v8089_v22, 0.0 }
 0x6d5   :  { %v8093_v4 = vpop.f32.mrf.mxu1 }
 0x6d6   :  { %8307 = vst [vmem:[%s13185_s5 + $0x148] sm:$0xff] %v8243_v50  ;;  %v8094_v44 = vadd.f32 %v8093_v4, %v12861_v16  ;;  %v13561_v4 = vld [vmem:[#allocation13_spill] sm:$0xff] }
 0x6d7   :  { %v8095_v2 = vpop.f32.mrf.mxu1 }
 0x6d8   :  { %v8244_v40 = vmax.f32 %v8094_v44, 0.0 }
 0x6d9   :  { %v8098_v58 = vpop.f32.mrf.mxu1 }
 0x6da   :  { %8308 = vst [vmem:[%s13185_s5 + $0x150] sm:$0xff] %v8244_v40  ;;  %v8099_v31 = vadd.f32 %v8098_v58, %v13551_v11  ;;  %v13562_v11 = vld [vmem:[#allocation20_spill] sm:$0xff] }
 0x6db   :  { %v8100_v43 = vpop.f32.mrf.mxu1 }
 0x6dc   :  { %v8245_v34 = vmax.f32 %v8099_v31, 0.0 }
 0x6dd   :  { %v8103_v39 = vpop.f32.mrf.mxu1 }
 0x6de   :  { %8309 = vst [vmem:[%s13185_s5 + $0x158] sm:$0xff] %v8245_v34  ;;  %v8104_v48 = vadd.f32 %v8103_v39, %v12867_v1 }
 0x6df   :  { %v8105_v24 = vpop.f32.mrf.mxu1 }
 0x6e0   :  { %v8246_v16 = vmax.f32 %v8104_v48, 0.0  ;;  %v13563_v48 = vld [vmem:[#allocation12_spill] sm:$0xff] }
 0x6e1   :  { %v8108_v38 = vpop.f32.mrf.mxu1 }
 0x6e2   :  { %8310 = vst [vmem:[%s13185_s5 + $0x160] sm:$0xff] %v8246_v16  ;;  %v8109_v59 = vadd.f32 %v8108_v38, %v13552_v7 }
 0x6e3   :  { %v8110_v32 = vpop.f32.mrf.mxu1 }
 0x6e4   :  { %v8247_v26 = vmax.f32 %v8109_v59, 0.0  ;;  %v13564_v59 = vld [vmem:[#allocation15_spill] sm:$0xff] }
 0x6e5   :  { %v8113_v45 = vpop.f32.mrf.mxu1 }
 0x6e6   :  { %8311 = vst [vmem:[%s13185_s5 + $0x168] sm:$0xff] %v8247_v26  ;;  %v8114_v21 = vadd.f32 %v8113_v45, %v13553_v0 }
 0x6e7   :  { %v8115_v33 = vpop.f32.mrf.mxu1 }
 0x6e8   :  { %v8248_v1 = vmax.f32 %v8114_v21, 0.0 }
 0x6e9   :  { %v8118_v27 = vpop.f32.mrf.mxu1 }
 0x6ea   :  { %8312 = vst [vmem:[%s13185_s5 + $0x170] sm:$0xff] %v8248_v1  ;;  %v8119_v9 = vadd.f32 %v8118_v27, %v13554_v25 }
 0x6eb   :  { %v8120_v54 = vpop.f32.mrf.mxu1 }
 0x6ec   :  { %v8249_v63 = vmax.f32 %v8119_v9, 0.0 }
 0x6ed   :  { %v8123_v30 = vpop.f32.mrf.mxu1 }
 0x6ee   :  { %8313 = vst [vmem:[%s13185_s5 + $0x178] sm:$0xff] %v8249_v63  ;;  %v8124_v47 = vadd.f32 %v8123_v30, %v13555_v29  ;;  %v13565_v30 = vld [vmem:[#allocation22_spill] sm:$0xff] }
 0x6ef   :  { %v8125_v36 = vpop.f32.mrf.mxu1 }
 0x6f0   :  { %v8250_v12 = vmax.f32 %v8124_v47, 0.0 }
 0x6f1   :  { %v8128_v3 = vpop.f32.mrf.mxu1 }
 0x6f2   :  { %8314 = vst [vmem:[%s13185_s5 + $0x180] sm:$0xff] %v8250_v12  ;;  %v8129_v41 = vadd.f32 %v8128_v3, %v13556_v53 }
 0x6f3   :  { %v8130_v55 = vpop.f32.mrf.mxu1 }
 0x6f4   :  { %v8251_v5 = vmax.f32 %v8129_v41, 0.0 }
 0x6f5   :  { %v8133_v20 = vpop.f32.mrf.mxu1 }
 0x6f6   :  { %8315 = vst [vmem:[%s13185_s5 + $0x188] sm:$0xff] %v8251_v5  ;;  %v8134_v6 = vadd.f32 %v8133_v20, %v13557_v10 }
 0x6f7   :  { %v8135_v37 = vpop.f32.mrf.mxu1 }
 0x6f8   :  { %v8252_v8 = vmax.f32 %v8134_v6, 0.0 }
 0x6f9   :  { %v8138_v23 = vpop.f32.mrf.mxu1 }
 0x6fa   :  { %8316 = vst [vmem:[%s13185_s5 + $0x190] sm:$0xff] %v8252_v8  ;;  %v8139_v42 = vadd.f32 %v8138_v23, %v13558_v57 }
 0x6fb   :  { %v8140_v46 = vpop.f32.mrf.mxu1 }
 0x6fc   :  { %v8253_v28 = vmax.f32 %v8139_v42, 0.0 }
 0x6fd   :  { %v8143_v14 = vpop.f32.mrf.mxu1 }
 0x6fe   :  { %8317 = vst [vmem:[%s13185_s5 + $0x198] sm:$0xff] %v8253_v28  ;;  %v8144_v51 = vadd.f32 %v8143_v14, %v13559_v19 }
 0x6ff   :  { %v8145_v52 = vpop.f32.mrf.mxu1 }
 0x700   :  { %v8254_v18 = vmax.f32 %v8144_v51, 0.0 }
 0x701   :  { %v8148_v15 = vpop.f32.mrf.mxu1 }
 0x702   :  { %8318 = vst [vmem:[%s13185_s5 + $0x1a0] sm:$0xff] %v8254_v18  ;;  %v8149_v17 = vadd.f32 %v8148_v15, %v13560_v60 }
 0x703   :  { %v8150_v22 = vpop.f32.mrf.mxu1 }
 0x704   :  { %v8255_v61 = vmax.f32 %v8149_v17, 0.0 }
 0x705   :  { %v8153_v50 = vpop.f32.mrf.mxu1 }
 0x706   :  { %8319 = vst [vmem:[%s13185_s5 + $0x1a8] sm:$0xff] %v8255_v61  ;;  %v8154_v44 = vadd.f32 %v8153_v50, %v13561_v4 }
 0x707   :  { %v8155_v2 = vpop.f32.mrf.mxu1 }
 0x708   :  { %v8256_v40 = vmax.f32 %v8154_v44, 0.0 }
 0x709   :  { %v8158_v58 = vpop.f32.mrf.mxu1 }
 0x70a   :  { %8320 = vst [vmem:[%s13185_s5 + $0x1b0] sm:$0xff] %v8256_v40  ;;  %v8159_v31 = vadd.f32 %v8158_v58, %v13562_v11 }
 0x70b   :  { %v8160_v43 = vpop.f32.mrf.mxu1 }
 0x70c   :  { %v8257_v34 = vmax.f32 %v8159_v31, 0.0 }
 0x70d   :  { %v8163_v39 = vpop.f32.mrf.mxu1 }
 0x70e   :  { %8321 = vst [vmem:[%s13185_s5 + $0x1b8] sm:$0xff] %v8257_v34  ;;  %v8164_v24 = vadd.f32 %v8163_v39, %v13563_v48 }
 0x70f   :  { %v8165_v16 = vpop.f32.mrf.mxu1 }
 0x710   :  { %v8258_v38 = vmax.f32 %v8164_v24, 0.0 }
 0x711   :  { %v8168_v7 = vpop.f32.mrf.mxu1 }
 0x712   :  { %8322 = vst [vmem:[%s13185_s5 + $0x1c0] sm:$0xff] %v8258_v38  ;;  %v8169_v32 = vadd.f32 %v8168_v7, %v13564_v59 }
 0x713   :  { %v8170_v26 = vpop.f32.mrf.mxu1 }
 0x714   :  { %v8259_v45 = vmax.f32 %v8169_v32, 0.0 }
 0x715   :  { %v8173_v0 = vpop.f32.mrf.mxu1 }
 0x716   :  { %8323 = vst [vmem:[%s13185_s5 + $0x1c8] sm:$0xff] %v8259_v45  ;;  %v8174_v21 = vadd.f32 %v8173_v0, %v12909_v13 }
 0x717   :  { %v8175_v33 = vpop.f32.mrf.mxu1 }
 0x718   :  { %v8260_v1 = vmax.f32 %v8174_v21, 0.0 }
 0x719   :  { %v8178_v27 = vpop.f32.mrf.mxu1 }
 0x71a   :  { %8324 = vst [vmem:[%s13185_s5 + $0x1d0] sm:$0xff] %v8260_v1  ;;  %v8179_v25 = vadd.f32 %v8178_v27, %v12912_v62 }
 0x71b   :  { %v8180_v9 = vpop.f32.mrf.mxu1 }
 0x71c   :  { %v8261_v54 = vmax.f32 %v8179_v25, 0.0 }
 0x71d   :  { %v8183_v63 = vpop.f32.mrf.mxu1 }
 0x71e   :  { %8325 = vst [vmem:[%s13185_s5 + $0x1d8] sm:$0xff] %v8261_v54  ;;  %v8184_v29 = vadd.f32 %v8183_v63, %v13565_v30 }
 0x71f   :  { %v8185_v47 = vpop.f32.mrf.mxu1 }
 0x720   :  { %v8262_v13 = vmax.f32 %v8184_v29, 0.0 }
 0x721   :  { %v8188_v36 = vpop.f32.mrf.mxu1 }
 0x722   :  { %8326 = vst [vmem:[%s13185_s5 + $0x1e0] sm:$0xff] %v8262_v13  ;;  %v8189_v12 = vadd.f32 %v8188_v36, %v12918_v35 }
 0x723   :  { %v8190_v3 = vpop.f32.mrf.mxu1 }
 0x724   :  { %v8263_v62 = vmax.f32 %v8189_v12, 0.0 }
 0x725   :  { %v8193_v53 = vpop.f32.mrf.mxu1 }
 0x726   :  { %8327 = vst [vmem:[%s13185_s5 + $0x1e8] sm:$0xff] %v8263_v62  ;;  %v8194_v41 = vadd.f32 %v8193_v53, %v12921_v49 }
 0x727   :  { %v8195_v55 = vpop.f32.mrf.mxu1 }
 0x728   :  { %v8264_v5 = vmax.f32 %v8194_v41, 0.0 }
 0x729   :  { %v8198_v20 = vpop.f32.mrf.mxu1 }
 0x72a   :  { %8328 = vst [vmem:[%s13185_s5 + $0x1f0] sm:$0xff] %v8264_v5  ;;  %v8199_v10 = vadd.f32 %v8198_v20, %v12927_v56 }
 0x72b   :  { %v8200_v6 = vpop.f32.mrf.mxu1 }
 0x72c   :  { %v8265_v35 = vmax.f32 %v8199_v10, 0.0 }
 0x72e   :  { %8329 = vst [vmem:[%s13185_s5 + $0x1f8] sm:$0xff] %v8265_v35 }

</bundles_post_ra>
